<compile_context>
chip_gen: v5e
topology: v5e:2x2
jax: 0.10.0
libtpu: 0.0.40
codegen_flags: <defaults>
</compile_context>

<pallas_src>
import functools

import jax
import jax.numpy as jnp
from jax.experimental import pallas as pl
from jax.experimental.pallas import tpu as pltpu

C_IN = 26
C_OUT = 256
N_CLASSES = 12
N_PAD = 128                      # lane-dense padded logits width
KERNEL_SIZES = (3, 4, 5, 6, 7, 8, 9, 10)
NUM_BRANCHES = len(KERNEL_SIZES)
K_MAX = KERNEL_SIZES[-1]
K_MIN = KERNEL_SIZES[0]
BN_EPS = 1e-5

_VMEM = pl.BlockSpec(memory_space=pltpu.MemorySpace.VMEM)


# ----------------------------------------------------------------------------
# Pallas kernels
# ----------------------------------------------------------------------------
def _conv_branches_kernel(lout_ref, x_ref, w_ref, scale_ref, shift_ref, out_ref, *, B, T):
    """One conv branch per grid step (grid=(NUM_BRANCHES,), 'parallel').

    lout_ref : SMEM (8,) int32                 valid output length per branch (L - k + 1)
    x_ref    : (B, L_pad, C_IN) bf16           shared, zero-padded, time-major copy of x
    w_ref    : (1, K_MAX, C_IN, C_OUT) bf16    conv weight; taps dk >= k are zero
    scale_ref: (1, 1, C_OUT) f32               gamma / sqrt(var + eps)
    shift_ref: (1, 1, C_OUT) f32               beta + (conv_bias - mean) * scale
    out_ref  : (B, C_OUT) f32                  column slice i of the (B, 2048) feature slab
    """
    lout = lout_ref[pl.program_id(0)]

    # Conv as K_MAX shifted, accumulating (B,T,C_IN)x(B,C_IN,C_OUT) batched matmuls.
    acc = jnp.zeros((B, T, C_OUT), jnp.float32)
    for dk in range(K_MAX):                              # static unroll; zero taps are no-ops
        xs = x_ref[:, dk:dk + T, :]                      # (B, T, C_IN) bf16
        wk = jnp.broadcast_to(w_ref[0, dk], (B, C_IN, C_OUT))
        acc = acc + jnp.einsum("btc,bco->bto", xs, wk,
                               preferred_element_type=jnp.float32)

    y = acc * scale_ref[...] + shift_ref[...]            # conv bias + BN(eval) folded affine
    y = jnp.maximum(y, 0.0)                              # ReLU (Dropout is identity in eval)

    # Mask positions t >= this branch's L_out; post-ReLU values are >= 0 so 0 never wins.
    t_idx = jax.lax.broadcasted_iota(jnp.int32, (B, T, C_OUT), 1)
    y = jnp.where(t_idx < lout, y, 0.0)

    out_ref[...] = jnp.max(y, axis=1)                    # global MaxPool1d -> one (B,256) store


def _mlp_kernel(feat_ref, w1_ref, b1_ref, w2_ref, b2_ref, w3_ref, b3_ref, out_ref):
    """FC head: 2048->1024 ReLU, 1024->512 ReLU, 512->12 (padded to 128), Softmax."""
    f = feat_ref[...].astype(jnp.bfloat16)
    h1 = jnp.dot(f, w1_ref[...], preferred_element_type=jnp.float32) + b1_ref[...]
    h1 = jnp.maximum(h1, 0.0)
    h2 = jnp.dot(h1.astype(jnp.bfloat16), w2_ref[...],
                 preferred_element_type=jnp.float32) + b2_ref[...]
    h2 = jnp.maximum(h2, 0.0)
    logits = jnp.dot(h2.astype(jnp.bfloat16), w3_ref[...],
                     preferred_element_type=jnp.float32) + b3_ref[...]
    m = jnp.max(logits, axis=-1, keepdims=True)
    e = jnp.exp(logits - m)                              # padded lanes: exp(-1e30 - m) == 0
    denom = jnp.sum(e, axis=-1, keepdims=True)
    out_ref[...] = e * pl.reciprocal(denom, approx=True)


# ----------------------------------------------------------------------------
# Forward pass
# ----------------------------------------------------------------------------
def novel_det_forward(x, params):
    """x: (B, 26, max_len) float32 -> (B, 12) softmax probabilities."""
    B, C, L = x.shape
    if C != C_IN:
        raise ValueError(f"expected {C_IN} input channels, got {C}")
    if L < K_MAX:
        raise ValueError(f"max_len must be >= {K_MAX}, got {L}")
    T = L - K_MIN + 1                 # largest L_out across branches
    L_pad = L + K_MAX - K_MIN         # so t + dk never reads out of bounds

    # ---- tiny host-graph prep: transpose/pad x once, pack weights, fold bias+BN ----
    x_t = jnp.transpose(x, (0, 2, 1))                                    # (B, L, C_IN)
    x_t = jnp.pad(x_t, ((0, 0), (0, L_pad - L), (0, 0))).astype(jnp.bfloat16)

    w_l, sc_l, sh_l, lo_l = [], [], [], []
    for k in KERNEL_SIZES:
        p = params[f"conv{k}"]
        w = jnp.transpose(p["w"], (2, 1, 0))                             # (k, C_IN, C_OUT)
        w_l.append(jnp.pad(w, ((0, K_MAX - k), (0, 0), (0, 0))))
        scale = p["bn_gamma"] * jax.lax.rsqrt(p["bn_var"] + BN_EPS)
        sc_l.append(scale)
        sh_l.append(p["bn_beta"] + (p["b"] - p["bn_mean"]) * scale)      # conv bias folded
        lo_l.append(L - k + 1)
    w_all = jnp.stack(w_l).astype(jnp.bfloat16)                          # (8, K_MAX, 26, 256)
    scale_all = jnp.stack(sc_l)[:, None, :]                              # (8, 1, 256) f32
    shift_all = jnp.stack(sh_l)[:, None, :]                              # (8, 1, 256) f32
    lout_arr = jnp.asarray(lo_l, dtype=jnp.int32)                        # (8,)

    # ---- fused conv stage: one launch, 8 branches, lane-dense (B, 2048) output ----
    feat = pl.pallas_call(
        functools.partial(_conv_branches_kernel, B=B, T=T),
        out_shape=jax.ShapeDtypeStruct((B, NUM_BRANCHES * C_OUT), jnp.float32),
        grid_spec=pltpu.PrefetchScalarGridSpec(
            num_scalar_prefetch=1,
            grid=(NUM_BRANCHES,),
            in_specs=[
                pl.BlockSpec((B, L_pad, C_IN), lambda i, lo: (0, 0, 0)),
                pl.BlockSpec((1, K_MAX, C_IN, C_OUT), lambda i, lo: (i, 0, 0, 0)),
                pl.BlockSpec((1, 1, C_OUT), lambda i, lo: (i, 0, 0)),
                pl.BlockSpec((1, 1, C_OUT), lambda i, lo: (i, 0, 0)),
            ],
            out_specs=pl.BlockSpec((B, C_OUT), lambda i, lo: (0, i)),
        ),
        compiler_params=pltpu.CompilerParams(dimension_semantics=("parallel",)),
    )(lout_arr, x_t, w_all, scale_all, shift_all)

    # ---- MLP head: bf16 weights, padded 128-lane softmax, slice back to 12 ----
    w1 = params["fc1_w"].astype(jnp.bfloat16)
    w2 = params["fc2_w"].astype(jnp.bfloat16)
    w3 = jnp.pad(params["fc3_w"], ((0, 0), (0, N_PAD - N_CLASSES))).astype(jnp.bfloat16)
    b3 = jnp.pad(params["fc3_b"], (0, N_PAD - N_CLASSES), constant_values=-1e30)

    # TODO(synk): for large B, add a 'parallel' grid axis over batch tiles instead of the
    # gridless whole-array-in-VMEM call below.
    probs_pad = pl.pallas_call(
        _mlp_kernel,
        out_shape=jax.ShapeDtypeStruct((B, N_PAD), jnp.float32),
        in_specs=[_VMEM] * 7,
        out_specs=_VMEM,
    )(feat,
      w1, params["fc1_b"].reshape(1, -1),
      w2, params["fc2_b"].reshape(1, -1),
      w3, b3.reshape(1, -1))
    return probs_pad[:, :N_CLASSES]


# ----------------------------------------------------------------------------
# Deterministic synthetic parameter init (shapes match nn.Module __init__)
# ----------------------------------------------------------------------------
def init_params(key):
    params = {}
    for k in KERNEL_SIZES:
        key, kw, kb = jax.random.split(key, 3)
        params[f"conv{k}"] = dict(
            w=0.05 * jax.random.normal(kw, (C_OUT, C_IN, k), jnp.float32),
            b=0.05 * jax.random.normal(kb, (C_OUT,), jnp.float32),
            bn_gamma=jnp.ones((C_OUT,), jnp.float32),
            bn_beta=jnp.zeros((C_OUT,), jnp.float32),
            bn_mean=jnp.zeros((C_OUT,), jnp.float32),
            bn_var=jnp.ones((C_OUT,), jnp.float32),
        )
    dims = [(2048, 1024), (1024, 512), (512, N_CLASSES)]
    for i, (din, dout) in enumerate(dims, start=1):
        key, kw, kb = jax.random.split(key, 3)
        # Stored directly in (in, out) layout (synthetic weights, not a checkpoint).
        params[f"fc{i}_w"] = 0.05 * jax.random.normal(kw, (din, dout), jnp.float32)
        params[f"fc{i}_b"] = 0.05 * jax.random.normal(kb, (dout,), jnp.float32)
    return params


# ----------------------------------------------------------------------------
if __name__ == "__main__":
    B = 2
    MAX_LEN = 16

    key = jax.random.PRNGKey(0)
    key, kx = jax.random.split(key)
    x = jax.random.normal(kx, (B, C_IN, MAX_LEN), jnp.float32)   # (N, C_in, L)

    params = init_params(key)

    fwd = jax.jit(novel_det_forward)
    out = jax.block_until_ready(fwd(x, params))

    assert out.shape == (B, N_CLASSES)
    # Softmax rows must sum to ~1 (bf16 matmul operands + EUP approx reciprocal).
    assert jnp.allclose(jnp.sum(out, axis=-1), 1.0, atol=1e-2)
    assert bool(jnp.all(out >= 0.0))
    print("KERNEL_OK")
</pallas_src>

<mosaic_0001>
module attributes {stable_mosaic.version = 11 : i64} {
  func.func @_conv_branches_kernel(%arg0: i32, %arg1: memref<8xi32, #tpu.memory_space<smem>>, %arg2: memref<2x23x26xbf16, #tpu.memory_space<vmem>>, %arg3: memref<1x10x26x256xbf16, #tpu.memory_space<vmem>>, %arg4: memref<1x1x256xf32, #tpu.memory_space<vmem>>, %arg5: memref<1x1x256xf32, #tpu.memory_space<vmem>>, %arg6: memref<2x256xf32, #tpu.memory_space<vmem>>) attributes {dimension_semantics = [#tpu.dimension_semantics<parallel>], iteration_bounds = array<i64: 8>, scalar_prefetch = 1 : i64, scratch_operands = 0 : i64, tpu.core_type = #tpu.core_type<tc>, window_params = [{pipeline_mode = #tpu.pipeline_mode<synchronous>, transform_indices = @transform_0, window_bounds = array<i64: 2, 23, 26>}, {transform_indices = @transform_1, window_bounds = array<i64: 1, 10, 26, 256>}, {transform_indices = @transform_2, window_bounds = array<i64: 1, 1, 256>}, {transform_indices = @transform_3, window_bounds = array<i64: 1, 1, 256>}, {transform_indices = @transform_4, window_bounds = array<i64: 2, 256>}]} {
    %0 = arith.index_cast %arg0 : i32 to index
    %1 = memref.load %arg1[%0] : memref<8xi32, #tpu.memory_space<smem>>
    %cst = arith.constant 0.000000e+00 : f32
    %2 = vector.broadcast %cst : f32 to vector<2x14x256xf32>
    %c0 = arith.constant 0 : index
    %c0_0 = arith.constant 0 : index
    %c0_1 = arith.constant 0 : index
    %3 = vector.load %arg2[%c0, %c0_0, %c0_1] : memref<2x23x26xbf16, #tpu.memory_space<vmem>>, vector<2x14x26xbf16>
    %c0_2 = arith.constant 0 : index
    %c0_3 = arith.constant 0 : index
    %c0_4 = arith.constant 0 : index
    %c0_5 = arith.constant 0 : index
    %4 = vector.load %arg3[%c0_2, %c0_3, %c0_4, %c0_5] : memref<1x10x26x256xbf16, #tpu.memory_space<vmem>>, vector<1x1x26x256xbf16>
    %5 = vector.shape_cast %4 : vector<1x1x26x256xbf16> to vector<26x256xbf16>
    %6 = vector.shape_cast %5 : vector<26x256xbf16> to vector<1x26x256xbf16>
    %7 = vector.broadcast %6 : vector<1x26x256xbf16> to vector<2x26x256xbf16>
    "tpu.trace_start"() <{level = 10 : i32, message = "btc,bco->bto"}> : () -> ()
    %cst_6 = arith.constant dense<0.000000e+00> : vector<2x14x256xf32>
    %8 = tpu.matmul %3, %7, %cst_6 {dimension_numbers = #tpu.dot_dimension_numbers<[2], [1], [1], [2], [0, 0, 0, 1, 1, 2], [0], [0]>} : vector<2x14x26xbf16>, vector<2x26x256xbf16>, vector<2x14x256xf32> -> vector<2x14x256xf32>
    "tpu.trace_stop"() : () -> ()
    %9 = arith.addf %2, %8 : vector<2x14x256xf32>
    %c0_7 = arith.constant 0 : index
    %c1 = arith.constant 1 : index
    %c0_8 = arith.constant 0 : index
    %10 = vector.load %arg2[%c0_7, %c1, %c0_8] : memref<2x23x26xbf16, #tpu.memory_space<vmem>>, vector<2x14x26xbf16>
    %c0_9 = arith.constant 0 : index
    %c1_10 = arith.constant 1 : index
    %c0_11 = arith.constant 0 : index
    %c0_12 = arith.constant 0 : index
    %11 = vector.load %arg3[%c0_9, %c1_10, %c0_11, %c0_12] : memref<1x10x26x256xbf16, #tpu.memory_space<vmem>>, vector<1x1x26x256xbf16>
    %12 = vector.shape_cast %11 : vector<1x1x26x256xbf16> to vector<26x256xbf16>
    %13 = vector.shape_cast %12 : vector<26x256xbf16> to vector<1x26x256xbf16>
    %14 = vector.broadcast %13 : vector<1x26x256xbf16> to vector<2x26x256xbf16>
    "tpu.trace_start"() <{level = 10 : i32, message = "btc,bco->bto"}> : () -> ()
    %cst_13 = arith.constant dense<0.000000e+00> : vector<2x14x256xf32>
    %15 = tpu.matmul %10, %14, %cst_13 {dimension_numbers = #tpu.dot_dimension_numbers<[2], [1], [1], [2], [0, 0, 0, 1, 1, 2], [0], [0]>} : vector<2x14x26xbf16>, vector<2x26x256xbf16>, vector<2x14x256xf32> -> vector<2x14x256xf32>
    "tpu.trace_stop"() : () -> ()
    %16 = arith.addf %9, %15 : vector<2x14x256xf32>
    %c0_14 = arith.constant 0 : index
    %c2 = arith.constant 2 : index
    %c0_15 = arith.constant 0 : index
    %17 = vector.load %arg2[%c0_14, %c2, %c0_15] : memref<2x23x26xbf16, #tpu.memory_space<vmem>>, vector<2x14x26xbf16>
    %c0_16 = arith.constant 0 : index
    %c2_17 = arith.constant 2 : index
    %c0_18 = arith.constant 0 : index
    %c0_19 = arith.constant 0 : index
    %18 = vector.load %arg3[%c0_16, %c2_17, %c0_18, %c0_19] : memref<1x10x26x256xbf16, #tpu.memory_space<vmem>>, vector<1x1x26x256xbf16>
    %19 = vector.shape_cast %18 : vector<1x1x26x256xbf16> to vector<26x256xbf16>
    %20 = vector.shape_cast %19 : vector<26x256xbf16> to vector<1x26x256xbf16>
    %21 = vector.broadcast %20 : vector<1x26x256xbf16> to vector<2x26x256xbf16>
    "tpu.trace_start"() <{level = 10 : i32, message = "btc,bco->bto"}> : () -> ()
    %cst_20 = arith.constant dense<0.000000e+00> : vector<2x14x256xf32>
    %22 = tpu.matmul %17, %21, %cst_20 {dimension_numbers = #tpu.dot_dimension_numbers<[2], [1], [1], [2], [0, 0, 0, 1, 1, 2], [0], [0]>} : vector<2x14x26xbf16>, vector<2x26x256xbf16>, vector<2x14x256xf32> -> vector<2x14x256xf32>
    "tpu.trace_stop"() : () -> ()
    %23 = arith.addf %16, %22 : vector<2x14x256xf32>
    %c0_21 = arith.constant 0 : index
    %c3 = arith.constant 3 : index
    %c0_22 = arith.constant 0 : index
    %24 = vector.load %arg2[%c0_21, %c3, %c0_22] : memref<2x23x26xbf16, #tpu.memory_space<vmem>>, vector<2x14x26xbf16>
    %c0_23 = arith.constant 0 : index
    %c3_24 = arith.constant 3 : index
    %c0_25 = arith.constant 0 : index
    %c0_26 = arith.constant 0 : index
    %25 = vector.load %arg3[%c0_23, %c3_24, %c0_25, %c0_26] : memref<1x10x26x256xbf16, #tpu.memory_space<vmem>>, vector<1x1x26x256xbf16>
    %26 = vector.shape_cast %25 : vector<1x1x26x256xbf16> to vector<26x256xbf16>
    %27 = vector.shape_cast %26 : vector<26x256xbf16> to vector<1x26x256xbf16>
    %28 = vector.broadcast %27 : vector<1x26x256xbf16> to vector<2x26x256xbf16>
    "tpu.trace_start"() <{level = 10 : i32, message = "btc,bco->bto"}> : () -> ()
    %cst_27 = arith.constant dense<0.000000e+00> : vector<2x14x256xf32>
    %29 = tpu.matmul %24, %28, %cst_27 {dimension_numbers = #tpu.dot_dimension_numbers<[2], [1], [1], [2], [0, 0, 0, 1, 1, 2], [0], [0]>} : vector<2x14x26xbf16>, vector<2x26x256xbf16>, vector<2x14x256xf32> -> vector<2x14x256xf32>
    "tpu.trace_stop"() : () -> ()
    %30 = arith.addf %23, %29 : vector<2x14x256xf32>
    %c0_28 = arith.constant 0 : index
    %c4 = arith.constant 4 : index
    %c0_29 = arith.constant 0 : index
    %31 = vector.load %arg2[%c0_28, %c4, %c0_29] : memref<2x23x26xbf16, #tpu.memory_space<vmem>>, vector<2x14x26xbf16>
    %c0_30 = arith.constant 0 : index
    %c4_31 = arith.constant 4 : index
    %c0_32 = arith.constant 0 : index
    %c0_33 = arith.constant 0 : index
    %32 = vector.load %arg3[%c0_30, %c4_31, %c0_32, %c0_33] : memref<1x10x26x256xbf16, #tpu.memory_space<vmem>>, vector<1x1x26x256xbf16>
    %33 = vector.shape_cast %32 : vector<1x1x26x256xbf16> to vector<26x256xbf16>
    %34 = vector.shape_cast %33 : vector<26x256xbf16> to vector<1x26x256xbf16>
    %35 = vector.broadcast %34 : vector<1x26x256xbf16> to vector<2x26x256xbf16>
    "tpu.trace_start"() <{level = 10 : i32, message = "btc,bco->bto"}> : () -> ()
    %cst_34 = arith.constant dense<0.000000e+00> : vector<2x14x256xf32>
    %36 = tpu.matmul %31, %35, %cst_34 {dimension_numbers = #tpu.dot_dimension_numbers<[2], [1], [1], [2], [0, 0, 0, 1, 1, 2], [0], [0]>} : vector<2x14x26xbf16>, vector<2x26x256xbf16>, vector<2x14x256xf32> -> vector<2x14x256xf32>
    "tpu.trace_stop"() : () -> ()
    %37 = arith.addf %30, %36 : vector<2x14x256xf32>
    %c0_35 = arith.constant 0 : index
    %c5 = arith.constant 5 : index
    %c0_36 = arith.constant 0 : index
    %38 = vector.load %arg2[%c0_35, %c5, %c0_36] : memref<2x23x26xbf16, #tpu.memory_space<vmem>>, vector<2x14x26xbf16>
    %c0_37 = arith.constant 0 : index
    %c5_38 = arith.constant 5 : index
    %c0_39 = arith.constant 0 : index
    %c0_40 = arith.constant 0 : index
    %39 = vector.load %arg3[%c0_37, %c5_38, %c0_39, %c0_40] : memref<1x10x26x256xbf16, #tpu.memory_space<vmem>>, vector<1x1x26x256xbf16>
    %40 = vector.shape_cast %39 : vector<1x1x26x256xbf16> to vector<26x256xbf16>
    %41 = vector.shape_cast %40 : vector<26x256xbf16> to vector<1x26x256xbf16>
    %42 = vector.broadcast %41 : vector<1x26x256xbf16> to vector<2x26x256xbf16>
    "tpu.trace_start"() <{level = 10 : i32, message = "btc,bco->bto"}> : () -> ()
    %cst_41 = arith.constant dense<0.000000e+00> : vector<2x14x256xf32>
    %43 = tpu.matmul %38, %42, %cst_41 {dimension_numbers = #tpu.dot_dimension_numbers<[2], [1], [1], [2], [0, 0, 0, 1, 1, 2], [0], [0]>} : vector<2x14x26xbf16>, vector<2x26x256xbf16>, vector<2x14x256xf32> -> vector<2x14x256xf32>
    "tpu.trace_stop"() : () -> ()
    %44 = arith.addf %37, %43 : vector<2x14x256xf32>
    %c0_42 = arith.constant 0 : index
    %c6 = arith.constant 6 : index
    %c0_43 = arith.constant 0 : index
    %45 = vector.load %arg2[%c0_42, %c6, %c0_43] : memref<2x23x26xbf16, #tpu.memory_space<vmem>>, vector<2x14x26xbf16>
    %c0_44 = arith.constant 0 : index
    %c6_45 = arith.constant 6 : index
    %c0_46 = arith.constant 0 : index
    %c0_47 = arith.constant 0 : index
    %46 = vector.load %arg3[%c0_44, %c6_45, %c0_46, %c0_47] : memref<1x10x26x256xbf16, #tpu.memory_space<vmem>>, vector<1x1x26x256xbf16>
    %47 = vector.shape_cast %46 : vector<1x1x26x256xbf16> to vector<26x256xbf16>
    %48 = vector.shape_cast %47 : vector<26x256xbf16> to vector<1x26x256xbf16>
    %49 = vector.broadcast %48 : vector<1x26x256xbf16> to vector<2x26x256xbf16>
    "tpu.trace_start"() <{level = 10 : i32, message = "btc,bco->bto"}> : () -> ()
    %cst_48 = arith.constant dense<0.000000e+00> : vector<2x14x256xf32>
    %50 = tpu.matmul %45, %49, %cst_48 {dimension_numbers = #tpu.dot_dimension_numbers<[2], [1], [1], [2], [0, 0, 0, 1, 1, 2], [0], [0]>} : vector<2x14x26xbf16>, vector<2x26x256xbf16>, vector<2x14x256xf32> -> vector<2x14x256xf32>
    "tpu.trace_stop"() : () -> ()
    %51 = arith.addf %44, %50 : vector<2x14x256xf32>
    %c0_49 = arith.constant 0 : index
    %c7 = arith.constant 7 : index
    %c0_50 = arith.constant 0 : index
    %52 = vector.load %arg2[%c0_49, %c7, %c0_50] : memref<2x23x26xbf16, #tpu.memory_space<vmem>>, vector<2x14x26xbf16>
    %c0_51 = arith.constant 0 : index
    %c7_52 = arith.constant 7 : index
    %c0_53 = arith.constant 0 : index
    %c0_54 = arith.constant 0 : index
    %53 = vector.load %arg3[%c0_51, %c7_52, %c0_53, %c0_54] : memref<1x10x26x256xbf16, #tpu.memory_space<vmem>>, vector<1x1x26x256xbf16>
    %54 = vector.shape_cast %53 : vector<1x1x26x256xbf16> to vector<26x256xbf16>
    %55 = vector.shape_cast %54 : vector<26x256xbf16> to vector<1x26x256xbf16>
    %56 = vector.broadcast %55 : vector<1x26x256xbf16> to vector<2x26x256xbf16>
    "tpu.trace_start"() <{level = 10 : i32, message = "btc,bco->bto"}> : () -> ()
    %cst_55 = arith.constant dense<0.000000e+00> : vector<2x14x256xf32>
    %57 = tpu.matmul %52, %56, %cst_55 {dimension_numbers = #tpu.dot_dimension_numbers<[2], [1], [1], [2], [0, 0, 0, 1, 1, 2], [0], [0]>} : vector<2x14x26xbf16>, vector<2x26x256xbf16>, vector<2x14x256xf32> -> vector<2x14x256xf32>
    "tpu.trace_stop"() : () -> ()
    %58 = arith.addf %51, %57 : vector<2x14x256xf32>
    %c0_56 = arith.constant 0 : index
    %c8 = arith.constant 8 : index
    %c0_57 = arith.constant 0 : index
    %59 = vector.load %arg2[%c0_56, %c8, %c0_57] : memref<2x23x26xbf16, #tpu.memory_space<vmem>>, vector<2x14x26xbf16>
    %c0_58 = arith.constant 0 : index
    %c8_59 = arith.constant 8 : index
    %c0_60 = arith.constant 0 : index
    %c0_61 = arith.constant 0 : index
    %60 = vector.load %arg3[%c0_58, %c8_59, %c0_60, %c0_61] : memref<1x10x26x256xbf16, #tpu.memory_space<vmem>>, vector<1x1x26x256xbf16>
    %61 = vector.shape_cast %60 : vector<1x1x26x256xbf16> to vector<26x256xbf16>
    %62 = vector.shape_cast %61 : vector<26x256xbf16> to vector<1x26x256xbf16>
    %63 = vector.broadcast %62 : vector<1x26x256xbf16> to vector<2x26x256xbf16>
    "tpu.trace_start"() <{level = 10 : i32, message = "btc,bco->bto"}> : () -> ()
    %cst_62 = arith.constant dense<0.000000e+00> : vector<2x14x256xf32>
    %64 = tpu.matmul %59, %63, %cst_62 {dimension_numbers = #tpu.dot_dimension_numbers<[2], [1], [1], [2], [0, 0, 0, 1, 1, 2], [0], [0]>} : vector<2x14x26xbf16>, vector<2x26x256xbf16>, vector<2x14x256xf32> -> vector<2x14x256xf32>
    "tpu.trace_stop"() : () -> ()
    %65 = arith.addf %58, %64 : vector<2x14x256xf32>
    %c0_63 = arith.constant 0 : index
    %c9 = arith.constant 9 : index
    %c0_64 = arith.constant 0 : index
    %66 = vector.load %arg2[%c0_63, %c9, %c0_64] : memref<2x23x26xbf16, #tpu.memory_space<vmem>>, vector<2x14x26xbf16>
    %c0_65 = arith.constant 0 : index
    %c9_66 = arith.constant 9 : index
    %c0_67 = arith.constant 0 : index
    %c0_68 = arith.constant 0 : index
    %67 = vector.load %arg3[%c0_65, %c9_66, %c0_67, %c0_68] : memref<1x10x26x256xbf16, #tpu.memory_space<vmem>>, vector<1x1x26x256xbf16>
    %68 = vector.shape_cast %67 : vector<1x1x26x256xbf16> to vector<26x256xbf16>
    %69 = vector.shape_cast %68 : vector<26x256xbf16> to vector<1x26x256xbf16>
    %70 = vector.broadcast %69 : vector<1x26x256xbf16> to vector<2x26x256xbf16>
    "tpu.trace_start"() <{level = 10 : i32, message = "btc,bco->bto"}> : () -> ()
    %cst_69 = arith.constant dense<0.000000e+00> : vector<2x14x256xf32>
    %71 = tpu.matmul %66, %70, %cst_69 {dimension_numbers = #tpu.dot_dimension_numbers<[2], [1], [1], [2], [0, 0, 0, 1, 1, 2], [0], [0]>} : vector<2x14x26xbf16>, vector<2x26x256xbf16>, vector<2x14x256xf32> -> vector<2x14x256xf32>
    "tpu.trace_stop"() : () -> ()
    %72 = arith.addf %65, %71 : vector<2x14x256xf32>
    %c0_70 = arith.constant 0 : index
    %c0_71 = arith.constant 0 : index
    %c0_72 = arith.constant 0 : index
    %73 = vector.load %arg4[%c0_70, %c0_71, %c0_72] : memref<1x1x256xf32, #tpu.memory_space<vmem>>, vector<1x1x256xf32>
    %74 = vector.broadcast %73 : vector<1x1x256xf32> to vector<2x14x256xf32>
    %75 = arith.mulf %72, %74 : vector<2x14x256xf32>
    %c0_73 = arith.constant 0 : index
    %c0_74 = arith.constant 0 : index
    %c0_75 = arith.constant 0 : index
    %76 = vector.load %arg5[%c0_73, %c0_74, %c0_75] : memref<1x1x256xf32, #tpu.memory_space<vmem>>, vector<1x1x256xf32>
    %77 = vector.broadcast %76 : vector<1x1x256xf32> to vector<2x14x256xf32>
    %78 = arith.addf %75, %77 : vector<2x14x256xf32>
    %cst_76 = arith.constant 0.000000e+00 : f32
    %79 = vector.broadcast %cst_76 : f32 to vector<2x14x256xf32>
    %80 = arith.maximumf %78, %79 : vector<2x14x256xf32>
    %81 = tpu.iota {dimensions = array<i32: 1>} : vector<2x14x256xi32>
    %82 = vector.broadcast %1 : i32 to vector<2x14x256xi32>
    %83 = arith.cmpi slt, %81, %82 : vector<2x14x256xi32>
    %cst_77 = arith.constant 0.000000e+00 : f32
    %84 = vector.broadcast %cst_77 : f32 to vector<2x14x256xf32>
    %85 = arith.select %83, %80, %84 : vector<2x14x256xi1>, vector<2x14x256xf32>
    %cst_78 = arith.constant dense<0xFF800000> : vector<2x256xf32>
    %86 = vector.multi_reduction <maximumf>, %85, %cst_78 [1] : vector<2x14x256xf32> to vector<2x256xf32>
    %c0_79 = arith.constant 0 : index
    %c0_80 = arith.constant 0 : index
    %87 = vector.load %arg6[%c0_79, %c0_80] : memref<2x256xf32, #tpu.memory_space<vmem>>, vector<2x256xf32>
    tpu.vector_store %arg6[%c0_79, %c0_80], %86 {strides = array<i32>} : memref<2x256xf32, #tpu.memory_space<vmem>>, vector<2x256xf32>,
    return
  }
  func.func @transform_0(%arg0: i32, %arg1: memref<8xi32, #tpu.memory_space<smem>>) -> (i32, i32, i32) {
    %c0_i32 = arith.constant 0 : i32
    %c0_i32_0 = arith.constant 0 : i32
    %c0_i32_1 = arith.constant 0 : i32
    %c0_i32_2 = arith.constant 0 : i32
    return %c0_i32, %c0_i32_0, %c0_i32_1 : i32, i32, i32
  }
  func.func @transform_1(%arg0: i32, %arg1: memref<8xi32, #tpu.memory_space<smem>>) -> (i32, i32, i32, i32) {
    %c0_i32 = arith.constant 0 : i32
    %c0_i32_0 = arith.constant 0 : i32
    %c0_i32_1 = arith.constant 0 : i32
    %c0_i32_2 = arith.constant 0 : i32
    return %arg0, %c0_i32, %c0_i32_0, %c0_i32_1 : i32, i32, i32, i32
  }
  func.func @transform_2(%arg0: i32, %arg1: memref<8xi32, #tpu.memory_space<smem>>) -> (i32, i32, i32) {
    %c0_i32 = arith.constant 0 : i32
    %c0_i32_0 = arith.constant 0 : i32
    %c0_i32_1 = arith.constant 0 : i32
    return %arg0, %c0_i32, %c0_i32_0 : i32, i32, i32
  }
  func.func @transform_3(%arg0: i32, %arg1: memref<8xi32, #tpu.memory_space<smem>>) -> (i32, i32, i32) {
    %c0_i32 = arith.constant 0 : i32
    %c0_i32_0 = arith.constant 0 : i32
    %c0_i32_1 = arith.constant 0 : i32
    return %arg0, %c0_i32, %c0_i32_0 : i32, i32, i32
  }
  func.func @transform_4(%arg0: i32, %arg1: memref<8xi32, #tpu.memory_space<smem>>) -> (i32, i32) {
    %c0_i32 = arith.constant 0 : i32
    %c0_i32_0 = arith.constant 0 : i32
    return %c0_i32, %arg0 : i32, i32
  }
}

module attributes {stable_mosaic.version = 11 : i64} {
  func.func @_mlp_kernel(%arg0: memref<2x2048xf32, #tpu.memory_space<vmem>>, %arg1: memref<2048x1024xbf16, #tpu.memory_space<vmem>>, %arg2: memref<1x1024xf32, #tpu.memory_space<vmem>>, %arg3: memref<1024x512xbf16, #tpu.memory_space<vmem>>, %arg4: memref<1x512xf32, #tpu.memory_space<vmem>>, %arg5: memref<512x128xbf16, #tpu.memory_space<vmem>>, %arg6: memref<1x128xf32, #tpu.memory_space<vmem>>, %arg7: memref<2x128xf32, #tpu.memory_space<vmem>>) attributes {dimension_semantics = [], scalar_prefetch = 0 : i64, scratch_operands = 0 : i64, tpu.core_type = #tpu.core_type<tc>} {
    %c0 = arith.constant 0 : index
    %c0_0 = arith.constant 0 : index
    %0 = vector.load %arg0[%c0, %c0_0] : memref<2x2048xf32, #tpu.memory_space<vmem>>, vector<2x2048xf32>
    %1 = arith.truncf %0 : vector<2x2048xf32> to vector<2x2048xbf16>
    %c0_1 = arith.constant 0 : index
    %c0_2 = arith.constant 0 : index
    %2 = vector.load %arg1[%c0_1, %c0_2] : memref<2048x1024xbf16, #tpu.memory_space<vmem>>, vector<2048x1024xbf16>
    %cst = arith.constant dense<0.000000e+00> : vector<2x1024xf32>
    %3 = tpu.matmul %1, %2, %cst {dimension_numbers = #tpu.dot_dimension_numbers<[1], [0], [0], [1], [0, 0, 1, 1], [], []>} : vector<2x2048xbf16>, vector<2048x1024xbf16>, vector<2x1024xf32> -> vector<2x1024xf32>
    %c0_3 = arith.constant 0 : index
    %c0_4 = arith.constant 0 : index
    %4 = vector.load %arg2[%c0_3, %c0_4] : memref<1x1024xf32, #tpu.memory_space<vmem>>, vector<1x1024xf32>
    %5 = vector.broadcast %4 : vector<1x1024xf32> to vector<2x1024xf32>
    %6 = arith.addf %3, %5 : vector<2x1024xf32>
    %cst_5 = arith.constant 0.000000e+00 : f32
    %7 = vector.broadcast %cst_5 : f32 to vector<2x1024xf32>
    %8 = arith.maximumf %6, %7 : vector<2x1024xf32>
    %9 = arith.truncf %8 : vector<2x1024xf32> to vector<2x1024xbf16>
    %c0_6 = arith.constant 0 : index
    %c0_7 = arith.constant 0 : index
    %10 = vector.load %arg3[%c0_6, %c0_7] : memref<1024x512xbf16, #tpu.memory_space<vmem>>, vector<1024x512xbf16>
    %cst_8 = arith.constant dense<0.000000e+00> : vector<2x512xf32>
    %11 = tpu.matmul %9, %10, %cst_8 {dimension_numbers = #tpu.dot_dimension_numbers<[1], [0], [0], [1], [0, 0, 1, 1], [], []>} : vector<2x1024xbf16>, vector<1024x512xbf16>, vector<2x512xf32> -> vector<2x512xf32>
    %c0_9 = arith.constant 0 : index
    %c0_10 = arith.constant 0 : index
    %12 = vector.load %arg4[%c0_9, %c0_10] : memref<1x512xf32, #tpu.memory_space<vmem>>, vector<1x512xf32>
    %13 = vector.broadcast %12 : vector<1x512xf32> to vector<2x512xf32>
    %14 = arith.addf %11, %13 : vector<2x512xf32>
    %cst_11 = arith.constant 0.000000e+00 : f32
    %15 = vector.broadcast %cst_11 : f32 to vector<2x512xf32>
    %16 = arith.maximumf %14, %15 : vector<2x512xf32>
    %17 = arith.truncf %16 : vector<2x512xf32> to vector<2x512xbf16>
    %c0_12 = arith.constant 0 : index
    %c0_13 = arith.constant 0 : index
    %18 = vector.load %arg5[%c0_12, %c0_13] : memref<512x128xbf16, #tpu.memory_space<vmem>>, vector<512x128xbf16>
    %cst_14 = arith.constant dense<0.000000e+00> : vector<2x128xf32>
    %19 = tpu.matmul %17, %18, %cst_14 {dimension_numbers = #tpu.dot_dimension_numbers<[1], [0], [0], [1], [0, 0, 1, 1], [], []>} : vector<2x512xbf16>, vector<512x128xbf16>, vector<2x128xf32> -> vector<2x128xf32>
    %c0_15 = arith.constant 0 : index
    %c0_16 = arith.constant 0 : index
    %20 = vector.load %arg6[%c0_15, %c0_16] : memref<1x128xf32, #tpu.memory_space<vmem>>, vector<1x128xf32>
    %21 = vector.broadcast %20 : vector<1x128xf32> to vector<2x128xf32>
    %22 = arith.addf %19, %21 : vector<2x128xf32>
    %cst_17 = arith.constant dense<0xFF800000> : vector<2xf32>
    %23 = vector.multi_reduction <maximumf>, %22, %cst_17 [1] : vector<2x128xf32> to vector<2xf32>
    %24 = vector.shape_cast %23 : vector<2xf32> to vector<2x1xf32>
    %25 = vector.broadcast %24 : vector<2x1xf32> to vector<2x128xf32>
    %26 = arith.subf %22, %25 : vector<2x128xf32>
    %27 = math.exp %26 : vector<2x128xf32>
    %cst_18 = arith.constant dense<0.000000e+00> : vector<2xf32>
    %28 = vector.multi_reduction <add>, %27, %cst_18 [1] : vector<2x128xf32> to vector<2xf32>
    %29 = vector.shape_cast %28 : vector<2xf32> to vector<2x1xf32>
    %30 = tpu.reciprocal %29 {approx = true} : vector<2x1xf32> -> vector<2x1xf32>
    %31 = vector.broadcast %30 : vector<2x1xf32> to vector<2x128xf32>
    %32 = arith.mulf %27, %31 : vector<2x128xf32>
    %c0_19 = arith.constant 0 : index
    %c0_20 = arith.constant 0 : index
    %33 = vector.load %arg7[%c0_19, %c0_20] : memref<2x128xf32, #tpu.memory_space<vmem>>, vector<2x128xf32>
    tpu.vector_store %arg7[%c0_19, %c0_20], %32 {strides = array<i32>} : memref<2x128xf32, #tpu.memory_space<vmem>>, vector<2x128xf32>,
    return
  }
}

</mosaic_0001>

<bundles_post_ra>
// kernel: novel_det_forward.2
= control target key start
LH: loop header
LB: loop body
LE: loop exit
PB: predicated region body
PF: predicated region fallthrough
CT: control target
= control target key end

     0   :  { %s2147_s21 = smov [#allocation3]   ;;  %s2544_s0 = inlined_call_operand.vmem [shape: s32[8], index: 0, kind: input, shape index: {}]   ;;  %s2545_s1 = inlined_call_operand.vmem [shape: bf16[2,23,26], index: 1, kind: input, shape index: {}]   ;;  %s2546_s2 = inlined_call_operand.vmem [shape: bf16[8,10,26,256], index: 2, kind: input, shape index: {}]   ;;  %s2547_s3 = inlined_call_operand.vmem [shape: f32[8,1,256], index: 3, kind: input, shape index: {}]   ;;  %s2548_s4 = inlined_call_operand.vmem [shape: f32[8,1,256], index: 4, kind: input, shape index: {}]   ;;  %s2549_s5 = inlined_call_operand.vmem [shape: f32[2,2048], index: 5, kind: output, shape index: {}]  }
   0x1   :  { %s11_s20 = sshll.u32 %s2544_s0, 4  ;;  %s12_s20 = int_to_ptr.vmem [resolvable:$true] %s11_s20 }
   0x2   :  { %14 = dma.vmem_to_smem %s12_s20, 16, %s2147_s21, [#allocation2] }
   0x3   :  { %2141 = dma.done.wait [#allocation2], 16 }
   0x4   :  { %2142 = vsyncadd [#allocation2], 4294967280 }
   0x5   :  { %17 = sfence }
   0x6   :  { %s2181_s22 = smov 0  }
   0x7 LB: > { %s2187_s23 = sadd.s32 4294967295, %s2145_s22   ;;  %p1731_p0 = scmp.ge.s32.totalorder %s2145_s22, 1  ;;  %s2145_s22 = sphi %s2181_s22, %s23_s22  }
   0x8   : > { %p189_p1 = scmp.lt.s32.totalorder %s2145_s22, 9 }
   0xa   : > { %p190_p2 = pnand %p1731_p0, %p189_p1 }
   0xb   : > { %p223_p3 = scmp.lt.s32.totalorder (!%p190_p2), %s2187_s23, 7  ;;  %s1735_s13 = sshll.u32 (!%p190_p2), %s2187_s23, 1 }
   0xc   : > { %193 = sbr.rel (%p190_p2) target bundleno = 354 (0x162), region = 36  ;;  %p237_p4 = scmp.lt.s32.totalorder (!%p190_p2), %s1735_s13, 15 }
  0x11   : > { %v2061_v0 = vld [vmem:[%s2545_s1] sm:$0xff]  ;;  %s2196_s25 = scalar_select %p223_p3, %s2187_s23, 7  ;;  %v2062_v2 = vld [vmem:[%s2545_s1 + $0xc] sm:$0xff]  ;;  %vm295_vm0 = vcmask 1044480   ;;  %vm291_vm1 = vcmask 211968   ;;  %vm751_vm3 = vcmask 1045504  }
  0x12   : > { %v269_v1 = vshll.u32 %v2061_v0, 16  ;;  %v267_v3 = vshrl.u32 %v2061_v0, 16  ;;  %v336_v5 = vshrl.u32 %v2062_v2, 16  ;;  %v338_v6 = vshll.u32 %v2062_v2, 16  ;;  %v1771_v52 = vld [vmem:[%s2545_s1] sm:$0xf] }
  0x13   : > { %s2115_s28 = smul.u32 320, %s2196_s25  ;;  %v2055_v57 = vld [vmem:[%s2545_s1] sm:$0x70]  ;;  %v1793_v58 = vld [vmem:[%s2545_s1 + $0xc] sm:$0xf]  ;;  %s1733_s30 = sshll.u32 %s2196_s25, 1 }
  0x14   : > { %v271_v4 = vrot.slane %v269_v1, 1  ;;  %v340_v19 = vrot.slane %v338_v6, 1  ;;  %v2056_v59 = vld [vmem:[%s2545_s1 + $0xc] sm:$0x70]  ;;  %v1772_v62 = vor.u32 %v2055_v57, %v1771_v52  ;;  %vm603_vm2 = vsmask.f32 6400  ;;  %s231_s9 = scalar_lea.vmem %s2547_s3, %s1733_s30  ;;  %s235_s12 = scalar_lea.vmem %s2548_s4, %s1733_s30 }
  0x15   : > { %s2205_s6 = scalar_lea.vmem %s2546_s2, %s2115_s28  ;;  %v1794_v63 = vor.u32 %v2056_v59, %v1793_v58  ;;  %vm879_vm4 = vsmask.f32 5376  ;;  %vm1163_vm5 = vsmask.f32 4352  ;;  %s2501_s25 = sld [smem:[#allocation3 + %s2187_s23]]  ;;  %vm1629_vm8 = vcmask 1041408  }
  0x16   : > { %v1755_v7 = vld [vmem:[%s2205_s6 + $0x30] sm:$0xf]  ;;  %v2066_v8 = vld [vmem:[%s2205_s6 + $0x34] sm:$0x10]  ;;  %v2065_v9 = vld [vmem:[%s2205_s6 + $0x34] sm:$0xf]  ;;  %v272_v34 = vor.u32 %v271_v4, %v267_v3  ;;  %v341_v35 = vor.u32 %v340_v19, %v336_v5 }
  0x17   : > { %v1756_v10 = vor.u32 %v2066_v8, %v1755_v7  ;;  %v1757_v11 = vld [vmem:[%s2205_s6 + $0x38] sm:$0x10]  ;;  %v1747_v12 = vld [vmem:[%s2205_s6 + $0x20] sm:$0xf]  ;;  %v2064_v13 = vld [vmem:[%s2205_s6 + $0x24] sm:$0xf0] }
  0x18   : > { %v1760_v14 = vor.u32 %v2065_v9, %v1757_v11  ;;  %v2063_v15 = vld [vmem:[%s2205_s6 + $0x24] sm:$0xf]  ;;  %v1749_v16 = vld [vmem:[%s2205_s6 + $0x28] sm:$0xf0]  ;;  %v2059_v17 = vld [vmem:[%s2205_s6 + $0x14] sm:$0xf]  ;;  %v1748_v23 = vor.u32 %v2064_v13, %v1747_v12 }
  0x19   : > { %v297_v18 = vsel %vm295_vm0, %v1756_v10, 0  ;;  %v1785_v20 = vld [vmem:[%s2205_s6 + $0x18] sm:$0x10]  ;;  %v1783_v21 = vld [vmem:[%s2205_s6 + $0x10] sm:$0xf]  ;;  %v1752_v26 = vor.u32 %v2063_v15, %v1749_v16  ;;  %s2555_s13 = smov (!%p237_p4, %s1735_s13), 15 }
  0x1a   : > { %308 = vmatpush.bf16.msra.mxu0 %v297_v18  ;;  %v300_v22 = vsel %vm295_vm0, %v1760_v14, 0  ;;  %351 = vmatpush.bf16.msra.mxu2 %v297_v18  ;;  %v1788_v24 = vor.u32 %v2059_v17, %v1785_v20  ;;  %v2060_v25 = vld [vmem:[%s2205_s6 + $0x14] sm:$0x10]  ;;  %v2057_v28 = vld [vmem:[%s2205_s6 + $0x4] sm:$0xf]  ;;  %vm1637_vm9 = vcmask 1041409  }
  0x1b   : > { %322 = vmatpush.bf16.msra.mxu1 %v300_v22  ;;  %365 = vmatpush.bf16.msra.mxu3 %v300_v22  ;;  %v1784_v27 = vor.u32 %v2060_v25, %v1783_v21  ;;  %v1777_v29 = vld [vmem:[%s2205_s6 + $0x8] sm:$0xf0]  ;;  %v1775_v30 = vld [vmem:[%s2205_s6] sm:$0xf]  ;;  %v2058_v31 = vld [vmem:[%s2205_s6 + $0x4] sm:$0xf0] }
  0x1c   : > { %v2071_v32 = vld [vmem:[%s2205_s6 + $0x54] sm:$0xf]  ;;  %v1817_v33 = vld [vmem:[%s2205_s6 + $0x58] sm:$0x10]  ;;  %v403_v36 = vsel %vm295_vm0, %v1788_v24, 0  ;;  %v1780_v42 = vor.u32 %v2057_v28, %v1777_v29  ;;  %v1776_v43 = vor.u32 %v2058_v31, %v1775_v30  ;;  %s1736_s14 = sshll.u32 %s2555_s13, 1 }
  0x1d   : > { %v400_v37 = vsel %vm295_vm0, %v1784_v27, 0  ;;  %v1815_v38 = vld [vmem:[%s2205_s6 + $0x50] sm:$0xf]  ;;  %v2072_v39 = vld [vmem:[%s2205_s6 + $0x54] sm:$0x10]  ;;  %v1820_v40 = vor.u32 %v2071_v32, %v1817_v33  ;;  %vm1639_vm10 = vcmask 1043459   ;;  %s240_s16 = scalar_lea.vmem %s2549_s5, %s1736_s14 }
  0x1e   : > { %309 = vmatpush.bf16.msra.mxu0 %v1748_v23  ;;  %352 = vmatpush.bf16.msra.mxu2 %v1748_v23  ;;  %v1816_v41 = vor.u32 %v2072_v39, %v1815_v38  ;;  %v2069_v44 = vld [vmem:[%s2205_s6 + $0x44] sm:$0xf]  ;;  %v1809_v45 = vld [vmem:[%s2205_s6 + $0x48] sm:$0xf0]  ;;  %v1807_v48 = vld [vmem:[%s2205_s6 + $0x40] sm:$0xf] }
  0x1f   : > { %323 = vmatpush.bf16.msra.mxu1 %v1752_v26  ;;  %366 = vmatpush.bf16.msra.mxu3 %v1752_v26  ;;  %v509_v46 = vsel %vm295_vm0, %v1820_v40, 0  ;;  %v2070_v49 = vld [vmem:[%s2205_s6 + $0x44] sm:$0xf0]  ;;  %v1812_v50 = vor.u32 %v2069_v44, %v1809_v45  ;;  %v2077_v53 = vld [vmem:[%s2205_s6 + $0x74] sm:$0xf]  ;;  %vm1641_vm11 = vcmask 1045509  }
  0x20   : > { %v506_v47 = vsel %vm295_vm0, %v1816_v41, 0  ;;  %v1808_v51 = vor.u32 %v2070_v49, %v1807_v48  ;;  %v1849_v54 = vld [vmem:[%s2205_s6 + $0x78] sm:$0x10]  ;;  %v1847_v55 = vld [vmem:[%s2205_s6 + $0x70] sm:$0xf]  ;;  %vm1643_vm12 = vcmask 1047559  }
  0x21   : > { %1761 = vmatmul.msk.bf16.vlgmr.msra.gmra.mxu0 %vm291_vm1, %v272_v34  ;;  %1767 = vmatmul.msk.bf16.vlgmr.msra.gmra.mxu2 %vm291_vm1, %v341_v35  ;;  %v2078_v56 = vld [vmem:[%s2205_s6 + $0x74] sm:$0x10]  ;;  %v1852_v60 = vor.u32 %v2077_v53, %v1849_v54  ;;  %v2075_v0 = vld [vmem:[%s2205_s6 + $0x64] sm:$0xf]  ;;  %v1841_v1 = vld [vmem:[%s2205_s6 + $0x68] sm:$0xf0] }
  0x22   : > { %447 = vmatpush.bf16.msrb.mxu2 %v400_v37  ;;  %1762 = vmatmul.msk.bf16.vlgmr.msra.gmra.mxu1 %vm291_vm1, %v272_v34  ;;  %v1848_v61 = vor.u32 %v2078_v56, %v1847_v55  ;;  %v1839_v4 = vld [vmem:[%s2205_s6 + $0x60] sm:$0xf]  ;;  %v2076_v5 = vld [vmem:[%s2205_s6 + $0x64] sm:$0xf0]  ;;  %v1844_v6 = vor.u32 %v2075_v0, %v1841_v1  ;;  %v2067_v9 = vld [vmem:[%s2545_s1] sm:$0xf0] }
  0x23   : > { %461 = vmatpush.bf16.msrb.mxu3 %v403_v36  ;;  %425 = vmatpush.bf16.msrb.mxu1 %v403_v36  ;;  %v642_v2 = vsel %vm295_vm0, %v1852_v60, 0  ;;  %v1840_v7 = vor.u32 %v2076_v5, %v1839_v4  ;;  %v1803_v8 = vld [vmem:[%s2545_s1] sm:$0xe]  ;;  %v1825_v10 = vld [vmem:[%s2545_s1 + $0xc] sm:$0xe] }
  0x24   : > { %1768 = vmatmul.msk.bf16.vlgmr.msra.gmra.mxu3 %vm291_vm1, %v341_v35  ;;  %411 = vmatpush.bf16.msrb.mxu0 %v400_v37  ;;  %v639_v3 = vsel %vm295_vm0, %v1848_v61, 0  ;;  %v2068_v11 = vld [vmem:[%s2545_s1 + $0xc] sm:$0xf0]  ;;  %v2083_v12 = vld [vmem:[%s2205_s6 + $0x94] sm:$0xf]  ;;  %v1804_v13 = vor.u32 %v2067_v9, %v1803_v8 }
  0x25   : > { %v1826_v14 = vor.u32 %v2068_v11, %v1825_v10  ;;  %v1881_v15 = vld [vmem:[%s2205_s6 + $0x98] sm:$0x10]  ;;  %v1879_v16 = vld [vmem:[%s2205_s6 + $0x90] sm:$0xf]  ;;  %v2084_v17 = vld [vmem:[%s2205_s6 + $0x94] sm:$0x10] }
  0x26   : > { %448 = vmatpush.bf16.msrb.mxu2 %v1776_v43  ;;  %v1835_v18 = vld [vmem:[%s2545_s1] sm:$0xe]  ;;  %v2073_v19 = vld [vmem:[%s2545_s1] sm:$0xf0]  ;;  %v586_v20 = vld [vmem:[%s2545_s1 + $0x8] sm:$0x1]  ;;  %v1884_v24 = vor.u32 %v2083_v12, %v1881_v15  ;;  %v1880_v25 = vor.u32 %v2084_v17, %v1879_v16 }
  0x27   : > { %462 = vmatpush.bf16.msrb.mxu3 %v1780_v42  ;;  %426 = vmatpush.bf16.msrb.mxu1 %v1780_v42  ;;  %v1857_v21 = vld [vmem:[%s2545_s1 + $0xc] sm:$0xe]  ;;  %v2074_v22 = vld [vmem:[%s2545_s1 + $0xc] sm:$0xf0]  ;;  %v589_v23 = vld [vmem:[%s2545_s1 + $0x14] sm:$0x1]  ;;  %v1836_v28 = vor.u32 %v2073_v19, %v1835_v18  ;;  %v600_v29 = vunpack.c.l.b16 %v586_v20 }
  0x28   : > { %412 = vmatpush.bf16.msrb.mxu0 %v1776_v43  ;;  %v483_v26 = vrot.slane %v1804_v13, 1  ;;  %v544_v27 = vrot.slane %v1826_v14, 1  ;;  %v677_v30 = vunpack.c.l.b16 %v589_v23  ;;  %v1858_v31 = vor.u32 %v2074_v22, %v1857_v21  ;;  %v2081_v32 = vld [vmem:[%s2205_s6 + $0x84] sm:$0xf]  ;;  %v1873_v33 = vld [vmem:[%s2205_s6 + $0x88] sm:$0xf0] }
  0x29   : > { %v780_v34 = vsel %vm295_vm0, %v1884_v24, 0  ;;  %v777_v35 = vsel %vm295_vm0, %v1880_v25, 0  ;;  %v1871_v36 = vld [vmem:[%s2205_s6 + $0x80] sm:$0xf]  ;;  %v2082_v37 = vld [vmem:[%s2205_s6 + $0x84] sm:$0xf0]  ;;  %v602_v40 = vpack.c.b16 %v600_v29, %v600_v29  ;;  %v1876_v44 = vor.u32 %v2081_v32, %v1873_v33 }
  0x2a   : > { %554 = vmatpush.bf16.msra.mxu2 %v506_v47  ;;  %v605_v38 = vshrl.u32 %v1836_v28, 16  ;;  %v608_v39 = vshll.u32 %v1836_v28, 16  ;;  %v679_v41 = vpack.c.b16 %v677_v30, %v677_v30  ;;  %v681_v42 = vshrl.u32 %v1858_v31, 16  ;;  %v2089_v52 = vld [vmem:[%s2205_s6 + $0xb4] sm:$0xf] }
  0x2b   : > { %568 = vmatpush.bf16.msra.mxu3 %v509_v46  ;;  %531 = vmatpush.bf16.msra.mxu1 %v509_v46  ;;  %v684_v43 = vshll.u32 %v1858_v31, 16  ;;  %v1872_v45 = vor.u32 %v2082_v37, %v1871_v36  ;;  %v613_v48 = vshll.u32 %v602_v40, 16  ;;  %v1913_v53 = vld [vmem:[%s2205_s6 + $0xb8] sm:$0x10]  ;;  %v1911_v54 = vld [vmem:[%s2205_s6 + $0xb0] sm:$0xf] }
  0x2c   : > { %517 = vmatpush.bf16.msra.mxu0 %v506_v47  ;;  %v607_v46 = vrot.slane %v605_v38, 1  ;;  %v610_v47 = vrot.slane %v608_v39, 2  ;;  %v683_v49 = vrot.slane %v681_v42, 1  ;;  %v2090_v55 = vld [vmem:[%s2205_s6 + $0xb4] sm:$0x10]  ;;  %v1916_v60 = vor.u32 %v2089_v52, %v1913_v53 }
  0x2d   : > { %v615_v57 = vrot.slane %v613_v48, 2  ;;  %v1912_v61 = vor.u32 %v2090_v55, %v1911_v54  ;;  %v737_v1 = vld [vmem:[%s2545_s1 + $0x14] sm:$0x1]  ;;  %v2088_v8 = vld [vmem:[%s2205_s6 + $0xa4] sm:$0xf0] }
  0x2e   : > { %555 = vmatpush.bf16.msra.mxu2 %v1808_v51  ;;  %v611_v56 = vor.u32 %v610_v47, %v607_v46  ;;  %v922_v5 = vsel %vm295_vm0, %v1916_v60, 0  ;;  %v1867_v9 = vld [vmem:[%s2545_s1] sm:$0xc]  ;;  %v2079_v10 = vld [vmem:[%s2545_s1] sm:$0xf0]  ;;  %v815_v11 = vunpack.c.l.b16 %v737_v1 }
  0x2f   : > { %569 = vmatpush.bf16.msra.mxu3 %v1812_v50  ;;  %532 = vmatpush.bf16.msra.mxu1 %v1812_v50  ;;  %v686_v50 = vrot.slane %v684_v43, 2  ;;  %v1889_v12 = vld [vmem:[%s2545_s1 + $0xc] sm:$0xc]  ;;  %v2080_v13 = vld [vmem:[%s2545_s1 + $0xc] sm:$0xf0]  ;;  %v1868_v16 = vor.u32 %v2079_v10, %v1867_v9 }
  0x30   : > { %518 = vmatpush.bf16.msra.mxu0 %v1808_v51  ;;  %v689_v51 = vshll.u32 %v679_v41, 16  ;;  %v1890_v18 = vor.u32 %v2080_v13, %v1889_v12  ;;  %v817_v19 = vpack.c.b16 %v815_v11, %v815_v11  ;;  %v862_v20 = vld [vmem:[%s2545_s1 + $0x8] sm:$0x3]  ;;  %v865_v21 = vld [vmem:[%s2545_s1 + $0x14] sm:$0x3] }
  0x31   : > { %1789 = vmatmul.msk.bf16.vlgmr.msrb.gmra.mxu0 %vm291_vm1, %v1772_v62  ;;  %1795 = vmatmul.msk.bf16.vlgmr.msrb.gmra.mxu2 %vm291_vm1, %v1794_v63  ;;  %v687_v58 = vor.u32 %v686_v50, %v683_v49  ;;  %v752_v22 = vrot.slane %v1868_v16, 2  ;;  %v2095_v24 = vld [vmem:[%s2205_s6 + $0xd4] sm:$0xf]  ;;  %v876_v25 = vunpack.c.l.b16 %v862_v20  ;;  %v2096_v28 = vld [vmem:[%s2205_s6 + $0xd4] sm:$0x10]  ;;  %v957_v33 = vunpack.c.l.b16 %v865_v21 }
  0x32   : > { %1790 = vmatmul.msk.bf16.vlgmr.msrb.gmra.mxu1 %vm291_vm1, %v1772_v62  ;;  %702 = vmatpush.bf16.msrb.mxu2 %v639_v3  ;;  %v691_v59 = vrot.slane %v689_v51, 2  ;;  %v734_v62 = vld [vmem:[%s2545_s1 + $0x8] sm:$0x1]  ;;  %v818_v29 = vrot.slane %v1890_v18, 2  ;;  %v819_v30 = vrot.slane %v817_v19, 2 }
  0x33   : > { %664 = vmatpush.bf16.msrb.mxu1 %v642_v2  ;;  %v748_v4 = vunpack.c.l.b16 %v734_v62  ;;  %v1899_v31 = vld [vmem:[%s2545_s1] sm:$0xc]  ;;  %v2085_v32 = vld [vmem:[%s2545_s1] sm:$0xf0]  ;;  %v878_v39 = vpack.c.b16 %v876_v25, %v876_v25  ;;  %v959_v43 = vpack.c.b16 %v957_v33, %v957_v33  ;;  %v2094_v49 = vld [vmem:[%s2205_s6 + $0xc4] sm:$0xf0] }
  0x34   : > { %1796 = vmatmul.msk.bf16.vlgmr.msrb.gmra.mxu3 %vm291_vm1, %v1794_v63  ;;  %650 = vmatpush.bf16.msrb.mxu0 %v639_v3  ;;  %v616_v63 = vsel %vm603_vm2, %v611_v56, %v615_v57  ;;  %v692_v0 = vsel %vm603_vm2, %v687_v58, %v691_v59  ;;  %v1905_v3 = vld [vmem:[%s2205_s6 + $0xa8] sm:$0xf0]  ;;  %v1900_v38 = vor.u32 %v2085_v32, %v1899_v31  ;;  %v1935_v48 = vld [vmem:[%s2205_s6 + $0xc0] sm:$0xf]  ;;  %v2099_v18 = vld [vmem:[%s2205_s6 + $0xe4] sm:$0xf] }
  0x35   : > { %716 = vmatpush.bf16.msrb.mxu3 %v642_v2  ;;  %v2087_v2 = vld [vmem:[%s2205_s6 + $0xa4] sm:$0xf]  ;;  %v750_v17 = vpack.c.b16 %v748_v4, %v748_v4  ;;  %v820_v41 = vsel %vm751_vm3, %v818_v29, %v819_v30  ;;  %v889_v52 = vshrl.u32 %v878_v39, 16  ;;  %v892_v53 = vshll.u32 %v878_v39, 16  ;;  %v2101_v4 = vld [vmem:[%s2205_s6 + $0xf4] sm:$0xf] }
  0x36   : > { %703 = vmatpush.bf16.msrb.mxu2 %v1840_v7  ;;  %v1908_v14 = vor.u32 %v2087_v2, %v1905_v3  ;;  %v881_v50 = vshrl.u32 %v1900_v38, 16  ;;  %v884_v51 = vshll.u32 %v1900_v38, 16  ;;  %v969_v56 = vshrl.u32 %v959_v43, 16  ;;  %v1969_v19 = vld [vmem:[%s2205_s6 + $0xe8] sm:$0xf0] }
  0x37   : > { %665 = vmatpush.bf16.msrb.mxu1 %v1844_v6  ;;  %v753_v23 = vrot.slane %v750_v17, 2  ;;  %v972_v57 = vshll.u32 %v959_v43, 16  ;;  %v1936_v59 = vor.u32 %v2094_v49, %v1935_v48  ;;  %v891_v62 = vrot.slane %v889_v52, 2  ;;  %v1021_v17 = vld [vmem:[%s2545_s1 + $0x14] sm:$0x3] }
  0x38   : > { %651 = vmatpush.bf16.msrb.mxu0 %v1840_v7  ;;  %v1903_v7 = vld [vmem:[%s2205_s6 + $0xa0] sm:$0xf]  ;;  %v883_v60 = vrot.slane %v881_v50, 2  ;;  %v971_v2 = vrot.slane %v969_v56, 2  ;;  %v2092_v29 = vld [vmem:[%s2545_s1 + $0xc] sm:$0xf0]  ;;  %v1972_v30 = vor.u32 %v2099_v18, %v1969_v19 }
  0x39   : > { %717 = vmatpush.bf16.msrb.mxu3 %v1844_v6  ;;  %v919_v6 = vsel %vm295_vm0, %v1912_v61, 0  ;;  %v1904_v15 = vor.u32 %v2088_v8, %v1903_v7  ;;  %v754_v40 = vsel %vm751_vm3, %v752_v22, %v753_v23  ;;  %v886_v61 = vrot.slane %v884_v51, 3  ;;  %v2102_v7 = vld [vmem:[%s2205_s6 + $0xf4] sm:$0x10]  ;;  %v1967_v23 = vld [vmem:[%s2205_s6 + $0xe0] sm:$0xf] }
  0x3a   : > { %v974_v3 = vrot.slane %v972_v57, 3  ;;  %v1931_v25 = vld [vmem:[%s2545_s1] sm:$0x8]  ;;  %v2007_v43 = vld [vmem:[%s2205_s6 + $0x110] sm:$0xf] }
  0x3b   : > { %v887_v8 = vor.u32 %v886_v61, %v883_v60  ;;  %v2097_v48 = vld [vmem:[%s2545_s1] sm:$0xf0]  ;;  %v1985_v50 = vld [vmem:[%s2545_s1 + $0xc] sm:$0x8]  ;;  %v2098_v51 = vld [vmem:[%s2545_s1 + $0xc] sm:$0xf0] }
  0x3c   : > { %v975_v11 = vor.u32 %v974_v3, %v971_v2  ;;  %v2105_v60 = vld [vmem:[%s2205_s6 + $0x104] sm:$0xf]  ;;  %v2001_v61 = vld [vmem:[%s2205_s6 + $0x108] sm:$0xf0] }
  0x41   : > { %1821 = vmatmul.msk.bf16.vlgmr.msra.gmra.mxu0 %vm291_vm1, %v483_v26  ;;  %1827 = vmatmul.msk.bf16.vlgmr.msra.gmra.mxu2 %vm291_vm1, %v544_v27 }
  0x42   : > { %1822 = vmatmul.msk.bf16.vlgmr.msra.gmra.mxu1 %vm291_vm1, %v483_v26  ;;  %830 = vmatpush.bf16.msra.mxu2 %v777_v35  ;;  %v1945_v26 = vld [vmem:[%s2205_s6 + $0xd8] sm:$0x10] }
  0x43   : > { %802 = vmatpush.bf16.msra.mxu1 %v780_v34  ;;  %788 = vmatpush.bf16.msra.mxu0 %v777_v35  ;;  %v2086_v35 = vld [vmem:[%s2545_s1 + $0xc] sm:$0xf0]  ;;  %v1948_v36 = vor.u32 %v2095_v24, %v1945_v26  ;;  %v2100_v24 = vld [vmem:[%s2205_s6 + $0xe4] sm:$0xf0]  ;;  %v2091_v26 = vld [vmem:[%s2545_s1] sm:$0xf0] }
  0x44   : > { %1828 = vmatmul.msk.bf16.vlgmr.msra.gmra.mxu3 %vm291_vm1, %v544_v27  ;;  %v1943_v27 = vld [vmem:[%s2205_s6 + $0xd0] sm:$0xf]  ;;  %v1968_v31 = vor.u32 %v2100_v24, %v1967_v23  ;;  %v1932_v32 = vor.u32 %v2091_v26, %v1931_v25  ;;  %v2114_v23 = vld [vmem:[%s2205_s6 + $0x134] sm:$0x10] }
  0x45   : > { %844 = vmatpush.bf16.msra.mxu3 %v780_v34  ;;  %v1921_v34 = vld [vmem:[%s2545_s1 + $0xc] sm:$0xc]  ;;  %v1944_v37 = vor.u32 %v2096_v28, %v1943_v27  ;;  %v1064_v46 = vsel %vm295_vm0, %v1948_v36, 0  ;;  %v1099_v27 = vunpack.c.l.b16 %v1021_v17  ;;  %v1146_v36 = vld [vmem:[%s2545_s1 + $0x8] sm:$0x7] }
  0x46   : > { %831 = vmatpush.bf16.msra.mxu2 %v1872_v45  ;;  %v1922_v42 = vor.u32 %v2086_v35, %v1921_v34  ;;  %v1953_v28 = vld [vmem:[%s2545_s1 + $0xc] sm:$0x8]  ;;  %v1036_v38 = vrot.slane %v1932_v32, 3 }
  0x47   : > { %789 = vmatpush.bf16.msra.mxu0 %v1872_v45  ;;  %803 = vmatpush.bf16.msra.mxu1 %v1876_v44  ;;  %v1937_v45 = vld [vmem:[%s2205_s6 + $0xc8] sm:$0xf0]  ;;  %v1061_v47 = vsel %vm295_vm0, %v1944_v37, 0  ;;  %v1954_v34 = vor.u32 %v2092_v29, %v1953_v28  ;;  %v1101_v35 = vpack.c.b16 %v1099_v27, %v1099_v27  ;;  %v1149_v37 = vld [vmem:[%s2545_s1 + $0x14] sm:$0x7] }
  0x48   : > { %v961_v54 = vshrl.u32 %v1922_v42, 16  ;;  %v964_v55 = vshll.u32 %v1922_v42, 16  ;;  %v2009_v42 = vld [vmem:[%s2205_s6 + $0x118] sm:$0x10]  ;;  %v1241_v49 = vunpack.c.l.b16 %v1149_v37  ;;  %v2112_v37 = vld [vmem:[%s2205_s6 + $0x124] sm:$0xf0] }
  0x49   : > { %845 = vmatpush.bf16.msra.mxu3 %v1876_v44  ;;  %v2093_v44 = vld [vmem:[%s2205_s6 + $0xc4] sm:$0xf] }
  0x4a   : > { %v1940_v58 = vor.u32 %v2093_v44, %v1937_v45  ;;  %v966_v1 = vrot.slane %v964_v55, 3  ;;  %v2108_v44 = vld [vmem:[%s2205_s6 + $0x114] sm:$0x10]  ;;  %v1102_v45 = vrot.slane %v1954_v34, 3  ;;  %v2111_v34 = vld [vmem:[%s2205_s6 + $0x124] sm:$0xf] }
  0x51   : > { %1853 = vmatmul.msk.bf16.vlgmr.msrb.gmra.mxu0 %vm291_vm1, %v616_v63  ;;  %1859 = vmatmul.msk.bf16.vlgmr.msrb.gmra.mxu2 %vm291_vm1, %v692_v0 }
  0x52   : > { %1854 = vmatmul.msk.bf16.vlgmr.msrb.gmra.mxu1 %vm291_vm1, %v616_v63  ;;  %986 = vmatpush.bf16.msrb.mxu2 %v919_v6  ;;  %v894_v63 = vrot.slane %v892_v53, 3  ;;  %v2008_v53 = vor.u32 %v2108_v44, %v2007_v43  ;;  %v2104_v43 = vld [vmem:[%s2545_s1 + $0x10] sm:$0x70] }
  0x53   : > { %944 = vmatpush.bf16.msrb.mxu1 %v922_v5  ;;  %930 = vmatpush.bf16.msrb.mxu0 %v919_v6  ;;  %v1975_v6 = vld [vmem:[%s2205_s6 + $0xf0] sm:$0xf] }
  0x54   : > { %1860 = vmatmul.msk.bf16.vlgmr.msrb.gmra.mxu3 %vm291_vm1, %v692_v0  ;;  %v963_v0 = vrot.slane %v961_v54, 2  ;;  %v895_v9 = vor.u32 %v894_v63, %v891_v62  ;;  %v1976_v13 = vor.u32 %v2102_v7, %v1975_v6  ;;  %v1336_v63 = vsel %vm295_vm0, %v2008_v53, 0 }
  0x55   : > { %1000 = vmatpush.bf16.msrb.mxu3 %v922_v5  ;;  %v1977_v5 = vld [vmem:[%s2205_s6 + $0xf8] sm:$0x10] }
  0x56   : > { %987 = vmatpush.bf16.msrb.mxu2 %v1904_v15  ;;  %v967_v10 = vor.u32 %v966_v1, %v963_v0  ;;  %v1980_v12 = vor.u32 %v2101_v4, %v1977_v5  ;;  %v1203_v22 = vsel %vm295_vm0, %v1976_v13, 0  ;;  %v1999_v0 = vld [vmem:[%s2205_s6 + $0x100] sm:$0xf]  ;;  %v2106_v1 = vld [vmem:[%s2205_s6 + $0x104] sm:$0xf0] }
  0x57   : > { %931 = vmatpush.bf16.msrb.mxu0 %v1904_v15  ;;  %945 = vmatpush.bf16.msrb.mxu1 %v1908_v14  ;;  %v896_v15 = vsel %vm879_vm4, %v887_v8, %v895_v9 }
  0x58   : > { %v976_v16 = vsel %vm879_vm4, %v967_v10, %v975_v11  ;;  %v1206_v21 = vsel %vm295_vm0, %v1980_v12, 0  ;;  %v2004_v10 = vor.u32 %v2105_v60, %v2001_v61  ;;  %v2000_v11 = vor.u32 %v2106_v1, %v1999_v0 }
  0x59   : > { %1001 = vmatpush.bf16.msrb.mxu3 %v1908_v14  ;;  %v1018_v14 = vld [vmem:[%s2545_s1 + $0x8] sm:$0x3] }
  0x5a   : > { %v1032_v20 = vunpack.c.l.b16 %v1018_v14 }
  0x5c   : > { %v1034_v33 = vpack.c.b16 %v1032_v20, %v1032_v20  ;;  %v2113_v20 = vld [vmem:[%s2205_s6 + $0x134] sm:$0xf] }
  0x5e   : > { %v1037_v39 = vrot.slane %v1034_v33, 3 }
  0x60   : > { %v1038_v56 = vsel %vm295_vm0, %v1036_v38, %v1037_v39 }
  0x61   : > { %1885 = vmatmul.msk.bf16.vlgmr.msra.gmra.mxu0 %vm291_vm1, %v754_v40  ;;  %1891 = vmatmul.msk.bf16.vlgmr.msra.gmra.mxu2 %vm291_vm1, %v820_v41 }
  0x62   : > { %1886 = vmatmul.msk.bf16.vlgmr.msra.gmra.mxu1 %vm291_vm1, %v754_v40  ;;  %1114 = vmatpush.bf16.msra.mxu2 %v1061_v47  ;;  %v2107_v40 = vld [vmem:[%s2205_s6 + $0x114] sm:$0xf] }
  0x63   : > { %1086 = vmatpush.bf16.msra.mxu1 %v1064_v46  ;;  %1072 = vmatpush.bf16.msra.mxu0 %v1061_v47  ;;  %v1963_v47 = vld [vmem:[%s2545_s1] sm:$0x8]  ;;  %v2012_v52 = vor.u32 %v2107_v40, %v2009_v42  ;;  %v1995_v40 = vld [vmem:[%s2545_s1 + $0x4] sm:$0xf]  ;;  %v2017_v42 = vld [vmem:[%s2545_s1 + $0x10] sm:$0xf] }
  0x64   : > { %1892 = vmatmul.msk.bf16.vlgmr.msra.gmra.mxu3 %vm291_vm1, %v820_v41  ;;  %v1160_v41 = vunpack.c.l.b16 %v1146_v36  ;;  %v1964_v54 = vor.u32 %v2097_v48, %v1963_v47  ;;  %v2031_v36 = vld [vmem:[%s2205_s6 + $0x120] sm:$0xf]  ;;  %v2109_v48 = vld [vmem:[%s2545_s1 + $0x4] sm:$0xff] }
  0x65   : > { %1128 = vmatpush.bf16.msra.mxu3 %v1064_v46  ;;  %v1103_v46 = vrot.slane %v1101_v35, 3  ;;  %v1339_v62 = vsel %vm295_vm0, %v2012_v52, 0  ;;  %v2033_v35 = vld [vmem:[%s2205_s6 + $0x128] sm:$0xf0]  ;;  %v2032_v39 = vor.u32 %v2112_v37, %v2031_v36  ;;  %v1430_v52 = vshll.u32 %v2109_v48, 16 }
  0x66   : > { %1115 = vmatpush.bf16.msra.mxu2 %v1936_v59  ;;  %v1162_v55 = vpack.c.b16 %v1160_v41, %v1160_v41  ;;  %v1165_v2 = vshrl.u32 %v1964_v54, 16  ;;  %v1168_v3 = vshll.u32 %v1964_v54, 16  ;;  %v2036_v38 = vor.u32 %v2111_v34, %v2033_v35  ;;  %v2103_v41 = vld [vmem:[%s2545_s1 + $0x4] sm:$0x70] }
  0x67   : > { %1073 = vmatpush.bf16.msra.mxu0 %v1936_v59  ;;  %1087 = vmatpush.bf16.msra.mxu1 %v1940_v58  ;;  %v1104_v57 = vsel %vm295_vm0, %v1102_v45, %v1103_v46  ;;  %v1243_v59 = vpack.c.b16 %v1241_v49, %v1241_v49  ;;  %v1996_v44 = vor.u32 %v2103_v41, %v1995_v40  ;;  %v2110_v49 = vld [vmem:[%s2545_s1 + $0x10] sm:$0xff] }
  0x68   : > { %v1173_v4 = vshrl.u32 %v1162_v55, 16  ;;  %v1176_v5 = vshll.u32 %v1162_v55, 16  ;;  %v1167_v12 = vrot.slane %v1165_v2, 3  ;;  %v1170_v13 = vrot.slane %v1168_v3, 4 }
  0x69   : > { %1129 = vmatpush.bf16.msra.mxu3 %v1940_v58  ;;  %v1986_v58 = vor.u32 %v2098_v51, %v1985_v50  ;;  %v1253_v8 = vshrl.u32 %v1243_v59, 16  ;;  %v1256_v9 = vshll.u32 %v1243_v59, 16  ;;  %v2018_v45 = vor.u32 %v2104_v43, %v2017_v42 }
  0x6a   : > { %v1175_v14 = vrot.slane %v1173_v4, 3  ;;  %v1171_v24 = vor.u32 %v1170_v13, %v1167_v12  ;;  %v1497_v53 = vshll.u32 %v2110_v49, 16 }
  0x6b   : > { %v1245_v6 = vshrl.u32 %v1986_v58, 16  ;;  %v1248_v7 = vshll.u32 %v1986_v58, 16  ;;  %v1255_v18 = vrot.slane %v1253_v8, 3  ;;  %v1258_v19 = vrot.slane %v1256_v9, 4 }
  0x6c   : > { %v1495_v58 = vshrl.u32 %v2110_v49, 16  ;;  %v1499_v59 = vrot.slane %v1497_v53, 1 }
  0x6d   : > { %v1250_v17 = vrot.slane %v1248_v7, 4  ;;  %v1259_v27 = vor.u32 %v1258_v19, %v1255_v18 }
  0x71   : > { %1917 = vmatmul.msk.bf16.vlgmr.msrb.gmra.mxu0 %vm291_vm1, %v896_v15  ;;  %1923 = vmatmul.msk.bf16.vlgmr.msrb.gmra.mxu2 %vm291_vm1, %v976_v16 }
  0x72   : > { %1918 = vmatmul.msk.bf16.vlgmr.msrb.gmra.mxu1 %vm291_vm1, %v896_v15  ;;  %1270 = vmatpush.bf16.msrb.mxu2 %v1203_v22  ;;  %v1178_v15 = vrot.slane %v1176_v5, 4 }
  0x73   : > { %1228 = vmatpush.bf16.msrb.mxu1 %v1206_v21  ;;  %1214 = vmatpush.bf16.msrb.mxu0 %v1203_v22  ;;  %v2039_v22 = vld [vmem:[%s2205_s6 + $0x130] sm:$0xf] }
  0x74   : > { %1924 = vmatmul.msk.bf16.vlgmr.msrb.gmra.mxu3 %vm291_vm1, %v976_v16  ;;  %v1247_v16 = vrot.slane %v1245_v6, 3  ;;  %v1179_v25 = vor.u32 %v1178_v15, %v1175_v14  ;;  %v2040_v29 = vor.u32 %v2114_v23, %v2039_v22 }
  0x75   : > { %1284 = vmatpush.bf16.msrb.mxu3 %v1206_v21  ;;  %v2041_v21 = vld [vmem:[%s2205_s6 + $0x138] sm:$0x10] }
  0x76   : > { %1271 = vmatpush.bf16.msrb.mxu2 %v1968_v31  ;;  %v1251_v26 = vor.u32 %v1250_v17, %v1247_v16  ;;  %v2044_v28 = vor.u32 %v2113_v20, %v2041_v21  ;;  %v1456_v33 = vsel %vm295_vm0, %v2040_v29, 0 }
  0x77   : > { %1215 = vmatpush.bf16.msrb.mxu0 %v1968_v31  ;;  %1229 = vmatpush.bf16.msrb.mxu1 %v1972_v30 }
  0x78   : > { %v1260_v31 = vsel %vm1163_vm5, %v1251_v26, %v1259_v27  ;;  %v1459_v32 = vsel %vm295_vm0, %v2044_v28, 0 }
  0x79   : > { %1285 = vmatpush.bf16.msrb.mxu3 %v1972_v30  ;;  %v1180_v30 = vsel %vm1163_vm5, %v1171_v24, %v1179_v25 }
  0x81   : > { %1949 = vmatmul.msk.bf16.vlgmr.msra.gmra.mxu0 %vm291_vm1, %v1038_v56  ;;  %1955 = vmatmul.msk.bf16.vlgmr.msra.gmra.mxu2 %vm291_vm1, %v1104_v57 }
  0x82   : > { %1950 = vmatmul.msk.bf16.vlgmr.msra.gmra.mxu1 %vm291_vm1, %v1038_v56  ;;  %1383 = vmatpush.bf16.msra.mxu2 %v1336_v63  ;;  %v1428_v56 = vshrl.u32 %v2109_v48, 16 }
  0x83   : > { %1361 = vmatpush.bf16.msra.mxu1 %v1339_v62  ;;  %1347 = vmatpush.bf16.msra.mxu0 %v1336_v63  ;;  %v1500_v63 = vor.u32 %v1499_v59, %v1495_v58 }
  0x84   : > { %1956 = vmatmul.msk.bf16.vlgmr.msra.gmra.mxu3 %vm291_vm1, %v1104_v57  ;;  %v1432_v57 = vrot.slane %v1430_v52, 1 }
  0x85   : > { %1397 = vmatpush.bf16.msra.mxu3 %v1339_v62 }
  0x86   : > { %1384 = vmatpush.bf16.msra.mxu2 %v2000_v11  ;;  %v1433_v62 = vor.u32 %v1432_v57, %v1428_v56 }
  0x87   : > { %1348 = vmatpush.bf16.msra.mxu0 %v2000_v11  ;;  %1362 = vmatpush.bf16.msra.mxu1 %v2004_v10 }
  0x89   : > { %1398 = vmatpush.bf16.msra.mxu3 %v2004_v10 }
  0x91   : > { %1981 = vmatmul.msk.bf16.vlgmr.msrb.gmra.mxu0 %vm291_vm1, %v1180_v30  ;;  %1987 = vmatmul.msk.bf16.vlgmr.msrb.gmra.mxu2 %vm291_vm1, %v1260_v31 }
  0x92   : > { %1982 = vmatmul.msk.bf16.vlgmr.msrb.gmra.mxu1 %vm291_vm1, %v1180_v30  ;;  %1510 = vmatpush.bf16.msrb.mxu2 %v1456_v33 }
  0x93   : > { %1481 = vmatpush.bf16.msrb.mxu1 %v1459_v32  ;;  %1467 = vmatpush.bf16.msrb.mxu0 %v1456_v33 }
  0x94   : > { %1988 = vmatmul.msk.bf16.vlgmr.msrb.gmra.mxu3 %vm291_vm1, %v1260_v31 }
  0x95   : > { %1524 = vmatpush.bf16.msrb.mxu3 %v1459_v32 }
  0x96   : > { %1511 = vmatpush.bf16.msrb.mxu2 %v2032_v39 }
  0x97   : > { %1468 = vmatpush.bf16.msrb.mxu0 %v2032_v39  ;;  %1482 = vmatpush.bf16.msrb.mxu1 %v2036_v38 }
  0x99   : > { %1525 = vmatpush.bf16.msrb.mxu3 %v2036_v38 }
  0x9e   : > { %v311_v46 = vpop.f32.mrf.mxu0 }
  0x9f   : > { %v325_v47 = vpop.f32.mrf.mxu1 }
  0xa1   : > { %2013 = vmatmul.msk.bf16.vlgmr.msra.gmra.mxu0 %vm291_vm1, %v1996_v44  ;;  %2019 = vmatmul.msk.bf16.vlgmr.msra.gmra.mxu2 %vm291_vm1, %v2018_v45 }
  0xa2   : > { %2014 = vmatmul.msk.bf16.vlgmr.msra.gmra.mxu1 %vm291_vm1, %v1996_v44 }
  0xa4   : > { %2020 = vmatmul.msk.bf16.vlgmr.msra.gmra.mxu3 %vm291_vm1, %v2018_v45  ;;  %v354_v50 = vpop.f32.mrf.mxu2 }
  0xa6   : > { %v313_v54 = vpop.f32.mrf.mxu0 }
  0xa7   : > { %v368_v51 = vpop.f32.mrf.mxu3  ;;  %v327_v55 = vpop.f32.mrf.mxu1 }
  0xac   : > { %v356_v60 = vpop.f32.mrf.mxu2 }
  0xae   : > { %v414_v0 = vpop.f32.mrf.mxu0 }
  0xaf   : > { %v370_v61 = vpop.f32.mrf.mxu3  ;;  %v415_v1 = vadd.f32 %v414_v0, %v311_v46  ;;  %v428_v2 = vpop.f32.mrf.mxu1 }
  0xb0   : > { %v429_v3 = vadd.f32 %v428_v2, %v325_v47 }
  0xb1   : > { %2045 = vmatmul.msk.bf16.vlgmr.msrb.gmra.mxu0 %vm291_vm1, %v1433_v62  ;;  %2051 = vmatmul.msk.bf16.vlgmr.msrb.gmra.mxu2 %vm291_vm1, %v1500_v63 }
  0xb2   : > { %2046 = vmatmul.msk.bf16.vlgmr.msrb.gmra.mxu1 %vm291_vm1, %v1433_v62 }
  0xb4   : > { %2052 = vmatmul.msk.bf16.vlgmr.msrb.gmra.mxu3 %vm291_vm1, %v1500_v63  ;;  %v450_v4 = vpop.f32.mrf.mxu2 }
  0xb5   : > { %v451_v5 = vadd.f32 %v450_v4, %v354_v50 }
  0xb6   : > { %v416_v8 = vpop.f32.mrf.mxu0 }
  0xb7   : > { %v464_v6 = vpop.f32.mrf.mxu3  ;;  %v417_v9 = vadd.f32 %v416_v8, %v313_v54  ;;  %v430_v10 = vpop.f32.mrf.mxu1 }
  0xb8   : > { %v465_v7 = vadd.f32 %v464_v6, %v368_v51  ;;  %v431_v11 = vadd.f32 %v430_v10, %v327_v55 }
  0xbc   : > { %v452_v12 = vpop.f32.mrf.mxu2 }
  0xbd   : > { %v453_v13 = vadd.f32 %v452_v12, %v356_v60 }
  0xbe   : > { %v520_v16 = vpop.f32.mrf.mxu0 }
  0xbf   : > { %v466_v14 = vpop.f32.mrf.mxu3  ;;  %v576_v17 = vadd.f32 %v520_v16, %v415_v1  ;;  %v534_v18 = vpop.f32.mrf.mxu1 }
  0xc0   : > { %v467_v15 = vadd.f32 %v466_v14, %v370_v61  ;;  %v577_v19 = vadd.f32 %v534_v18, %v429_v3 }
  0xc4   : > { %v557_v20 = vpop.f32.mrf.mxu2 }
  0xc5   : > { %v580_v21 = vadd.f32 %v557_v20, %v451_v5 }
  0xc6   : > { %v522_v24 = vpop.f32.mrf.mxu0 }
  0xc7   : > { %v571_v22 = vpop.f32.mrf.mxu3  ;;  %v578_v25 = vadd.f32 %v522_v24, %v417_v9  ;;  %v536_v26 = vpop.f32.mrf.mxu1 }
  0xc8   : > { %v581_v23 = vadd.f32 %v571_v22, %v465_v7  ;;  %v579_v27 = vadd.f32 %v536_v26, %v431_v11 }
  0xcc   : > { %v559_v28 = vpop.f32.mrf.mxu2 }
  0xcd   : > { %v582_v29 = vadd.f32 %v559_v28, %v453_v13 }
  0xce   : > { %v653_v32 = vpop.f32.mrf.mxu0 }
  0xcf   : > { %v573_v30 = vpop.f32.mrf.mxu3  ;;  %v724_v33 = vadd.f32 %v653_v32, %v576_v17  ;;  %v667_v34 = vpop.f32.mrf.mxu1 }
  0xd0   : > { %v583_v31 = vadd.f32 %v573_v30, %v467_v15  ;;  %v725_v35 = vadd.f32 %v667_v34, %v577_v19 }
  0xd4   : > { %v705_v36 = vpop.f32.mrf.mxu2 }
  0xd5   : > { %v728_v37 = vadd.f32 %v705_v36, %v580_v21 }
  0xd6   : > { %v655_v40 = vpop.f32.mrf.mxu0 }
  0xd7   : > { %v719_v38 = vpop.f32.mrf.mxu3  ;;  %v726_v41 = vadd.f32 %v655_v40, %v578_v25  ;;  %v669_v42 = vpop.f32.mrf.mxu1  ;;  %v1540_v40 = vld [vmem:[%s231_s9] sm:$0x3] }
  0xd8   : > { %v729_v39 = vadd.f32 %v719_v38, %v581_v23  ;;  %v727_v43 = vadd.f32 %v669_v42, %v579_v27 }
  0xdc   : > { %v707_v44 = vpop.f32.mrf.mxu2 }
  0xdd   : > { %v730_v45 = vadd.f32 %v707_v44, %v582_v29 }
  0xde   : > { %v791_v48 = vpop.f32.mrf.mxu0 }
  0xdf   : > { %v721_v46 = vpop.f32.mrf.mxu3  ;;  %v852_v49 = vadd.f32 %v791_v48, %v724_v33  ;;  %v805_v50 = vpop.f32.mrf.mxu1 }
  0xe0   : > { %v731_v47 = vadd.f32 %v721_v46, %v583_v31  ;;  %v853_v51 = vadd.f32 %v805_v50, %v725_v35 }
  0xe4   : > { %v833_v52 = vpop.f32.mrf.mxu2 }
  0xe5   : > { %v856_v53 = vadd.f32 %v833_v52, %v728_v37  ;;  %v1554_v52 = vld [vmem:[%s235_s12] sm:$0x3] }
  0xe6   : > { %v793_v56 = vpop.f32.mrf.mxu0 }
  0xe7   : > { %v847_v54 = vpop.f32.mrf.mxu3  ;;  %v854_v57 = vadd.f32 %v793_v56, %v726_v41  ;;  %v807_v58 = vpop.f32.mrf.mxu1 }
  0xe8   : > { %v857_v55 = vadd.f32 %v847_v54, %v729_v39  ;;  %v855_v59 = vadd.f32 %v807_v58, %v727_v43  ;;  %v1543_v54 = vperm.slane %v1540_v40, 1  ;;  %v1576_v58 = vlaneseq }
  0xec   : > { %v835_v60 = vpop.f32.mrf.mxu2 }
  0xed   : > { %v2483_v61 = vadd.f32 %v835_v60, %v730_v45 }
  0xee   : > { %v933_v0 = vpop.f32.mrf.mxu0 }
  0xef   : > { %v849_v62 = vpop.f32.mrf.mxu3  ;;  %v1008_v1 = vadd.f32 %v933_v0, %v852_v49  ;;  %v947_v2 = vpop.f32.mrf.mxu1  ;;  %v1542_v49 = vperm.slane %v1540_v40, 0 }
  0xf0   : > { %v2485_v63 = vadd.f32 %v849_v62, %v731_v47  ;;  %v1009_v3 = vadd.f32 %v947_v2, %v853_v51  ;;  %v1556_v2 = vperm.slane %v1554_v52, 0 }
  0xf4   : > { %v989_v4 = vpop.f32.mrf.mxu2 }
  0xf5   : > { %v1012_v5 = vadd.f32 %v989_v4, %v856_v53 }
  0xf6   : > { %v935_v8 = vpop.f32.mrf.mxu0 }
  0xf7   : > { %v1003_v6 = vpop.f32.mrf.mxu3  ;;  %v949_v9 = vpop.f32.mrf.mxu1  ;;  %v1010_v43 = vadd.f32 %v935_v8, %v854_v57 }
  0xf8   : > { %v1013_v7 = vadd.f32 %v1003_v6, %v857_v55  ;;  %v1011_v46 = vadd.f32 %v949_v9, %v855_v59 }
  0xfc   : > { %v991_v10 = vpop.f32.mrf.mxu2 }
  0xfd   : > { %v1014_v60 = vadd.f32 %v991_v10, %v2483_v61 }
  0xfe   : > { %v1075_v12 = vpop.f32.mrf.mxu0 }
  0xff   : > { %v2487_v11 = vpop.f32.mrf.mxu3  ;;  %v1089_v13 = vpop.f32.mrf.mxu1  ;;  %v1136_v34 = vadd.f32 %v1075_v12, %v1008_v1 }
 0x100   : > { %v1137_v35 = vadd.f32 %v1089_v13, %v1009_v3  ;;  %v1015_v9 = vadd.f32 %v2487_v11, %v2485_v63  ;;  %v1577_v13 = vshrl.u32 %v1576_v58, 7  ;;  %v1579_v63 = vstv %s2501_s25 }
 0x102   : > { %vm2513_vm7 = vcmp.lt.s32.totalorder %v1577_v13, %v1579_v63 }
 0x104   : > { %v1117_v14 = vpop.f32.mrf.mxu2 }
 0x105   : > { %v1140_v47 = vadd.f32 %v1117_v14, %v1012_v5 }
 0x106   : > { %v1077_v16 = vpop.f32.mrf.mxu0 }
 0x107   : > { %v1131_v15 = vpop.f32.mrf.mxu3  ;;  %v1091_v17 = vpop.f32.mrf.mxu1  ;;  %v1138_v51 = vadd.f32 %v1077_v16, %v1010_v43 }
 0x108   : > { %v1141_v50 = vadd.f32 %v1131_v15, %v1013_v7  ;;  %v1139_v55 = vadd.f32 %v1091_v17, %v1011_v46  ;;  %v1557_v7 = vperm.slane %v1554_v52, 1 }
 0x10c   : > { %v1119_v18 = vpop.f32.mrf.mxu2 }
 0x10d   : > { %v1142_v10 = vadd.f32 %v1119_v18, %v1014_v60 }
 0x10e   : > { %v1217_v20 = vpop.f32.mrf.mxu0 }
 0x10f   : > { %v2489_v19 = vpop.f32.mrf.mxu3  ;;  %v1231_v21 = vpop.f32.mrf.mxu1  ;;  %v1292_v36 = vadd.f32 %v1217_v20, %v1136_v34 }
 0x110   : > { %v1293_v38 = vadd.f32 %v1231_v21, %v1137_v35  ;;  %v1143_v20 = vadd.f32 %v2489_v19, %v1015_v9 }
 0x114   : > { %v1273_v22 = vpop.f32.mrf.mxu2 }
 0x115   : > { %v1296_v56 = vadd.f32 %v1273_v22, %v1140_v47  ;;  %v1578_v22 = vadd.s32 8, %v1577_v13 }
 0x116   : > { %v1219_v24 = vpop.f32.mrf.mxu0 }
 0x117   : > { %v1287_v23 = vpop.f32.mrf.mxu3  ;;  %v1233_v25 = vpop.f32.mrf.mxu1  ;;  %v1294_v57 = vadd.f32 %v1219_v24, %v1138_v51  ;;  %vm2509_vm6 = vcmp.lt.s32.totalorder %v1578_v22, %v1579_v63 }
 0x118   : > { %v1297_v62 = vadd.f32 %v1287_v23, %v1141_v50  ;;  %v1295_v0 = vadd.f32 %v1233_v25, %v1139_v55 }
 0x11c   : > { %v1275_v26 = vpop.f32.mrf.mxu2 }
 0x11d   : > { %v1298_v24 = vadd.f32 %v1275_v26, %v1142_v10 }
 0x11e   : > { %v1350_v28 = vpop.f32.mrf.mxu0 }
 0x11f   : > { %v2491_v27 = vpop.f32.mrf.mxu3  ;;  %v1364_v29 = vpop.f32.mrf.mxu1  ;;  %v1405_v41 = vadd.f32 %v1350_v28, %v1292_v36 }
 0x120   : > { %v1406_v44 = vadd.f32 %v1364_v29, %v1293_v38  ;;  %v1299_v29 = vadd.f32 %v2491_v27, %v1143_v20 }
 0x124   : > { %v1386_v30 = vpop.f32.mrf.mxu2 }
 0x125   : > { %v1409_v1 = vadd.f32 %v1386_v30, %v1296_v56 }
 0x126   : > { %v1352_v32 = vpop.f32.mrf.mxu0 }
 0x127   : > { %v1400_v31 = vpop.f32.mrf.mxu3  ;;  %v1366_v33 = vpop.f32.mrf.mxu1  ;;  %v1407_v5 = vadd.f32 %v1352_v32, %v1294_v57 }
 0x128   : > { %v1410_v4 = vadd.f32 %v1400_v31, %v1297_v62  ;;  %v1408_v12 = vadd.f32 %v1366_v33, %v1295_v0 }
 0x12c   : > { %v1388_v37 = vpop.f32.mrf.mxu2 }
 0x12d   : > { %v1411_v31 = vadd.f32 %v1388_v37, %v1298_v24 }
 0x12e   : > { %v1470_v42 = vpop.f32.mrf.mxu0 }
 0x12f   : > { %v1402_v39 = vpop.f32.mrf.mxu3  ;;  %v1484_v45 = vpop.f32.mrf.mxu1  ;;  %v1532_v48 = vadd.f32 %v1470_v42, %v1405_v41 }
 0x130   : > { %v1533_v53 = vadd.f32 %v1484_v45, %v1406_v44  ;;  %v1412_v18 = vadd.f32 %v1402_v39, %v1299_v29 }
 0x131   : > { %v1546_v59 = vmul.f32 %v1542_v49, %v1532_v48 }
 0x132   : > { %v1547_v6 = vmul.f32 %v1543_v54, %v1533_v53 }
 0x133   : > { %v1560_v21 = vadd.f32 %v1556_v2, %v1546_v59 }
 0x134   : > { %v1513_v3 = vpop.f32.mrf.mxu2  ;;  %v1561_v25 = vadd.f32 %v1557_v7, %v1547_v6 }
 0x135   : > { %v1536_v14 = vadd.f32 %v1513_v3, %v1409_v1  ;;  %v1568_v34 = vmax.f32 %v1560_v21, 0.0 }
 0x136   : > { %v1472_v61 = vpop.f32.mrf.mxu0  ;;  %v1569_v38 = vmax.f32 %v1561_v25, 0.0 }
 0x137   : > { %v1527_v8 = vpop.f32.mrf.mxu3  ;;  %v1534_v16 = vadd.f32 %v1472_v61, %v1407_v5  ;;  %v1486_v17 = vpop.f32.mrf.mxu1  ;;  %v1550_v11 = vmul.f32 %v1542_v49, %v1536_v14  ;;  %v1582_v46 = vsel %vm2513_vm7, %v1568_v34, 0.0 }
 0x138   : > { %v1537_v15 = vadd.f32 %v1527_v8, %v1410_v4  ;;  %v1535_v23 = vadd.f32 %v1486_v17, %v1408_v12  ;;  %v1583_v51 = vsel %vm2513_vm7, %v1569_v38, 0.0 }
 0x139   : > { %v1548_v28 = vmul.f32 %v1542_v49, %v1534_v16  ;;  %v1564_v42 = vadd.f32 %v1556_v2, %v1550_v11 }
 0x13a   : > { %v1549_v30 = vmul.f32 %v1543_v54, %v1535_v23  ;;  %v1551_v32 = vmul.f32 %v1543_v54, %v1537_v15 }
 0x13b   : > { %v1562_v33 = vadd.f32 %v1556_v2, %v1548_v28  ;;  %v1572_v56 = vmax.f32 %v1564_v42, 0.0 }
 0x13c   : > { %v1563_v19 = vadd.f32 %v1557_v7, %v1549_v30  ;;  %v1515_v36 = vpop.f32.mrf.mxu2  ;;  %v1565_v44 = vadd.f32 %v1557_v7, %v1551_v32 }
 0x13d   : > { %v1570_v27 = vmax.f32 %v1562_v33, 0.0  ;;  %v1538_v40 = vadd.f32 %v1515_v36, %v1411_v31 }
 0x13e   : > { %v1571_v37 = vmax.f32 %v1563_v19, 0.0 }
 0x13f   : > { %v1529_v41 = vpop.f32.mrf.mxu3  ;;  %v1584_v39 = vsel %vm2509_vm6, %v1570_v27, 0.0  ;;  %v1552_v45 = vmul.f32 %v1542_v49, %v1538_v40  ;;  %v1573_v49 = vmax.f32 %v1565_v44, 0.0 }
 0x140   : > { %v1539_v43 = vadd.f32 %v1529_v41, %v1412_v18  ;;  %v1591_v47 = vsel %vm751_vm3, %v1584_v39, -inf  ;;  %v1585_v48 = vsel %vm2509_vm6, %v1571_v37, 0.0 }
 0x141   : > { %v1592_v52 = vmax.f32 %v1582_v46, %v1591_v47  ;;  %v1599_v53 = vsel %vm751_vm3, %v1585_v48, -inf  ;;  %v1566_v55 = vadd.f32 %v1556_v2, %v1552_v45  ;;  %v1587_v6 = vsel %vm2513_vm7, %v1573_v49, 0.0 }
 0x142   : > { %v1553_v50 = vmul.f32 %v1543_v54, %v1539_v43  ;;  %v1600_v58 = vmax.f32 %v1583_v51, %v1599_v53  ;;  %v1586_v54 = vsel %vm2513_vm7, %v1572_v56, 0.0 }
 0x143   : > { %v1593_v62 = vrot.slane %v1592_v52, 4  ;;  %v1574_v57 = vmax.f32 %v1566_v55, 0.0 }
 0x144   : > { %v1567_v60 = vadd.f32 %v1557_v7, %v1553_v50  ;;  %v1601_v0 = vrot.slane %v1600_v58, 4 }
 0x145   : > { %v1594_v59 = vmax.f32 %v1592_v52, %v1593_v62  ;;  %v1588_v3 = vsel %vm2509_vm6, %v1574_v57, 0.0 }
 0x146   : > { %v1575_v1 = vmax.f32 %v1567_v60, 0.0  ;;  %v1602_v4 = vmax.f32 %v1600_v58, %v1601_v0  ;;  %v1607_v5 = vsel %vm751_vm3, %v1588_v3, -inf }
 0x147   : > { %v1595_v7 = vrot.slane %v1594_v59, 2  ;;  %v1608_v8 = vmax.f32 %v1586_v54, %v1607_v5 }
 0x148   : > { %v1589_v2 = vsel %vm2509_vm6, %v1575_v1, 0.0  ;;  %v1603_v12 = vrot.slane %v1602_v4, 2 }
 0x149   : > { %v1615_v9 = vsel %vm751_vm3, %v1589_v2, -inf  ;;  %v1596_v14 = vmax.f32 %v1594_v59, %v1595_v7  ;;  %v1609_v61 = vrot.slane %v1608_v8, 4 }
 0x14a   : > { %v1616_v13 = vmax.f32 %v1587_v6, %v1615_v9  ;;  %v1604_v10 = vmax.f32 %v1602_v4, %v1603_v12 }
 0x14b   : > { %v1610_v16 = vmax.f32 %v1608_v8, %v1609_v61  ;;  %v1597_v17 = vrot.slane %v1596_v14, 1 }
 0x14c   : > { %v1617_v15 = vrot.slane %v1616_v13, 4  ;;  %v1605_v20 = vrot.slane %v1604_v10, 1 }
 0x14d   : > { %v1611_v22 = vrot.slane %v1610_v16, 2  ;;  %v1598_v28 = vmax.f32 %v1596_v14, %v1597_v17 }
 0x14e   : > { %v1618_v21 = vmax.f32 %v1616_v13, %v1617_v15  ;;  %v1606_v23 = vmax.f32 %v1604_v10, %v1605_v20 }
 0x14f   : > { %v1612_v25 = vmax.f32 %v1610_v16, %v1611_v22 }
 0x150   : > { %v1619_v24 = vrot.slane %v1618_v21, 2  ;;  %v1627_v29 = vrot.slane %v1606_v23, 6 }
 0x151   : > { %v1613_v30 = vrot.slane %v1612_v25, 1 }
 0x152   : > { %v1620_v63 = vmax.f32 %v1618_v21, %v1619_v24  ;;  %v1630_v11 = vsel %vm1629_vm8, %v1598_v28, %v1627_v29 }
 0x153   : > { %v1614_v33 = vmax.f32 %v1612_v25, %v1613_v30 }
 0x154   : > { %v1621_v31 = vrot.slane %v1620_v63, 1 }
 0x156   : > { %v1622_v32 = vmax.f32 %v1620_v63, %v1621_v31 }
 0x158   : > { %v1628_v18 = vrot.slane %v1622_v32, 6 }
 0x15a   : > { %v1631_v34 = vsel %vm1629_vm8, %v1614_v33, %v1628_v18 }
 0x15b   : > { %v1636_v35 = vrot.slane %v1631_v34, 7 }
 0x15d   : > { %v1638_v19 = vsel %vm1637_vm9, %v1636_v35, %v1630_v11 }
 0x15e   : > { %v1640_v36 = vsel %vm1639_vm10, %v1636_v35, %v1638_v19 }
 0x15f   : > { %v1642_v26 = vsel %vm1641_vm11, %v1636_v35, %v1640_v36 }
 0x160   : > { %v1644_v38 = vsel %vm1643_vm12, %v1636_v35, %v1642_v26 }
 0x161   : > { %1646 = vst [vmem:[%s240_s16] sm:$0xf] %v1644_v38 }
 0x162 PF: > { %s23_s22 = sadd.s32 1, %s2145_s22  }
 0x163   : > { %p20_p5 = scmp.ge.s32.totalorder %s23_s22, 10  }
 0x165   :  { %22 = sbr.rel (!%p20_p5) target bundleno = 7 (0x7), region = 81 }

// kernel: novel_det_forward.3
= control target key start
LH: loop header
LB: loop body
LE: loop exit
PB: predicated region body
PF: predicated region fallthrough
CT: control target
= control target key end

     0   :  { %s25060_s0 = inlined_call_operand.vmem [shape: f32[2,2048], index: 0, kind: input, shape index: {}]   ;;  %s25061_s1 = inlined_call_operand.vmem [shape: bf16[2048,1024], index: 1, kind: input, shape index: {}]   ;;  %s25062_s2 = inlined_call_operand.vmem [shape: f32[1,1024], index: 2, kind: input, shape index: {}]   ;;  %s25063_s3 = inlined_call_operand.vmem [shape: bf16[1024,512], index: 3, kind: input, shape index: {}]   ;;  %s25064_s4 = inlined_call_operand.vmem [shape: f32[1,512], index: 4, kind: input, shape index: {}]   ;;  %s25065_s5 = inlined_call_operand.vmem [shape: bf16[512,128], index: 5, kind: input, shape index: {}]   ;;  %s25066_s6 = inlined_call_operand.vmem [shape: f32[1,128], index: 6, kind: input, shape index: {}]   ;;  %s25067_s7 = inlined_call_operand.hbm [shape: f32[2,128], index: 7, kind: output, shape index: {}]  }
   0x1   :  { %v10467_v0 = vld [vmem:[%s25061_s1 + $0x1c0] sm:$0xf] }
   0x2   :  { %v15549_v1 = vld [vmem:[%s25061_s1 + $0x1dc] sm:$0xf0] }
   0x3   :  { %v10723_v2 = vld [vmem:[%s25061_s1 + $0x3c0] sm:$0xf]  ;;  %v10468_v3 = vor.u32 %v15549_v1, %v10467_v0 }
   0x4   :  { %v15613_v4 = vld [vmem:[%s25061_s1 + $0x3dc] sm:$0xf0] }
   0x5   :  { %v10979_v5 = vld [vmem:[%s25061_s1 + $0x5c0] sm:$0xf]  ;;  %v10724_v7 = vor.u32 %v15613_v4, %v10723_v2  ;;  %6250 = vmatpush.bf16.msra.mxu0 %v10468_v3 }
   0x6   :  { %v15677_v6 = vld [vmem:[%s25061_s1 + $0x5dc] sm:$0xf0] }
   0x7   :  { %v10980_v8 = vor.u32 %v15677_v6, %v10979_v5  ;;  %v11235_v9 = vld [vmem:[%s25061_s1 + $0x7c0] sm:$0xf]  ;;  %6263 = vmatpush.bf16.msra.mxu1 %v10724_v7 }
   0x8   :  { %v15741_v10 = vld [vmem:[%s25061_s1 + $0x7dc] sm:$0xf0] }
   0x9   :  { %v10435_v11 = vld [vmem:[%s25061_s1 + $0x180] sm:$0xf]  ;;  %v11236_v12 = vor.u32 %v15741_v10, %v11235_v9  ;;  %6276 = vmatpush.bf16.msra.mxu2 %v10980_v8 }
   0xa   :  { %v15541_v13 = vld [vmem:[%s25061_s1 + $0x19c] sm:$0xf0] }
   0xb   :  { %v10691_v14 = vld [vmem:[%s25061_s1 + $0x380] sm:$0xf]  ;;  %v10436_v16 = vor.u32 %v15541_v13, %v10435_v11  ;;  %6289 = vmatpush.bf16.msra.mxu3 %v11236_v12 }
   0xc   :  { %v15605_v15 = vld [vmem:[%s25061_s1 + $0x39c] sm:$0xf0] }
   0xd   :  { %v10692_v17 = vor.u32 %v15605_v15, %v10691_v14  ;;  %v10947_v18 = vld [vmem:[%s25061_s1 + $0x580] sm:$0xf]  ;;  %6251 = vmatpush.bf16.msra.mxu0 %v10436_v16 }
   0xe   :  { %v15669_v19 = vld [vmem:[%s25061_s1 + $0x59c] sm:$0xf0] }
   0xf   :  { %v11203_v20 = vld [vmem:[%s25061_s1 + $0x780] sm:$0xf]  ;;  %v10948_v21 = vor.u32 %v15669_v19, %v10947_v18  ;;  %6264 = vmatpush.bf16.msra.mxu1 %v10692_v17 }
  0x10   :  { %v15733_v22 = vld [vmem:[%s25061_s1 + $0x79c] sm:$0xf0] }
  0x11   :  { %v10403_v23 = vld [vmem:[%s25061_s1 + $0x140] sm:$0xf]  ;;  %v11204_v25 = vor.u32 %v15733_v22, %v11203_v20  ;;  %6277 = vmatpush.bf16.msra.mxu2 %v10948_v21 }
  0x12   :  { %v15533_v24 = vld [vmem:[%s25061_s1 + $0x15c] sm:$0xf0] }
  0x13   :  { %v10659_v26 = vld [vmem:[%s25061_s1 + $0x340] sm:$0xf]  ;;  %v10404_v29 = vor.u32 %v15533_v24, %v10403_v23  ;;  %6290 = vmatpush.bf16.msra.mxu3 %v11204_v25 }
  0x14   :  { %v15597_v27 = vld [vmem:[%s25061_s1 + $0x35c] sm:$0xf0] }
  0x15   :  { %v10915_v28 = vld [vmem:[%s25061_s1 + $0x540] sm:$0xf]  ;;  %v10660_v33 = vor.u32 %v15597_v27, %v10659_v26  ;;  %6252 = vmatpush.bf16.msra.mxu0 %v10404_v29 }
  0x16   :  { %v15661_v30 = vld [vmem:[%s25061_s1 + $0x55c] sm:$0xf0] }
  0x17   :  { %v11171_v31 = vld [vmem:[%s25061_s1 + $0x740] sm:$0xf]  ;;  %v10916_v34 = vor.u32 %v15661_v30, %v10915_v28  ;;  %6265 = vmatpush.bf16.msra.mxu1 %v10660_v33 }
  0x18   :  { %v15725_v32 = vld [vmem:[%s25061_s1 + $0x75c] sm:$0xf0] }
  0x19   :  { %v10371_v35 = vld [vmem:[%s25061_s1 + $0x100] sm:$0xf]  ;;  %v11172_v38 = vor.u32 %v15725_v32, %v11171_v31  ;;  %6278 = vmatpush.bf16.msra.mxu2 %v10916_v34 }
  0x1a   :  { %v15525_v36 = vld [vmem:[%s25061_s1 + $0x11c] sm:$0xf0] }
  0x1b   :  { %v10627_v37 = vld [vmem:[%s25061_s1 + $0x300] sm:$0xf]  ;;  %v10372_v44 = vor.u32 %v15525_v36, %v10371_v35  ;;  %6291 = vmatpush.bf16.msra.mxu3 %v11172_v38 }
  0x1c   :  { %v15589_v39 = vld [vmem:[%s25061_s1 + $0x31c] sm:$0xf0] }
  0x1d   :  { %v10883_v40 = vld [vmem:[%s25061_s1 + $0x500] sm:$0xf]  ;;  %v10628_v45 = vor.u32 %v15589_v39, %v10627_v37  ;;  %6253 = vmatpush.bf16.msra.mxu0 %v10372_v44 }
  0x1e   :  { %v15653_v41 = vld [vmem:[%s25061_s1 + $0x51c] sm:$0xf0] }
  0x1f   :  { %v11139_v42 = vld [vmem:[%s25061_s1 + $0x700] sm:$0xf]  ;;  %v10884_v46 = vor.u32 %v15653_v41, %v10883_v40  ;;  %6266 = vmatpush.bf16.msra.mxu1 %v10628_v45 }
  0x20   :  { %v15717_v43 = vld [vmem:[%s25061_s1 + $0x71c] sm:$0xf0] }
  0x21   :  { %v10339_v47 = vld [vmem:[%s25061_s1 + $0xc0] sm:$0xf]  ;;  %v11140_v50 = vor.u32 %v15717_v43, %v11139_v42  ;;  %6279 = vmatpush.bf16.msra.mxu2 %v10884_v46 }
  0x22   :  { %v15517_v48 = vld [vmem:[%s25061_s1 + $0xdc] sm:$0xf0] }
  0x23   :  { %v10595_v49 = vld [vmem:[%s25061_s1 + $0x2c0] sm:$0xf]  ;;  %v10340_v56 = vor.u32 %v15517_v48, %v10339_v47  ;;  %6292 = vmatpush.bf16.msra.mxu3 %v11140_v50 }
  0x24   :  { %v15581_v51 = vld [vmem:[%s25061_s1 + $0x2dc] sm:$0xf0] }
  0x25   :  { %v10851_v52 = vld [vmem:[%s25061_s1 + $0x4c0] sm:$0xf]  ;;  %v10596_v57 = vor.u32 %v15581_v51, %v10595_v49  ;;  %6254 = vmatpush.bf16.msra.mxu0 %v10340_v56 }
  0x26   :  { %v15645_v53 = vld [vmem:[%s25061_s1 + $0x4dc] sm:$0xf0] }
  0x27   :  { %v11107_v54 = vld [vmem:[%s25061_s1 + $0x6c0] sm:$0xf]  ;;  %v10852_v58 = vor.u32 %v15645_v53, %v10851_v52  ;;  %6267 = vmatpush.bf16.msra.mxu1 %v10596_v57 }
  0x28   :  { %v15709_v55 = vld [vmem:[%s25061_s1 + $0x6dc] sm:$0xf0] }
  0x29   :  { %v10307_v59 = vld [vmem:[%s25061_s1 + $0x80] sm:$0xf]  ;;  %v11108_v62 = vor.u32 %v15709_v55, %v11107_v54  ;;  %6280 = vmatpush.bf16.msra.mxu2 %v10852_v58 }
  0x2a   :  { %v15509_v60 = vld [vmem:[%s25061_s1 + $0x9c] sm:$0xf0] }
  0x2b   :  { %v10563_v61 = vld [vmem:[%s25061_s1 + $0x280] sm:$0xf]  ;;  %v10308_v4 = vor.u32 %v15509_v60, %v10307_v59  ;;  %6293 = vmatpush.bf16.msra.mxu3 %v11108_v62 }
  0x2c   :  { %v15573_v63 = vld [vmem:[%s25061_s1 + $0x29c] sm:$0xf0] }
  0x2d   :  { %v10819_v0 = vld [vmem:[%s25061_s1 + $0x480] sm:$0xf]  ;;  %v10564_v5 = vor.u32 %v15573_v63, %v10563_v61  ;;  %6255 = vmatpush.bf16.msra.mxu0 %v10308_v4 }
  0x2e   :  { %v15637_v1 = vld [vmem:[%s25061_s1 + $0x49c] sm:$0xf0] }
  0x2f   :  { %v11075_v2 = vld [vmem:[%s25061_s1 + $0x680] sm:$0xf]  ;;  %v10820_v6 = vor.u32 %v15637_v1, %v10819_v0  ;;  %6268 = vmatpush.bf16.msra.mxu1 %v10564_v5 }
  0x30   :  { %v15701_v3 = vld [vmem:[%s25061_s1 + $0x69c] sm:$0xf0] }
  0x31   :  { %v10275_v7 = vld [vmem:[%s25061_s1 + $0x40] sm:$0xf]  ;;  %v11076_v10 = vor.u32 %v15701_v3, %v11075_v2  ;;  %6281 = vmatpush.bf16.msra.mxu2 %v10820_v6 }
  0x32   :  { %v15501_v8 = vld [vmem:[%s25061_s1 + $0x5c] sm:$0xf0] }
  0x33   :  { %v10531_v9 = vld [vmem:[%s25061_s1 + $0x240] sm:$0xf]  ;;  %v10276_v16 = vor.u32 %v15501_v8, %v10275_v7  ;;  %6294 = vmatpush.bf16.msra.mxu3 %v11076_v10 }
  0x34   :  { %v15565_v11 = vld [vmem:[%s25061_s1 + $0x25c] sm:$0xf0] }
  0x35   :  { %v10787_v12 = vld [vmem:[%s25061_s1 + $0x440] sm:$0xf]  ;;  %v10532_v19 = vor.u32 %v15565_v11, %v10531_v9  ;;  %6256 = vmatpush.bf16.msra.mxu0 %v10276_v16 }
  0x36   :  { %v15629_v13 = vld [vmem:[%s25061_s1 + $0x45c] sm:$0xf0] }
  0x37   :  { %v11043_v14 = vld [vmem:[%s25061_s1 + $0x640] sm:$0xf]  ;;  %v10788_v20 = vor.u32 %v15629_v13, %v10787_v12  ;;  %6269 = vmatpush.bf16.msra.mxu1 %v10532_v19 }
  0x38   :  { %v15693_v15 = vld [vmem:[%s25061_s1 + $0x65c] sm:$0xf0] }
  0x39   :  { %v10243_v17 = vld [vmem:[%s25061_s1] sm:$0xf]  ;;  %v11044_v24 = vor.u32 %v15693_v15, %v11043_v14  ;;  %6282 = vmatpush.bf16.msra.mxu2 %v10788_v20 }
  0x3a   :  { %v15493_v18 = vld [vmem:[%s25061_s1 + $0x1c] sm:$0xf0] }
  0x3b   :  { %v10499_v21 = vld [vmem:[%s25061_s1 + $0x200] sm:$0xf]  ;;  %v10244_v31 = vor.u32 %v15493_v18, %v10243_v17  ;;  %6295 = vmatpush.bf16.msra.mxu3 %v11044_v24 }
  0x3c   :  { %v15557_v22 = vld [vmem:[%s25061_s1 + $0x21c] sm:$0xf0] }
  0x3d   :  { %v10755_v23 = vld [vmem:[%s25061_s1 + $0x400] sm:$0xf]  ;;  %v10500_v35 = vor.u32 %v15557_v22, %v10499_v21  ;;  %6257 = vmatpush.bf16.msra.mxu0 %v10244_v31 }
  0x3e   :  { %v15621_v25 = vld [vmem:[%s25061_s1 + $0x41c] sm:$0xf0] }
  0x3f   :  { %v11011_v26 = vld [vmem:[%s25061_s1 + $0x600] sm:$0xf]  ;;  %v10756_v36 = vor.u32 %v15621_v25, %v10755_v23  ;;  %6270 = vmatpush.bf16.msra.mxu1 %v10500_v35 }
  0x40   :  { %v15685_v27 = vld [vmem:[%s25061_s1 + $0x61c] sm:$0xf0] }
  0x41   :  { %v11491_v28 = vld [vmem:[%s25061_s1 + $0x9c0] sm:$0xf]  ;;  %v11012_v39 = vor.u32 %v15685_v27, %v11011_v26  ;;  %6283 = vmatpush.bf16.msra.mxu2 %v10756_v36  ;;  %v29_v27 = vld [vmem:[%s25060_s0 + $0x10] sm:$0xff] }
  0x42   :  { %v15805_v29 = vld [vmem:[%s25061_s1 + $0x9dc] sm:$0xf0] }
  0x43   :  { %v11747_v30 = vld [vmem:[%s25061_s1 + $0xbc0] sm:$0xf]  ;;  %v11492_v40 = vor.u32 %v15805_v29, %v11491_v28  ;;  %6296 = vmatpush.bf16.msra.mxu3 %v11012_v39 }
  0x44   :  { %v15869_v32 = vld [vmem:[%s25061_s1 + $0xbdc] sm:$0xf0] }
  0x45   :  { %v12003_v33 = vld [vmem:[%s25061_s1 + $0xdc0] sm:$0xf]  ;;  %v11748_v41 = vor.u32 %v15869_v32, %v11747_v30  ;;  %6302 = vmatpush.bf16.msrb.mxu0 %v11492_v40 }
  0x46   :  { %v15933_v34 = vld [vmem:[%s25061_s1 + $0xddc] sm:$0xf0] }
  0x47   :  { %v12259_v37 = vld [vmem:[%s25061_s1 + $0xfc0] sm:$0xf]  ;;  %v12004_v42 = vor.u32 %v15933_v34, %v12003_v33  ;;  %6315 = vmatpush.bf16.msrb.mxu1 %v11748_v41 }
  0x48   :  { %v15997_v38 = vld [vmem:[%s25061_s1 + $0xfdc] sm:$0xf0] }
  0x49   :  { %v11459_v43 = vld [vmem:[%s25061_s1 + $0x980] sm:$0xf]  ;;  %v12260_v46 = vor.u32 %v15997_v38, %v12259_v37  ;;  %6328 = vmatpush.bf16.msrb.mxu2 %v12004_v42 }
  0x4a   :  { %v15797_v44 = vld [vmem:[%s25061_s1 + $0x99c] sm:$0xf0] }
  0x4b   :  { %v11715_v45 = vld [vmem:[%s25061_s1 + $0xb80] sm:$0xf]  ;;  %v11460_v52 = vor.u32 %v15797_v44, %v11459_v43  ;;  %6341 = vmatpush.bf16.msrb.mxu3 %v12260_v46 }
  0x4c   :  { %v15861_v47 = vld [vmem:[%s25061_s1 + $0xb9c] sm:$0xf0] }
  0x4d   :  { %v11971_v48 = vld [vmem:[%s25061_s1 + $0xd80] sm:$0xf]  ;;  %v11716_v53 = vor.u32 %v15861_v47, %v11715_v45  ;;  %6303 = vmatpush.bf16.msrb.mxu0 %v11460_v52 }
  0x4e   :  { %v15925_v49 = vld [vmem:[%s25061_s1 + $0xd9c] sm:$0xf0] }
  0x4f   :  { %v12227_v50 = vld [vmem:[%s25061_s1 + $0xf80] sm:$0xf]  ;;  %v11972_v54 = vor.u32 %v15925_v49, %v11971_v48  ;;  %6316 = vmatpush.bf16.msrb.mxu1 %v11716_v53 }
  0x50   :  { %v15989_v51 = vld [vmem:[%s25061_s1 + $0xf9c] sm:$0xf0] }
  0x51   :  { %v11427_v55 = vld [vmem:[%s25061_s1 + $0x940] sm:$0xf]  ;;  %v12228_v58 = vor.u32 %v15989_v51, %v12227_v50  ;;  %6329 = vmatpush.bf16.msrb.mxu2 %v11972_v54 }
  0x52   :  { %v15789_v56 = vld [vmem:[%s25061_s1 + $0x95c] sm:$0xf0] }
  0x53   :  { %v11683_v57 = vld [vmem:[%s25061_s1 + $0xb40] sm:$0xf]  ;;  %v11428_v0 = vor.u32 %v15789_v56, %v11427_v55  ;;  %6342 = vmatpush.bf16.msrb.mxu3 %v12228_v58 }
  0x54   :  { %v15853_v59 = vld [vmem:[%s25061_s1 + $0xb5c] sm:$0xf0] }
  0x55   :  { %v11939_v60 = vld [vmem:[%s25061_s1 + $0xd40] sm:$0xf]  ;;  %v11684_v3 = vor.u32 %v15853_v59, %v11683_v57  ;;  %6304 = vmatpush.bf16.msrb.mxu0 %v11428_v0  ;;  %v28_v57 = vld [vmem:[%s25060_s0 + $0x8] sm:$0xff] }
  0x56   :  { %v15917_v61 = vld [vmem:[%s25061_s1 + $0xd5c] sm:$0xf0]  ;;  %37 = vst [vmem:[#allocation1 + $0x20] ss:$4 sm:$0xff] %v28_v57 }
  0x57   :  { %v12195_v62 = vld [vmem:[%s25061_s1 + $0xf40] sm:$0xf]  ;;  %v11940_v4 = vor.u32 %v15917_v61, %v11939_v60  ;;  %6317 = vmatpush.bf16.msrb.mxu1 %v11684_v3 }
  0x58   :  { %v15981_v63 = vld [vmem:[%s25061_s1 + $0xf5c] sm:$0xf0] }
  0x59   :  { %v11395_v1 = vld [vmem:[%s25061_s1 + $0x900] sm:$0xf]  ;;  %v12196_v7 = vor.u32 %v15981_v63, %v12195_v62  ;;  %6330 = vmatpush.bf16.msrb.mxu2 %v11940_v4 }
  0x5a   :  { %v27_v2 = vld [vmem:[%s25060_s0] sm:$0xff] }
  0x5b   :  { %v15781_v5 = vld [vmem:[%s25061_s1 + $0x91c] sm:$0xf0]  ;;  %35 = vst [vmem:[#allocation1] ss:$4 sm:$0xff] %v27_v2  ;;  %6343 = vmatpush.bf16.msrb.mxu3 %v12196_v7 }
  0x5c   :  { %v11651_v6 = vld [vmem:[%s25061_s1 + $0xb00] sm:$0xf]  ;;  %v11396_v13 = vor.u32 %v15781_v5, %v11395_v1 }
  0x5d   :  { %v15845_v8 = vld [vmem:[%s25061_s1 + $0xb1c] sm:$0xf0] }
  0x5e   :  { %v11907_v9 = vld [vmem:[%s25061_s1 + $0xd00] sm:$0xf]  ;;  %v11652_v16 = vor.u32 %v15845_v8, %v11651_v6  ;;  %6305 = vmatpush.bf16.msrb.mxu0 %v11396_v13 }
  0x5f   :  { %v15909_v10 = vld [vmem:[%s25061_s1 + $0xd1c] sm:$0xf0] }
  0x60   :  { %v12163_v11 = vld [vmem:[%s25061_s1 + $0xf00] sm:$0xf]  ;;  %v11908_v17 = vor.u32 %v15909_v10, %v11907_v9  ;;  %6318 = vmatpush.bf16.msrb.mxu1 %v11652_v16 }
  0x61   :  { %v15973_v12 = vld [vmem:[%s25061_s1 + $0xf1c] sm:$0xf0] }
  0x62   :  { %v11363_v14 = vld [vmem:[%s25061_s1 + $0x8c0] sm:$0xf]  ;;  %v12164_v21 = vor.u32 %v15973_v12, %v12163_v11  ;;  %v40_v32 = vld.sshfl [vmem:[#allocation1 + $0x10] sm:$0xff pattern:$0x73625140]  ;;  %6331 = vmatpush.bf16.msrb.mxu2 %v11908_v17 }
  0x63   :  { %v15773_v15 = vld [vmem:[%s25061_s1 + $0x8dc] sm:$0xf0]  ;;  %v17212_v35 = vpack.c.bf16 %v40_v32, %v40_v32  ;;  %v41_v37 = vld.sshfl [vmem:[#allocation1 + $0x18] sm:$0xff pattern:$0x73625140] }
  0x64   :  { %v11619_v18 = vld [vmem:[%s25061_s1 + $0xac0] sm:$0xf]  ;;  %v11364_v28 = vor.u32 %v15773_v15, %v11363_v14  ;;  %v39_v38 = vld.sshfl [vmem:[#allocation1 + $0x8] sm:$0xff pattern:$0x73625140]  ;;  %6344 = vmatpush.bf16.msrb.mxu3 %v12164_v21  ;;  %v17222_v42 = vpack.c.bf16 %v41_v37, %v41_v37 }
  0x65   :  { %v15837_v19 = vld [vmem:[%s25061_s1 + $0xadc] sm:$0xf0]  ;;  %v17224_v43 = vpack.c.bf16 %v39_v38, %v39_v38  ;;  %6284 = vmatmul.bf16.vlgmr.msra.gmra.mxu2 %v17212_v35 }
  0x66   :  { %v11875_v20 = vld [vmem:[%s25061_s1 + $0xcc0] sm:$0xf]  ;;  %v11620_v29 = vor.u32 %v15837_v19, %v11619_v18  ;;  %6306 = vmatpush.bf16.msrb.mxu0 %v11364_v28  ;;  %6297 = vmatmul.bf16.vlgmr.msra.gmra.mxu3 %v17222_v42 }
  0x67   :  { %v15901_v22 = vld [vmem:[%s25061_s1 + $0xcdc] sm:$0xf0]  ;;  %6271 = vmatmul.bf16.vlgmr.msra.gmra.mxu1 %v17224_v43 }
  0x68   :  { %v12131_v23 = vld [vmem:[%s25061_s1 + $0xec0] sm:$0xf]  ;;  %v11876_v34 = vor.u32 %v15901_v22, %v11875_v20  ;;  %6319 = vmatpush.bf16.msrb.mxu1 %v11620_v29  ;;  %v30_v20 = vld [vmem:[%s25060_s0 + $0x18] sm:$0xff] }
  0x69   :  { %v15965_v24 = vld [vmem:[%s25061_s1 + $0xedc] sm:$0xf0]  ;;  %v45_v29 = vld.sshfl [vmem:[#allocation1 + $0x38] sm:$0xff pattern:$0x73625140] }
  0x6a   :  { %v11331_v25 = vld [vmem:[%s25061_s1 + $0x880] sm:$0xf]  ;;  %v12132_v39 = vor.u32 %v15965_v24, %v12131_v23  ;;  %6332 = vmatpush.bf16.msrb.mxu2 %v11876_v34 }
  0x6b   :  { %v15765_v26 = vld [vmem:[%s25061_s1 + $0x89c] sm:$0xf0] }
  0x6c   :  { %v11587_v30 = vld [vmem:[%s25061_s1 + $0xa80] sm:$0xf]  ;;  %v11332_v46 = vor.u32 %v15765_v26, %v11331_v25  ;;  %6345 = vmatpush.bf16.msrb.mxu3 %v12132_v39  ;;  %v44_v25 = vld.sshfl [vmem:[#allocation1 + $0x30] sm:$0xff pattern:$0x73625140] }
  0x6d   :  { %v15829_v31 = vld [vmem:[%s25061_s1 + $0xa9c] sm:$0xf0]  ;;  %v17332_v34 = vpack.c.bf16 %v44_v25, %v44_v25 }
  0x6e   :  { %v38_v33 = vld.sshfl [vmem:[#allocation1] sm:$0xff pattern:$0x73625140]  ;;  %v11588_v49 = vor.u32 %v15829_v31, %v11587_v30  ;;  %6307 = vmatpush.bf16.msrb.mxu0 %v11332_v46  ;;  %v43_v30 = vld.sshfl [vmem:[#allocation1 + $0x28] sm:$0xff pattern:$0x73625140] }
  0x6f   :  { %v17214_v36 = vpack.c.bf16 %v38_v33, %v38_v33  ;;  %v11843_v40 = vld [vmem:[%s25061_s1 + $0xc80] sm:$0xf]  ;;  %46 = vst [vmem:[#allocation1] ss:$4 sm:$0xff] %v29_v27 }
  0x70   :  { %v15893_v41 = vld [vmem:[%s25061_s1 + $0xc9c] sm:$0xf0]  ;;  %6320 = vmatpush.bf16.msrb.mxu1 %v11588_v49 }
  0x71   :  { %v12099_v44 = vld [vmem:[%s25061_s1 + $0xe80] sm:$0xf]  ;;  %6258 = vmatmul.bf16.vlgmr.msra.gmra.mxu0 %v17214_v36  ;;  %v11844_v50 = vor.u32 %v15893_v41, %v11843_v40  ;;  %v17342_v40 = vpack.c.bf16 %v45_v29, %v45_v29 }
  0x72   :  { %v15957_v45 = vld [vmem:[%s25061_s1 + $0xe9c] sm:$0xf0] }
  0x73   :  { %v11299_v47 = vld [vmem:[%s25061_s1 + $0x840] sm:$0xf]  ;;  %v12100_v54 = vor.u32 %v15957_v45, %v12099_v44  ;;  %6333 = vmatpush.bf16.msrb.mxu2 %v11844_v50  ;;  %v17344_v44 = vpack.c.bf16 %v43_v30, %v43_v30 }
  0x74   :  { %v15757_v48 = vld [vmem:[%s25061_s1 + $0x85c] sm:$0xf0] }
  0x75   :  { %v11555_v51 = vld [vmem:[%s25061_s1 + $0xa40] sm:$0xf]  ;;  %v11300_v60 = vor.u32 %v15757_v48, %v11299_v47  ;;  %6346 = vmatpush.bf16.msrb.mxu3 %v12100_v54 }
  0x76   :  { %v15821_v52 = vld [vmem:[%s25061_s1 + $0xa5c] sm:$0xf0] }
  0x77   :  { %v11811_v53 = vld [vmem:[%s25061_s1 + $0xc40] sm:$0xf]  ;;  %v11556_v0 = vor.u32 %v15821_v52, %v11555_v51  ;;  %6308 = vmatpush.bf16.msrb.mxu0 %v11300_v60 }
  0x78   :  { %v15885_v55 = vld [vmem:[%s25061_s1 + $0xc5c] sm:$0xf0] }
  0x79   :  { %v12067_v56 = vld [vmem:[%s25061_s1 + $0xe40] sm:$0xf]  ;;  %v11812_v1 = vor.u32 %v15885_v55, %v11811_v53  ;;  %6321 = vmatpush.bf16.msrb.mxu1 %v11556_v0 }
  0x7a   :  { %v15949_v58 = vld [vmem:[%s25061_s1 + $0xe5c] sm:$0xf0] }
  0x7b   :  { %v11267_v59 = vld [vmem:[%s25061_s1 + $0x800] sm:$0xf]  ;;  %v12068_v5 = vor.u32 %v15949_v58, %v12067_v56  ;;  %6334 = vmatpush.bf16.msrb.mxu2 %v11812_v1 }
  0x7c   :  { %v15749_v61 = vld [vmem:[%s25061_s1 + $0x81c] sm:$0xf0] }
  0x7d   :  { %v11523_v62 = vld [vmem:[%s25061_s1 + $0xa00] sm:$0xf]  ;;  %v11268_v12 = vor.u32 %v15749_v61, %v11267_v59  ;;  %6347 = vmatpush.bf16.msrb.mxu3 %v12068_v5 }
  0x7e   :  { %v15813_v63 = vld [vmem:[%s25061_s1 + $0xa1c] sm:$0xf0] }
  0x7f   :  { %v11779_v2 = vld [vmem:[%s25061_s1 + $0xc00] sm:$0xf]  ;;  %v11524_v16 = vor.u32 %v15813_v63, %v11523_v62  ;;  %6309 = vmatpush.bf16.msrb.mxu0 %v11268_v12 }
  0x80   :  { %v15877_v3 = vld [vmem:[%s25061_s1 + $0xc1c] sm:$0xf0] }
  0x81   :  { %v12035_v4 = vld [vmem:[%s25061_s1 + $0xe00] sm:$0xf]  ;;  %v11780_v17 = vor.u32 %v15877_v3, %v11779_v2  ;;  %6322 = vmatpush.bf16.msrb.mxu1 %v11524_v16 }
  0x82   :  { %v15941_v6 = vld [vmem:[%s25061_s1 + $0xe1c] sm:$0xf0] }
  0x83   :  { %v12515_v7 = vld [vmem:[%s25061_s1 + $0x11c0] sm:$0xf]  ;;  %v12036_v21 = vor.u32 %v15941_v6, %v12035_v4  ;;  %6335 = vmatpush.bf16.msrb.mxu2 %v11780_v17 }
  0x84   :  { %v16061_v8 = vld [vmem:[%s25061_s1 + $0x11dc] sm:$0xf0]  ;;  %6323 = vmatmul.bf16.vlgmr.msrb.gmra.mxu1 %v17344_v44 }
  0x85   :  { %v12771_v9 = vld [vmem:[%s25061_s1 + $0x13c0] sm:$0xf]  ;;  %v12516_v22 = vor.u32 %v16061_v8, %v12515_v7  ;;  %6348 = vmatpush.bf16.msrb.mxu3 %v12036_v21 }
  0x86   :  { %v16125_v10 = vld [vmem:[%s25061_s1 + $0x13dc] sm:$0xf0]  ;;  %6336 = vmatmul.bf16.vlgmr.msrb.gmra.mxu2 %v17332_v34 }
  0x87   :  { %v13027_v11 = vld [vmem:[%s25061_s1 + $0x15c0] sm:$0xf]  ;;  %v12772_v27 = vor.u32 %v16125_v10, %v12771_v9  ;;  %6354 = vmatpush.bf16.msra.mxu0 %v12516_v22 }
  0x88   :  { %v16189_v13 = vld [vmem:[%s25061_s1 + $0x15dc] sm:$0xf0]  ;;  %6349 = vmatmul.bf16.vlgmr.msrb.gmra.mxu3 %v17342_v40 }
  0x89   :  { %v13283_v14 = vld [vmem:[%s25061_s1 + $0x17c0] sm:$0xf]  ;;  %v13028_v28 = vor.u32 %v16189_v13, %v13027_v11  ;;  %6367 = vmatpush.bf16.msra.mxu1 %v12772_v27 }
  0x8a   :  { %v16253_v15 = vld [vmem:[%s25061_s1 + $0x17dc] sm:$0xf0] }
  0x8b   :  { %v12483_v18 = vld [vmem:[%s25061_s1 + $0x1180] sm:$0xf]  ;;  %v13284_v31 = vor.u32 %v16253_v15, %v13283_v14  ;;  %6380 = vmatpush.bf16.msra.mxu2 %v13028_v28 }
  0x8c   :  { %v16053_v19 = vld [vmem:[%s25061_s1 + $0x119c] sm:$0xf0] }
  0x8d   :  { %v12739_v23 = vld [vmem:[%s25061_s1 + $0x1380] sm:$0xf]  ;;  %v12484_v41 = vor.u32 %v16053_v19, %v12483_v18  ;;  %6393 = vmatpush.bf16.msra.mxu3 %v13284_v31 }
  0x8e   :  { %v16117_v24 = vld [vmem:[%s25061_s1 + $0x139c] sm:$0xf0] }
  0x8f   :  { %v42_v26 = vld.sshfl [vmem:[#allocation1 + $0x20] sm:$0xff pattern:$0x73625140]  ;;  %v12740_v45 = vor.u32 %v16117_v24, %v12739_v23  ;;  %6355 = vmatpush.bf16.msra.mxu0 %v12484_v41 }
  0x90   :  { %v12995_v32 = vld [vmem:[%s25061_s1 + $0x1580] sm:$0xf]  ;;  %47 = vst [vmem:[#allocation1 + $0x20] ss:$4 sm:$0xff] %v30_v20  ;;  %v17340_v39 = vpack.c.bf16 %v42_v26, %v42_v26 }
  0x91   :  { %v16181_v33 = vld [vmem:[%s25061_s1 + $0x159c] sm:$0xf0]  ;;  %6368 = vmatpush.bf16.msra.mxu1 %v12740_v45 }
  0x92   :  { %v13251_v37 = vld [vmem:[%s25061_s1 + $0x1780] sm:$0xf]  ;;  %v12996_v46 = vor.u32 %v16181_v33, %v12995_v32  ;;  %6310 = vmatmul.bf16.vlgmr.msrb.gmra.mxu0 %v17340_v39 }
  0x93   :  { %v16245_v38 = vld [vmem:[%s25061_s1 + $0x179c] sm:$0xf0] }
  0x94   :  { %v12451_v47 = vld [vmem:[%s25061_s1 + $0x1140] sm:$0xf]  ;;  %v13252_v50 = vor.u32 %v16245_v38, %v13251_v37  ;;  %6381 = vmatpush.bf16.msra.mxu2 %v12996_v46 }
  0x95   :  { %v16045_v48 = vld [vmem:[%s25061_s1 + $0x115c] sm:$0xf0] }
  0x96   :  { %v12707_v49 = vld [vmem:[%s25061_s1 + $0x1340] sm:$0xf]  ;;  %v12452_v56 = vor.u32 %v16045_v48, %v12451_v47  ;;  %6394 = vmatpush.bf16.msra.mxu3 %v13252_v50 }
  0x97   :  { %v16109_v51 = vld [vmem:[%s25061_s1 + $0x135c] sm:$0xf0] }
  0x98   :  { %v12963_v52 = vld [vmem:[%s25061_s1 + $0x1540] sm:$0xf]  ;;  %v12708_v57 = vor.u32 %v16109_v51, %v12707_v49  ;;  %6356 = vmatpush.bf16.msra.mxu0 %v12452_v56 }
  0x99   :  { %v16173_v53 = vld [vmem:[%s25061_s1 + $0x155c] sm:$0xf0] }
  0x9a   :  { %v13219_v54 = vld [vmem:[%s25061_s1 + $0x1740] sm:$0xf]  ;;  %v12964_v58 = vor.u32 %v16173_v53, %v12963_v52  ;;  %6369 = vmatpush.bf16.msra.mxu1 %v12708_v57 }
  0x9b   :  { %v16237_v55 = vld [vmem:[%s25061_s1 + $0x175c] sm:$0xf0] }
  0x9c   :  { %v12419_v59 = vld [vmem:[%s25061_s1 + $0x1100] sm:$0xf]  ;;  %v13220_v62 = vor.u32 %v16237_v55, %v13219_v54  ;;  %6382 = vmatpush.bf16.msra.mxu2 %v12964_v58 }
  0x9d   :  { %v16037_v60 = vld [vmem:[%s25061_s1 + $0x111c] sm:$0xf0] }
  0x9e   :  { %v12675_v61 = vld [vmem:[%s25061_s1 + $0x1300] sm:$0xf]  ;;  %v12420_v4 = vor.u32 %v16037_v60, %v12419_v59  ;;  %6395 = vmatpush.bf16.msra.mxu3 %v13220_v62 }
  0x9f   :  { %v16101_v63 = vld [vmem:[%s25061_s1 + $0x131c] sm:$0xf0] }
  0xa0   :  { %v12931_v0 = vld [vmem:[%s25061_s1 + $0x1500] sm:$0xf]  ;;  %v12676_v5 = vor.u32 %v16101_v63, %v12675_v61  ;;  %6357 = vmatpush.bf16.msra.mxu0 %v12420_v4 }
  0xa1   :  { %v16165_v1 = vld [vmem:[%s25061_s1 + $0x151c] sm:$0xf0] }
  0xa2   :  { %v13187_v2 = vld [vmem:[%s25061_s1 + $0x1700] sm:$0xf]  ;;  %v12932_v6 = vor.u32 %v16165_v1, %v12931_v0  ;;  %6370 = vmatpush.bf16.msra.mxu1 %v12676_v5 }
  0xa3   :  { %v16229_v3 = vld [vmem:[%s25061_s1 + $0x171c] sm:$0xf0] }
  0xa4   :  { %v12387_v7 = vld [vmem:[%s25061_s1 + $0x10c0] sm:$0xf]  ;;  %v13188_v10 = vor.u32 %v16229_v3, %v13187_v2  ;;  %6383 = vmatpush.bf16.msra.mxu2 %v12932_v6 }
  0xa5   :  { %v16029_v8 = vld [vmem:[%s25061_s1 + $0x10dc] sm:$0xf0] }
  0xa6   :  { %v12643_v9 = vld [vmem:[%s25061_s1 + $0x12c0] sm:$0xf]  ;;  %v12388_v16 = vor.u32 %v16029_v8, %v12387_v7  ;;  %6396 = vmatpush.bf16.msra.mxu3 %v13188_v10  ;;  %v50_v8 = vld.sshfl [vmem:[#allocation1 + $0x10] sm:$0xff pattern:$0x73625140] }
  0xa7   :  { %v16093_v11 = vld [vmem:[%s25061_s1 + $0x12dc] sm:$0xf0] }
  0xa8   :  { %v12899_v12 = vld [vmem:[%s25061_s1 + $0x14c0] sm:$0xf]  ;;  %v12644_v17 = vor.u32 %v16093_v11, %v12643_v9  ;;  %6358 = vmatpush.bf16.msra.mxu0 %v12388_v16  ;;  %v49_v11 = vld.sshfl [vmem:[#allocation1 + $0x8] sm:$0xff pattern:$0x73625140] }
  0xa9   :  { %v16157_v13 = vld [vmem:[%s25061_s1 + $0x14dc] sm:$0xf0] }
  0xaa   :  { %v13155_v14 = vld [vmem:[%s25061_s1 + $0x16c0] sm:$0xf]  ;;  %v12900_v18 = vor.u32 %v16157_v13, %v12899_v12  ;;  %6371 = vmatpush.bf16.msra.mxu1 %v12644_v17  ;;  %v51_v12 = vld.sshfl [vmem:[#allocation1 + $0x18] sm:$0xff pattern:$0x73625140] }
  0xab   :  { %v16221_v15 = vld [vmem:[%s25061_s1 + $0x16dc] sm:$0xf0] }
  0xac   :  { %v12355_v19 = vld [vmem:[%s25061_s1 + $0x1080] sm:$0xf]  ;;  %v13156_v22 = vor.u32 %v16221_v15, %v13155_v14  ;;  %6384 = vmatpush.bf16.msra.mxu2 %v12900_v18 }
  0xad   :  { %v16021_v20 = vld [vmem:[%s25061_s1 + $0x109c] sm:$0xf0] }
  0xae   :  { %v12611_v21 = vld [vmem:[%s25061_s1 + $0x1280] sm:$0xf]  ;;  %v12356_v28 = vor.u32 %v16021_v20, %v12355_v19  ;;  %6397 = vmatpush.bf16.msra.mxu3 %v13156_v22 }
  0xaf   :  { %v16085_v23 = vld [vmem:[%s25061_s1 + $0x129c] sm:$0xf0] }
  0xb0   :  { %v12867_v24 = vld [vmem:[%s25061_s1 + $0x1480] sm:$0xf]  ;;  %v12612_v29 = vor.u32 %v16085_v23, %v12611_v21  ;;  %6359 = vmatpush.bf16.msra.mxu0 %v12356_v28  ;;  %v17538_v23 = vpack.c.bf16 %v50_v8, %v50_v8 }
  0xb1   :  { %v16149_v25 = vld [vmem:[%s25061_s1 + $0x149c] sm:$0xf0] }
  0xb2   :  { %v13123_v26 = vld [vmem:[%s25061_s1 + $0x1680] sm:$0xf]  ;;  %v12868_v30 = vor.u32 %v16149_v25, %v12867_v24  ;;  %6372 = vmatpush.bf16.msra.mxu1 %v12612_v29  ;;  %v17540_v24 = vpack.c.bf16 %v49_v11, %v49_v11 }
  0xb3   :  { %v16213_v27 = vld [vmem:[%s25061_s1 + $0x169c] sm:$0xf0] }
  0xb4   :  { %v12323_v31 = vld [vmem:[%s25061_s1 + $0x1040] sm:$0xf]  ;;  %v13124_v37 = vor.u32 %v16213_v27, %v13123_v26  ;;  %6385 = vmatpush.bf16.msra.mxu2 %v12868_v30  ;;  %v17548_v27 = vpack.c.bf16 %v51_v12, %v51_v12 }
  0xb5   :  { %v16013_v32 = vld [vmem:[%s25061_s1 + $0x105c] sm:$0xf0] }
  0xb6   :  { %v12579_v33 = vld [vmem:[%s25061_s1 + $0x1240] sm:$0xf]  ;;  %v12324_v49 = vor.u32 %v16013_v32, %v12323_v31  ;;  %6398 = vmatpush.bf16.msra.mxu3 %v13124_v37 }
  0xb7   :  { %v16077_v38 = vld [vmem:[%s25061_s1 + $0x125c] sm:$0xf0] }
  0xb8   :  { %v12835_v41 = vld [vmem:[%s25061_s1 + $0x1440] sm:$0xf]  ;;  %v12580_v53 = vor.u32 %v16077_v38, %v12579_v33  ;;  %6360 = vmatpush.bf16.msra.mxu0 %v12324_v49 }
  0xb9   :  { %v16141_v45 = vld [vmem:[%s25061_s1 + $0x145c] sm:$0xf0] }
  0xba   :  { %v13091_v46 = vld [vmem:[%s25061_s1 + $0x1640] sm:$0xf]  ;;  %v12836_v54 = vor.u32 %v16141_v45, %v12835_v41  ;;  %6373 = vmatpush.bf16.msra.mxu1 %v12580_v53 }
  0xbb   :  { %v16205_v47 = vld [vmem:[%s25061_s1 + $0x165c] sm:$0xf0] }
  0xbc   :  { %v12291_v48 = vld [vmem:[%s25061_s1 + $0x1000] sm:$0xf]  ;;  %v13092_v58 = vor.u32 %v16205_v47, %v13091_v46  ;;  %6386 = vmatpush.bf16.msra.mxu2 %v12836_v54 }
  0xbd   :  { %v16005_v50 = vld [vmem:[%s25061_s1 + $0x101c] sm:$0xf0] }
  0xbe   :  { %v12547_v51 = vld [vmem:[%s25061_s1 + $0x1200] sm:$0xf]  ;;  %v12292_v1 = vor.u32 %v16005_v50, %v12291_v48  ;;  %6399 = vmatpush.bf16.msra.mxu3 %v13092_v58 }
  0xbf   :  { %v16069_v52 = vld [vmem:[%s25061_s1 + $0x121c] sm:$0xf0] }
  0xc0   :  { %v12803_v55 = vld [vmem:[%s25061_s1 + $0x1400] sm:$0xf]  ;;  %v12548_v5 = vor.u32 %v16069_v52, %v12547_v51  ;;  %6361 = vmatpush.bf16.msra.mxu0 %v12292_v1 }
  0xc1   :  { %v16133_v56 = vld [vmem:[%s25061_s1 + $0x141c] sm:$0xf0] }
  0xc2   :  { %v13059_v57 = vld [vmem:[%s25061_s1 + $0x1600] sm:$0xf]  ;;  %v12804_v6 = vor.u32 %v16133_v56, %v12803_v55  ;;  %6374 = vmatpush.bf16.msra.mxu1 %v12548_v5 }
  0xc3   :  { %v16197_v59 = vld [vmem:[%s25061_s1 + $0x161c] sm:$0xf0] }
  0xc4   :  { %v13539_v60 = vld [vmem:[%s25061_s1 + $0x19c0] sm:$0xf]  ;;  %v13060_v9 = vor.u32 %v16197_v59, %v13059_v57  ;;  %6387 = vmatpush.bf16.msra.mxu2 %v12804_v6 }
  0xc5   :  { %v16317_v61 = vld [vmem:[%s25061_s1 + $0x19dc] sm:$0xf0]  ;;  %6375 = vmatmul.bf16.vlgmr.msra.gmra.mxu1 %v17540_v24 }
  0xc6   :  { %v13795_v62 = vld [vmem:[%s25061_s1 + $0x1bc0] sm:$0xf]  ;;  %v13540_v10 = vor.u32 %v16317_v61, %v13539_v60  ;;  %6400 = vmatpush.bf16.msra.mxu3 %v13060_v9 }
  0xc7   :  { %v16381_v63 = vld [vmem:[%s25061_s1 + $0x1bdc] sm:$0xf0]  ;;  %6388 = vmatmul.bf16.vlgmr.msra.gmra.mxu2 %v17538_v23 }
  0xc8   :  { %v14051_v0 = vld [vmem:[%s25061_s1 + $0x1dc0] sm:$0xf]  ;;  %v13796_v13 = vor.u32 %v16381_v63, %v13795_v62  ;;  %6406 = vmatpush.bf16.msrb.mxu0 %v13540_v10 }
  0xc9   :  { %v16445_v2 = vld [vmem:[%s25061_s1 + $0x1ddc] sm:$0xf0]  ;;  %6401 = vmatmul.bf16.vlgmr.msra.gmra.mxu3 %v17548_v27 }
  0xca   :  { %v14307_v3 = vld [vmem:[%s25061_s1 + $0x1fc0] sm:$0xf]  ;;  %v14052_v14 = vor.u32 %v16445_v2, %v14051_v0  ;;  %6419 = vmatpush.bf16.msrb.mxu1 %v13796_v13 }
  0xcb   :  { %v16509_v4 = vld [vmem:[%s25061_s1 + $0x1fdc] sm:$0xf0] }
  0xcc   :  { %v48_v7 = vld.sshfl [vmem:[#allocation1] sm:$0xff pattern:$0x73625140]  ;;  %v14308_v18 = vor.u32 %v16509_v4, %v14307_v3  ;;  %6432 = vmatpush.bf16.msrb.mxu2 %v14052_v14 }
  0xcd   :  { %v13507_v15 = vld [vmem:[%s25061_s1 + $0x1980] sm:$0xf]  ;;  %v17527_v19 = vpack.c.bf16 %v48_v7, %v48_v7 }
  0xce   :  { %v16309_v16 = vld [vmem:[%s25061_s1 + $0x199c] sm:$0xf0]  ;;  %6445 = vmatpush.bf16.msrb.mxu3 %v14308_v18 }
  0xcf   :  { %v13763_v17 = vld [vmem:[%s25061_s1 + $0x1b80] sm:$0xf]  ;;  %v13508_v28 = vor.u32 %v16309_v16, %v13507_v15  ;;  %6362 = vmatmul.bf16.vlgmr.msra.gmra.mxu0 %v17527_v19 }
  0xd0   :  { %v16373_v20 = vld [vmem:[%s25061_s1 + $0x1b9c] sm:$0xf0] }
  0xd1   :  { %v14019_v21 = vld [vmem:[%s25061_s1 + $0x1d80] sm:$0xf]  ;;  %v13764_v29 = vor.u32 %v16373_v20, %v13763_v17  ;;  %6407 = vmatpush.bf16.msrb.mxu0 %v13508_v28 }
  0xd2   :  { %v16437_v22 = vld [vmem:[%s25061_s1 + $0x1d9c] sm:$0xf0] }
  0xd3   :  { %v14275_v25 = vld [vmem:[%s25061_s1 + $0x1f80] sm:$0xf]  ;;  %v14020_v30 = vor.u32 %v16437_v22, %v14019_v21  ;;  %6420 = vmatpush.bf16.msrb.mxu1 %v13764_v29 }
  0xd4   :  { %v16501_v26 = vld [vmem:[%s25061_s1 + $0x1f9c] sm:$0xf0] }
  0xd5   :  { %v13475_v31 = vld [vmem:[%s25061_s1 + $0x1940] sm:$0xf]  ;;  %v14276_v37 = vor.u32 %v16501_v26, %v14275_v25  ;;  %6433 = vmatpush.bf16.msrb.mxu2 %v14020_v30 }
  0xd6   :  { %v16301_v32 = vld [vmem:[%s25061_s1 + $0x195c] sm:$0xf0] }
  0xd7   :  { %v13731_v33 = vld [vmem:[%s25061_s1 + $0x1b40] sm:$0xf]  ;;  %v13476_v48 = vor.u32 %v16301_v32, %v13475_v31  ;;  %6446 = vmatpush.bf16.msrb.mxu3 %v14276_v37 }
  0xd8   :  { %v16365_v38 = vld [vmem:[%s25061_s1 + $0x1b5c] sm:$0xf0] }
  0xd9   :  { %v13987_v41 = vld [vmem:[%s25061_s1 + $0x1d40] sm:$0xf]  ;;  %v13732_v49 = vor.u32 %v16365_v38, %v13731_v33  ;;  %6408 = vmatpush.bf16.msrb.mxu0 %v13476_v48 }
  0xda   :  { %v16429_v45 = vld [vmem:[%s25061_s1 + $0x1d5c] sm:$0xf0] }
  0xdb   :  { %v14243_v46 = vld [vmem:[%s25061_s1 + $0x1f40] sm:$0xf]  ;;  %v13988_v50 = vor.u32 %v16429_v45, %v13987_v41  ;;  %6421 = vmatpush.bf16.msrb.mxu1 %v13732_v49 }
  0xdc   :  { %v16493_v47 = vld [vmem:[%s25061_s1 + $0x1f5c] sm:$0xf0] }
  0xdd   :  { %v13443_v51 = vld [vmem:[%s25061_s1 + $0x1900] sm:$0xf]  ;;  %v14244_v54 = vor.u32 %v16493_v47, %v14243_v46  ;;  %6434 = vmatpush.bf16.msrb.mxu2 %v13988_v50 }
  0xde   :  { %v16293_v52 = vld [vmem:[%s25061_s1 + $0x191c] sm:$0xf0] }
  0xdf   :  { %v13699_v53 = vld [vmem:[%s25061_s1 + $0x1b00] sm:$0xf]  ;;  %v13444_v60 = vor.u32 %v16293_v52, %v13443_v51  ;;  %6447 = vmatpush.bf16.msrb.mxu3 %v14244_v54 }
  0xe0   :  { %v16357_v55 = vld [vmem:[%s25061_s1 + $0x1b1c] sm:$0xf0] }
  0xe1   :  { %v13955_v56 = vld [vmem:[%s25061_s1 + $0x1d00] sm:$0xf]  ;;  %v13700_v61 = vor.u32 %v16357_v55, %v13699_v53  ;;  %6409 = vmatpush.bf16.msrb.mxu0 %v13444_v60 }
  0xe2   :  { %v16421_v57 = vld [vmem:[%s25061_s1 + $0x1d1c] sm:$0xf0] }
  0xe3   :  { %v14211_v58 = vld [vmem:[%s25061_s1 + $0x1f00] sm:$0xf]  ;;  %v13956_v62 = vor.u32 %v16421_v57, %v13955_v56  ;;  %6422 = vmatpush.bf16.msrb.mxu1 %v13700_v61 }
  0xe4   :  { %v16485_v59 = vld [vmem:[%s25061_s1 + $0x1f1c] sm:$0xf0] }
  0xe5   :  { %v13411_v63 = vld [vmem:[%s25061_s1 + $0x18c0] sm:$0xf]  ;;  %v14212_v2 = vor.u32 %v16485_v59, %v14211_v58  ;;  %6435 = vmatpush.bf16.msrb.mxu2 %v13956_v62 }
  0xe6   :  { %v16285_v0 = vld [vmem:[%s25061_s1 + $0x18dc] sm:$0xf0] }
  0xe7   :  { %v13667_v1 = vld [vmem:[%s25061_s1 + $0x1ac0] sm:$0xf]  ;;  %v13412_v8 = vor.u32 %v16285_v0, %v13411_v63  ;;  %6448 = vmatpush.bf16.msrb.mxu3 %v14212_v2 }
  0xe8   :  { %v16349_v3 = vld [vmem:[%s25061_s1 + $0x1adc] sm:$0xf0] }
  0xe9   :  { %v13923_v4 = vld [vmem:[%s25061_s1 + $0x1cc0] sm:$0xf]  ;;  %v13668_v9 = vor.u32 %v16349_v3, %v13667_v1  ;;  %6410 = vmatpush.bf16.msrb.mxu0 %v13412_v8 }
  0xea   :  { %v16413_v5 = vld [vmem:[%s25061_s1 + $0x1cdc] sm:$0xf0] }
  0xeb   :  { %v14179_v6 = vld [vmem:[%s25061_s1 + $0x1ec0] sm:$0xf]  ;;  %v13924_v10 = vor.u32 %v16413_v5, %v13923_v4  ;;  %6423 = vmatpush.bf16.msrb.mxu1 %v13668_v9 }
  0xec   :  { %v16477_v7 = vld [vmem:[%s25061_s1 + $0x1edc] sm:$0xf0] }
  0xed   :  { %v13379_v11 = vld [vmem:[%s25061_s1 + $0x1880] sm:$0xf]  ;;  %v14180_v14 = vor.u32 %v16477_v7, %v14179_v6  ;;  %6436 = vmatpush.bf16.msrb.mxu2 %v13924_v10 }
  0xee   :  { %v16277_v12 = vld [vmem:[%s25061_s1 + $0x189c] sm:$0xf0] }
  0xef   :  { %v13635_v13 = vld [vmem:[%s25061_s1 + $0x1a80] sm:$0xf]  ;;  %v13380_v21 = vor.u32 %v16277_v12, %v13379_v11  ;;  %6449 = vmatpush.bf16.msrb.mxu3 %v14180_v14 }
  0xf0   :  { %v16341_v15 = vld [vmem:[%s25061_s1 + $0x1a9c] sm:$0xf0] }
  0xf1   :  { %v13891_v16 = vld [vmem:[%s25061_s1 + $0x1c80] sm:$0xf]  ;;  %v13636_v26 = vor.u32 %v16341_v15, %v13635_v13 }
  0xf2   :  { %v16405_v17 = vld [vmem:[%s25061_s1 + $0x1c9c] sm:$0xf0] }
  0xf3   :  { %v14147_v18 = vld [vmem:[%s25061_s1 + $0x1e80] sm:$0xf]  ;;  %v13892_v28 = vor.u32 %v16405_v17, %v13891_v16 }
  0xf4   :  { %v16469_v20 = vld [vmem:[%s25061_s1 + $0x1e9c] sm:$0xf0] }
  0xf5   :  { %v13347_v22 = vld [vmem:[%s25061_s1 + $0x1840] sm:$0xf]  ;;  %v14148_v32 = vor.u32 %v16469_v20, %v14147_v18 }
  0xf6   :  { %v16269_v25 = vld [vmem:[%s25061_s1 + $0x185c] sm:$0xf0] }
  0xf7   :  { %v13603_v29 = vld [vmem:[%s25061_s1 + $0x1a40] sm:$0xf] }
  0xf8   :  { %v16333_v30 = vld [vmem:[%s25061_s1 + $0x1a5c] sm:$0xf0] }
  0xf9   :  { %v13859_v31 = vld [vmem:[%s25061_s1 + $0x1c40] sm:$0xf] }
  0xfa   :  { %v16397_v33 = vld [vmem:[%s25061_s1 + $0x1c5c] sm:$0xf0] }
  0xfb   :  { %v14115_v37 = vld [vmem:[%s25061_s1 + $0x1e40] sm:$0xf] }
  0xfc   :  { %v16461_v38 = vld [vmem:[%s25061_s1 + $0x1e5c] sm:$0xf0] }
  0xfd   :  { %v13315_v41 = vld [vmem:[%s25061_s1 + $0x1800] sm:$0xf] }
  0xfe   :  { %12 = vsyncpa [#allocation3], 0  ;;  %6411 = vmatpush.bf16.msrb.mxu0 %v13380_v21  ;;  %v13348_v45 = vor.u32 %v16269_v25, %v13347_v22  ;;  %v16261_v46 = vld [vmem:[%s25061_s1 + $0x181c] sm:$0xf0]  ;;  %6424 = vmatpush.bf16.msrb.mxu1 %v13636_v26  ;;  %v13604_v49 = vor.u32 %v16333_v30, %v13603_v29  ;;  %v13860_v50 = vor.u32 %v16397_v33, %v13859_v31  ;;  %v15545_v56 = vld [vmem:[%s25061_s1 + $0x1c4] sm:$0xf] }
  0xff   :  { %v13571_v47 = vld [vmem:[%s25061_s1 + $0x1a00] sm:$0xf]  ;;  %6437 = vmatpush.bf16.msrb.mxu2 %v13892_v28  ;;  %6450 = vmatpush.bf16.msrb.mxu3 %v14148_v32  ;;  %v14116_v54 = vor.u32 %v16461_v38, %v14115_v37  ;;  %v10469_v57 = vld [vmem:[%s25061_s1 + $0x1e0] sm:$0xf0]  ;;  %v13316_v61 = vor.u32 %v16261_v46, %v13315_v41  ;;  %vm10212_vm0 = vcmask 1041408   ;;  %s10232_s11 = sshll.u32 %s25067_s7, 4  ;;  %s10233_s11 = int_to_ptr.hbm [resolvable:$true] %s10232_s11 }
 0x100   :  { %v16325_v48 = vld [vmem:[%s25061_s1 + $0x1a1c] sm:$0xf0]  ;;  %v15609_v58 = vld [vmem:[%s25061_s1 + $0x3c4] sm:$0xf]  ;;  %v10472_v6 = vor.u32 %v15545_v56, %v10469_v57 }
 0x101   :  { %v13827_v51 = vld [vmem:[%s25061_s1 + $0x1c00] sm:$0xf]  ;;  %v10725_v59 = vld [vmem:[%s25061_s1 + $0x3e0] sm:$0xf0]  ;;  %v13572_v1 = vor.u32 %v16325_v48, %v13571_v47 }
 0x102   :  { %v16389_v52 = vld [vmem:[%s25061_s1 + $0x1c1c] sm:$0xf0]  ;;  %v15673_v60 = vld [vmem:[%s25061_s1 + $0x5c4] sm:$0xf]  ;;  %6412 = vmatpush.bf16.msrb.mxu0 %v13348_v45  ;;  %6425 = vmatpush.bf16.msrb.mxu1 %v13604_v49  ;;  %v10728_v9 = vor.u32 %v15609_v58, %v10725_v59 }
 0x103   :  { %v14083_v53 = vld [vmem:[%s25061_s1 + $0x1e00] sm:$0xf]  ;;  %v10981_v62 = vld [vmem:[%s25061_s1 + $0x5e0] sm:$0xf0]  ;;  %6438 = vmatpush.bf16.msrb.mxu2 %v13860_v50  ;;  %v13828_v2 = vor.u32 %v16389_v52, %v13827_v51  ;;  %6451 = vmatpush.bf16.msrb.mxu3 %v14116_v54 }
 0x104   :  { %v16453_v55 = vld [vmem:[%s25061_s1 + $0x1e1c] sm:$0xf0]  ;;  %v15737_v63 = vld [vmem:[%s25061_s1 + $0x7c4] sm:$0xf]  ;;  %v10984_v10 = vor.u32 %v15673_v60, %v10981_v62 }
 0x105   :  { %v11237_v0 = vld [vmem:[%s25061_s1 + $0x7e0] sm:$0xf0]  ;;  %v54_v4 = vld.sshfl [vmem:[#allocation1 + $0x30] sm:$0xff pattern:$0x73625140]  ;;  %v14084_v5 = vor.u32 %v16453_v55, %v14083_v53 }
 0x106   :  { %v52_v3 = vld.sshfl [vmem:[#allocation1 + $0x20] sm:$0xff pattern:$0x73625140]  ;;  %v53_v7 = vld.sshfl [vmem:[#allocation1 + $0x28] sm:$0xff pattern:$0x73625140]  ;;  %6413 = vmatpush.bf16.msrb.mxu0 %v13316_v61  ;;  %v11240_v14 = vor.u32 %v15737_v63, %v11237_v0  ;;  %6426 = vmatpush.bf16.msrb.mxu1 %v13572_v1  ;;  %v17742_v20 = vpack.c.bf16 %v54_v4, %v54_v4 }
 0x107   :  { %v55_v8 = vld.sshfl [vmem:[#allocation1 + $0x38] sm:$0xff pattern:$0x73625140]  ;;  %v15537_v11 = vld [vmem:[%s25061_s1 + $0x184] sm:$0xf]  ;;  %v17731_v15 = vpack.c.bf16 %v52_v3, %v52_v3  ;;  %6439 = vmatpush.bf16.msrb.mxu2 %v13828_v2  ;;  %v17744_v21 = vpack.c.bf16 %v53_v7, %v53_v7  ;;  %6452 = vmatpush.bf16.msrb.mxu3 %v14084_v5 }
 0x108   :  { %v10437_v12 = vld [vmem:[%s25061_s1 + $0x1a0] sm:$0xf0]  ;;  %v17752_v26 = vpack.c.bf16 %v55_v8, %v55_v8 }
 0x109   :  { %v15601_v13 = vld [vmem:[%s25061_s1 + $0x384] sm:$0xf]  ;;  %v10440_v28 = vor.u32 %v15537_v11, %v10437_v12  ;;  %6414 = vmatmul.bf16.vlgmr.msrb.gmra.mxu0 %v17731_v15  ;;  %6427 = vmatmul.bf16.vlgmr.msrb.gmra.mxu1 %v17744_v21 }
 0x10a   :  { %v10693_v16 = vld [vmem:[%s25061_s1 + $0x3a0] sm:$0xf0]  ;;  %6458 = vmatpush.bf16.msra.mxu0 %v10472_v6  ;;  %6471 = vmatpush.bf16.msra.mxu1 %v10728_v9 }
 0x10b   :  { %v15665_v17 = vld [vmem:[%s25061_s1 + $0x584] sm:$0xf]  ;;  %6484 = vmatpush.bf16.msra.mxu2 %v10984_v10  ;;  %v10696_v29 = vor.u32 %v15601_v13, %v10693_v16  ;;  %6497 = vmatpush.bf16.msra.mxu3 %v11240_v14 }
 0x10c   :  { %v10949_v18 = vld [vmem:[%s25061_s1 + $0x5a0] sm:$0xf0]  ;;  %6440 = vmatmul.bf16.vlgmr.msrb.gmra.mxu2 %v17742_v20  ;;  %6453 = vmatmul.bf16.vlgmr.msrb.gmra.mxu3 %v17752_v26 }
 0x10d   :  { %v15729_v22 = vld [vmem:[%s25061_s1 + $0x784] sm:$0xf]  ;;  %v10952_v30 = vor.u32 %v15665_v17, %v10949_v18 }
 0x10e   :  { %v11205_v25 = vld [vmem:[%s25061_s1 + $0x7a0] sm:$0xf0]  ;;  %6459 = vmatpush.bf16.msra.mxu0 %v10440_v28  ;;  %6472 = vmatpush.bf16.msra.mxu1 %v10696_v29 }
 0x10f   :  { %v15529_v31 = vld [vmem:[%s25061_s1 + $0x144] sm:$0xf]  ;;  %v11208_v37 = vor.u32 %v15729_v22, %v11205_v25  ;;  %6485 = vmatpush.bf16.msra.mxu2 %v10952_v30 }
 0x110   :  { %v10405_v32 = vld [vmem:[%s25061_s1 + $0x160] sm:$0xf0] }
 0x111   :  { %v15593_v33 = vld [vmem:[%s25061_s1 + $0x344] sm:$0xf]  ;;  %v10408_v48 = vor.u32 %v15529_v31, %v10405_v32  ;;  %6498 = vmatpush.bf16.msra.mxu3 %v11208_v37 }
 0x112   :  { %v10661_v38 = vld [vmem:[%s25061_s1 + $0x360] sm:$0xf0] }
 0x113   :  { %v15657_v41 = vld [vmem:[%s25061_s1 + $0x544] sm:$0xf]  ;;  %v10664_v49 = vor.u32 %v15593_v33, %v10661_v38  ;;  %6460 = vmatpush.bf16.msra.mxu0 %v10408_v48 }
 0x114   :  { %v10917_v45 = vld [vmem:[%s25061_s1 + $0x560] sm:$0xf0] }
 0x115   :  { %v15721_v46 = vld [vmem:[%s25061_s1 + $0x744] sm:$0xf]  ;;  %v10920_v50 = vor.u32 %v15657_v41, %v10917_v45  ;;  %6473 = vmatpush.bf16.msra.mxu1 %v10664_v49 }
 0x116   :  { %v11173_v47 = vld [vmem:[%s25061_s1 + $0x760] sm:$0xf0] }
 0x117   :  { %v15521_v51 = vld [vmem:[%s25061_s1 + $0x104] sm:$0xf]  ;;  %v11176_v54 = vor.u32 %v15721_v46, %v11173_v47  ;;  %6486 = vmatpush.bf16.msra.mxu2 %v10920_v50 }
 0x118   :  { %v10373_v52 = vld [vmem:[%s25061_s1 + $0x120] sm:$0xf0] }
 0x119   :  { %v15585_v53 = vld [vmem:[%s25061_s1 + $0x304] sm:$0xf]  ;;  %v10376_v60 = vor.u32 %v15521_v51, %v10373_v52  ;;  %6499 = vmatpush.bf16.msra.mxu3 %v11176_v54 }
 0x11a   :  { %v10629_v55 = vld [vmem:[%s25061_s1 + $0x320] sm:$0xf0] }
 0x11b   :  { %v15649_v56 = vld [vmem:[%s25061_s1 + $0x504] sm:$0xf]  ;;  %v10632_v61 = vor.u32 %v15585_v53, %v10629_v55  ;;  %6461 = vmatpush.bf16.msra.mxu0 %v10376_v60 }
 0x11c   :  { %v10885_v57 = vld [vmem:[%s25061_s1 + $0x520] sm:$0xf0] }
 0x11d   :  { %v15713_v58 = vld [vmem:[%s25061_s1 + $0x704] sm:$0xf]  ;;  %v10888_v62 = vor.u32 %v15649_v56, %v10885_v57  ;;  %6474 = vmatpush.bf16.msra.mxu1 %v10632_v61 }
 0x11e   :  { %v11141_v59 = vld [vmem:[%s25061_s1 + $0x720] sm:$0xf0] }
 0x11f   :  { %v15513_v63 = vld [vmem:[%s25061_s1 + $0xc4] sm:$0xf]  ;;  %v11144_v2 = vor.u32 %v15713_v58, %v11141_v59  ;;  %6487 = vmatpush.bf16.msra.mxu2 %v10888_v62 }
 0x120   :  { %v10341_v0 = vld [vmem:[%s25061_s1 + $0xe0] sm:$0xf0] }
 0x121   :  { %v15577_v1 = vld [vmem:[%s25061_s1 + $0x2c4] sm:$0xf]  ;;  %v10344_v8 = vor.u32 %v15513_v63, %v10341_v0  ;;  %6500 = vmatpush.bf16.msra.mxu3 %v11144_v2 }
 0x122   :  { %v10597_v3 = vld [vmem:[%s25061_s1 + $0x2e0] sm:$0xf0] }
 0x123   :  { %v15641_v4 = vld [vmem:[%s25061_s1 + $0x4c4] sm:$0xf]  ;;  %v10600_v9 = vor.u32 %v15577_v1, %v10597_v3  ;;  %6462 = vmatpush.bf16.msra.mxu0 %v10344_v8 }
 0x124   :  { %v10853_v5 = vld [vmem:[%s25061_s1 + $0x4e0] sm:$0xf0] }
 0x125   :  { %v15705_v6 = vld [vmem:[%s25061_s1 + $0x6c4] sm:$0xf]  ;;  %v10856_v10 = vor.u32 %v15641_v4, %v10853_v5  ;;  %6475 = vmatpush.bf16.msra.mxu1 %v10600_v9 }
 0x126   :  { %v11109_v7 = vld [vmem:[%s25061_s1 + $0x6e0] sm:$0xf0] }
 0x127   :  { %v15505_v11 = vld [vmem:[%s25061_s1 + $0x84] sm:$0xf]  ;;  %v11112_v14 = vor.u32 %v15705_v6, %v11109_v7  ;;  %6488 = vmatpush.bf16.msra.mxu2 %v10856_v10 }
 0x128   :  { %v10309_v12 = vld [vmem:[%s25061_s1 + $0xa0] sm:$0xf0] }
 0x129   :  { %v15569_v13 = vld [vmem:[%s25061_s1 + $0x284] sm:$0xf]  ;;  %v10312_v28 = vor.u32 %v15505_v11, %v10309_v12  ;;  %6501 = vmatpush.bf16.msra.mxu3 %v11112_v14 }
 0x12a   :  { %v10565_v16 = vld [vmem:[%s25061_s1 + $0x2a0] sm:$0xf0] }
 0x12b   :  { %v15633_v17 = vld [vmem:[%s25061_s1 + $0x484] sm:$0xf]  ;;  %v10568_v29 = vor.u32 %v15569_v13, %v10565_v16  ;;  %6463 = vmatpush.bf16.msra.mxu0 %v10312_v28 }
 0x12c   :  { %v10821_v18 = vld [vmem:[%s25061_s1 + $0x4a0] sm:$0xf0] }
 0x12d   :  { %v15697_v22 = vld [vmem:[%s25061_s1 + $0x684] sm:$0xf]  ;;  %v10824_v30 = vor.u32 %v15633_v17, %v10821_v18  ;;  %6476 = vmatpush.bf16.msra.mxu1 %v10568_v29 }
 0x12e   :  { %v11077_v25 = vld [vmem:[%s25061_s1 + $0x6a0] sm:$0xf0] }
 0x12f   :  { %v15497_v31 = vld [vmem:[%s25061_s1 + $0x44] sm:$0xf]  ;;  %v11080_v37 = vor.u32 %v15697_v22, %v11077_v25  ;;  %6489 = vmatpush.bf16.msra.mxu2 %v10824_v30 }
 0x130   :  { %v10277_v32 = vld [vmem:[%s25061_s1 + $0x60] sm:$0xf0] }
 0x131   :  { %v15561_v33 = vld [vmem:[%s25061_s1 + $0x244] sm:$0xf]  ;;  %v10280_v48 = vor.u32 %v15497_v31, %v10277_v32  ;;  %6502 = vmatpush.bf16.msra.mxu3 %v11080_v37 }
 0x132   :  { %v10533_v38 = vld [vmem:[%s25061_s1 + $0x260] sm:$0xf0] }
 0x133   :  { %v15625_v41 = vld [vmem:[%s25061_s1 + $0x444] sm:$0xf]  ;;  %v10536_v51 = vor.u32 %v15561_v33, %v10533_v38  ;;  %6464 = vmatpush.bf16.msra.mxu0 %v10280_v48 }
 0x134   :  { %v10789_v45 = vld [vmem:[%s25061_s1 + $0x460] sm:$0xf0] }
 0x135   :  { %v15689_v46 = vld [vmem:[%s25061_s1 + $0x644] sm:$0xf]  ;;  %v10792_v52 = vor.u32 %v15625_v41, %v10789_v45  ;;  %6477 = vmatpush.bf16.msra.mxu1 %v10536_v51 }
 0x136   :  { %v11045_v47 = vld [vmem:[%s25061_s1 + $0x660] sm:$0xf0] }
 0x137   :  { %v15489_v49 = vld [vmem:[%s25061_s1 + $0x4] sm:$0xf]  ;;  %v11048_v56 = vor.u32 %v15689_v46, %v11045_v47  ;;  %6490 = vmatpush.bf16.msra.mxu2 %v10792_v52 }
 0x138   :  { %v10245_v50 = vld [vmem:[%s25061_s1 + $0x20] sm:$0xf0] }
 0x139   :  { %v15553_v53 = vld [vmem:[%s25061_s1 + $0x204] sm:$0xf]  ;;  %v10248_v63 = vor.u32 %v15489_v49, %v10245_v50  ;;  %6503 = vmatpush.bf16.msra.mxu3 %v11048_v56 }
 0x13a   :  { %v10501_v54 = vld [vmem:[%s25061_s1 + $0x220] sm:$0xf0] }
 0x13b   :  { %v15617_v55 = vld [vmem:[%s25061_s1 + $0x404] sm:$0xf]  ;;  %v10504_v3 = vor.u32 %v15553_v53, %v10501_v54  ;;  %6465 = vmatpush.bf16.msra.mxu0 %v10248_v63 }
 0x13c   :  { %v10757_v57 = vld [vmem:[%s25061_s1 + $0x420] sm:$0xf0] }
 0x13d   :  { %v15681_v58 = vld [vmem:[%s25061_s1 + $0x604] sm:$0xf]  ;;  %v10760_v4 = vor.u32 %v15617_v55, %v10757_v57  ;;  %6478 = vmatpush.bf16.msra.mxu1 %v10504_v3 }
 0x13e   :  { %v11013_v59 = vld [vmem:[%s25061_s1 + $0x620] sm:$0xf0]  ;;  %6466 = vmatmul.bf16.vlgmr.msra.gmra.mxu0 %v17214_v36 }
 0x13f   :  { %v15801_v60 = vld [vmem:[%s25061_s1 + $0x9c4] sm:$0xf]  ;;  %v11016_v7 = vor.u32 %v15681_v58, %v11013_v59  ;;  %6491 = vmatpush.bf16.msra.mxu2 %v10760_v4 }
 0x140   :  { %v11493_v61 = vld [vmem:[%s25061_s1 + $0x9e0] sm:$0xf0]  ;;  %6479 = vmatmul.bf16.vlgmr.msra.gmra.mxu1 %v17224_v43 }
 0x141   :  { %v15865_v62 = vld [vmem:[%s25061_s1 + $0xbc4] sm:$0xf]  ;;  %v11496_v8 = vor.u32 %v15801_v60, %v11493_v61  ;;  %6504 = vmatpush.bf16.msra.mxu3 %v11016_v7 }
 0x142   :  { %v11749_v0 = vld [vmem:[%s25061_s1 + $0xbe0] sm:$0xf0]  ;;  %6492 = vmatmul.bf16.vlgmr.msra.gmra.mxu2 %v17212_v35 }
 0x143   :  { %v15929_v1 = vld [vmem:[%s25061_s1 + $0xdc4] sm:$0xf]  ;;  %v11752_v9 = vor.u32 %v15865_v62, %v11749_v0  ;;  %6510 = vmatpush.bf16.msrb.mxu0 %v11496_v8 }
 0x144   :  { %v12005_v2 = vld [vmem:[%s25061_s1 + $0xde0] sm:$0xf0]  ;;  %6505 = vmatmul.bf16.vlgmr.msra.gmra.mxu3 %v17222_v42 }
 0x145   :  { %v15993_v5 = vld [vmem:[%s25061_s1 + $0xfc4] sm:$0xf]  ;;  %v12008_v10 = vor.u32 %v15929_v1, %v12005_v2  ;;  %6523 = vmatpush.bf16.msrb.mxu1 %v11752_v9 }
 0x146   :  { %v12261_v6 = vld [vmem:[%s25061_s1 + $0xfe0] sm:$0xf0] }
 0x147   :  { %v15793_v11 = vld [vmem:[%s25061_s1 + $0x984] sm:$0xf]  ;;  %v12264_v14 = vor.u32 %v15993_v5, %v12261_v6  ;;  %6536 = vmatpush.bf16.msrb.mxu2 %v12008_v10 }
 0x148   :  { %v11461_v12 = vld [vmem:[%s25061_s1 + $0x9a0] sm:$0xf0] }
 0x149   :  { %v15857_v13 = vld [vmem:[%s25061_s1 + $0xb84] sm:$0xf]  ;;  %v11464_v28 = vor.u32 %v15793_v11, %v11461_v12  ;;  %6549 = vmatpush.bf16.msrb.mxu3 %v12264_v14 }
 0x14a   :  { %v11717_v16 = vld [vmem:[%s25061_s1 + $0xba0] sm:$0xf0] }
 0x14b   :  { %v15921_v17 = vld [vmem:[%s25061_s1 + $0xd84] sm:$0xf]  ;;  %v11720_v29 = vor.u32 %v15857_v13, %v11717_v16  ;;  %6511 = vmatpush.bf16.msrb.mxu0 %v11464_v28 }
 0x14c   :  { %v11973_v18 = vld [vmem:[%s25061_s1 + $0xda0] sm:$0xf0] }
 0x14d   :  { %v15985_v22 = vld [vmem:[%s25061_s1 + $0xf84] sm:$0xf]  ;;  %v11976_v30 = vor.u32 %v15921_v17, %v11973_v18  ;;  %6524 = vmatpush.bf16.msrb.mxu1 %v11720_v29 }
 0x14e   :  { %v12229_v25 = vld [vmem:[%s25061_s1 + $0xfa0] sm:$0xf0] }
 0x14f   :  { %v15785_v31 = vld [vmem:[%s25061_s1 + $0x944] sm:$0xf]  ;;  %v12232_v37 = vor.u32 %v15985_v22, %v12229_v25  ;;  %6537 = vmatpush.bf16.msrb.mxu2 %v11976_v30 }
 0x150   :  { %v11429_v32 = vld [vmem:[%s25061_s1 + $0x960] sm:$0xf0] }
 0x151   :  { %v15849_v33 = vld [vmem:[%s25061_s1 + $0xb44] sm:$0xf]  ;;  %v11432_v48 = vor.u32 %v15785_v31, %v11429_v32  ;;  %6550 = vmatpush.bf16.msrb.mxu3 %v12232_v37 }
 0x152   :  { %v11685_v38 = vld [vmem:[%s25061_s1 + $0xb60] sm:$0xf0] }
 0x153   :  { %v15913_v41 = vld [vmem:[%s25061_s1 + $0xd44] sm:$0xf]  ;;  %v11688_v49 = vor.u32 %v15849_v33, %v11685_v38  ;;  %6512 = vmatpush.bf16.msrb.mxu0 %v11432_v48 }
 0x154   :  { %v11941_v45 = vld [vmem:[%s25061_s1 + $0xd60] sm:$0xf0] }
 0x155   :  { %v15977_v46 = vld [vmem:[%s25061_s1 + $0xf44] sm:$0xf]  ;;  %v11944_v50 = vor.u32 %v15913_v41, %v11941_v45  ;;  %6525 = vmatpush.bf16.msrb.mxu1 %v11688_v49 }
 0x156   :  { %v12197_v47 = vld [vmem:[%s25061_s1 + $0xf60] sm:$0xf0] }
 0x157   :  { %v15777_v51 = vld [vmem:[%s25061_s1 + $0x904] sm:$0xf]  ;;  %v12200_v54 = vor.u32 %v15977_v46, %v12197_v47  ;;  %6538 = vmatpush.bf16.msrb.mxu2 %v11944_v50 }
 0x158   :  { %v11397_v52 = vld [vmem:[%s25061_s1 + $0x920] sm:$0xf0] }
 0x159   :  { %v15841_v53 = vld [vmem:[%s25061_s1 + $0xb04] sm:$0xf]  ;;  %v11400_v60 = vor.u32 %v15777_v51, %v11397_v52  ;;  %6551 = vmatpush.bf16.msrb.mxu3 %v12200_v54 }
 0x15a   :  { %v11653_v55 = vld [vmem:[%s25061_s1 + $0xb20] sm:$0xf0] }
 0x15b   :  { %v15905_v56 = vld [vmem:[%s25061_s1 + $0xd04] sm:$0xf]  ;;  %v11656_v61 = vor.u32 %v15841_v53, %v11653_v55  ;;  %6513 = vmatpush.bf16.msrb.mxu0 %v11400_v60  ;;  %v6259_v53 = vpop.f32.mrf.mxu0 }
 0x15c   :  { %v11909_v57 = vld [vmem:[%s25061_s1 + $0xd20] sm:$0xf0] }
 0x15d   :  { %v15969_v58 = vld [vmem:[%s25061_s1 + $0xf04] sm:$0xf]  ;;  %v11912_v62 = vor.u32 %v15905_v56, %v11909_v57  ;;  %6526 = vmatpush.bf16.msrb.mxu1 %v11656_v61 }
 0x15e   :  { %v12165_v59 = vld [vmem:[%s25061_s1 + $0xf20] sm:$0xf0] }
 0x15f   :  { %v15769_v63 = vld [vmem:[%s25061_s1 + $0x8c4] sm:$0xf]  ;;  %v12168_v2 = vor.u32 %v15969_v58, %v12165_v59  ;;  %6539 = vmatpush.bf16.msrb.mxu2 %v11912_v62 }
 0x160   :  { %v11365_v0 = vld [vmem:[%s25061_s1 + $0x8e0] sm:$0xf0] }
 0x161   :  { %v15833_v1 = vld [vmem:[%s25061_s1 + $0xac4] sm:$0xf]  ;;  %v11368_v8 = vor.u32 %v15769_v63, %v11365_v0  ;;  %6552 = vmatpush.bf16.msrb.mxu3 %v12168_v2 }
 0x162   :  { %v11621_v3 = vld [vmem:[%s25061_s1 + $0xae0] sm:$0xf0] }
 0x163   :  { %v15897_v4 = vld [vmem:[%s25061_s1 + $0xcc4] sm:$0xf]  ;;  %v11624_v10 = vor.u32 %v15833_v1, %v11621_v3  ;;  %6514 = vmatpush.bf16.msrb.mxu0 %v11368_v8  ;;  %v6272_v3 = vpop.f32.mrf.mxu1 }
 0x164   :  { %v11877_v5 = vld [vmem:[%s25061_s1 + $0xce0] sm:$0xf0] }
 0x165   :  { %v15961_v6 = vld [vmem:[%s25061_s1 + $0xec4] sm:$0xf]  ;;  %v11880_v11 = vor.u32 %v15897_v4, %v11877_v5  ;;  %6527 = vmatpush.bf16.msrb.mxu1 %v11624_v10 }
 0x166   :  { %v12133_v7 = vld [vmem:[%s25061_s1 + $0xee0] sm:$0xf0] }
 0x167   :  { %v15761_v9 = vld [vmem:[%s25061_s1 + $0x884] sm:$0xf]  ;;  %v12136_v16 = vor.u32 %v15961_v6, %v12133_v7  ;;  %6540 = vmatpush.bf16.msrb.mxu2 %v11880_v11 }
 0x168   :  { %v11333_v12 = vld [vmem:[%s25061_s1 + $0x8a0] sm:$0xf0] }
 0x169   :  { %v15825_v13 = vld [vmem:[%s25061_s1 + $0xa84] sm:$0xf]  ;;  %v11336_v29 = vor.u32 %v15761_v9, %v11333_v12  ;;  %6553 = vmatpush.bf16.msrb.mxu3 %v12136_v16  ;;  %v6285_v16 = vpop.f32.mrf.mxu2 }
 0x16a   :  { %v11589_v14 = vld [vmem:[%s25061_s1 + $0xaa0] sm:$0xf0] }
 0x16b   :  { %v15889_v17 = vld [vmem:[%s25061_s1 + $0xc84] sm:$0xf]  ;;  %v11592_v31 = vor.u32 %v15825_v13, %v11589_v14  ;;  %6515 = vmatpush.bf16.msrb.mxu0 %v11336_v29 }
 0x16c   :  { %v11845_v18 = vld [vmem:[%s25061_s1 + $0xca0] sm:$0xf0] }
 0x16d   :  { %v1112_v22 = vld [vmem:[%s25062_s2] sm:$0xff]  ;;  %v11848_v32 = vor.u32 %v15889_v17, %v11845_v18  ;;  %6528 = vmatpush.bf16.msrb.mxu1 %v11592_v31 }
 0x16e   :  { %v15953_v25 = vld [vmem:[%s25061_s1 + $0xe84] sm:$0xf]  ;;  %v1114_v38 = vperm.slane %v1112_v22, 0 }
 0x16f   :  { %v12101_v28 = vld [vmem:[%s25061_s1 + $0xea0] sm:$0xf0]  ;;  %6541 = vmatpush.bf16.msrb.mxu2 %v11848_v32 }
 0x170   :  { %v15753_v30 = vld [vmem:[%s25061_s1 + $0x844] sm:$0xf]  ;;  %v12104_v41 = vor.u32 %v15953_v25, %v12101_v28  ;;  %v6260_v59 = vadd.f32 %v6259_v53, %v1114_v38  ;;  %v6261_v38 = vpop.f32.mrf.mxu0  ;;  %v6274_v53 = vpop.f32.mrf.mxu1 }
 0x171   :  { %v11301_v33 = vld [vmem:[%s25061_s1 + $0x860] sm:$0xf0] }
 0x172   :  { %v15817_v37 = vld [vmem:[%s25061_s1 + $0xa44] sm:$0xf]  ;;  %v11304_v50 = vor.u32 %v15753_v30, %v11301_v33  ;;  %6554 = vmatpush.bf16.msrb.mxu3 %v12104_v41  ;;  %v6273_v8 = vadd.f32 %v6272_v3, %v6260_v59  ;;  %v6298_v30 = vpop.f32.mrf.mxu3 }
 0x173   :  { %v11557_v45 = vld [vmem:[%s25061_s1 + $0xa60] sm:$0xf0] }
 0x174   :  { %v15881_v46 = vld [vmem:[%s25061_s1 + $0xc44] sm:$0xf]  ;;  %v11560_v54 = vor.u32 %v15817_v37, %v11557_v45  ;;  %6516 = vmatpush.bf16.msrb.mxu0 %v11304_v50  ;;  %v6286_v29 = vadd.f32 %v6285_v16, %v6273_v8 }
 0x175   :  { %v11813_v47 = vld [vmem:[%s25061_s1 + $0xc60] sm:$0xf0] }
 0x176   :  { %v15945_v48 = vld [vmem:[%s25061_s1 + $0xe44] sm:$0xf]  ;;  %v11816_v55 = vor.u32 %v15881_v46, %v11813_v47  ;;  %6529 = vmatpush.bf16.msrb.mxu1 %v11560_v54  ;;  %v6299_v46 = vadd.f32 %v6298_v30, %v6286_v29 }
 0x177   :  { %v12069_v49 = vld [vmem:[%s25061_s1 + $0xe60] sm:$0xf0] }
 0x178   :  { %v15745_v51 = vld [vmem:[%s25061_s1 + $0x804] sm:$0xf]  ;;  %v12072_v60 = vor.u32 %v15945_v48, %v12069_v49  ;;  %6542 = vmatpush.bf16.msrb.mxu2 %v11816_v55 }
 0x179   :  { %v11269_v52 = vld [vmem:[%s25061_s1 + $0x820] sm:$0xf0] }
 0x17a   :  { %v15809_v56 = vld [vmem:[%s25061_s1 + $0xa04] sm:$0xf]  ;;  %v11272_v4 = vor.u32 %v15745_v51, %v11269_v52  ;;  %6555 = vmatpush.bf16.msrb.mxu3 %v12072_v60  ;;  %v6300_v3 = vpop.f32.mrf.mxu3 }
 0x17b   :  { %v11525_v57 = vld [vmem:[%s25061_s1 + $0xa20] sm:$0xf0] }
 0x17c   :  { %v15873_v58 = vld [vmem:[%s25061_s1 + $0xc04] sm:$0xf]  ;;  %v11528_v9 = vor.u32 %v15809_v56, %v11525_v57  ;;  %6517 = vmatpush.bf16.msrb.mxu0 %v11272_v4 }
 0x17d   :  { %v11781_v61 = vld [vmem:[%s25061_s1 + $0xc20] sm:$0xf0] }
 0x17e   :  { %v15937_v62 = vld [vmem:[%s25061_s1 + $0xe04] sm:$0xf]  ;;  %v11784_v10 = vor.u32 %v15873_v58, %v11781_v61  ;;  %6530 = vmatpush.bf16.msrb.mxu1 %v11528_v9  ;;  %v6287_v61 = vpop.f32.mrf.mxu2 }
 0x17f   :  { %v12037_v63 = vld [vmem:[%s25061_s1 + $0xe20] sm:$0xf0]  ;;  %6518 = vmatmul.bf16.vlgmr.msrb.gmra.mxu0 %v17340_v39 }
 0x180   :  { %v16057_v0 = vld [vmem:[%s25061_s1 + $0x11c4] sm:$0xf]  ;;  %v12040_v13 = vor.u32 %v15937_v62, %v12037_v63  ;;  %6543 = vmatpush.bf16.msrb.mxu2 %v11784_v10 }
 0x181   :  { %v12517_v1 = vld [vmem:[%s25061_s1 + $0x11e0] sm:$0xf0]  ;;  %6531 = vmatmul.bf16.vlgmr.msrb.gmra.mxu1 %v17344_v44 }
 0x182   :  { %v16121_v2 = vld [vmem:[%s25061_s1 + $0x13c4] sm:$0xf]  ;;  %v12520_v14 = vor.u32 %v16057_v0, %v12517_v1  ;;  %6556 = vmatpush.bf16.msrb.mxu3 %v12040_v13 }
 0x183   :  { %v12773_v5 = vld [vmem:[%s25061_s1 + $0x13e0] sm:$0xf0]  ;;  %6544 = vmatmul.bf16.vlgmr.msrb.gmra.mxu2 %v17332_v34 }
 0x184   :  { %v16185_v6 = vld [vmem:[%s25061_s1 + $0x15c4] sm:$0xf]  ;;  %v12776_v17 = vor.u32 %v16121_v2, %v12773_v5  ;;  %6562 = vmatpush.bf16.msra.mxu0 %v12520_v14 }
 0x185   :  { %v13029_v7 = vld [vmem:[%s25061_s1 + $0x15e0] sm:$0xf0]  ;;  %6557 = vmatmul.bf16.vlgmr.msrb.gmra.mxu3 %v17342_v40 }
 0x186   :  { %v16249_v11 = vld [vmem:[%s25061_s1 + $0x17c4] sm:$0xf]  ;;  %v13032_v18 = vor.u32 %v16185_v6, %v13029_v7  ;;  %6575 = vmatpush.bf16.msra.mxu1 %v12776_v17 }
 0x187   :  { %v13285_v12 = vld [vmem:[%s25061_s1 + $0x17e0] sm:$0xf0] }
 0x188   :  { %v16049_v22 = vld [vmem:[%s25061_s1 + $0x1184] sm:$0xf]  ;;  %v13288_v31 = vor.u32 %v16249_v11, %v13285_v12  ;;  %6588 = vmatpush.bf16.msra.mxu2 %v13032_v18  ;;  %v6311_v11 = vpop.f32.mrf.mxu0 }
 0x189   :  { %v12485_v25 = vld [vmem:[%s25061_s1 + $0x11a0] sm:$0xf0]  ;;  %v6312_v18 = vadd.f32 %v6311_v11, %v6299_v46 }
 0x18a   :  { %v16113_v28 = vld [vmem:[%s25061_s1 + $0x1384] sm:$0xf]  ;;  %v12488_v47 = vor.u32 %v16049_v22, %v12485_v25  ;;  %6601 = vmatpush.bf16.msra.mxu3 %v13288_v31  ;;  %v6324_v22 = vpop.f32.mrf.mxu1 }
 0x18b   :  { %v12741_v32 = vld [vmem:[%s25061_s1 + $0x13a0] sm:$0xf0] }
 0x18c   :  { %v16177_v33 = vld [vmem:[%s25061_s1 + $0x1584] sm:$0xf]  ;;  %v12744_v48 = vor.u32 %v16113_v28, %v12741_v32  ;;  %6563 = vmatpush.bf16.msra.mxu0 %v12488_v47 }
 0x18d   :  { %v12997_v37 = vld [vmem:[%s25061_s1 + $0x15a0] sm:$0xf0] }
 0x18e   :  { %v16241_v41 = vld [vmem:[%s25061_s1 + $0x1784] sm:$0xf]  ;;  %v13000_v49 = vor.u32 %v16177_v33, %v12997_v37  ;;  %6576 = vmatpush.bf16.msra.mxu1 %v12744_v48  ;;  %v6325_v33 = vadd.f32 %v6324_v22, %v6312_v18  ;;  %v6337_v48 = vpop.f32.mrf.mxu2 }
 0x18f   :  { %v13253_v45 = vld [vmem:[%s25061_s1 + $0x17a0] sm:$0xf0] }
 0x190   :  { %v16041_v50 = vld [vmem:[%s25061_s1 + $0x1144] sm:$0xf]  ;;  %v13256_v54 = vor.u32 %v16241_v41, %v13253_v45  ;;  %6589 = vmatpush.bf16.msra.mxu2 %v13000_v49  ;;  %v6338_v53 = vadd.f32 %v6337_v48, %v6325_v33 }
 0x191   :  { %v12453_v51 = vld [vmem:[%s25061_s1 + $0x1160] sm:$0xf0] }
 0x192   :  { %v16105_v52 = vld [vmem:[%s25061_s1 + $0x1344] sm:$0xf]  ;;  %v12456_v60 = vor.u32 %v16041_v50, %v12453_v51  ;;  %6602 = vmatpush.bf16.msra.mxu3 %v13256_v54  ;;  %v6350_v54 = vpop.f32.mrf.mxu3 }
 0x193   :  { %v12709_v55 = vld [vmem:[%s25061_s1 + $0x1360] sm:$0xf0] }
 0x194   :  { %v16169_v56 = vld [vmem:[%s25061_s1 + $0x1544] sm:$0xf]  ;;  %v12712_v62 = vor.u32 %v16105_v52, %v12709_v55  ;;  %6564 = vmatpush.bf16.msra.mxu0 %v12456_v60 }
 0x195   :  { %v12965_v57 = vld [vmem:[%s25061_s1 + $0x1560] sm:$0xf0] }
 0x196   :  { %v16233_v58 = vld [vmem:[%s25061_s1 + $0x1744] sm:$0xf]  ;;  %v12968_v63 = vor.u32 %v16169_v56, %v12965_v57  ;;  %6577 = vmatpush.bf16.msra.mxu1 %v12712_v62 }
 0x197   :  { %v13221_v59 = vld [vmem:[%s25061_s1 + $0x1760] sm:$0xf0] }
 0x198   :  { %v16033_v0 = vld [vmem:[%s25061_s1 + $0x1104] sm:$0xf]  ;;  %v13224_v4 = vor.u32 %v16233_v58, %v13221_v59  ;;  %6590 = vmatpush.bf16.msra.mxu2 %v12968_v63  ;;  %v18249_v58 = vadd.f32 %v6350_v54, %v6338_v53  ;;  %v6313_v59 = vpop.f32.mrf.mxu0 }
 0x199   :  { %v12421_v1 = vld [vmem:[%s25061_s1 + $0x1120] sm:$0xf0] }
 0x19a   :  { %v16097_v2 = vld [vmem:[%s25061_s1 + $0x1304] sm:$0xf]  ;;  %v12424_v10 = vor.u32 %v16033_v0, %v12421_v1  ;;  %6603 = vmatpush.bf16.msra.mxu3 %v13224_v4  ;;  %v6326_v1 = vpop.f32.mrf.mxu1 }
 0x19b   :  { %v12677_v5 = vld [vmem:[%s25061_s1 + $0x1320] sm:$0xf0] }
 0x19c   :  { %v16161_v6 = vld [vmem:[%s25061_s1 + $0x1504] sm:$0xf]  ;;  %v12680_v12 = vor.u32 %v16097_v2, %v12677_v5  ;;  %6565 = vmatpush.bf16.msra.mxu0 %v12424_v10 }
 0x19d   :  { %v12933_v7 = vld [vmem:[%s25061_s1 + $0x1520] sm:$0xf0] }
 0x19e   :  { %v16225_v8 = vld [vmem:[%s25061_s1 + $0x1704] sm:$0xf]  ;;  %v12936_v13 = vor.u32 %v16161_v6, %v12933_v7  ;;  %6578 = vmatpush.bf16.msra.mxu1 %v12680_v12 }
 0x19f   :  { %v13189_v9 = vld [vmem:[%s25061_s1 + $0x1720] sm:$0xf0] }
 0x1a0   :  { %v16025_v14 = vld [vmem:[%s25061_s1 + $0x10c4] sm:$0xf]  ;;  %v13192_v25 = vor.u32 %v16225_v8, %v13189_v9  ;;  %6591 = vmatpush.bf16.msra.mxu2 %v12936_v13 }
 0x1a1   :  { %v12389_v16 = vld [vmem:[%s25061_s1 + $0x10e0] sm:$0xf0] }
 0x1a2   :  { %v16089_v17 = vld [vmem:[%s25061_s1 + $0x12c4] sm:$0xf]  ;;  %v12392_v37 = vor.u32 %v16025_v14, %v12389_v16  ;;  %6604 = vmatpush.bf16.msra.mxu3 %v13192_v25 }
 0x1a3   :  { %v12645_v28 = vld [vmem:[%s25061_s1 + $0x12e0] sm:$0xf0] }
 0x1a4   :  { %v16153_v29 = vld [vmem:[%s25061_s1 + $0x14c4] sm:$0xf]  ;;  %v12648_v38 = vor.u32 %v16089_v17, %v12645_v28  ;;  %6566 = vmatpush.bf16.msra.mxu0 %v12392_v37  ;;  %v6339_v17 = vpop.f32.mrf.mxu2 }
 0x1a5   :  { %v12901_v30 = vld [vmem:[%s25061_s1 + $0x14e0] sm:$0xf0] }
 0x1a6   :  { %v16217_v31 = vld [vmem:[%s25061_s1 + $0x16c4] sm:$0xf]  ;;  %v12904_v41 = vor.u32 %v16153_v29, %v12901_v30  ;;  %6579 = vmatpush.bf16.msra.mxu1 %v12648_v38  ;;  %v6352_v29 = vpop.f32.mrf.mxu3 }
 0x1a7   :  { %v13157_v32 = vld [vmem:[%s25061_s1 + $0x16e0] sm:$0xf0]  ;;  %v6363_v29 = vpop.f32.mrf.mxu0 }
 0x1a8   :  { %v16017_v45 = vld [vmem:[%s25061_s1 + $0x1084] sm:$0xf]  ;;  %v13160_v49 = vor.u32 %v16217_v31, %v13157_v32  ;;  %6592 = vmatpush.bf16.msra.mxu2 %v12904_v41 }
 0x1a9   :  { %v12357_v46 = vld [vmem:[%s25061_s1 + $0x10a0] sm:$0xf0] }
 0x1aa   :  { %v16081_v47 = vld [vmem:[%s25061_s1 + $0x1284] sm:$0xf]  ;;  %v12360_v57 = vor.u32 %v16017_v45, %v12357_v46  ;;  %6605 = vmatpush.bf16.msra.mxu3 %v13160_v49 }
 0x1ab   :  { %v12613_v50 = vld [vmem:[%s25061_s1 + $0x12a0] sm:$0xf0] }
 0x1ac   :  { %v16145_v51 = vld [vmem:[%s25061_s1 + $0x1484] sm:$0xf]  ;;  %v12616_v60 = vor.u32 %v16081_v47, %v12613_v50  ;;  %6567 = vmatpush.bf16.msra.mxu0 %v12360_v57 }
 0x1ad   :  { %v12869_v52 = vld [vmem:[%s25061_s1 + $0x14a0] sm:$0xf0] }
 0x1ae   :  { %v16209_v55 = vld [vmem:[%s25061_s1 + $0x1684] sm:$0xf]  ;;  %v12872_v61 = vor.u32 %v16145_v51, %v12869_v52  ;;  %6580 = vmatpush.bf16.msra.mxu1 %v12616_v60 }
 0x1af   :  { %v13125_v56 = vld [vmem:[%s25061_s1 + $0x16a0] sm:$0xf0] }
 0x1b0   :  { %v16009_v62 = vld [vmem:[%s25061_s1 + $0x1044] sm:$0xf]  ;;  %v13128_v2 = vor.u32 %v16209_v55, %v13125_v56  ;;  %6593 = vmatpush.bf16.msra.mxu2 %v12872_v61 }
 0x1b1   :  { %v12325_v63 = vld [vmem:[%s25061_s1 + $0x1060] sm:$0xf0] }
 0x1b2   :  { %v16073_v0 = vld [vmem:[%s25061_s1 + $0x1244] sm:$0xf]  ;;  %v12328_v8 = vor.u32 %v16009_v62, %v12325_v63  ;;  %6606 = vmatpush.bf16.msra.mxu3 %v13128_v2 }
 0x1b3   :  { %v12581_v3 = vld [vmem:[%s25061_s1 + $0x1260] sm:$0xf0] }
 0x1b4   :  { %v16137_v4 = vld [vmem:[%s25061_s1 + $0x1444] sm:$0xf]  ;;  %v12584_v11 = vor.u32 %v16073_v0, %v12581_v3  ;;  %6568 = vmatpush.bf16.msra.mxu0 %v12328_v8 }
 0x1b5   :  { %v12837_v5 = vld [vmem:[%s25061_s1 + $0x1460] sm:$0xf0] }
 0x1b6   :  { %v16201_v6 = vld [vmem:[%s25061_s1 + $0x1644] sm:$0xf]  ;;  %v12840_v12 = vor.u32 %v16137_v4, %v12837_v5  ;;  %6581 = vmatpush.bf16.msra.mxu1 %v12584_v11 }
 0x1b7   :  { %v13093_v7 = vld [vmem:[%s25061_s1 + $0x1660] sm:$0xf0] }
 0x1b8   :  { %v16001_v9 = vld [vmem:[%s25061_s1 + $0x1004] sm:$0xf]  ;;  %v13096_v18 = vor.u32 %v16201_v6, %v13093_v7  ;;  %6594 = vmatpush.bf16.msra.mxu2 %v12840_v12 }
 0x1b9   :  { %v12293_v10 = vld [vmem:[%s25061_s1 + $0x1020] sm:$0xf0] }
 0x1ba   :  { %v16065_v13 = vld [vmem:[%s25061_s1 + $0x1204] sm:$0xf]  ;;  %v12296_v33 = vor.u32 %v16001_v9, %v12293_v10  ;;  %6607 = vmatpush.bf16.msra.mxu3 %v13096_v18 }
 0x1bb   :  { %v12549_v14 = vld [vmem:[%s25061_s1 + $0x1220] sm:$0xf0] }
 0x1bc   :  { %v16129_v16 = vld [vmem:[%s25061_s1 + $0x1404] sm:$0xf]  ;;  %v12552_v45 = vor.u32 %v16065_v13, %v12549_v14  ;;  %6569 = vmatpush.bf16.msra.mxu0 %v12296_v33 }
 0x1bd   :  { %v12805_v22 = vld [vmem:[%s25061_s1 + $0x1420] sm:$0xf0] }
 0x1be   :  { %v16193_v25 = vld [vmem:[%s25061_s1 + $0x1604] sm:$0xf]  ;;  %v12808_v46 = vor.u32 %v16129_v16, %v12805_v22  ;;  %6582 = vmatpush.bf16.msra.mxu1 %v12552_v45 }
 0x1bf   :  { %v13061_v28 = vld [vmem:[%s25061_s1 + $0x1620] sm:$0xf0]  ;;  %6570 = vmatmul.bf16.vlgmr.msra.gmra.mxu0 %v17527_v19 }
 0x1c0   :  { %v16313_v30 = vld [vmem:[%s25061_s1 + $0x19c4] sm:$0xf]  ;;  %v13064_v49 = vor.u32 %v16193_v25, %v13061_v28  ;;  %6595 = vmatpush.bf16.msra.mxu2 %v12808_v46 }
 0x1c1   :  { %v13541_v31 = vld [vmem:[%s25061_s1 + $0x19e0] sm:$0xf0]  ;;  %6583 = vmatmul.bf16.vlgmr.msra.gmra.mxu1 %v17540_v24 }
 0x1c2   :  { %v16377_v32 = vld [vmem:[%s25061_s1 + $0x1bc4] sm:$0xf]  ;;  %v13544_v50 = vor.u32 %v16313_v30, %v13541_v31  ;;  %6608 = vmatpush.bf16.msra.mxu3 %v13064_v49 }
 0x1c3   :  { %v13797_v37 = vld [vmem:[%s25061_s1 + $0x1be0] sm:$0xf0]  ;;  %6596 = vmatmul.bf16.vlgmr.msra.gmra.mxu2 %v17538_v23 }
 0x1c4   :  { %v16441_v38 = vld [vmem:[%s25061_s1 + $0x1dc4] sm:$0xf]  ;;  %v13800_v51 = vor.u32 %v16377_v32, %v13797_v37  ;;  %6614 = vmatpush.bf16.msrb.mxu0 %v13544_v50  ;;  %v6364_v32 = vadd.f32 %v6363_v29, %v18249_v58  ;;  %v6376_v37 = vpop.f32.mrf.mxu1 }
 0x1c5   :  { %v14053_v41 = vld [vmem:[%s25061_s1 + $0x1de0] sm:$0xf0]  ;;  %6609 = vmatmul.bf16.vlgmr.msra.gmra.mxu3 %v17548_v27 }
 0x1c6   :  { %v16505_v47 = vld [vmem:[%s25061_s1 + $0x1fc4] sm:$0xf]  ;;  %v14056_v52 = vor.u32 %v16441_v38, %v14053_v41  ;;  %6627 = vmatpush.bf16.msrb.mxu1 %v13800_v51 }
 0x1c7   :  { %v14309_v48 = vld [vmem:[%s25061_s1 + $0x1fe0] sm:$0xf0] }
 0x1c8   :  { %v16305_v53 = vld [vmem:[%s25061_s1 + $0x1984] sm:$0xf]  ;;  %v14312_v56 = vor.u32 %v16505_v47, %v14309_v48  ;;  %6640 = vmatpush.bf16.msrb.mxu2 %v14056_v52  ;;  %v6377_v48 = vadd.f32 %v6376_v37, %v6364_v32 }
 0x1c9   :  { %v13509_v54 = vld [vmem:[%s25061_s1 + $0x19a0] sm:$0xf0] }
 0x1ca   :  { %v16369_v55 = vld [vmem:[%s25061_s1 + $0x1b84] sm:$0xf]  ;;  %v13512_v63 = vor.u32 %v16305_v53, %v13509_v54  ;;  %6653 = vmatpush.bf16.msrb.mxu3 %v14312_v56 }
 0x1cb   :  { %v13765_v57 = vld [vmem:[%s25061_s1 + $0x1ba0] sm:$0xf0] }
 0x1cc   :  { %v16433_v59 = vld [vmem:[%s25061_s1 + $0x1d84] sm:$0xf]  ;;  %v13768_v0 = vor.u32 %v16369_v55, %v13765_v57  ;;  %6615 = vmatpush.bf16.msrb.mxu0 %v13512_v63 }
 0x1cd   :  { %v14021_v60 = vld [vmem:[%s25061_s1 + $0x1da0] sm:$0xf0] }
 0x1ce   :  { %v16497_v61 = vld [vmem:[%s25061_s1 + $0x1f84] sm:$0xf]  ;;  %v14024_v1 = vor.u32 %v16433_v59, %v14021_v60  ;;  %6628 = vmatpush.bf16.msrb.mxu1 %v13768_v0 }
 0x1cf   :  { %v14277_v62 = vld [vmem:[%s25061_s1 + $0x1fa0] sm:$0xf0] }
 0x1d0   :  { %v16297_v2 = vld [vmem:[%s25061_s1 + $0x1944] sm:$0xf]  ;;  %v14280_v5 = vor.u32 %v16497_v61, %v14277_v62  ;;  %6641 = vmatpush.bf16.msrb.mxu2 %v14024_v1  ;;  %v6389_v62 = vpop.f32.mrf.mxu2 }
 0x1d1   :  { %v13477_v3 = vld [vmem:[%s25061_s1 + $0x1960] sm:$0xf0] }
 0x1d2   :  { %v16361_v4 = vld [vmem:[%s25061_s1 + $0x1b44] sm:$0xf]  ;;  %v13480_v11 = vor.u32 %v16297_v2, %v13477_v3  ;;  %6654 = vmatpush.bf16.msrb.mxu3 %v14280_v5  ;;  %v6390_v2 = vadd.f32 %v6389_v62, %v6377_v48  ;;  %v6402_v3 = vpop.f32.mrf.mxu3 }
 0x1d3   :  { %v13733_v6 = vld [vmem:[%s25061_s1 + $0x1b60] sm:$0xf0] }
 0x1d4   :  { %v16425_v7 = vld [vmem:[%s25061_s1 + $0x1d44] sm:$0xf]  ;;  %v13736_v12 = vor.u32 %v16361_v4, %v13733_v6  ;;  %6616 = vmatpush.bf16.msrb.mxu0 %v13480_v11  ;;  %v6365_v6 = vpop.f32.mrf.mxu0 }
 0x1d5   :  { %v13989_v8 = vld [vmem:[%s25061_s1 + $0x1d60] sm:$0xf0]  ;;  %v15606_v6 = vld [vmem:[%s25061_s1 + $0x3a4] sm:$0xf0] }
 0x1d6   :  { %v16489_v9 = vld [vmem:[%s25061_s1 + $0x1f44] sm:$0xf]  ;;  %v13992_v13 = vor.u32 %v16425_v7, %v13989_v8  ;;  %6629 = vmatpush.bf16.msrb.mxu1 %v13736_v12  ;;  %v6378_v8 = vpop.f32.mrf.mxu1 }
 0x1d7   :  { %v14245_v10 = vld [vmem:[%s25061_s1 + $0x1f60] sm:$0xf0]  ;;  %v15670_v8 = vld [vmem:[%s25061_s1 + $0x5a4] sm:$0xf0] }
 0x1d8   :  { %v16289_v14 = vld [vmem:[%s25061_s1 + $0x1904] sm:$0xf]  ;;  %v14248_v18 = vor.u32 %v16489_v9, %v14245_v10  ;;  %6642 = vmatpush.bf16.msrb.mxu2 %v13992_v13  ;;  %v18448_v9 = vadd.f32 %v6402_v3, %v6390_v2  ;;  %v6391_v48 = vpop.f32.mrf.mxu2  ;;  %v10443_v2 = vld [vmem:[%s25061_s1 + $0x188] sm:$0xf] }
 0x1d9   :  { %v13445_v16 = vld [vmem:[%s25061_s1 + $0x1920] sm:$0xf0]  ;;  %v15542_v3 = vld [vmem:[%s25061_s1 + $0x1a4] sm:$0xf0] }
 0x1da   :  { %v16353_v17 = vld [vmem:[%s25061_s1 + $0x1b04] sm:$0xf]  ;;  %v13448_v33 = vor.u32 %v16289_v14, %v13445_v16  ;;  %6655 = vmatpush.bf16.msrb.mxu3 %v14248_v18  ;;  %v15654_v48 = vld [vmem:[%s25061_s1 + $0x524] sm:$0xf0] }
 0x1db   :  { %v13701_v22 = vld [vmem:[%s25061_s1 + $0x1b20] sm:$0xf0] }
 0x1dc   :  { %v16417_v25 = vld [vmem:[%s25061_s1 + $0x1d04] sm:$0xf]  ;;  %v13704_v38 = vor.u32 %v16353_v17, %v13701_v22  ;;  %6617 = vmatpush.bf16.msrb.mxu0 %v13448_v33 }
 0x1dd   :  { %v13957_v28 = vld [vmem:[%s25061_s1 + $0x1d20] sm:$0xf0] }
 0x1de   :  { %v16481_v30 = vld [vmem:[%s25061_s1 + $0x1f04] sm:$0xf]  ;;  %v13960_v41 = vor.u32 %v16417_v25, %v13957_v28  ;;  %6630 = vmatpush.bf16.msrb.mxu1 %v13704_v38 }
 0x1df   :  { %v14213_v31 = vld [vmem:[%s25061_s1 + $0x1f20] sm:$0xf0] }
 0x1e0   :  { %v16281_v45 = vld [vmem:[%s25061_s1 + $0x18c4] sm:$0xf]  ;;  %v14216_v58 = vor.u32 %v16481_v30, %v14213_v31  ;;  %6643 = vmatpush.bf16.msrb.mxu2 %v13960_v41 }
 0x1e1   :  { %v13413_v46 = vld [vmem:[%s25061_s1 + $0x18e0] sm:$0xf0] }
 0x1e2   :  { %v16345_v47 = vld [vmem:[%s25061_s1 + $0x1ac4] sm:$0xf]  ;;  %v13416_v54 = vor.u32 %v16281_v45, %v13413_v46  ;;  %6656 = vmatpush.bf16.msrb.mxu3 %v14216_v58 }
 0x1e3   :  { %v13669_v49 = vld [vmem:[%s25061_s1 + $0x1ae0] sm:$0xf0] }
 0x1e4   :  { %v16409_v50 = vld [vmem:[%s25061_s1 + $0x1cc4] sm:$0xf]  ;;  %v13672_v55 = vor.u32 %v16345_v47, %v13669_v49  ;;  %6618 = vmatpush.bf16.msrb.mxu0 %v13416_v54  ;;  %v10475_v49 = vld [vmem:[%s25061_s1 + $0x1c8] sm:$0xf] }
 0x1e5   :  { %v13925_v51 = vld [vmem:[%s25061_s1 + $0x1ce0] sm:$0xf0]  ;;  %v15614_v54 = vld [vmem:[%s25061_s1 + $0x3e4] sm:$0xf0] }
 0x1e6   :  { %v16473_v52 = vld [vmem:[%s25061_s1 + $0x1ec4] sm:$0xf]  ;;  %v13928_v56 = vor.u32 %v16409_v50, %v13925_v51  ;;  %6631 = vmatpush.bf16.msrb.mxu1 %v13672_v55  ;;  %v15550_v50 = vld [vmem:[%s25061_s1 + $0x1e4] sm:$0xf0] }
 0x1e7   :  { %v14181_v53 = vld [vmem:[%s25061_s1 + $0x1ee0] sm:$0xf0]  ;;  %v10731_v51 = vld [vmem:[%s25061_s1 + $0x3c8] sm:$0xf] }
 0x1e8   :  { %v16273_v57 = vld [vmem:[%s25061_s1 + $0x1884] sm:$0xf]  ;;  %v14184_v61 = vor.u32 %v16473_v52, %v14181_v53  ;;  %6644 = vmatpush.bf16.msrb.mxu2 %v13928_v56  ;;  %v6404_v52 = vpop.f32.mrf.mxu3  ;;  %v10987_v55 = vld [vmem:[%s25061_s1 + $0x5c8] sm:$0xf] }
 0x1e9   :  { %v13381_v59 = vld [vmem:[%s25061_s1 + $0x18a0] sm:$0xf0]  ;;  %v15678_v56 = vld [vmem:[%s25061_s1 + $0x5e4] sm:$0xf0] }
 0x1ea   :  { %v16337_v60 = vld [vmem:[%s25061_s1 + $0x1a84] sm:$0xf]  ;;  %v13384_v7 = vor.u32 %v16273_v57, %v13381_v59  ;;  %6657 = vmatpush.bf16.msrb.mxu3 %v14184_v61  ;;  %v15742_v61 = vld [vmem:[%s25061_s1 + $0x7e4] sm:$0xf0] }
 0x1eb   :  { %v13637_v63 = vld [vmem:[%s25061_s1 + $0x1aa0] sm:$0xf0] }
 0x1ec   :  { %v16401_v0 = vld [vmem:[%s25061_s1 + $0x1c84] sm:$0xf]  ;;  %v13640_v10 = vor.u32 %v16337_v60, %v13637_v63  ;;  %6619 = vmatpush.bf16.msrb.mxu0 %v13384_v7  ;;  %v11243_v60 = vld [vmem:[%s25061_s1 + $0x7c8] sm:$0xf]  ;;  %v10476_v63 = vor.u32 %v15550_v50, %v10475_v49  ;;  %v6415_v49 = vpop.f32.mrf.mxu0 }
 0x1ed   :  { %v13893_v1 = vld [vmem:[%s25061_s1 + $0x1ca0] sm:$0xf0]  ;;  %v10955_v7 = vld [vmem:[%s25061_s1 + $0x588] sm:$0xf]  ;;  %v6416_v52 = vadd.f32 %v6415_v49, %v18448_v9 }
 0x1ee   :  { %v16465_v4 = vld [vmem:[%s25061_s1 + $0x1e84] sm:$0xf]  ;;  %v13896_v11 = vor.u32 %v16401_v0, %v13893_v1  ;;  %6632 = vmatpush.bf16.msrb.mxu1 %v13640_v10  ;;  %v10732_v0 = vor.u32 %v15614_v54, %v10731_v51  ;;  %v10988_v1 = vor.u32 %v15678_v56, %v10987_v55  ;;  %v11211_v10 = vld [vmem:[%s25061_s1 + $0x788] sm:$0xf]  ;;  %v6428_v54 = vpop.f32.mrf.mxu1 }
 0x1ef   :  { %v14149_v5 = vld [vmem:[%s25061_s1 + $0x1ea0] sm:$0xf0]  ;;  %v11147_v50 = vld [vmem:[%s25061_s1 + $0x708] sm:$0xf] }
 0x1f0   :  { %v16265_v12 = vld [vmem:[%s25061_s1 + $0x1844] sm:$0xf]  ;;  %v14152_v16 = vor.u32 %v16465_v4, %v14149_v5  ;;  %6645 = vmatpush.bf16.msrb.mxu2 %v13896_v11  ;;  %v10699_v4 = vld [vmem:[%s25061_s1 + $0x388] sm:$0xf]  ;;  %v11244_v5 = vor.u32 %v15742_v61, %v11243_v60  ;;  %v6429_v61 = vadd.f32 %v6428_v54, %v6416_v52 }
 0x1f1   :  { %v13349_v13 = vld [vmem:[%s25061_s1 + $0x1860] sm:$0xf0]  ;;  %v15734_v11 = vld [vmem:[%s25061_s1 + $0x7a4] sm:$0xf0] }
 0x1f2   :  { %v16329_v14 = vld [vmem:[%s25061_s1 + $0x1a44] sm:$0xf]  ;;  %v13352_v29 = vor.u32 %v16265_v12, %v13349_v13  ;;  %6658 = vmatpush.bf16.msrb.mxu3 %v14152_v16  ;;  %v10444_v12 = vor.u32 %v15542_v3, %v10443_v2  ;;  %v10700_v13 = vor.u32 %v15606_v6, %v10699_v4  ;;  %v10411_v16 = vld [vmem:[%s25061_s1 + $0x148] sm:$0xf] }
 0x1f3   :  { %v13605_v17 = vld [vmem:[%s25061_s1 + $0x1a60] sm:$0xf0]  ;;  %v15718_v51 = vld [vmem:[%s25061_s1 + $0x724] sm:$0xf0] }
 0x1f4   :  { %v16393_v18 = vld [vmem:[%s25061_s1 + $0x1c44] sm:$0xf]  ;;  %v13608_v32 = vor.u32 %v16329_v14, %v13605_v17  ;;  %6620 = vmatpush.bf16.msrb.mxu0 %v13352_v29  ;;  %v10956_v14 = vor.u32 %v15670_v8, %v10955_v7  ;;  %v15534_v17 = vld [vmem:[%s25061_s1 + $0x164] sm:$0xf0]  ;;  %v11148_v9 = vor.u32 %v15718_v51, %v11147_v50 }
 0x1f5   :  { %v13861_v22 = vld [vmem:[%s25061_s1 + $0x1c60] sm:$0xf0]  ;;  %v15662_v29 = vld [vmem:[%s25061_s1 + $0x564] sm:$0xf0] }
 0x1f6   :  { %v16457_v25 = vld [vmem:[%s25061_s1 + $0x1e44] sm:$0xf]  ;;  %v13864_v33 = vor.u32 %v16393_v18, %v13861_v22  ;;  %6633 = vmatpush.bf16.msrb.mxu1 %v13608_v32  ;;  %v10667_v18 = vld [vmem:[%s25061_s1 + $0x348] sm:$0xf]  ;;  %v11212_v22 = vor.u32 %v15734_v11, %v11211_v10  ;;  %v10412_v32 = vor.u32 %v15534_v17, %v10411_v16  ;;  %v6441_v11 = vpop.f32.mrf.mxu2  ;;  %v6454_v17 = vpop.f32.mrf.mxu3 }
 0x1f7   :  { %v14117_v28 = vld [vmem:[%s25061_s1 + $0x1e60] sm:$0xf0]  ;;  %v10603_v60 = vld [vmem:[%s25061_s1 + $0x2c8] sm:$0xf]  ;;  %v6442_v16 = vadd.f32 %v6441_v11, %v6429_v61 }
 0x1f8   :  { %v16257_v30 = vld [vmem:[%s25061_s1 + $0x1804] sm:$0xf]  ;;  %v14120_v45 = vor.u32 %v16457_v25, %v14117_v28  ;;  %6646 = vmatpush.bf16.msrb.mxu2 %v13864_v33  ;;  %v15598_v25 = vld [vmem:[%s25061_s1 + $0x364] sm:$0xf0] }
 0x1f9   :  { %v13317_v31 = vld [vmem:[%s25061_s1 + $0x1820] sm:$0xf0]  ;;  %v10923_v28 = vld [vmem:[%s25061_s1 + $0x548] sm:$0xf]  ;;  %v10668_v33 = vor.u32 %v15598_v25, %v10667_v18  ;;  %v6417_v25 = vpop.f32.mrf.mxu0 }
 0x1fa   :  { %v16321_v37 = vld [vmem:[%s25061_s1 + $0x1a04] sm:$0xf]  ;;  %v13320_v53 = vor.u32 %v16257_v30, %v13317_v31  ;;  %6659 = vmatpush.bf16.msrb.mxu3 %v14120_v45  ;;  %v11179_v30 = vld [vmem:[%s25061_s1 + $0x748] sm:$0xf] }
 0x1fb   :  { %v13573_v38 = vld [vmem:[%s25061_s1 + $0x1a20] sm:$0xf0]  ;;  %v15726_v31 = vld [vmem:[%s25061_s1 + $0x764] sm:$0xf0] }
 0x1fc   :  { %v16385_v41 = vld [vmem:[%s25061_s1 + $0x1c04] sm:$0xf]  ;;  %v13576_v57 = vor.u32 %v16321_v37, %v13573_v38  ;;  %6621 = vmatpush.bf16.msrb.mxu0 %v13320_v53  ;;  %v10924_v37 = vor.u32 %v15662_v29, %v10923_v28  ;;  %v10379_v38 = vld [vmem:[%s25061_s1 + $0x108] sm:$0xf]  ;;  %v6430_v29 = vpop.f32.mrf.mxu1 }
 0x1fd   :  { %v13829_v46 = vld [vmem:[%s25061_s1 + $0x1c20] sm:$0xf0]  ;;  %v10635_v45 = vld [vmem:[%s25061_s1 + $0x308] sm:$0xf] }
 0x1fe   :  { %v16449_v47 = vld [vmem:[%s25061_s1 + $0x1e04] sm:$0xf]  ;;  %v13832_v59 = vor.u32 %v16385_v41, %v13829_v46  ;;  %6634 = vmatpush.bf16.msrb.mxu1 %v13576_v57  ;;  %v15526_v41 = vld [vmem:[%s25061_s1 + $0x124] sm:$0xf0]  ;;  %v11180_v46 = vor.u32 %v15726_v31, %v11179_v30  ;;  %v18647_v30 = vadd.f32 %v6454_v17, %v6442_v16  ;;  %v6443_v61 = vpop.f32.mrf.mxu2 }
 0x1ff   :  { %v14085_v58 = vld [vmem:[%s25061_s1 + $0x1e20] sm:$0xf0]  ;;  %6622 = vmatmul.bf16.vlgmr.msrb.gmra.mxu0 %v17731_v15  ;;  %v10380_v53 = vor.u32 %v15526_v41, %v10379_v38  ;;  %v10347_v57 = vld [vmem:[%s25061_s1 + $0xc8] sm:$0xf] }
 0x200   :  { %v14088_v62 = vor.u32 %v16449_v47, %v14085_v58  ;;  %6647 = vmatpush.bf16.msrb.mxu2 %v13832_v59  ;;  %6666 = vmatpush.bf16.msra.mxu0 %v10476_v63  ;;  %v15590_v47 = vld [vmem:[%s25061_s1 + $0x324] sm:$0xf0] }
 0x201   :  { %6635 = vmatmul.bf16.vlgmr.msrb.gmra.mxu1 %v17744_v21  ;;  %v10891_v58 = vld [vmem:[%s25061_s1 + $0x508] sm:$0xf]  ;;  %v10636_v55 = vor.u32 %v15590_v47, %v10635_v45 }
 0x202   :  { %6660 = vmatpush.bf16.msrb.mxu3 %v14088_v62  ;;  %6679 = vmatpush.bf16.msra.mxu1 %v10732_v0  ;;  %v10892_v56 = vor.u32 %v15654_v48, %v10891_v58  ;;  %v15518_v59 = vld [vmem:[%s25061_s1 + $0xe4] sm:$0xf0] }
 0x203   :  { %6648 = vmatmul.bf16.vlgmr.msrb.gmra.mxu2 %v17742_v20  ;;  %v15582_v62 = vld [vmem:[%s25061_s1 + $0x2e4] sm:$0xf0]  ;;  %v10348_v3 = vor.u32 %v15518_v59, %v10347_v57 }
 0x204   :  { %6692 = vmatpush.bf16.msra.mxu2 %v10988_v1  ;;  %6667 = vmatpush.bf16.msra.mxu0 %v10444_v12  ;;  %v10859_v63 = vld [vmem:[%s25061_s1 + $0x4c8] sm:$0xf]  ;;  %v10604_v4 = vor.u32 %v15582_v62, %v10603_v60 }
 0x205   :  { %6661 = vmatmul.bf16.vlgmr.msrb.gmra.mxu3 %v17752_v26  ;;  %v15646_v0 = vld [vmem:[%s25061_s1 + $0x4e4] sm:$0xf0] }
 0x206   :  { %6705 = vmatpush.bf16.msra.mxu3 %v11244_v5  ;;  %6680 = vmatpush.bf16.msra.mxu1 %v10700_v13  ;;  %v11115_v1 = vld [vmem:[%s25061_s1 + $0x6c8] sm:$0xf]  ;;  %v10860_v5 = vor.u32 %v15646_v0, %v10859_v63 }
 0x207   :  { %v15710_v2 = vld [vmem:[%s25061_s1 + $0x6e4] sm:$0xf0] }
 0x208   :  { %6693 = vmatpush.bf16.msra.mxu2 %v10956_v14  ;;  %6668 = vmatpush.bf16.msra.mxu0 %v10412_v32  ;;  %v10315_v6 = vld [vmem:[%s25061_s1 + $0x88] sm:$0xf]  ;;  %v11116_v10 = vor.u32 %v15710_v2, %v11115_v1  ;;  %v6456_v1 = vpop.f32.mrf.mxu3 }
 0x209   :  { %v15510_v7 = vld [vmem:[%s25061_s1 + $0xa4] sm:$0xf0] }
 0x20a   :  { %6706 = vmatpush.bf16.msra.mxu3 %v11212_v22  ;;  %6681 = vmatpush.bf16.msra.mxu1 %v10668_v33  ;;  %v10571_v8 = vld [vmem:[%s25061_s1 + $0x288] sm:$0xf]  ;;  %v10316_v28 = vor.u32 %v15510_v7, %v10315_v6 }
 0x20b   :  { %v15574_v12 = vld [vmem:[%s25061_s1 + $0x2a4] sm:$0xf0] }
 0x20c   :  { %6694 = vmatpush.bf16.msra.mxu2 %v10924_v37  ;;  %6669 = vmatpush.bf16.msra.mxu0 %v10380_v53  ;;  %v10827_v13 = vld [vmem:[%s25061_s1 + $0x488] sm:$0xf]  ;;  %v10572_v31 = vor.u32 %v15574_v12, %v10571_v8 }
 0x20d   :  { %v15638_v14 = vld [vmem:[%s25061_s1 + $0x4a4] sm:$0xf0] }
 0x20e   :  { %6707 = vmatpush.bf16.msra.mxu3 %v11180_v46  ;;  %6682 = vmatpush.bf16.msra.mxu1 %v10636_v55  ;;  %v11083_v18 = vld [vmem:[%s25061_s1 + $0x688] sm:$0xf]  ;;  %v10828_v32 = vor.u32 %v15638_v14, %v10827_v13 }
 0x20f   :  { %v15702_v22 = vld [vmem:[%s25061_s1 + $0x6a4] sm:$0xf0] }
 0x210   :  { %6695 = vmatpush.bf16.msra.mxu2 %v10892_v56  ;;  %6670 = vmatpush.bf16.msra.mxu0 %v10348_v3  ;;  %v10283_v33 = vld [vmem:[%s25061_s1 + $0x48] sm:$0xf]  ;;  %v11084_v41 = vor.u32 %v15702_v22, %v11083_v18 }
 0x211   :  { %v15502_v37 = vld [vmem:[%s25061_s1 + $0x64] sm:$0xf0] }
 0x212   :  { %6708 = vmatpush.bf16.msra.mxu3 %v11148_v9  ;;  %6683 = vmatpush.bf16.msra.mxu1 %v10604_v4  ;;  %v10539_v38 = vld [vmem:[%s25061_s1 + $0x248] sm:$0xf]  ;;  %v10284_v49 = vor.u32 %v15502_v37, %v10283_v33 }
 0x213   :  { %v15566_v45 = vld [vmem:[%s25061_s1 + $0x264] sm:$0xf0] }
 0x214   :  { %6696 = vmatpush.bf16.msra.mxu2 %v10860_v5  ;;  %v10795_v46 = vld [vmem:[%s25061_s1 + $0x448] sm:$0xf]  ;;  %6671 = vmatpush.bf16.msra.mxu0 %v10316_v28  ;;  %v10540_v52 = vor.u32 %v15566_v45, %v10539_v38 }
 0x215   :  { %v15630_v47 = vld [vmem:[%s25061_s1 + $0x464] sm:$0xf0] }
 0x216   :  { %6709 = vmatpush.bf16.msra.mxu3 %v11116_v10  ;;  %v11051_v58 = vld [vmem:[%s25061_s1 + $0x648] sm:$0xf]  ;;  %6684 = vmatpush.bf16.msra.mxu1 %v10572_v31  ;;  %v10796_v53 = vor.u32 %v15630_v47, %v10795_v46 }
 0x217   :  { %v15694_v48 = vld [vmem:[%s25061_s1 + $0x664] sm:$0xf0] }
 0x218   :  { %v10251_v50 = vld [vmem:[%s25061_s1 + $0x8] sm:$0xf]  ;;  %6697 = vmatpush.bf16.msra.mxu2 %v10828_v32  ;;  %v11052_v57 = vor.u32 %v15694_v48, %v11051_v58  ;;  %6672 = vmatpush.bf16.msra.mxu0 %v10284_v49 }
 0x219   :  { %v15494_v51 = vld [vmem:[%s25061_s1 + $0x24] sm:$0xf0] }
 0x21a   :  { %v10507_v54 = vld [vmem:[%s25061_s1 + $0x208] sm:$0xf]  ;;  %6710 = vmatpush.bf16.msra.mxu3 %v11084_v41  ;;  %v10252_v2 = vor.u32 %v15494_v51, %v10251_v50  ;;  %6685 = vmatpush.bf16.msra.mxu1 %v10540_v52 }
 0x21b   :  { %v15558_v55 = vld [vmem:[%s25061_s1 + $0x224] sm:$0xf0] }
 0x21c   :  { %v10763_v56 = vld [vmem:[%s25061_s1 + $0x408] sm:$0xf]  ;;  %6698 = vmatpush.bf16.msra.mxu2 %v10796_v53  ;;  %v10508_v6 = vor.u32 %v15558_v55, %v10507_v54  ;;  %6673 = vmatpush.bf16.msra.mxu0 %v10252_v2 }
 0x21d   :  { %v15622_v59 = vld [vmem:[%s25061_s1 + $0x424] sm:$0xf0] }
 0x21e   :  { %v11019_v60 = vld [vmem:[%s25061_s1 + $0x608] sm:$0xf]  ;;  %v10764_v7 = vor.u32 %v15622_v59, %v10763_v56  ;;  %6711 = vmatpush.bf16.msra.mxu3 %v11052_v57  ;;  %6686 = vmatpush.bf16.msra.mxu1 %v10508_v6  ;;  %v16807_v59 = vld [vmem:[%s25062_s2] sm:$0xff] }
 0x21f   :  { %v15686_v9 = vld [vmem:[%s25061_s1 + $0x624] sm:$0xf0]  ;;  %6674 = vmatmul.bf16.vlgmr.msra.gmra.mxu0 %v17214_v36 }
 0x220   :  { %v11499_v62 = vld [vmem:[%s25061_s1 + $0x9c8] sm:$0xf]  ;;  %v11020_v11 = vor.u32 %v15686_v9, %v11019_v60  ;;  %6699 = vmatpush.bf16.msra.mxu2 %v10764_v7  ;;  %v1115_v60 = vperm.slane %v16807_v59, 1 }
 0x221   :  { %v15806_v63 = vld [vmem:[%s25061_s1 + $0x9e4] sm:$0xf0]  ;;  %6687 = vmatmul.bf16.vlgmr.msra.gmra.mxu1 %v17224_v43 }
 0x222   :  { %v11755_v0 = vld [vmem:[%s25061_s1 + $0xbc8] sm:$0xf]  ;;  %v11500_v12 = vor.u32 %v15806_v63, %v11499_v62  ;;  %6712 = vmatpush.bf16.msra.mxu3 %v11020_v11  ;;  %v6480_v11 = vpop.f32.mrf.mxu1 }
 0x223   :  { %v15870_v3 = vld [vmem:[%s25061_s1 + $0xbe4] sm:$0xf0]  ;;  %6700 = vmatmul.bf16.vlgmr.msra.gmra.mxu2 %v17212_v35 }
 0x224   :  { %v12011_v4 = vld [vmem:[%s25061_s1 + $0xdc8] sm:$0xf]  ;;  %v11756_v13 = vor.u32 %v15870_v3, %v11755_v0  ;;  %6718 = vmatpush.bf16.msrb.mxu0 %v11500_v12  ;;  %v6467_v3 = vpop.f32.mrf.mxu0 }
 0x225   :  { %v15934_v5 = vld [vmem:[%s25061_s1 + $0xde4] sm:$0xf0]  ;;  %6713 = vmatmul.bf16.vlgmr.msra.gmra.mxu3 %v17222_v42 }
 0x226   :  { %v12267_v8 = vld [vmem:[%s25061_s1 + $0xfc8] sm:$0xf]  ;;  %v12012_v14 = vor.u32 %v15934_v5, %v12011_v4  ;;  %6731 = vmatpush.bf16.msrb.mxu1 %v11756_v13 }
 0x227   :  { %v15998_v10 = vld [vmem:[%s25061_s1 + $0xfe4] sm:$0xf0] }
 0x228   :  { %v11467_v16 = vld [vmem:[%s25061_s1 + $0x988] sm:$0xf]  ;;  %v12268_v22 = vor.u32 %v15998_v10, %v12267_v8  ;;  %6744 = vmatpush.bf16.msrb.mxu2 %v12012_v14  ;;  %v6468_v10 = vadd.f32 %v6467_v3, %v1115_v60 }
 0x229   :  { %v15798_v17 = vld [vmem:[%s25061_s1 + $0x9a4] sm:$0xf0] }
 0x22a   :  { %v11723_v18 = vld [vmem:[%s25061_s1 + $0xb88] sm:$0xf]  ;;  %v11468_v33 = vor.u32 %v15798_v17, %v11467_v16  ;;  %6757 = vmatpush.bf16.msrb.mxu3 %v12268_v22  ;;  %v6481_v22 = vadd.f32 %v6480_v11, %v6468_v10  ;;  %v6482_v59 = vpop.f32.mrf.mxu1 }
 0x22b   :  { %v15862_v25 = vld [vmem:[%s25061_s1 + $0xba4] sm:$0xf0] }
 0x22c   :  { %v11979_v28 = vld [vmem:[%s25061_s1 + $0xd88] sm:$0xf]  ;;  %v11724_v37 = vor.u32 %v15862_v25, %v11723_v18  ;;  %6719 = vmatpush.bf16.msrb.mxu0 %v11468_v33 }
 0x22d   :  { %v15926_v29 = vld [vmem:[%s25061_s1 + $0xda4] sm:$0xf0] }
 0x22e   :  { %v12235_v31 = vld [vmem:[%s25061_s1 + $0xf88] sm:$0xf]  ;;  %v11980_v38 = vor.u32 %v15926_v29, %v11979_v28  ;;  %6732 = vmatpush.bf16.msrb.mxu1 %v11724_v37  ;;  %v6493_v37 = vpop.f32.mrf.mxu2 }
 0x22f   :  { %v15990_v32 = vld [vmem:[%s25061_s1 + $0xfa4] sm:$0xf0] }
 0x230   :  { %v11435_v41 = vld [vmem:[%s25061_s1 + $0x948] sm:$0xf]  ;;  %v12236_v47 = vor.u32 %v15990_v32, %v12235_v31  ;;  %6745 = vmatpush.bf16.msrb.mxu2 %v11980_v38 }
 0x231   :  { %v15790_v45 = vld [vmem:[%s25061_s1 + $0x964] sm:$0xf0] }
 0x232   :  { %v11691_v46 = vld [vmem:[%s25061_s1 + $0xb48] sm:$0xf]  ;;  %v11436_v52 = vor.u32 %v15790_v45, %v11435_v41  ;;  %6758 = vmatpush.bf16.msrb.mxu3 %v12236_v47  ;;  %v6494_v47 = vadd.f32 %v6493_v37, %v6481_v22 }
 0x233   :  { %v15854_v58 = vld [vmem:[%s25061_s1 + $0xb64] sm:$0xf0] }
 0x234   :  { %v11947_v48 = vld [vmem:[%s25061_s1 + $0xd48] sm:$0xf]  ;;  %v11692_v54 = vor.u32 %v15854_v58, %v11691_v46  ;;  %6720 = vmatpush.bf16.msrb.mxu0 %v11436_v52  ;;  %v6506_v58 = vpop.f32.mrf.mxu3  ;;  %v6469_v52 = vpop.f32.mrf.mxu0 }
 0x235   :  { %v15918_v49 = vld [vmem:[%s25061_s1 + $0xd64] sm:$0xf0] }
 0x236   :  { %v12203_v50 = vld [vmem:[%s25061_s1 + $0xf48] sm:$0xf]  ;;  %v11948_v55 = vor.u32 %v15918_v49, %v11947_v48  ;;  %6733 = vmatpush.bf16.msrb.mxu1 %v11692_v54  ;;  %v6495_v10 = vpop.f32.mrf.mxu2 }
 0x237   :  { %v15982_v51 = vld [vmem:[%s25061_s1 + $0xf64] sm:$0xf0] }
 0x238   :  { %v11403_v53 = vld [vmem:[%s25061_s1 + $0x908] sm:$0xf]  ;;  %v12204_v9 = vor.u32 %v15982_v51, %v12203_v50  ;;  %6746 = vmatpush.bf16.msrb.mxu2 %v11948_v55  ;;  %v18848_v51 = vadd.f32 %v6506_v58, %v6494_v47 }
 0x239   :  { %v15782_v56 = vld [vmem:[%s25061_s1 + $0x924] sm:$0xf0] }
 0x23a   :  { %v11659_v57 = vld [vmem:[%s25061_s1 + $0xb08] sm:$0xf]  ;;  %v11404_v2 = vor.u32 %v15782_v56, %v11403_v53  ;;  %6759 = vmatpush.bf16.msrb.mxu3 %v12204_v9 }
 0x23b   :  { %v15846_v61 = vld [vmem:[%s25061_s1 + $0xb24] sm:$0xf0] }
 0x23c   :  { %v11915_v62 = vld [vmem:[%s25061_s1 + $0xd08] sm:$0xf]  ;;  %v11660_v4 = vor.u32 %v15846_v61, %v11659_v57  ;;  %6721 = vmatpush.bf16.msrb.mxu0 %v11404_v2 }
 0x23d   :  { %v15910_v63 = vld [vmem:[%s25061_s1 + $0xd24] sm:$0xf0] }
 0x23e   :  { %v12171_v0 = vld [vmem:[%s25061_s1 + $0xf08] sm:$0xf]  ;;  %v11916_v5 = vor.u32 %v15910_v63, %v11915_v62  ;;  %6734 = vmatpush.bf16.msrb.mxu1 %v11660_v4 }
 0x23f   :  { %v15974_v1 = vld [vmem:[%s25061_s1 + $0xf24] sm:$0xf0] }
 0x240   :  { %v11371_v6 = vld [vmem:[%s25061_s1 + $0x8c8] sm:$0xf]  ;;  %v12172_v12 = vor.u32 %v15974_v1, %v12171_v0  ;;  %6747 = vmatpush.bf16.msrb.mxu2 %v11916_v5 }
 0x241   :  { %v15774_v7 = vld [vmem:[%s25061_s1 + $0x8e4] sm:$0xf0] }
 0x242   :  { %v11627_v8 = vld [vmem:[%s25061_s1 + $0xac8] sm:$0xf]  ;;  %v11372_v25 = vor.u32 %v15774_v7, %v11371_v6  ;;  %6760 = vmatpush.bf16.msrb.mxu3 %v12172_v12 }
 0x243   :  { %v15838_v13 = vld [vmem:[%s25061_s1 + $0xae4] sm:$0xf0] }
 0x244   :  { %v11883_v14 = vld [vmem:[%s25061_s1 + $0xcc8] sm:$0xf]  ;;  %v11628_v28 = vor.u32 %v15838_v13, %v11627_v8  ;;  %6722 = vmatpush.bf16.msrb.mxu0 %v11372_v25 }
 0x245   :  { %v15902_v16 = vld [vmem:[%s25061_s1 + $0xce4] sm:$0xf0] }
 0x246   :  { %v12139_v17 = vld [vmem:[%s25061_s1 + $0xec8] sm:$0xf]  ;;  %v11884_v29 = vor.u32 %v15902_v16, %v11883_v14  ;;  %6735 = vmatpush.bf16.msrb.mxu1 %v11628_v28  ;;  %v6508_v16 = vpop.f32.mrf.mxu3 }
 0x247   :  { %v15966_v18 = vld [vmem:[%s25061_s1 + $0xee4] sm:$0xf0] }
 0x248   :  { %v11339_v31 = vld [vmem:[%s25061_s1 + $0x888] sm:$0xf]  ;;  %v12140_v38 = vor.u32 %v15966_v18, %v12139_v17  ;;  %6748 = vmatpush.bf16.msrb.mxu2 %v11884_v29 }
 0x249   :  { %v15766_v32 = vld [vmem:[%s25061_s1 + $0x8a4] sm:$0xf0] }
 0x24a   :  { %v11595_v33 = vld [vmem:[%s25061_s1 + $0xa88] sm:$0xf]  ;;  %v11340_v50 = vor.u32 %v15766_v32, %v11339_v31  ;;  %6761 = vmatpush.bf16.msrb.mxu3 %v12140_v38 }
 0x24b   :  { %v15830_v41 = vld [vmem:[%s25061_s1 + $0xaa4] sm:$0xf0] }
 0x24c   :  { %v11851_v45 = vld [vmem:[%s25061_s1 + $0xc88] sm:$0xf]  ;;  %v11596_v53 = vor.u32 %v15830_v41, %v11595_v33  ;;  %6723 = vmatpush.bf16.msrb.mxu0 %v11340_v50 }
 0x24d   :  { %v15894_v46 = vld [vmem:[%s25061_s1 + $0xca4] sm:$0xf0] }
 0x24e   :  { %v12107_v48 = vld [vmem:[%s25061_s1 + $0xe88] sm:$0xf]  ;;  %v11852_v54 = vor.u32 %v15894_v46, %v11851_v45  ;;  %6736 = vmatpush.bf16.msrb.mxu1 %v11596_v53 }
 0x24f   :  { %v15958_v49 = vld [vmem:[%s25061_s1 + $0xea4] sm:$0xf0] }
 0x250   :  { %v11307_v55 = vld [vmem:[%s25061_s1 + $0x848] sm:$0xf]  ;;  %v12108_v60 = vor.u32 %v15958_v49, %v12107_v48  ;;  %6749 = vmatpush.bf16.msrb.mxu2 %v11852_v54 }
 0x251   :  { %v15758_v56 = vld [vmem:[%s25061_s1 + $0x864] sm:$0xf0] }
 0x252   :  { %v11563_v57 = vld [vmem:[%s25061_s1 + $0xa48] sm:$0xf]  ;;  %v11308_v1 = vor.u32 %v15758_v56, %v11307_v55  ;;  %6762 = vmatpush.bf16.msrb.mxu3 %v12108_v60 }
 0x253   :  { %v15822_v9 = vld [vmem:[%s25061_s1 + $0xa64] sm:$0xf0] }
 0x254   :  { %v11819_v61 = vld [vmem:[%s25061_s1 + $0xc48] sm:$0xf]  ;;  %v11564_v4 = vor.u32 %v15822_v9, %v11563_v57  ;;  %6724 = vmatpush.bf16.msrb.mxu0 %v11308_v1 }
 0x255   :  { %v15886_v62 = vld [vmem:[%s25061_s1 + $0xc64] sm:$0xf0] }
 0x256   :  { %v12075_v63 = vld [vmem:[%s25061_s1 + $0xe48] sm:$0xf]  ;;  %v11820_v5 = vor.u32 %v15886_v62, %v11819_v61  ;;  %6737 = vmatpush.bf16.msrb.mxu1 %v11564_v4 }
 0x257   :  { %v15950_v0 = vld [vmem:[%s25061_s1 + $0xe64] sm:$0xf0] }
 0x258   :  { %v11275_v2 = vld [vmem:[%s25061_s1 + $0x808] sm:$0xf]  ;;  %v12076_v11 = vor.u32 %v15950_v0, %v12075_v63  ;;  %6750 = vmatpush.bf16.msrb.mxu2 %v11820_v5 }
 0x259   :  { %v15750_v3 = vld [vmem:[%s25061_s1 + $0x824] sm:$0xf0] }
 0x25a   :  { %v11531_v6 = vld [vmem:[%s25061_s1 + $0xa08] sm:$0xf]  ;;  %v11276_v25 = vor.u32 %v15750_v3, %v11275_v2  ;;  %6763 = vmatpush.bf16.msrb.mxu3 %v12076_v11 }
 0x25b   :  { %v15814_v7 = vld [vmem:[%s25061_s1 + $0xa24] sm:$0xf0] }
 0x25c   :  { %v11787_v8 = vld [vmem:[%s25061_s1 + $0xc08] sm:$0xf]  ;;  %v11532_v32 = vor.u32 %v15814_v7, %v11531_v6  ;;  %6725 = vmatpush.bf16.msrb.mxu0 %v11276_v25  ;;  %v6519_v25 = vpop.f32.mrf.mxu0 }
 0x25d   :  { %v15878_v12 = vld [vmem:[%s25061_s1 + $0xc24] sm:$0xf0] }
 0x25e   :  { %v12043_v13 = vld [vmem:[%s25061_s1 + $0xe08] sm:$0xf]  ;;  %v11788_v33 = vor.u32 %v15878_v12, %v11787_v8  ;;  %6738 = vmatpush.bf16.msrb.mxu1 %v11532_v32 }
 0x25f   :  { %v15942_v14 = vld [vmem:[%s25061_s1 + $0xe24] sm:$0xf0]  ;;  %6726 = vmatmul.bf16.vlgmr.msrb.gmra.mxu0 %v17340_v39 }
 0x260   :  { %v12523_v17 = vld [vmem:[%s25061_s1 + $0x11c8] sm:$0xf]  ;;  %v12044_v41 = vor.u32 %v15942_v14, %v12043_v13  ;;  %6751 = vmatpush.bf16.msrb.mxu2 %v11788_v33 }
 0x261   :  { %v16062_v18 = vld [vmem:[%s25061_s1 + $0x11e4] sm:$0xf0]  ;;  %6739 = vmatmul.bf16.vlgmr.msrb.gmra.mxu1 %v17344_v44 }
 0x262   :  { %v12779_v22 = vld [vmem:[%s25061_s1 + $0x13c8] sm:$0xf]  ;;  %v12524_v45 = vor.u32 %v16062_v18, %v12523_v17  ;;  %6764 = vmatpush.bf16.msrb.mxu3 %v12044_v41 }
 0x263   :  { %v16126_v28 = vld [vmem:[%s25061_s1 + $0x13e4] sm:$0xf0]  ;;  %6752 = vmatmul.bf16.vlgmr.msrb.gmra.mxu2 %v17332_v34 }
 0x264   :  { %v13035_v29 = vld [vmem:[%s25061_s1 + $0x15c8] sm:$0xf]  ;;  %v12780_v46 = vor.u32 %v16126_v28, %v12779_v22  ;;  %6770 = vmatpush.bf16.msra.mxu0 %v12524_v45 }
 0x265   :  { %v16190_v31 = vld [vmem:[%s25061_s1 + $0x15e4] sm:$0xf0]  ;;  %6765 = vmatmul.bf16.vlgmr.msrb.gmra.mxu3 %v17342_v40 }
 0x266   :  { %v13291_v37 = vld [vmem:[%s25061_s1 + $0x17c8] sm:$0xf]  ;;  %v13036_v47 = vor.u32 %v16190_v31, %v13035_v29  ;;  %6783 = vmatpush.bf16.msra.mxu1 %v12780_v46 }
 0x267   :  { %v16254_v38 = vld [vmem:[%s25061_s1 + $0x17e4] sm:$0xf0] }
 0x268   :  { %v12491_v58 = vld [vmem:[%s25061_s1 + $0x1188] sm:$0xf]  ;;  %v13292_v50 = vor.u32 %v16254_v38, %v13291_v37  ;;  %6796 = vmatpush.bf16.msra.mxu2 %v13036_v47  ;;  %v6520_v37 = vadd.f32 %v6519_v25, %v18848_v51  ;;  %v6532_v38 = vpop.f32.mrf.mxu1 }
 0x269   :  { %v16054_v48 = vld [vmem:[%s25061_s1 + $0x11a4] sm:$0xf0] }
 0x26a   :  { %v12747_v49 = vld [vmem:[%s25061_s1 + $0x1388] sm:$0xf]  ;;  %v12492_v57 = vor.u32 %v16054_v48, %v12491_v58  ;;  %6809 = vmatpush.bf16.msra.mxu3 %v13292_v50  ;;  %v6533_v48 = vadd.f32 %v6532_v38, %v6520_v37 }
 0x26b   :  { %v16118_v52 = vld [vmem:[%s25061_s1 + $0x13a4] sm:$0xf0] }
 0x26c   :  { %v13003_v53 = vld [vmem:[%s25061_s1 + $0x1588] sm:$0xf]  ;;  %v12748_v59 = vor.u32 %v16118_v52, %v12747_v49  ;;  %6771 = vmatpush.bf16.msra.mxu0 %v12492_v57 }
 0x26d   :  { %v16182_v54 = vld [vmem:[%s25061_s1 + $0x15a4] sm:$0xf0] }
 0x26e   :  { %v13259_v55 = vld [vmem:[%s25061_s1 + $0x1788] sm:$0xf]  ;;  %v13004_v60 = vor.u32 %v16182_v54, %v13003_v53  ;;  %6784 = vmatpush.bf16.msra.mxu1 %v12748_v59 }
 0x26f   :  { %v16246_v56 = vld [vmem:[%s25061_s1 + $0x17a4] sm:$0xf0] }
 0x270   :  { %v12459_v9 = vld [vmem:[%s25061_s1 + $0x1148] sm:$0xf]  ;;  %v13260_v63 = vor.u32 %v16246_v56, %v13259_v55  ;;  %6797 = vmatpush.bf16.msra.mxu2 %v13004_v60  ;;  %v6545_v56 = vpop.f32.mrf.mxu2 }
 0x271   :  { %v16046_v61 = vld [vmem:[%s25061_s1 + $0x1164] sm:$0xf0] }
 0x272   :  { %v12715_v62 = vld [vmem:[%s25061_s1 + $0x1348] sm:$0xf]  ;;  %v12460_v5 = vor.u32 %v16046_v61, %v12459_v9  ;;  %6810 = vmatpush.bf16.msra.mxu3 %v13260_v63  ;;  %v6546_v61 = vadd.f32 %v6545_v56, %v6533_v48 }
 0x273   :  { %v16110_v0 = vld [vmem:[%s25061_s1 + $0x1364] sm:$0xf0] }
 0x274   :  { %v12971_v1 = vld [vmem:[%s25061_s1 + $0x1548] sm:$0xf]  ;;  %v12716_v6 = vor.u32 %v16110_v0, %v12715_v62  ;;  %6772 = vmatpush.bf16.msra.mxu0 %v12460_v5  ;;  %v6558_v62 = vpop.f32.mrf.mxu3 }
 0x275   :  { %v16174_v2 = vld [vmem:[%s25061_s1 + $0x1564] sm:$0xf0] }
 0x276   :  { %v13227_v3 = vld [vmem:[%s25061_s1 + $0x1748] sm:$0xf]  ;;  %v12972_v7 = vor.u32 %v16174_v2, %v12971_v1  ;;  %6785 = vmatpush.bf16.msra.mxu1 %v12716_v6  ;;  %v19047_v2 = vadd.f32 %v6558_v62, %v6546_v61 }
 0x277   :  { %v16238_v4 = vld [vmem:[%s25061_s1 + $0x1764] sm:$0xf0] }
 0x278   :  { %v12427_v8 = vld [vmem:[%s25061_s1 + $0x1108] sm:$0xf]  ;;  %v13228_v12 = vor.u32 %v16238_v4, %v13227_v3  ;;  %6798 = vmatpush.bf16.msra.mxu2 %v12972_v7  ;;  %v6521_v3 = vpop.f32.mrf.mxu0  ;;  %v6547_v37 = vpop.f32.mrf.mxu2 }
 0x279   :  { %v16038_v10 = vld [vmem:[%s25061_s1 + $0x1124] sm:$0xf0] }
 0x27a   :  { %v12683_v11 = vld [vmem:[%s25061_s1 + $0x1308] sm:$0xf]  ;;  %v12428_v22 = vor.u32 %v16038_v10, %v12427_v8  ;;  %6811 = vmatpush.bf16.msra.mxu3 %v13228_v12  ;;  %v6534_v10 = vpop.f32.mrf.mxu1 }
 0x27b   :  { %v16102_v13 = vld [vmem:[%s25061_s1 + $0x1324] sm:$0xf0] }
 0x27c   :  { %v12939_v14 = vld [vmem:[%s25061_s1 + $0x1508] sm:$0xf]  ;;  %v12684_v28 = vor.u32 %v16102_v13, %v12683_v11  ;;  %6773 = vmatpush.bf16.msra.mxu0 %v12428_v22 }
 0x27d   :  { %v16166_v16 = vld [vmem:[%s25061_s1 + $0x1524] sm:$0xf0] }
 0x27e   :  { %v13195_v17 = vld [vmem:[%s25061_s1 + $0x1708] sm:$0xf]  ;;  %v12940_v29 = vor.u32 %v16166_v16, %v12939_v14  ;;  %6786 = vmatpush.bf16.msra.mxu1 %v12684_v28 }
 0x27f   :  { %v16230_v18 = vld [vmem:[%s25061_s1 + $0x1724] sm:$0xf0] }
 0x280   :  { %v12395_v31 = vld [vmem:[%s25061_s1 + $0x10c8] sm:$0xf]  ;;  %v13196_v41 = vor.u32 %v16230_v18, %v13195_v17  ;;  %6799 = vmatpush.bf16.msra.mxu2 %v12940_v29 }
 0x281   :  { %v16030_v32 = vld [vmem:[%s25061_s1 + $0x10e4] sm:$0xf0] }
 0x282   :  { %v12651_v33 = vld [vmem:[%s25061_s1 + $0x12c8] sm:$0xf]  ;;  %v12396_v49 = vor.u32 %v16030_v32, %v12395_v31  ;;  %6812 = vmatpush.bf16.msra.mxu3 %v13196_v41 }
 0x283   :  { %v16094_v45 = vld [vmem:[%s25061_s1 + $0x12e4] sm:$0xf0] }
 0x284   :  { %v12907_v46 = vld [vmem:[%s25061_s1 + $0x14c8] sm:$0xf]  ;;  %v12652_v50 = vor.u32 %v16094_v45, %v12651_v33  ;;  %6774 = vmatpush.bf16.msra.mxu0 %v12396_v49 }
 0x285   :  { %v16158_v47 = vld [vmem:[%s25061_s1 + $0x14e4] sm:$0xf0] }
 0x286   :  { %v13163_v58 = vld [vmem:[%s25061_s1 + $0x16c8] sm:$0xf]  ;;  %v12908_v52 = vor.u32 %v16158_v47, %v12907_v46  ;;  %6787 = vmatpush.bf16.msra.mxu1 %v12652_v50  ;;  %v6560_v47 = vpop.f32.mrf.mxu3 }
 0x287   :  { %v16222_v51 = vld [vmem:[%s25061_s1 + $0x16e4] sm:$0xf0] }
 0x288   :  { %v12363_v53 = vld [vmem:[%s25061_s1 + $0x1088] sm:$0xf]  ;;  %v13164_v57 = vor.u32 %v16222_v51, %v13163_v58  ;;  %6800 = vmatpush.bf16.msra.mxu2 %v12908_v52 }
 0x289   :  { %v16022_v54 = vld [vmem:[%s25061_s1 + $0x10a4] sm:$0xf0] }
 0x28a   :  { %v12619_v55 = vld [vmem:[%s25061_s1 + $0x1288] sm:$0xf]  ;;  %v12364_v1 = vor.u32 %v16022_v54, %v12363_v53  ;;  %6813 = vmatpush.bf16.msra.mxu3 %v13164_v57 }
 0x28b   :  { %v16086_v59 = vld [vmem:[%s25061_s1 + $0x12a4] sm:$0xf0] }
 0x28c   :  { %v12875_v60 = vld [vmem:[%s25061_s1 + $0x1488] sm:$0xf]  ;;  %v12620_v4 = vor.u32 %v16086_v59, %v12619_v55  ;;  %6775 = vmatpush.bf16.msra.mxu0 %v12364_v1 }
 0x28d   :  { %v16150_v9 = vld [vmem:[%s25061_s1 + $0x14a4] sm:$0xf0] }
 0x28e   :  { %v13131_v63 = vld [vmem:[%s25061_s1 + $0x1688] sm:$0xf]  ;;  %v12876_v5 = vor.u32 %v16150_v9, %v12875_v60  ;;  %6788 = vmatpush.bf16.msra.mxu1 %v12620_v4 }
 0x28f   :  { %v16214_v0 = vld [vmem:[%s25061_s1 + $0x16a4] sm:$0xf0] }
 0x290   :  { %v12331_v6 = vld [vmem:[%s25061_s1 + $0x1048] sm:$0xf]  ;;  %v13132_v11 = vor.u32 %v16214_v0, %v13131_v63  ;;  %6801 = vmatpush.bf16.msra.mxu2 %v12876_v5 }
 0x291   :  { %v16014_v7 = vld [vmem:[%s25061_s1 + $0x1064] sm:$0xf0] }
 0x292   :  { %v12587_v8 = vld [vmem:[%s25061_s1 + $0x1248] sm:$0xf]  ;;  %v12332_v18 = vor.u32 %v16014_v7, %v12331_v6  ;;  %6814 = vmatpush.bf16.msra.mxu3 %v13132_v11 }
 0x293   :  { %v16078_v12 = vld [vmem:[%s25061_s1 + $0x1264] sm:$0xf0] }
 0x294   :  { %v12843_v13 = vld [vmem:[%s25061_s1 + $0x1448] sm:$0xf]  ;;  %v12588_v28 = vor.u32 %v16078_v12, %v12587_v8  ;;  %6776 = vmatpush.bf16.msra.mxu0 %v12332_v18 }
 0x295   :  { %v16142_v14 = vld [vmem:[%s25061_s1 + $0x1464] sm:$0xf0] }
 0x296   :  { %v13099_v16 = vld [vmem:[%s25061_s1 + $0x1648] sm:$0xf]  ;;  %v12844_v29 = vor.u32 %v16142_v14, %v12843_v13  ;;  %6789 = vmatpush.bf16.msra.mxu1 %v12588_v28 }
 0x297   :  { %v16206_v17 = vld [vmem:[%s25061_s1 + $0x1664] sm:$0xf0] }
 0x298   :  { %v12299_v22 = vld [vmem:[%s25061_s1 + $0x1008] sm:$0xf]  ;;  %v13100_v38 = vor.u32 %v16206_v17, %v13099_v16  ;;  %6802 = vmatpush.bf16.msra.mxu2 %v12844_v29 }
 0x299   :  { %v16006_v25 = vld [vmem:[%s25061_s1 + $0x1024] sm:$0xf0] }
 0x29a   :  { %v12555_v31 = vld [vmem:[%s25061_s1 + $0x1208] sm:$0xf]  ;;  %v12300_v49 = vor.u32 %v16006_v25, %v12299_v22  ;;  %6815 = vmatpush.bf16.msra.mxu3 %v13100_v38 }
 0x29b   :  { %v16070_v32 = vld [vmem:[%s25061_s1 + $0x1224] sm:$0xf0] }
 0x29c   :  { %v12811_v33 = vld [vmem:[%s25061_s1 + $0x1408] sm:$0xf]  ;;  %v12556_v54 = vor.u32 %v16070_v32, %v12555_v31  ;;  %6777 = vmatpush.bf16.msra.mxu0 %v12300_v49 }
 0x29d   :  { %v16134_v41 = vld [vmem:[%s25061_s1 + $0x1424] sm:$0xf0] }
 0x29e   :  { %v13067_v45 = vld [vmem:[%s25061_s1 + $0x1608] sm:$0xf]  ;;  %v12812_v55 = vor.u32 %v16134_v41, %v12811_v33  ;;  %6790 = vmatpush.bf16.msra.mxu1 %v12556_v54 }
 0x29f   :  { %v16198_v46 = vld [vmem:[%s25061_s1 + $0x1624] sm:$0xf0]  ;;  %6778 = vmatmul.bf16.vlgmr.msra.gmra.mxu0 %v17527_v19 }
 0x2a0   :  { %v13547_v58 = vld [vmem:[%s25061_s1 + $0x19c8] sm:$0xf]  ;;  %v13068_v59 = vor.u32 %v16198_v46, %v13067_v45  ;;  %6803 = vmatpush.bf16.msra.mxu2 %v12812_v55 }
 0x2a1   :  { %v16318_v51 = vld [vmem:[%s25061_s1 + $0x19e4] sm:$0xf0]  ;;  %6791 = vmatmul.bf16.vlgmr.msra.gmra.mxu1 %v17540_v24 }
 0x2a2   :  { %v13803_v48 = vld [vmem:[%s25061_s1 + $0x1bc8] sm:$0xf]  ;;  %v13548_v60 = vor.u32 %v16318_v51, %v13547_v58  ;;  %6816 = vmatpush.bf16.msra.mxu3 %v13068_v59  ;;  %v6571_v58 = vpop.f32.mrf.mxu0 }
 0x2a3   :  { %v16382_v50 = vld [vmem:[%s25061_s1 + $0x1be4] sm:$0xf0]  ;;  %6804 = vmatmul.bf16.vlgmr.msra.gmra.mxu2 %v17538_v23  ;;  %v6572_v49 = vadd.f32 %v6571_v58, %v19047_v2 }
 0x2a4   :  { %v14059_v52 = vld [vmem:[%s25061_s1 + $0x1dc8] sm:$0xf]  ;;  %v13804_v9 = vor.u32 %v16382_v50, %v13803_v48  ;;  %6822 = vmatpush.bf16.msrb.mxu0 %v13548_v60 }
 0x2a5   :  { %v16446_v53 = vld [vmem:[%s25061_s1 + $0x1de4] sm:$0xf0]  ;;  %6817 = vmatmul.bf16.vlgmr.msra.gmra.mxu3 %v17548_v27 }
 0x2a6   :  { %v14315_v56 = vld [vmem:[%s25061_s1 + $0x1fc8] sm:$0xf]  ;;  %v14060_v61 = vor.u32 %v16446_v53, %v14059_v52  ;;  %6835 = vmatpush.bf16.msrb.mxu1 %v13804_v9  ;;  %v6584_v52 = vpop.f32.mrf.mxu1 }
 0x2a7   :  { %v16510_v57 = vld [vmem:[%s25061_s1 + $0x1fe4] sm:$0xf0]  ;;  %v6585_v59 = vadd.f32 %v6584_v52, %v6572_v49 }
 0x2a8   :  { %v13515_v62 = vld [vmem:[%s25061_s1 + $0x1988] sm:$0xf]  ;;  %v14316_v1 = vor.u32 %v16510_v57, %v14315_v56  ;;  %6848 = vmatpush.bf16.msrb.mxu2 %v14060_v61 }
 0x2a9   :  { %v16310_v63 = vld [vmem:[%s25061_s1 + $0x19a4] sm:$0xf0] }
 0x2aa   :  { %v13771_v0 = vld [vmem:[%s25061_s1 + $0x1b88] sm:$0xf]  ;;  %v13516_v8 = vor.u32 %v16310_v63, %v13515_v62  ;;  %6861 = vmatpush.bf16.msrb.mxu3 %v14316_v1 }
 0x2ab   :  { %v16374_v3 = vld [vmem:[%s25061_s1 + $0x1ba4] sm:$0xf0] }
 0x2ac   :  { %v14027_v4 = vld [vmem:[%s25061_s1 + $0x1d88] sm:$0xf]  ;;  %v13772_v10 = vor.u32 %v16374_v3, %v13771_v0  ;;  %6823 = vmatpush.bf16.msrb.mxu0 %v13516_v8  ;;  %v6597_v8 = vpop.f32.mrf.mxu2 }
 0x2ad   :  { %v16438_v5 = vld [vmem:[%s25061_s1 + $0x1da4] sm:$0xf0] }
 0x2ae   :  { %v14283_v6 = vld [vmem:[%s25061_s1 + $0x1f88] sm:$0xf]  ;;  %v14028_v11 = vor.u32 %v16438_v5, %v14027_v4  ;;  %6836 = vmatpush.bf16.msrb.mxu1 %v13772_v10 }
 0x2af   :  { %v16502_v7 = vld [vmem:[%s25061_s1 + $0x1fa4] sm:$0xf0] }
 0x2b0   :  { %v13483_v12 = vld [vmem:[%s25061_s1 + $0x1948] sm:$0xf]  ;;  %v14284_v16 = vor.u32 %v16502_v7, %v14283_v6  ;;  %6849 = vmatpush.bf16.msrb.mxu2 %v14028_v11 }
 0x2b1   :  { %v16302_v13 = vld [vmem:[%s25061_s1 + $0x1964] sm:$0xf0] }
 0x2b2   :  { %v13739_v14 = vld [vmem:[%s25061_s1 + $0x1b48] sm:$0xf]  ;;  %v13484_v29 = vor.u32 %v16302_v13, %v13483_v12  ;;  %6862 = vmatpush.bf16.msrb.mxu3 %v14284_v16  ;;  %v6598_v13 = vadd.f32 %v6597_v8, %v6585_v59  ;;  %v11245_v8 = vld [vmem:[%s25061_s1 + $0x7e8] sm:$0xf0] }
 0x2b3   :  { %v16366_v17 = vld [vmem:[%s25061_s1 + $0x1b64] sm:$0xf0] }
 0x2b4   :  { %v13995_v18 = vld [vmem:[%s25061_s1 + $0x1d48] sm:$0xf]  ;;  %v13740_v31 = vor.u32 %v16366_v17, %v13739_v14  ;;  %6824 = vmatpush.bf16.msrb.mxu0 %v13484_v29  ;;  %v6610_v14 = vpop.f32.mrf.mxu3 }
 0x2b5   :  { %v16430_v22 = vld [vmem:[%s25061_s1 + $0x1d64] sm:$0xf0] }
 0x2b6   :  { %v14251_v25 = vld [vmem:[%s25061_s1 + $0x1f48] sm:$0xf]  ;;  %v13996_v32 = vor.u32 %v16430_v22, %v13995_v18  ;;  %6837 = vmatpush.bf16.msrb.mxu1 %v13740_v31  ;;  %v6573_v18 = vpop.f32.mrf.mxu0 }
 0x2b7   :  { %v16494_v28 = vld [vmem:[%s25061_s1 + $0x1f64] sm:$0xf0] }
 0x2b8   :  { %v13451_v33 = vld [vmem:[%s25061_s1 + $0x1908] sm:$0xf]  ;;  %v14252_v41 = vor.u32 %v16494_v28, %v14251_v25  ;;  %6850 = vmatpush.bf16.msrb.mxu2 %v13996_v32  ;;  %v6586_v25 = vpop.f32.mrf.mxu1  ;;  %v19246_v28 = vadd.f32 %v6610_v14, %v6598_v13  ;;  %v15538_v14 = vld [vmem:[%s25061_s1 + $0x18c] sm:$0xf] }
 0x2b9   :  { %v16294_v37 = vld [vmem:[%s25061_s1 + $0x1924] sm:$0xf0]  ;;  %v15666_v25 = vld [vmem:[%s25061_s1 + $0x58c] sm:$0xf] }
 0x2ba   :  { %v13707_v38 = vld [vmem:[%s25061_s1 + $0x1b08] sm:$0xf]  ;;  %v13452_v50 = vor.u32 %v16294_v37, %v13451_v33  ;;  %6863 = vmatpush.bf16.msrb.mxu3 %v14252_v41 }
 0x2bb   :  { %v16358_v45 = vld [vmem:[%s25061_s1 + $0x1b24] sm:$0xf0] }
 0x2bc   :  { %v13963_v46 = vld [vmem:[%s25061_s1 + $0x1d08] sm:$0xf]  ;;  %v13708_v53 = vor.u32 %v16358_v45, %v13707_v38  ;;  %6825 = vmatpush.bf16.msrb.mxu0 %v13452_v50 }
 0x2bd   :  { %v16422_v47 = vld [vmem:[%s25061_s1 + $0x1d24] sm:$0xf0] }
 0x2be   :  { %v14219_v51 = vld [vmem:[%s25061_s1 + $0x1f08] sm:$0xf]  ;;  %v13964_v54 = vor.u32 %v16422_v47, %v13963_v46  ;;  %6838 = vmatpush.bf16.msrb.mxu1 %v13708_v53 }
 0x2bf   :  { %v16486_v48 = vld [vmem:[%s25061_s1 + $0x1f24] sm:$0xf0] }
 0x2c0   :  { %v13419_v55 = vld [vmem:[%s25061_s1 + $0x18c8] sm:$0xf]  ;;  %v14220_v2 = vor.u32 %v16486_v48, %v14219_v51  ;;  %6851 = vmatpush.bf16.msrb.mxu2 %v13964_v54 }
 0x2c1   :  { %v16286_v56 = vld [vmem:[%s25061_s1 + $0x18e4] sm:$0xf0] }
 0x2c2   :  { %v13675_v57 = vld [vmem:[%s25061_s1 + $0x1ac8] sm:$0xf]  ;;  %v13420_v0 = vor.u32 %v16286_v56, %v13419_v55  ;;  %6864 = vmatpush.bf16.msrb.mxu3 %v14220_v2 }
 0x2c3   :  { %v16350_v60 = vld [vmem:[%s25061_s1 + $0x1ae4] sm:$0xf0] }
 0x2c4   :  { %v13931_v9 = vld [vmem:[%s25061_s1 + $0x1cc8] sm:$0xf]  ;;  %v13676_v1 = vor.u32 %v16350_v60, %v13675_v57  ;;  %6826 = vmatpush.bf16.msrb.mxu0 %v13420_v0  ;;  %v6599_v60 = vpop.f32.mrf.mxu2 }
 0x2c5   :  { %v16414_v61 = vld [vmem:[%s25061_s1 + $0x1ce4] sm:$0xf0]  ;;  %v15650_v60 = vld [vmem:[%s25061_s1 + $0x50c] sm:$0xf] }
 0x2c6   :  { %v14187_v62 = vld [vmem:[%s25061_s1 + $0x1ec8] sm:$0xf]  ;;  %v13932_v3 = vor.u32 %v16414_v61, %v13931_v9  ;;  %6839 = vmatpush.bf16.msrb.mxu1 %v13676_v1  ;;  %v15546_v9 = vld [vmem:[%s25061_s1 + $0x1cc] sm:$0xf] }
 0x2c7   :  { %v16478_v63 = vld [vmem:[%s25061_s1 + $0x1ee4] sm:$0xf0]  ;;  %v10477_v61 = vld [vmem:[%s25061_s1 + $0x1e8] sm:$0xf0] }
 0x2c8   :  { %v13387_v4 = vld [vmem:[%s25061_s1 + $0x1888] sm:$0xf]  ;;  %v14188_v7 = vor.u32 %v16478_v63, %v14187_v62  ;;  %6852 = vmatpush.bf16.msrb.mxu2 %v13932_v3  ;;  %v15610_v62 = vld [vmem:[%s25061_s1 + $0x3cc] sm:$0xf]  ;;  %v6612_v63 = vpop.f32.mrf.mxu3 }
 0x2c9   :  { %v16278_v5 = vld [vmem:[%s25061_s1 + $0x18a4] sm:$0xf0]  ;;  %v10733_v1 = vld [vmem:[%s25061_s1 + $0x3e8] sm:$0xf0] }
 0x2ca   :  { %v13643_v6 = vld [vmem:[%s25061_s1 + $0x1a88] sm:$0xf]  ;;  %v13388_v22 = vor.u32 %v16278_v5, %v13387_v4  ;;  %6865 = vmatpush.bf16.msrb.mxu3 %v14188_v7  ;;  %v15674_v3 = vld [vmem:[%s25061_s1 + $0x5cc] sm:$0xf] }
 0x2cb   :  { %v16342_v10 = vld [vmem:[%s25061_s1 + $0x1aa4] sm:$0xf0]  ;;  %v10989_v4 = vld [vmem:[%s25061_s1 + $0x5e8] sm:$0xf0] }
 0x2cc   :  { %v13899_v11 = vld [vmem:[%s25061_s1 + $0x1c88] sm:$0xf]  ;;  %v13644_v29 = vor.u32 %v16342_v10, %v13643_v6  ;;  %6827 = vmatpush.bf16.msrb.mxu0 %v13388_v22  ;;  %v15738_v7 = vld [vmem:[%s25061_s1 + $0x7cc] sm:$0xf]  ;;  %v10992_v13 = vor.u32 %v15674_v3, %v10989_v4  ;;  %v6636_v3 = vpop.f32.mrf.mxu1 }
 0x2cd   :  { %v16406_v12 = vld [vmem:[%s25061_s1 + $0x1ca4] sm:$0xf0]  ;;  %v11248_v18 = vor.u32 %v15738_v7, %v11245_v8  ;;  %v10701_v22 = vld [vmem:[%s25061_s1 + $0x3a8] sm:$0xf0] }
 0x2ce   :  { %v14155_v16 = vld [vmem:[%s25061_s1 + $0x1e88] sm:$0xf]  ;;  %v13900_v31 = vor.u32 %v16406_v12, %v13899_v11  ;;  %6840 = vmatpush.bf16.msrb.mxu1 %v13644_v29  ;;  %v10480_v11 = vor.u32 %v15546_v9, %v10477_v61  ;;  %v10736_v12 = vor.u32 %v15610_v62, %v10733_v1  ;;  %v10957_v29 = vld [vmem:[%s25061_s1 + $0x5a8] sm:$0xf0]  ;;  %v6623_v61 = vpop.f32.mrf.mxu0 }
 0x2cf   :  { %v16470_v17 = vld [vmem:[%s25061_s1 + $0x1ea4] sm:$0xf0]  ;;  %v10893_v9 = vld [vmem:[%s25061_s1 + $0x528] sm:$0xf0] }
 0x2d0   :  { %v13355_v32 = vld [vmem:[%s25061_s1 + $0x1848] sm:$0xf]  ;;  %v14156_v38 = vor.u32 %v16470_v17, %v14155_v16  ;;  %6853 = vmatpush.bf16.msrb.mxu2 %v13900_v31  ;;  %v10445_v16 = vld [vmem:[%s25061_s1 + $0x1a8] sm:$0xf0] }
 0x2d1   :  { %v16270_v33 = vld [vmem:[%s25061_s1 + $0x1864] sm:$0xf0]  ;;  %v15602_v17 = vld [vmem:[%s25061_s1 + $0x38c] sm:$0xf] }
 0x2d2   :  { %v13611_v37 = vld [vmem:[%s25061_s1 + $0x1a48] sm:$0xf]  ;;  %v13356_v51 = vor.u32 %v16270_v33, %v13355_v32  ;;  %6866 = vmatpush.bf16.msrb.mxu3 %v14156_v38  ;;  %v15730_v31 = vld [vmem:[%s25061_s1 + $0x78c] sm:$0xf]  ;;  %v10448_v33 = vor.u32 %v15538_v14, %v10445_v16  ;;  %v10960_v38 = vor.u32 %v15666_v25, %v10957_v29 }
 0x2d3   :  { %v16334_v41 = vld [vmem:[%s25061_s1 + $0x1a64] sm:$0xf0]  ;;  %v11213_v32 = vld [vmem:[%s25061_s1 + $0x7a8] sm:$0xf0] }
 0x2d4   :  { %v13867_v45 = vld [vmem:[%s25061_s1 + $0x1c48] sm:$0xf]  ;;  %v13612_v50 = vor.u32 %v16334_v41, %v13611_v37  ;;  %6828 = vmatpush.bf16.msrb.mxu0 %v13356_v51  ;;  %v10704_v37 = vor.u32 %v15602_v17, %v10701_v22  ;;  %v15530_v41 = vld [vmem:[%s25061_s1 + $0x14c] sm:$0xf] }
 0x2d5   :  { %v16398_v46 = vld [vmem:[%s25061_s1 + $0x1c64] sm:$0xf0]  ;;  %v15658_v51 = vld [vmem:[%s25061_s1 + $0x54c] sm:$0xf] }
 0x2d6   :  { %v14123_v47 = vld [vmem:[%s25061_s1 + $0x1e48] sm:$0xf]  ;;  %v13868_v52 = vor.u32 %v16398_v46, %v13867_v45  ;;  %6841 = vmatpush.bf16.msrb.mxu1 %v13612_v50  ;;  %v10413_v45 = vld [vmem:[%s25061_s1 + $0x168] sm:$0xf0] }
 0x2d7   :  { %v16462_v58 = vld [vmem:[%s25061_s1 + $0x1e64] sm:$0xf0]  ;;  %v15594_v46 = vld [vmem:[%s25061_s1 + $0x34c] sm:$0xf] }
 0x2d8   :  { %v13323_v48 = vld [vmem:[%s25061_s1 + $0x1808] sm:$0xf]  ;;  %v14124_v56 = vor.u32 %v16462_v58, %v14123_v47  ;;  %6854 = vmatpush.bf16.msrb.mxu2 %v13868_v52  ;;  %v11216_v47 = vor.u32 %v15730_v31, %v11213_v32  ;;  %v10669_v58 = vld [vmem:[%s25061_s1 + $0x368] sm:$0xf0]  ;;  %v10416_v52 = vor.u32 %v15530_v41, %v10413_v45 }
 0x2d9   :  { %v16262_v49 = vld [vmem:[%s25061_s1 + $0x1824] sm:$0xf0]  ;;  %v11181_v50 = vld [vmem:[%s25061_s1 + $0x768] sm:$0xf0] }
 0x2da   :  { %v13579_v53 = vld [vmem:[%s25061_s1 + $0x1a08] sm:$0xf]  ;;  %v13324_v0 = vor.u32 %v16262_v49, %v13323_v48  ;;  %6867 = vmatpush.bf16.msrb.mxu3 %v14124_v56  ;;  %v10925_v48 = vld [vmem:[%s25061_s1 + $0x568] sm:$0xf0] }
 0x2db   :  { %v16326_v54 = vld [vmem:[%s25061_s1 + $0x1a24] sm:$0xf0]  ;;  %v15722_v49 = vld [vmem:[%s25061_s1 + $0x74c] sm:$0xf] }
 0x2dc   :  { %v13835_v55 = vld [vmem:[%s25061_s1 + $0x1c08] sm:$0xf]  ;;  %v13580_v5 = vor.u32 %v16326_v54, %v13579_v53  ;;  %6829 = vmatpush.bf16.msrb.mxu0 %v13324_v0  ;;  %v10672_v53 = vor.u32 %v15594_v46, %v10669_v58  ;;  %v10928_v54 = vor.u32 %v15658_v51, %v10925_v48  ;;  %v10381_v56 = vld [vmem:[%s25061_s1 + $0x128] sm:$0xf0]  ;;  %v6624_v0 = vadd.f32 %v6623_v61, %v19246_v28  ;;  %v6662_v46 = vpop.f32.mrf.mxu3  ;;  %v6625_v51 = vpop.f32.mrf.mxu0 }
 0x2dd   :  { %v16390_v57 = vld [vmem:[%s25061_s1 + $0x1c24] sm:$0xf0]  ;;  %v15714_v62 = vld [vmem:[%s25061_s1 + $0x70c] sm:$0xf] }
 0x2de   :  { %v14091_v2 = vld [vmem:[%s25061_s1 + $0x1e08] sm:$0xf]  ;;  %v13836_v6 = vor.u32 %v16390_v57, %v13835_v55  ;;  %6842 = vmatpush.bf16.msrb.mxu1 %v13580_v5  ;;  %v15522_v55 = vld [vmem:[%s25061_s1 + $0x10c] sm:$0xf]  ;;  %v10896_v5 = vor.u32 %v15650_v60, %v10893_v9 }
 0x2df   :  { %v16454_v59 = vld [vmem:[%s25061_s1 + $0x1e24] sm:$0xf0]  ;;  %6830 = vmatmul.bf16.vlgmr.msrb.gmra.mxu0 %v17731_v15  ;;  %v15586_v57 = vld [vmem:[%s25061_s1 + $0x30c] sm:$0xf]  ;;  %v10384_v1 = vor.u32 %v15522_v55, %v10381_v56 }
 0x2e0   :  { %v14092_v10 = vor.u32 %v16454_v59, %v14091_v2  ;;  %6855 = vmatpush.bf16.msrb.mxu2 %v13836_v6  ;;  %6874 = vmatpush.bf16.msra.mxu0 %v10480_v11  ;;  %v11184_v2 = vor.u32 %v15722_v49, %v11181_v50  ;;  %v10637_v59 = vld [vmem:[%s25061_s1 + $0x328] sm:$0xf0]  ;;  %v6638_v49 = vpop.f32.mrf.mxu1 }
 0x2e1   :  { %6843 = vmatmul.bf16.vlgmr.msrb.gmra.mxu1 %v17744_v21  ;;  %v11149_v63 = vld [vmem:[%s25061_s1 + $0x728] sm:$0xf0]  ;;  %v10640_v4 = vor.u32 %v15586_v57, %v10637_v59 }
 0x2e2   :  { %6868 = vmatpush.bf16.msrb.mxu3 %v14092_v10  ;;  %6887 = vmatpush.bf16.msra.mxu1 %v10736_v12  ;;  %v15514_v6 = vld [vmem:[%s25061_s1 + $0xcc] sm:$0xf]  ;;  %v11152_v28 = vor.u32 %v15714_v62, %v11149_v63  ;;  %v6637_v10 = vadd.f32 %v6636_v3, %v6624_v0 }
 0x2e3   :  { %6856 = vmatmul.bf16.vlgmr.msrb.gmra.mxu2 %v17742_v20  ;;  %v10349_v7 = vld [vmem:[%s25061_s1 + $0xe8] sm:$0xf0] }
 0x2e4   :  { %6900 = vmatpush.bf16.msra.mxu2 %v10992_v13  ;;  %6875 = vmatpush.bf16.msra.mxu0 %v10448_v33  ;;  %v15578_v8 = vld [vmem:[%s25061_s1 + $0x2cc] sm:$0xf]  ;;  %v10352_v17 = vor.u32 %v15514_v6, %v10349_v7  ;;  %v6649_v33 = vpop.f32.mrf.mxu2 }
 0x2e5   :  { %6869 = vmatmul.bf16.vlgmr.msrb.gmra.mxu3 %v17752_v26  ;;  %v10605_v11 = vld [vmem:[%s25061_s1 + $0x2e8] sm:$0xf0]  ;;  %v6650_v45 = vadd.f32 %v6649_v33, %v6637_v10 }
 0x2e6   :  { %6913 = vmatpush.bf16.msra.mxu3 %v11248_v18  ;;  %6888 = vmatpush.bf16.msra.mxu1 %v10704_v37  ;;  %v15642_v12 = vld [vmem:[%s25061_s1 + $0x4cc] sm:$0xf]  ;;  %v10608_v18 = vor.u32 %v15578_v8, %v10605_v11 }
 0x2e7   :  { %v10861_v13 = vld [vmem:[%s25061_s1 + $0x4e8] sm:$0xf0]  ;;  %v19445_v50 = vadd.f32 %v6662_v46, %v6650_v45 }
 0x2e8   :  { %6901 = vmatpush.bf16.msra.mxu2 %v10960_v38  ;;  %6876 = vmatpush.bf16.msra.mxu0 %v10416_v52  ;;  %v15706_v14 = vld [vmem:[%s25061_s1 + $0x6cc] sm:$0xf]  ;;  %v10864_v22 = vor.u32 %v15642_v12, %v10861_v13 }
 0x2e9   :  { %v11117_v16 = vld [vmem:[%s25061_s1 + $0x6e8] sm:$0xf0] }
 0x2ea   :  { %6914 = vmatpush.bf16.msra.mxu3 %v11216_v47  ;;  %6889 = vmatpush.bf16.msra.mxu1 %v10672_v53  ;;  %v15506_v25 = vld [vmem:[%s25061_s1 + $0x8c] sm:$0xf]  ;;  %v11120_v32 = vor.u32 %v15706_v14, %v11117_v16  ;;  %v6664_v16 = vpop.f32.mrf.mxu3 }
 0x2eb   :  { %v10317_v29 = vld [vmem:[%s25061_s1 + $0xa8] sm:$0xf0] }
 0x2ec   :  { %6902 = vmatpush.bf16.msra.mxu2 %v10928_v54  ;;  %6877 = vmatpush.bf16.msra.mxu0 %v10384_v1  ;;  %v15570_v31 = vld [vmem:[%s25061_s1 + $0x28c] sm:$0xf]  ;;  %v10320_v48 = vor.u32 %v15506_v25, %v10317_v29  ;;  %v6651_v11 = vpop.f32.mrf.mxu2 }
 0x2ed   :  { %v10573_v37 = vld [vmem:[%s25061_s1 + $0x2a8] sm:$0xf0] }
 0x2ee   :  { %6915 = vmatpush.bf16.msra.mxu3 %v11184_v2  ;;  %6890 = vmatpush.bf16.msra.mxu1 %v10640_v4  ;;  %v15634_v38 = vld [vmem:[%s25061_s1 + $0x48c] sm:$0xf]  ;;  %v10576_v52 = vor.u32 %v15570_v31, %v10573_v37 }
 0x2ef   :  { %v10829_v41 = vld [vmem:[%s25061_s1 + $0x4a8] sm:$0xf0] }
 0x2f0   :  { %6903 = vmatpush.bf16.msra.mxu2 %v10896_v5  ;;  %v15698_v47 = vld [vmem:[%s25061_s1 + $0x68c] sm:$0xf]  ;;  %6878 = vmatpush.bf16.msra.mxu0 %v10352_v17  ;;  %v10832_v53 = vor.u32 %v15634_v38, %v10829_v41 }
 0x2f1   :  { %v11085_v58 = vld [vmem:[%s25061_s1 + $0x6a8] sm:$0xf0] }
 0x2f2   :  { %6916 = vmatpush.bf16.msra.mxu3 %v11152_v28  ;;  %6891 = vmatpush.bf16.msra.mxu1 %v10608_v18  ;;  %v15498_v54 = vld [vmem:[%s25061_s1 + $0x4c] sm:$0xf]  ;;  %v11088_v57 = vor.u32 %v15698_v47, %v11085_v58 }
 0x2f3   :  { %v10285_v55 = vld [vmem:[%s25061_s1 + $0x68] sm:$0xf0] }
 0x2f4   :  { %6904 = vmatpush.bf16.msra.mxu2 %v10864_v22  ;;  %v15562_v56 = vld [vmem:[%s25061_s1 + $0x24c] sm:$0xf]  ;;  %6879 = vmatpush.bf16.msra.mxu0 %v10320_v48  ;;  %v10288_v62 = vor.u32 %v15498_v54, %v10285_v55 }
 0x2f5   :  { %v10541_v2 = vld [vmem:[%s25061_s1 + $0x268] sm:$0xf0] }
 0x2f6   :  { %6917 = vmatpush.bf16.msra.mxu3 %v11120_v32  ;;  %v15626_v59 = vld [vmem:[%s25061_s1 + $0x44c] sm:$0xf]  ;;  %6892 = vmatpush.bf16.msra.mxu1 %v10576_v52  ;;  %v10544_v1 = vor.u32 %v15562_v56, %v10541_v2 }
 0x2f7   :  { %v10797_v60 = vld [vmem:[%s25061_s1 + $0x468] sm:$0xf0] }
 0x2f8   :  { %v15690_v9 = vld [vmem:[%s25061_s1 + $0x64c] sm:$0xf]  ;;  %6905 = vmatpush.bf16.msra.mxu2 %v10832_v53  ;;  %v10800_v3 = vor.u32 %v15626_v59, %v10797_v60  ;;  %6880 = vmatpush.bf16.msra.mxu0 %v10288_v62 }
 0x2f9   :  { %v11053_v61 = vld [vmem:[%s25061_s1 + $0x668] sm:$0xf0] }
 0x2fa   :  { %v15490_v63 = vld [vmem:[%s25061_s1 + $0xc] sm:$0xf]  ;;  %6918 = vmatpush.bf16.msra.mxu3 %v11088_v57  ;;  %v11056_v7 = vor.u32 %v15690_v9, %v11053_v61  ;;  %6893 = vmatpush.bf16.msra.mxu1 %v10544_v1 }
 0x2fb   :  { %v10253_v0 = vld [vmem:[%s25061_s1 + $0x28] sm:$0xf0] }
 0x2fc   :  { %v15554_v4 = vld [vmem:[%s25061_s1 + $0x20c] sm:$0xf]  ;;  %v10256_v17 = vor.u32 %v15490_v63, %v10253_v0  ;;  %6906 = vmatpush.bf16.msra.mxu2 %v10800_v3 }
 0x2fd   :  { %v10509_v5 = vld [vmem:[%s25061_s1 + $0x228] sm:$0xf0] }
 0x2fe   :  { %v15618_v6 = vld [vmem:[%s25061_s1 + $0x40c] sm:$0xf]  ;;  %v10512_v29 = vor.u32 %v15554_v4, %v10509_v5  ;;  %6919 = vmatpush.bf16.msra.mxu3 %v11056_v7  ;;  %6881 = vmatpush.bf16.msra.mxu0 %v10256_v17 }
 0x2ff   :  { %v10765_v8 = vld [vmem:[%s25061_s1 + $0x428] sm:$0xf0] }
 0x300   :  { %v15682_v28 = vld [vmem:[%s25061_s1 + $0x60c] sm:$0xf]  ;;  %v10768_v31 = vor.u32 %v15618_v6, %v10765_v8  ;;  %6894 = vmatpush.bf16.msra.mxu1 %v10512_v29 }
 0x301   :  { %v11021_v10 = vld [vmem:[%s25061_s1 + $0x628] sm:$0xf0]  ;;  %6882 = vmatmul.bf16.vlgmr.msra.gmra.mxu0 %v17214_v36 }
 0x302   :  { %v15802_v12 = vld [vmem:[%s25061_s1 + $0x9cc] sm:$0xf]  ;;  %v11024_v37 = vor.u32 %v15682_v28, %v11021_v10  ;;  %6907 = vmatpush.bf16.msra.mxu2 %v10768_v31  ;;  %v16808_v28 = vld [vmem:[%s25062_s2] sm:$0xff] }
 0x303   :  { %v11501_v13 = vld [vmem:[%s25061_s1 + $0x9e8] sm:$0xf0]  ;;  %6895 = vmatmul.bf16.vlgmr.msra.gmra.mxu1 %v17224_v43  ;;  %v1116_v10 = vperm.slane %v16808_v28, 2 }
 0x304   :  { %v15866_v14 = vld [vmem:[%s25061_s1 + $0xbcc] sm:$0xf]  ;;  %v11504_v38 = vor.u32 %v15802_v12, %v11501_v13  ;;  %6920 = vmatpush.bf16.msra.mxu3 %v11024_v37 }
 0x305   :  { %v11757_v18 = vld [vmem:[%s25061_s1 + $0xbe8] sm:$0xf0]  ;;  %6908 = vmatmul.bf16.vlgmr.msra.gmra.mxu2 %v17212_v35 }
 0x306   :  { %v15930_v22 = vld [vmem:[%s25061_s1 + $0xdcc] sm:$0xf]  ;;  %v11760_v41 = vor.u32 %v15866_v14, %v11757_v18  ;;  %6926 = vmatpush.bf16.msrb.mxu0 %v11504_v38  ;;  %v6688_v38 = vpop.f32.mrf.mxu1 }
 0x307   :  { %v12013_v25 = vld [vmem:[%s25061_s1 + $0xde8] sm:$0xf0]  ;;  %6921 = vmatmul.bf16.vlgmr.msra.gmra.mxu3 %v17222_v42 }
 0x308   :  { %v15994_v32 = vld [vmem:[%s25061_s1 + $0xfcc] sm:$0xf]  ;;  %v12016_v45 = vor.u32 %v15930_v22, %v12013_v25  ;;  %6939 = vmatpush.bf16.msrb.mxu1 %v11760_v41  ;;  %v6675_v22 = vpop.f32.mrf.mxu0 }
 0x309   :  { %v12269_v33 = vld [vmem:[%s25061_s1 + $0xfe8] sm:$0xf0]  ;;  %v6676_v37 = vadd.f32 %v6675_v22, %v1116_v10 }
 0x30a   :  { %v15794_v46 = vld [vmem:[%s25061_s1 + $0x98c] sm:$0xf]  ;;  %v12272_v51 = vor.u32 %v15994_v32, %v12269_v33  ;;  %6952 = vmatpush.bf16.msrb.mxu2 %v12016_v45 }
 0x30b   :  { %v11469_v47 = vld [vmem:[%s25061_s1 + $0x9a8] sm:$0xf0] }
 0x30c   :  { %v15858_v58 = vld [vmem:[%s25061_s1 + $0xb8c] sm:$0xf]  ;;  %v11472_v55 = vor.u32 %v15794_v46, %v11469_v47  ;;  %6965 = vmatpush.bf16.msrb.mxu3 %v12272_v51 }
 0x30d   :  { %v11725_v48 = vld [vmem:[%s25061_s1 + $0xba8] sm:$0xf0] }
 0x30e   :  { %v15922_v49 = vld [vmem:[%s25061_s1 + $0xd8c] sm:$0xf]  ;;  %v11728_v56 = vor.u32 %v15858_v58, %v11725_v48  ;;  %6927 = vmatpush.bf16.msrb.mxu0 %v11472_v55  ;;  %v6689_v48 = vadd.f32 %v6688_v38, %v6676_v37  ;;  %v6690_v10 = vpop.f32.mrf.mxu1 }
 0x30f   :  { %v11981_v52 = vld [vmem:[%s25061_s1 + $0xda8] sm:$0xf0] }
 0x310   :  { %v15986_v53 = vld [vmem:[%s25061_s1 + $0xf8c] sm:$0xf]  ;;  %v11984_v57 = vor.u32 %v15922_v49, %v11981_v52  ;;  %6940 = vmatpush.bf16.msrb.mxu1 %v11728_v56 }
 0x311   :  { %v12237_v54 = vld [vmem:[%s25061_s1 + $0xfa8] sm:$0xf0] }
 0x312   :  { %v15786_v2 = vld [vmem:[%s25061_s1 + $0x94c] sm:$0xf]  ;;  %v12240_v9 = vor.u32 %v15986_v53, %v12237_v54  ;;  %6953 = vmatpush.bf16.msrb.mxu2 %v11984_v57  ;;  %v6701_v57 = vpop.f32.mrf.mxu2 }
 0x313   :  { %v11437_v59 = vld [vmem:[%s25061_s1 + $0x968] sm:$0xf0] }
 0x314   :  { %v15850_v60 = vld [vmem:[%s25061_s1 + $0xb4c] sm:$0xf]  ;;  %v11440_v3 = vor.u32 %v15786_v2, %v11437_v59  ;;  %6966 = vmatpush.bf16.msrb.mxu3 %v12240_v9 }
 0x315   :  { %v11693_v61 = vld [vmem:[%s25061_s1 + $0xb68] sm:$0xf0] }
 0x316   :  { %v15914_v62 = vld [vmem:[%s25061_s1 + $0xd4c] sm:$0xf]  ;;  %v11696_v5 = vor.u32 %v15850_v60, %v11693_v61  ;;  %6928 = vmatpush.bf16.msrb.mxu0 %v11440_v3  ;;  %v6702_v61 = vadd.f32 %v6701_v57, %v6689_v48 }
 0x317   :  { %v11949_v63 = vld [vmem:[%s25061_s1 + $0xd68] sm:$0xf0] }
 0x318   :  { %v15978_v0 = vld [vmem:[%s25061_s1 + $0xf4c] sm:$0xf]  ;;  %v11952_v6 = vor.u32 %v15914_v62, %v11949_v63  ;;  %6941 = vmatpush.bf16.msrb.mxu1 %v11696_v5  ;;  %v6714_v62 = vpop.f32.mrf.mxu3 }
 0x319   :  { %v12205_v1 = vld [vmem:[%s25061_s1 + $0xf68] sm:$0xf0]  ;;  %v19646_v3 = vadd.f32 %v6714_v62, %v6702_v61 }
 0x31a   :  { %v15778_v4 = vld [vmem:[%s25061_s1 + $0x90c] sm:$0xf]  ;;  %v12208_v11 = vor.u32 %v15978_v0, %v12205_v1  ;;  %6954 = vmatpush.bf16.msrb.mxu2 %v11952_v6  ;;  %v6703_v38 = vpop.f32.mrf.mxu2 }
 0x31b   :  { %v11405_v7 = vld [vmem:[%s25061_s1 + $0x928] sm:$0xf0] }
 0x31c   :  { %v15842_v8 = vld [vmem:[%s25061_s1 + $0xb0c] sm:$0xf]  ;;  %v11408_v18 = vor.u32 %v15778_v4, %v11405_v7  ;;  %6967 = vmatpush.bf16.msrb.mxu3 %v12208_v11  ;;  %v6677_v4 = vpop.f32.mrf.mxu0 }
 0x31d   :  { %v11661_v12 = vld [vmem:[%s25061_s1 + $0xb28] sm:$0xf0] }
 0x31e   :  { %v15906_v13 = vld [vmem:[%s25061_s1 + $0xd0c] sm:$0xf]  ;;  %v11664_v25 = vor.u32 %v15842_v8, %v11661_v12  ;;  %6929 = vmatpush.bf16.msrb.mxu0 %v11408_v18 }
 0x31f   :  { %v11917_v14 = vld [vmem:[%s25061_s1 + $0xd28] sm:$0xf0] }
 0x320   :  { %v15970_v16 = vld [vmem:[%s25061_s1 + $0xf0c] sm:$0xf]  ;;  %v11920_v29 = vor.u32 %v15906_v13, %v11917_v14  ;;  %6942 = vmatpush.bf16.msrb.mxu1 %v11664_v25 }
 0x321   :  { %v12173_v17 = vld [vmem:[%s25061_s1 + $0xf28] sm:$0xf0] }
 0x322   :  { %v15770_v31 = vld [vmem:[%s25061_s1 + $0x8cc] sm:$0xf]  ;;  %v12176_v41 = vor.u32 %v15970_v16, %v12173_v17  ;;  %6955 = vmatpush.bf16.msrb.mxu2 %v11920_v29 }
 0x323   :  { %v11373_v32 = vld [vmem:[%s25061_s1 + $0x8e8] sm:$0xf0] }
 0x324   :  { %v15834_v33 = vld [vmem:[%s25061_s1 + $0xacc] sm:$0xf]  ;;  %v11376_v49 = vor.u32 %v15770_v31, %v11373_v32  ;;  %6968 = vmatpush.bf16.msrb.mxu3 %v12176_v41 }
 0x325   :  { %v11629_v45 = vld [vmem:[%s25061_s1 + $0xae8] sm:$0xf0] }
 0x326   :  { %v15898_v46 = vld [vmem:[%s25061_s1 + $0xccc] sm:$0xf]  ;;  %v11632_v52 = vor.u32 %v15834_v33, %v11629_v45  ;;  %6930 = vmatpush.bf16.msrb.mxu0 %v11376_v49 }
 0x327   :  { %v11885_v47 = vld [vmem:[%s25061_s1 + $0xce8] sm:$0xf0] }
 0x328   :  { %v15962_v58 = vld [vmem:[%s25061_s1 + $0xecc] sm:$0xf]  ;;  %v11888_v53 = vor.u32 %v15898_v46, %v11885_v47  ;;  %6943 = vmatpush.bf16.msrb.mxu1 %v11632_v52 }
 0x329   :  { %v12141_v51 = vld [vmem:[%s25061_s1 + $0xee8] sm:$0xf0] }
 0x32a   :  { %v15762_v54 = vld [vmem:[%s25061_s1 + $0x88c] sm:$0xf]  ;;  %v12144_v2 = vor.u32 %v15962_v58, %v12141_v51  ;;  %6956 = vmatpush.bf16.msrb.mxu2 %v11888_v53  ;;  %v6716_v58 = vpop.f32.mrf.mxu3 }
 0x32b   :  { %v11341_v55 = vld [vmem:[%s25061_s1 + $0x8a8] sm:$0xf0] }
 0x32c   :  { %v15826_v56 = vld [vmem:[%s25061_s1 + $0xa8c] sm:$0xf]  ;;  %v11344_v1 = vor.u32 %v15762_v54, %v11341_v55  ;;  %6969 = vmatpush.bf16.msrb.mxu3 %v12144_v2 }
 0x32d   :  { %v11597_v59 = vld [vmem:[%s25061_s1 + $0xaa8] sm:$0xf0] }
 0x32e   :  { %v15890_v60 = vld [vmem:[%s25061_s1 + $0xc8c] sm:$0xf]  ;;  %v11600_v5 = vor.u32 %v15826_v56, %v11597_v59  ;;  %6931 = vmatpush.bf16.msrb.mxu0 %v11344_v1 }
 0x32f   :  { %v11853_v9 = vld [vmem:[%s25061_s1 + $0xca8] sm:$0xf0] }
 0x330   :  { %v15954_v63 = vld [vmem:[%s25061_s1 + $0xe8c] sm:$0xf]  ;;  %v11856_v6 = vor.u32 %v15890_v60, %v11853_v9  ;;  %6944 = vmatpush.bf16.msrb.mxu1 %v11600_v5 }
 0x331   :  { %v12109_v0 = vld [vmem:[%s25061_s1 + $0xea8] sm:$0xf0] }
 0x332   :  { %v15754_v7 = vld [vmem:[%s25061_s1 + $0x84c] sm:$0xf]  ;;  %v12112_v11 = vor.u32 %v15954_v63, %v12109_v0  ;;  %6957 = vmatpush.bf16.msrb.mxu2 %v11856_v6 }
 0x333   :  { %v11309_v8 = vld [vmem:[%s25061_s1 + $0x868] sm:$0xf0] }
 0x334   :  { %v15818_v28 = vld [vmem:[%s25061_s1 + $0xa4c] sm:$0xf]  ;;  %v11312_v18 = vor.u32 %v15754_v7, %v11309_v8  ;;  %6970 = vmatpush.bf16.msrb.mxu3 %v12112_v11 }
 0x335   :  { %v11565_v12 = vld [vmem:[%s25061_s1 + $0xa68] sm:$0xf0] }
 0x336   :  { %v15882_v13 = vld [vmem:[%s25061_s1 + $0xc4c] sm:$0xf]  ;;  %v11568_v29 = vor.u32 %v15818_v28, %v11565_v12  ;;  %6932 = vmatpush.bf16.msrb.mxu0 %v11312_v18 }
 0x337   :  { %v11821_v14 = vld [vmem:[%s25061_s1 + $0xc68] sm:$0xf0] }
 0x338   :  { %v15946_v16 = vld [vmem:[%s25061_s1 + $0xe4c] sm:$0xf]  ;;  %v11824_v31 = vor.u32 %v15882_v13, %v11821_v14  ;;  %6945 = vmatpush.bf16.msrb.mxu1 %v11568_v29 }
 0x339   :  { %v12077_v17 = vld [vmem:[%s25061_s1 + $0xe68] sm:$0xf0] }
 0x33a   :  { %v15746_v22 = vld [vmem:[%s25061_s1 + $0x80c] sm:$0xf]  ;;  %v12080_v41 = vor.u32 %v15946_v16, %v12077_v17  ;;  %6958 = vmatpush.bf16.msrb.mxu2 %v11824_v31 }
 0x33b   :  { %v11277_v25 = vld [vmem:[%s25061_s1 + $0x828] sm:$0xf0] }
 0x33c   :  { %v15810_v32 = vld [vmem:[%s25061_s1 + $0xa0c] sm:$0xf]  ;;  %v11280_v52 = vor.u32 %v15746_v22, %v11277_v25  ;;  %6971 = vmatpush.bf16.msrb.mxu3 %v12080_v41 }
 0x33d   :  { %v11533_v33 = vld [vmem:[%s25061_s1 + $0xa28] sm:$0xf0] }
 0x33e   :  { %v15874_v37 = vld [vmem:[%s25061_s1 + $0xc0c] sm:$0xf]  ;;  %v11536_v56 = vor.u32 %v15810_v32, %v11533_v33  ;;  %6933 = vmatpush.bf16.msrb.mxu0 %v11280_v52 }
 0x33f   :  { %v11789_v45 = vld [vmem:[%s25061_s1 + $0xc28] sm:$0xf0] }
 0x340   :  { %v15938_v46 = vld [vmem:[%s25061_s1 + $0xe0c] sm:$0xf]  ;;  %v11792_v57 = vor.u32 %v15874_v37, %v11789_v45  ;;  %6946 = vmatpush.bf16.msrb.mxu1 %v11536_v56 }
 0x341   :  { %v12045_v47 = vld [vmem:[%s25061_s1 + $0xe28] sm:$0xf0]  ;;  %6934 = vmatmul.bf16.vlgmr.msrb.gmra.mxu0 %v17340_v39 }
 0x342   :  { %v16058_v51 = vld [vmem:[%s25061_s1 + $0x11cc] sm:$0xf]  ;;  %v12048_v60 = vor.u32 %v15938_v46, %v12045_v47  ;;  %6959 = vmatpush.bf16.msrb.mxu2 %v11792_v57 }
 0x343   :  { %v12525_v48 = vld [vmem:[%s25061_s1 + $0x11e8] sm:$0xf0]  ;;  %6947 = vmatmul.bf16.vlgmr.msrb.gmra.mxu1 %v17344_v44 }
 0x344   :  { %v16122_v49 = vld [vmem:[%s25061_s1 + $0x13cc] sm:$0xf]  ;;  %v12528_v9 = vor.u32 %v16058_v51, %v12525_v48  ;;  %6972 = vmatpush.bf16.msrb.mxu3 %v12048_v60  ;;  %v6740_v60 = vpop.f32.mrf.mxu1 }
 0x345   :  { %v12781_v53 = vld [vmem:[%s25061_s1 + $0x13e8] sm:$0xf0]  ;;  %6960 = vmatmul.bf16.vlgmr.msrb.gmra.mxu2 %v17332_v34 }
 0x346   :  { %v16186_v54 = vld [vmem:[%s25061_s1 + $0x15cc] sm:$0xf]  ;;  %v12784_v61 = vor.u32 %v16122_v49, %v12781_v53  ;;  %6978 = vmatpush.bf16.msra.mxu0 %v12528_v9  ;;  %v6727_v53 = vpop.f32.mrf.mxu0 }
 0x347   :  { %v13037_v55 = vld [vmem:[%s25061_s1 + $0x15e8] sm:$0xf0]  ;;  %6973 = vmatmul.bf16.vlgmr.msrb.gmra.mxu3 %v17342_v40 }
 0x348   :  { %v16250_v2 = vld [vmem:[%s25061_s1 + $0x17cc] sm:$0xf]  ;;  %v13040_v62 = vor.u32 %v16186_v54, %v13037_v55  ;;  %6991 = vmatpush.bf16.msra.mxu1 %v12784_v61 }
 0x349   :  { %v13293_v59 = vld [vmem:[%s25061_s1 + $0x17e8] sm:$0xf0] }
 0x34a   :  { %v16050_v63 = vld [vmem:[%s25061_s1 + $0x118c] sm:$0xf]  ;;  %v13296_v4 = vor.u32 %v16250_v2, %v13293_v59  ;;  %7004 = vmatpush.bf16.msra.mxu2 %v13040_v62  ;;  %v6728_v59 = vadd.f32 %v6727_v53, %v19646_v3 }
 0x34b   :  { %v12493_v0 = vld [vmem:[%s25061_s1 + $0x11a8] sm:$0xf0] }
 0x34c   :  { %v16114_v1 = vld [vmem:[%s25061_s1 + $0x138c] sm:$0xf]  ;;  %v12496_v10 = vor.u32 %v16050_v63, %v12493_v0  ;;  %7017 = vmatpush.bf16.msra.mxu3 %v13296_v4 }
 0x34d   :  { %v12749_v5 = vld [vmem:[%s25061_s1 + $0x13a8] sm:$0xf0] }
 0x34e   :  { %v16178_v6 = vld [vmem:[%s25061_s1 + $0x158c] sm:$0xf]  ;;  %v12752_v11 = vor.u32 %v16114_v1, %v12749_v5  ;;  %6979 = vmatpush.bf16.msra.mxu0 %v12496_v10  ;;  %v6741_v1 = vadd.f32 %v6740_v60, %v6728_v59  ;;  %v6753_v10 = vpop.f32.mrf.mxu2 }
 0x34f   :  { %v13005_v7 = vld [vmem:[%s25061_s1 + $0x15a8] sm:$0xf0] }
 0x350   :  { %v16242_v8 = vld [vmem:[%s25061_s1 + $0x178c] sm:$0xf]  ;;  %v13008_v12 = vor.u32 %v16178_v6, %v13005_v7  ;;  %6992 = vmatpush.bf16.msra.mxu1 %v12752_v11 }
 0x351   :  { %v13261_v28 = vld [vmem:[%s25061_s1 + $0x17a8] sm:$0xf0] }
 0x352   :  { %v16042_v13 = vld [vmem:[%s25061_s1 + $0x114c] sm:$0xf]  ;;  %v13264_v17 = vor.u32 %v16242_v8, %v13261_v28  ;;  %7005 = vmatpush.bf16.msra.mxu2 %v13008_v12 }
 0x353   :  { %v12461_v14 = vld [vmem:[%s25061_s1 + $0x1168] sm:$0xf0] }
 0x354   :  { %v16106_v16 = vld [vmem:[%s25061_s1 + $0x134c] sm:$0xf]  ;;  %v12464_v32 = vor.u32 %v16042_v13, %v12461_v14  ;;  %7018 = vmatpush.bf16.msra.mxu3 %v13264_v17  ;;  %v6766_v17 = vpop.f32.mrf.mxu3 }
 0x355   :  { %v12717_v18 = vld [vmem:[%s25061_s1 + $0x1368] sm:$0xf0] }
 0x356   :  { %v16170_v22 = vld [vmem:[%s25061_s1 + $0x154c] sm:$0xf]  ;;  %v12720_v33 = vor.u32 %v16106_v16, %v12717_v18  ;;  %6980 = vmatpush.bf16.msra.mxu0 %v12464_v32  ;;  %v6754_v16 = vadd.f32 %v6753_v10, %v6741_v1  ;;  %v6755_v60 = vpop.f32.mrf.mxu2 }
 0x357   :  { %v12973_v25 = vld [vmem:[%s25061_s1 + $0x1568] sm:$0xf0] }
 0x358   :  { %v16234_v29 = vld [vmem:[%s25061_s1 + $0x174c] sm:$0xf]  ;;  %v12976_v37 = vor.u32 %v16170_v22, %v12973_v25  ;;  %6993 = vmatpush.bf16.msra.mxu1 %v12720_v33 }
 0x359   :  { %v13229_v31 = vld [vmem:[%s25061_s1 + $0x1768] sm:$0xf0] }
 0x35a   :  { %v16034_v38 = vld [vmem:[%s25061_s1 + $0x110c] sm:$0xf]  ;;  %v13232_v46 = vor.u32 %v16234_v29, %v13229_v31  ;;  %7006 = vmatpush.bf16.msra.mxu2 %v12976_v37  ;;  %v19845_v29 = vadd.f32 %v6766_v17, %v6754_v16  ;;  %v6729_v31 = vpop.f32.mrf.mxu0 }
 0x35b   :  { %v12429_v41 = vld [vmem:[%s25061_s1 + $0x1128] sm:$0xf0] }
 0x35c   :  { %v16098_v45 = vld [vmem:[%s25061_s1 + $0x130c] sm:$0xf]  ;;  %v12432_v52 = vor.u32 %v16034_v38, %v12429_v41  ;;  %7019 = vmatpush.bf16.msra.mxu3 %v13232_v46 }
 0x35d   :  { %v12685_v47 = vld [vmem:[%s25061_s1 + $0x1328] sm:$0xf0] }
 0x35e   :  { %v16162_v58 = vld [vmem:[%s25061_s1 + $0x150c] sm:$0xf]  ;;  %v12688_v54 = vor.u32 %v16098_v45, %v12685_v47  ;;  %6981 = vmatpush.bf16.msra.mxu0 %v12432_v52  ;;  %v6742_v45 = vpop.f32.mrf.mxu1 }
 0x35f   :  { %v12941_v51 = vld [vmem:[%s25061_s1 + $0x1528] sm:$0xf0] }
 0x360   :  { %v16226_v48 = vld [vmem:[%s25061_s1 + $0x170c] sm:$0xf]  ;;  %v12944_v55 = vor.u32 %v16162_v58, %v12941_v51  ;;  %6994 = vmatpush.bf16.msra.mxu1 %v12688_v54 }
 0x361   :  { %v13197_v49 = vld [vmem:[%s25061_s1 + $0x1728] sm:$0xf0] }
 0x362   :  { %v16026_v56 = vld [vmem:[%s25061_s1 + $0x10cc] sm:$0xf]  ;;  %v13200_v9 = vor.u32 %v16226_v48, %v13197_v49  ;;  %7007 = vmatpush.bf16.msra.mxu2 %v12944_v55 }
 0x363   :  { %v12397_v57 = vld [vmem:[%s25061_s1 + $0x10e8] sm:$0xf0] }
 0x364   :  { %v16090_v2 = vld [vmem:[%s25061_s1 + $0x12cc] sm:$0xf]  ;;  %v12400_v4 = vor.u32 %v16026_v56, %v12397_v57  ;;  %7020 = vmatpush.bf16.msra.mxu3 %v13200_v9 }
 0x365   :  { %v12653_v61 = vld [vmem:[%s25061_s1 + $0x12e8] sm:$0xf0] }
 0x366   :  { %v16154_v62 = vld [vmem:[%s25061_s1 + $0x14cc] sm:$0xf]  ;;  %v12656_v5 = vor.u32 %v16090_v2, %v12653_v61  ;;  %6982 = vmatpush.bf16.msra.mxu0 %v12400_v4 }
 0x367   :  { %v12909_v63 = vld [vmem:[%s25061_s1 + $0x14e8] sm:$0xf0] }
 0x368   :  { %v16218_v0 = vld [vmem:[%s25061_s1 + $0x16cc] sm:$0xf]  ;;  %v12912_v6 = vor.u32 %v16154_v62, %v12909_v63  ;;  %6995 = vmatpush.bf16.msra.mxu1 %v12656_v5 }
 0x369   :  { %v13165_v3 = vld [vmem:[%s25061_s1 + $0x16e8] sm:$0xf0] }
 0x36a   :  { %v16018_v7 = vld [vmem:[%s25061_s1 + $0x108c] sm:$0xf]  ;;  %v13168_v11 = vor.u32 %v16218_v0, %v13165_v3  ;;  %7008 = vmatpush.bf16.msra.mxu2 %v12912_v6  ;;  %v6768_v0 = vpop.f32.mrf.mxu3 }
 0x36b   :  { %v12365_v8 = vld [vmem:[%s25061_s1 + $0x10a8] sm:$0xf0] }
 0x36c   :  { %v16082_v28 = vld [vmem:[%s25061_s1 + $0x128c] sm:$0xf]  ;;  %v12368_v25 = vor.u32 %v16018_v7, %v12365_v8  ;;  %7021 = vmatpush.bf16.msra.mxu3 %v13168_v11 }
 0x36d   :  { %v12621_v12 = vld [vmem:[%s25061_s1 + $0x12a8] sm:$0xf0] }
 0x36e   :  { %v16146_v13 = vld [vmem:[%s25061_s1 + $0x148c] sm:$0xf]  ;;  %v12624_v32 = vor.u32 %v16082_v28, %v12621_v12  ;;  %6983 = vmatpush.bf16.msra.mxu0 %v12368_v25 }
 0x36f   :  { %v12877_v14 = vld [vmem:[%s25061_s1 + $0x14a8] sm:$0xf0] }
 0x370   :  { %v16210_v18 = vld [vmem:[%s25061_s1 + $0x168c] sm:$0xf]  ;;  %v12880_v33 = vor.u32 %v16146_v13, %v12877_v14  ;;  %6996 = vmatpush.bf16.msra.mxu1 %v12624_v32 }
 0x371   :  { %v13133_v22 = vld [vmem:[%s25061_s1 + $0x16a8] sm:$0xf0] }
 0x372   :  { %v16010_v37 = vld [vmem:[%s25061_s1 + $0x104c] sm:$0xf]  ;;  %v13136_v46 = vor.u32 %v16210_v18, %v13133_v22  ;;  %7009 = vmatpush.bf16.msra.mxu2 %v12880_v33 }
 0x373   :  { %v12333_v38 = vld [vmem:[%s25061_s1 + $0x1068] sm:$0xf0] }
 0x374   :  { %v16074_v41 = vld [vmem:[%s25061_s1 + $0x124c] sm:$0xf]  ;;  %v12336_v52 = vor.u32 %v16010_v37, %v12333_v38  ;;  %7022 = vmatpush.bf16.msra.mxu3 %v13136_v46 }
 0x375   :  { %v12589_v47 = vld [vmem:[%s25061_s1 + $0x1268] sm:$0xf0] }
 0x376   :  { %v16138_v58 = vld [vmem:[%s25061_s1 + $0x144c] sm:$0xf]  ;;  %v12592_v55 = vor.u32 %v16074_v41, %v12589_v47  ;;  %6984 = vmatpush.bf16.msra.mxu0 %v12336_v52 }
 0x377   :  { %v12845_v51 = vld [vmem:[%s25061_s1 + $0x1468] sm:$0xf0] }
 0x378   :  { %v16202_v48 = vld [vmem:[%s25061_s1 + $0x164c] sm:$0xf]  ;;  %v12848_v56 = vor.u32 %v16138_v58, %v12845_v51  ;;  %6997 = vmatpush.bf16.msra.mxu1 %v12592_v55 }
 0x379   :  { %v13101_v49 = vld [vmem:[%s25061_s1 + $0x1668] sm:$0xf0] }
 0x37a   :  { %v16002_v53 = vld [vmem:[%s25061_s1 + $0x100c] sm:$0xf]  ;;  %v13104_v9 = vor.u32 %v16202_v48, %v13101_v49  ;;  %7010 = vmatpush.bf16.msra.mxu2 %v12848_v56 }
 0x37b   :  { %v12301_v54 = vld [vmem:[%s25061_s1 + $0x1028] sm:$0xf0] }
 0x37c   :  { %v16066_v57 = vld [vmem:[%s25061_s1 + $0x120c] sm:$0xf]  ;;  %v12304_v5 = vor.u32 %v16002_v53, %v12301_v54  ;;  %7023 = vmatpush.bf16.msra.mxu3 %v13104_v9 }
 0x37d   :  { %v12557_v2 = vld [vmem:[%s25061_s1 + $0x1228] sm:$0xf0] }
 0x37e   :  { %v16130_v59 = vld [vmem:[%s25061_s1 + $0x140c] sm:$0xf]  ;;  %v12560_v28 = vor.u32 %v16066_v57, %v12557_v2  ;;  %6985 = vmatpush.bf16.msra.mxu0 %v12304_v5 }
 0x37f   :  { %v12813_v61 = vld [vmem:[%s25061_s1 + $0x1428] sm:$0xf0] }
 0x380   :  { %v16194_v62 = vld [vmem:[%s25061_s1 + $0x160c] sm:$0xf]  ;;  %v12816_v10 = vor.u32 %v16130_v59, %v12813_v61  ;;  %6998 = vmatpush.bf16.msra.mxu1 %v12560_v28 }
 0x381   :  { %v13069_v63 = vld [vmem:[%s25061_s1 + $0x1628] sm:$0xf0]  ;;  %6986 = vmatmul.bf16.vlgmr.msra.gmra.mxu0 %v17527_v19 }
 0x382   :  { %v16314_v3 = vld [vmem:[%s25061_s1 + $0x19cc] sm:$0xf]  ;;  %v13072_v13 = vor.u32 %v16194_v62, %v13069_v63  ;;  %7011 = vmatpush.bf16.msra.mxu2 %v12816_v10 }
 0x383   :  { %v13549_v1 = vld [vmem:[%s25061_s1 + $0x19e8] sm:$0xf0]  ;;  %6999 = vmatmul.bf16.vlgmr.msra.gmra.mxu1 %v17540_v24 }
 0x384   :  { %v16378_v4 = vld [vmem:[%s25061_s1 + $0x1bcc] sm:$0xf]  ;;  %v13552_v14 = vor.u32 %v16314_v3, %v13549_v1  ;;  %7024 = vmatpush.bf16.msra.mxu3 %v13072_v13  ;;  %v6779_v1 = vpop.f32.mrf.mxu0 }
 0x385   :  { %v13805_v6 = vld [vmem:[%s25061_s1 + $0x1be8] sm:$0xf0]  ;;  %7012 = vmatmul.bf16.vlgmr.msra.gmra.mxu2 %v17538_v23 }
 0x386   :  { %v16442_v7 = vld [vmem:[%s25061_s1 + $0x1dcc] sm:$0xf]  ;;  %v13808_v16 = vor.u32 %v16378_v4, %v13805_v6  ;;  %7030 = vmatpush.bf16.msrb.mxu0 %v13552_v14  ;;  %v6780_v6 = vadd.f32 %v6779_v1, %v19845_v29 }
 0x387   :  { %v14061_v8 = vld [vmem:[%s25061_s1 + $0x1de8] sm:$0xf0]  ;;  %7025 = vmatmul.bf16.vlgmr.msra.gmra.mxu3 %v17548_v27 }
 0x388   :  { %v16506_v11 = vld [vmem:[%s25061_s1 + $0x1fcc] sm:$0xf]  ;;  %v14064_v17 = vor.u32 %v16442_v7, %v14061_v8  ;;  %7043 = vmatpush.bf16.msrb.mxu1 %v13808_v16  ;;  %v6792_v8 = vpop.f32.mrf.mxu1 }
 0x389   :  { %v14317_v12 = vld [vmem:[%s25061_s1 + $0x1fe8] sm:$0xf0]  ;;  %v6793_v14 = vadd.f32 %v6792_v8, %v6780_v6 }
 0x38a   :  { %v16306_v18 = vld [vmem:[%s25061_s1 + $0x198c] sm:$0xf]  ;;  %v14320_v31 = vor.u32 %v16506_v11, %v14317_v12  ;;  %7056 = vmatpush.bf16.msrb.mxu2 %v14064_v17 }
 0x38b   :  { %v13517_v22 = vld [vmem:[%s25061_s1 + $0x19a8] sm:$0xf0] }
 0x38c   :  { %v16370_v25 = vld [vmem:[%s25061_s1 + $0x1b8c] sm:$0xf]  ;;  %v13520_v45 = vor.u32 %v16306_v18, %v13517_v22  ;;  %7069 = vmatpush.bf16.msrb.mxu3 %v14320_v31 }
 0x38d   :  { %v13773_v32 = vld [vmem:[%s25061_s1 + $0x1ba8] sm:$0xf0] }
 0x38e   :  { %v16434_v33 = vld [vmem:[%s25061_s1 + $0x1d8c] sm:$0xf]  ;;  %v13776_v46 = vor.u32 %v16370_v25, %v13773_v32  ;;  %7031 = vmatpush.bf16.msrb.mxu0 %v13520_v45 }
 0x38f   :  { %v14029_v37 = vld [vmem:[%s25061_s1 + $0x1da8] sm:$0xf0] }
 0x390   :  { %v16498_v38 = vld [vmem:[%s25061_s1 + $0x1f8c] sm:$0xf]  ;;  %v14032_v47 = vor.u32 %v16434_v33, %v14029_v37  ;;  %7044 = vmatpush.bf16.msrb.mxu1 %v13776_v46  ;;  %v6805_v46 = vpop.f32.mrf.mxu2 }
 0x391   :  { %v14285_v41 = vld [vmem:[%s25061_s1 + $0x1fa8] sm:$0xf0] }
 0x392   :  { %v16298_v58 = vld [vmem:[%s25061_s1 + $0x194c] sm:$0xf]  ;;  %v14288_v49 = vor.u32 %v16498_v38, %v14285_v41  ;;  %7057 = vmatpush.bf16.msrb.mxu2 %v14032_v47 }
 0x393   :  { %v13485_v51 = vld [vmem:[%s25061_s1 + $0x1968] sm:$0xf0] }
 0x394   :  { %v16362_v48 = vld [vmem:[%s25061_s1 + $0x1b4c] sm:$0xf]  ;;  %v13488_v57 = vor.u32 %v16298_v58, %v13485_v51  ;;  %7070 = vmatpush.bf16.msrb.mxu3 %v14288_v49  ;;  %v6818_v49 = vpop.f32.mrf.mxu3 }
 0x395   :  { %v13741_v52 = vld [vmem:[%s25061_s1 + $0x1b68] sm:$0xf0] }
 0x396   :  { %v16426_v53 = vld [vmem:[%s25061_s1 + $0x1d4c] sm:$0xf]  ;;  %v13744_v2 = vor.u32 %v16362_v48, %v13741_v52  ;;  %7032 = vmatpush.bf16.msrb.mxu0 %v13488_v57  ;;  %v6806_v48 = vadd.f32 %v6805_v46, %v6793_v14  ;;  %v11251_v46 = vld [vmem:[%s25061_s1 + $0x7d0] sm:$0xf] }
 0x397   :  { %v13997_v54 = vld [vmem:[%s25061_s1 + $0x1d68] sm:$0xf0] }
 0x398   :  { %v16490_v55 = vld [vmem:[%s25061_s1 + $0x1f4c] sm:$0xf]  ;;  %v14000_v59 = vor.u32 %v16426_v53, %v13997_v54  ;;  %7045 = vmatpush.bf16.msrb.mxu1 %v13744_v2  ;;  %v6781_v54 = vpop.f32.mrf.mxu0  ;;  %v20044_v57 = vadd.f32 %v6818_v49, %v6806_v48 }
 0x399   :  { %v14253_v56 = vld [vmem:[%s25061_s1 + $0x1f68] sm:$0xf0]  ;;  %v10707_v54 = vld [vmem:[%s25061_s1 + $0x390] sm:$0xf] }
 0x39a   :  { %v16290_v60 = vld [vmem:[%s25061_s1 + $0x190c] sm:$0xf]  ;;  %v14256_v62 = vor.u32 %v16490_v55, %v14253_v56  ;;  %7058 = vmatpush.bf16.msrb.mxu2 %v14000_v59  ;;  %v6794_v56 = vpop.f32.mrf.mxu1 }
 0x39b   :  { %v13453_v9 = vld [vmem:[%s25061_s1 + $0x1928] sm:$0xf0]  ;;  %v15607_v56 = vld [vmem:[%s25061_s1 + $0x3ac] sm:$0xf0] }
 0x39c   :  { %v16354_v61 = vld [vmem:[%s25061_s1 + $0x1b0c] sm:$0xf]  ;;  %v13456_v7 = vor.u32 %v16290_v60, %v13453_v9  ;;  %7071 = vmatpush.bf16.msrb.mxu3 %v14256_v62 }
 0x39d   :  { %v13709_v63 = vld [vmem:[%s25061_s1 + $0x1b28] sm:$0xf0] }
 0x39e   :  { %v16418_v0 = vld [vmem:[%s25061_s1 + $0x1d0c] sm:$0xf]  ;;  %v13712_v28 = vor.u32 %v16354_v61, %v13709_v63  ;;  %7033 = vmatpush.bf16.msrb.mxu0 %v13456_v7 }
 0x39f   :  { %v13965_v3 = vld [vmem:[%s25061_s1 + $0x1d28] sm:$0xf0] }
 0x3a0   :  { %v16482_v4 = vld [vmem:[%s25061_s1 + $0x1f0c] sm:$0xf]  ;;  %v13968_v10 = vor.u32 %v16418_v0, %v13965_v3  ;;  %7046 = vmatpush.bf16.msrb.mxu1 %v13712_v28 }
 0x3a1   :  { %v14221_v5 = vld [vmem:[%s25061_s1 + $0x1f28] sm:$0xf0] }
 0x3a2   :  { %v16282_v11 = vld [vmem:[%s25061_s1 + $0x18cc] sm:$0xf]  ;;  %v14224_v29 = vor.u32 %v16482_v4, %v14221_v5  ;;  %7059 = vmatpush.bf16.msrb.mxu2 %v13968_v10 }
 0x3a3   :  { %v13421_v12 = vld [vmem:[%s25061_s1 + $0x18e8] sm:$0xf0] }
 0x3a4   :  { %v16346_v13 = vld [vmem:[%s25061_s1 + $0x1acc] sm:$0xf]  ;;  %v13424_v31 = vor.u32 %v16282_v11, %v13421_v12  ;;  %7072 = vmatpush.bf16.msrb.mxu3 %v14224_v29 }
 0x3a5   :  { %v13677_v16 = vld [vmem:[%s25061_s1 + $0x1ae8] sm:$0xf0] }
 0x3a6   :  { %v16410_v17 = vld [vmem:[%s25061_s1 + $0x1ccc] sm:$0xf]  ;;  %v13680_v32 = vor.u32 %v16346_v13, %v13677_v16  ;;  %7034 = vmatpush.bf16.msrb.mxu0 %v13424_v31  ;;  %v6820_v31 = vpop.f32.mrf.mxu3 }
 0x3a7   :  { %v13933_v18 = vld [vmem:[%s25061_s1 + $0x1ce8] sm:$0xf0]  ;;  %v11155_v31 = vld [vmem:[%s25061_s1 + $0x710] sm:$0xf] }
 0x3a8   :  { %v16474_v22 = vld [vmem:[%s25061_s1 + $0x1ecc] sm:$0xf]  ;;  %v13936_v33 = vor.u32 %v16410_v17, %v13933_v18  ;;  %7047 = vmatpush.bf16.msrb.mxu1 %v13680_v32  ;;  %v6807_v17 = vpop.f32.mrf.mxu2  ;;  %v10483_v18 = vld [vmem:[%s25061_s1 + $0x1d0] sm:$0xf] }
 0x3a9   :  { %v14189_v25 = vld [vmem:[%s25061_s1 + $0x1ee8] sm:$0xf0]  ;;  %v15591_v17 = vld [vmem:[%s25061_s1 + $0x32c] sm:$0xf0] }
 0x3aa   :  { %v16274_v37 = vld [vmem:[%s25061_s1 + $0x188c] sm:$0xf]  ;;  %v14192_v45 = vor.u32 %v16474_v22, %v14189_v25  ;;  %7060 = vmatpush.bf16.msrb.mxu2 %v13936_v33  ;;  %v15551_v22 = vld [vmem:[%s25061_s1 + $0x1ec] sm:$0xf0] }
 0x3ab   :  { %v13389_v38 = vld [vmem:[%s25061_s1 + $0x18a8] sm:$0xf0]  ;;  %v10739_v25 = vld [vmem:[%s25061_s1 + $0x3d0] sm:$0xf] }
 0x3ac   :  { %v16338_v41 = vld [vmem:[%s25061_s1 + $0x1a8c] sm:$0xf]  ;;  %v13392_v55 = vor.u32 %v16274_v37, %v13389_v38  ;;  %7073 = vmatpush.bf16.msrb.mxu3 %v14192_v45  ;;  %v15615_v33 = vld [vmem:[%s25061_s1 + $0x3ec] sm:$0xf0] }
 0x3ad   :  { %v13645_v47 = vld [vmem:[%s25061_s1 + $0x1aa8] sm:$0xf0]  ;;  %v10995_v37 = vld [vmem:[%s25061_s1 + $0x5d0] sm:$0xf]  ;;  %v10740_v48 = vor.u32 %v15615_v33, %v10739_v25  ;;  %v6831_v25 = vpop.f32.mrf.mxu0 }
 0x3ae   :  { %v16402_v58 = vld [vmem:[%s25061_s1 + $0x1c8c] sm:$0xf]  ;;  %v13648_v2 = vor.u32 %v16338_v41, %v13645_v47  ;;  %7035 = vmatpush.bf16.msrb.mxu0 %v13392_v55  ;;  %v15679_v38 = vld [vmem:[%s25061_s1 + $0x5ec] sm:$0xf0]  ;;  %v6832_v33 = vadd.f32 %v6831_v25, %v20044_v57 }
 0x3af   :  { %v13901_v51 = vld [vmem:[%s25061_s1 + $0x1ca8] sm:$0xf0]  ;;  %v15743_v47 = vld [vmem:[%s25061_s1 + $0x7ec] sm:$0xf0]  ;;  %v10996_v49 = vor.u32 %v15679_v38, %v10995_v37  ;;  %v6844_v38 = vpop.f32.mrf.mxu1 }
 0x3b0   :  { %v16466_v52 = vld [vmem:[%s25061_s1 + $0x1e8c] sm:$0xf]  ;;  %v13904_v59 = vor.u32 %v16402_v58, %v13901_v51  ;;  %7048 = vmatpush.bf16.msrb.mxu1 %v13648_v2  ;;  %v10484_v51 = vor.u32 %v15551_v22, %v10483_v18  ;;  %v11252_v55 = vor.u32 %v15743_v47, %v11251_v46  ;;  %v10963_v2 = vld [vmem:[%s25061_s1 + $0x590] sm:$0xf] }
 0x3b1   :  { %v14157_v53 = vld [vmem:[%s25061_s1 + $0x1ea8] sm:$0xf0]  ;;  %v10899_v18 = vld [vmem:[%s25061_s1 + $0x510] sm:$0xf] }
 0x3b2   :  { %v16266_v60 = vld [vmem:[%s25061_s1 + $0x184c] sm:$0xf]  ;;  %v14160_v62 = vor.u32 %v16466_v52, %v14157_v53  ;;  %7061 = vmatpush.bf16.msrb.mxu2 %v13904_v59  ;;  %v10451_v52 = vld [vmem:[%s25061_s1 + $0x190] sm:$0xf] }
 0x3b3   :  { %v13357_v9 = vld [vmem:[%s25061_s1 + $0x1868] sm:$0xf0]  ;;  %v15543_v53 = vld [vmem:[%s25061_s1 + $0x1ac] sm:$0xf0] }
 0x3b4   :  { %v16330_v61 = vld [vmem:[%s25061_s1 + $0x1a4c] sm:$0xf]  ;;  %v13360_v5 = vor.u32 %v16266_v60, %v13357_v9  ;;  %7074 = vmatpush.bf16.msrb.mxu3 %v14160_v62  ;;  %v15671_v59 = vld [vmem:[%s25061_s1 + $0x5ac] sm:$0xf0]  ;;  %v10708_v62 = vor.u32 %v15607_v56, %v10707_v54 }
 0x3b5   :  { %v13613_v63 = vld [vmem:[%s25061_s1 + $0x1a68] sm:$0xf0]  ;;  %v11219_v60 = vld [vmem:[%s25061_s1 + $0x790] sm:$0xf] }
 0x3b6   :  { %v16394_v0 = vld [vmem:[%s25061_s1 + $0x1c4c] sm:$0xf]  ;;  %v13616_v8 = vor.u32 %v16330_v61, %v13613_v63  ;;  %7036 = vmatpush.bf16.msrb.mxu0 %v13360_v5  ;;  %v15735_v9 = vld [vmem:[%s25061_s1 + $0x7ac] sm:$0xf0]  ;;  %v10452_v61 = vor.u32 %v15543_v53, %v10451_v52  ;;  %v10964_v63 = vor.u32 %v15671_v59, %v10963_v2 }
 0x3b7   :  { %v13869_v3 = vld [vmem:[%s25061_s1 + $0x1c68] sm:$0xf0]  ;;  %v15599_v5 = vld [vmem:[%s25061_s1 + $0x36c] sm:$0xf0] }
 0x3b8   :  { %v16458_v1 = vld [vmem:[%s25061_s1 + $0x1e4c] sm:$0xf]  ;;  %v13872_v28 = vor.u32 %v16394_v0, %v13869_v3  ;;  %7049 = vmatpush.bf16.msrb.mxu1 %v13616_v8  ;;  %v10419_v0 = vld [vmem:[%s25061_s1 + $0x150] sm:$0xf] }
 0x3b9   :  { %v14125_v4 = vld [vmem:[%s25061_s1 + $0x1e68] sm:$0xf0]  ;;  %v15535_v3 = vld [vmem:[%s25061_s1 + $0x16c] sm:$0xf0] }
 0x3ba   :  { %v16258_v6 = vld [vmem:[%s25061_s1 + $0x180c] sm:$0xf]  ;;  %v14128_v13 = vor.u32 %v16458_v1, %v14125_v4  ;;  %7062 = vmatpush.bf16.msrb.mxu2 %v13872_v28  ;;  %v10675_v1 = vld [vmem:[%s25061_s1 + $0x350] sm:$0xf]  ;;  %v11220_v4 = vor.u32 %v15735_v9, %v11219_v60 }
 0x3bb   :  { %v13325_v7 = vld [vmem:[%s25061_s1 + $0x1828] sm:$0xf0]  ;;  %v11187_v8 = vld [vmem:[%s25061_s1 + $0x750] sm:$0xf] }
 0x3bc   :  { %v16322_v10 = vld [vmem:[%s25061_s1 + $0x1a0c] sm:$0xf]  ;;  %v13328_v32 = vor.u32 %v16258_v6, %v13325_v7  ;;  %7075 = vmatpush.bf16.msrb.mxu3 %v14128_v13  ;;  %v10931_v6 = vld [vmem:[%s25061_s1 + $0x550] sm:$0xf] }
 0x3bd   :  { %v13581_v11 = vld [vmem:[%s25061_s1 + $0x1a28] sm:$0xf0]  ;;  %v15663_v7 = vld [vmem:[%s25061_s1 + $0x56c] sm:$0xf0] }
 0x3be   :  { %v16386_v12 = vld [vmem:[%s25061_s1 + $0x1c0c] sm:$0xf]  ;;  %v13584_v41 = vor.u32 %v16322_v10, %v13581_v11  ;;  %7037 = vmatpush.bf16.msrb.mxu0 %v13328_v32  ;;  %v15727_v28 = vld [vmem:[%s25061_s1 + $0x76c] sm:$0xf0]  ;;  %v10420_v10 = vor.u32 %v15535_v3, %v10419_v0  ;;  %v10676_v11 = vor.u32 %v15599_v5, %v10675_v1 }
 0x3bf   :  { %v13837_v29 = vld [vmem:[%s25061_s1 + $0x1c28] sm:$0xf0]  ;;  %v10387_v13 = vld [vmem:[%s25061_s1 + $0x110] sm:$0xf] }
 0x3c0   :  { %v16450_v14 = vld [vmem:[%s25061_s1 + $0x1e0c] sm:$0xf]  ;;  %v13840_v45 = vor.u32 %v16386_v12, %v13837_v29  ;;  %7050 = vmatpush.bf16.msrb.mxu1 %v13584_v41  ;;  %v10932_v12 = vor.u32 %v15663_v7, %v10931_v6  ;;  %v15527_v29 = vld [vmem:[%s25061_s1 + $0x12c] sm:$0xf0]  ;;  %v6833_v7 = vpop.f32.mrf.mxu0 }
 0x3c1   :  { %v14093_v16 = vld [vmem:[%s25061_s1 + $0x1e28] sm:$0xf0]  ;;  %7038 = vmatmul.bf16.vlgmr.msrb.gmra.mxu0 %v17731_v15  ;;  %v15655_v22 = vld [vmem:[%s25061_s1 + $0x52c] sm:$0xf0]  ;;  %v10388_v37 = vor.u32 %v15527_v29, %v10387_v13 }
 0x3c2   :  { %v14096_v58 = vor.u32 %v16450_v14, %v14093_v16  ;;  %7063 = vmatpush.bf16.msrb.mxu2 %v13840_v45  ;;  %7082 = vmatpush.bf16.msra.mxu0 %v10484_v51  ;;  %v10643_v14 = vld [vmem:[%s25061_s1 + $0x310] sm:$0xf]  ;;  %v11188_v16 = vor.u32 %v15727_v28, %v11187_v8  ;;  %v10900_v45 = vor.u32 %v15655_v22, %v10899_v18  ;;  %v6846_v28 = vpop.f32.mrf.mxu1 }
 0x3c3   :  { %7051 = vmatmul.bf16.vlgmr.msrb.gmra.mxu1 %v17744_v21  ;;  %v15719_v32 = vld [vmem:[%s25061_s1 + $0x72c] sm:$0xf0]  ;;  %v10644_v41 = vor.u32 %v15591_v17, %v10643_v14  ;;  %v6845_v51 = vadd.f32 %v6844_v38, %v6832_v33 }
 0x3c4   :  { %7076 = vmatpush.bf16.msrb.mxu3 %v14096_v58  ;;  %7095 = vmatpush.bf16.msra.mxu1 %v10740_v48  ;;  %v10355_v46 = vld [vmem:[%s25061_s1 + $0xd0] sm:$0xf]  ;;  %v11156_v57 = vor.u32 %v15719_v32, %v11155_v31 }
 0x3c5   :  { %7064 = vmatmul.bf16.vlgmr.msrb.gmra.mxu2 %v17742_v20  ;;  %v15519_v47 = vld [vmem:[%s25061_s1 + $0xec] sm:$0xf0] }
 0x3c6   :  { %7108 = vmatpush.bf16.msra.mxu2 %v10996_v49  ;;  %7083 = vmatpush.bf16.msra.mxu0 %v10452_v61  ;;  %v10611_v58 = vld [vmem:[%s25061_s1 + $0x2d0] sm:$0xf] }
 0x3c7   :  { %7077 = vmatmul.bf16.vlgmr.msrb.gmra.mxu3 %v17752_v26  ;;  %v15583_v48 = vld [vmem:[%s25061_s1 + $0x2ec] sm:$0xf0] }
 0x3c8   :  { %7121 = vmatpush.bf16.msra.mxu3 %v11252_v55  ;;  %7096 = vmatpush.bf16.msra.mxu1 %v10708_v62  ;;  %v10867_v49 = vld [vmem:[%s25061_s1 + $0x4d0] sm:$0xf]  ;;  %v10356_v55 = vor.u32 %v15519_v47, %v10355_v46  ;;  %v10612_v56 = vor.u32 %v15583_v48, %v10611_v58  ;;  %v6857_v62 = vpop.f32.mrf.mxu2 }
 0x3c9   :  { %v15647_v52 = vld [vmem:[%s25061_s1 + $0x4ec] sm:$0xf0]  ;;  %v6858_v1 = vadd.f32 %v6857_v62, %v6845_v51 }
 0x3ca   :  { %7109 = vmatpush.bf16.msra.mxu2 %v10964_v63  ;;  %7084 = vmatpush.bf16.msra.mxu0 %v10420_v10  ;;  %v11123_v53 = vld [vmem:[%s25061_s1 + $0x6d0] sm:$0xf]  ;;  %v10868_v2 = vor.u32 %v15647_v52, %v10867_v49 }
 0x3cb   :  { %v15711_v54 = vld [vmem:[%s25061_s1 + $0x6ec] sm:$0xf0] }
 0x3cc   :  { %7122 = vmatpush.bf16.msra.mxu3 %v11220_v4  ;;  %7097 = vmatpush.bf16.msra.mxu1 %v10676_v11  ;;  %v10323_v59 = vld [vmem:[%s25061_s1 + $0x90] sm:$0xf]  ;;  %v11124_v61 = vor.u32 %v15711_v54, %v11123_v53  ;;  %v6870_v4 = vpop.f32.mrf.mxu3 }
 0x3cd   :  { %v15511_v60 = vld [vmem:[%s25061_s1 + $0xac] sm:$0xf0]  ;;  %v20243_v10 = vadd.f32 %v6870_v4, %v6858_v1 }
 0x3ce   :  { %7110 = vmatpush.bf16.msra.mxu2 %v10932_v12  ;;  %7085 = vmatpush.bf16.msra.mxu0 %v10388_v37  ;;  %v10579_v9 = vld [vmem:[%s25061_s1 + $0x290] sm:$0xf]  ;;  %v10324_v8 = vor.u32 %v15511_v60, %v10323_v59 }
 0x3cf   :  { %v15575_v63 = vld [vmem:[%s25061_s1 + $0x2ac] sm:$0xf0] }
 0x3d0   :  { %7123 = vmatpush.bf16.msra.mxu3 %v11188_v16  ;;  %7098 = vmatpush.bf16.msra.mxu1 %v10644_v41  ;;  %v10835_v0 = vld [vmem:[%s25061_s1 + $0x490] sm:$0xf]  ;;  %v10580_v11 = vor.u32 %v15575_v63, %v10579_v9  ;;  %v6859_v49 = vpop.f32.mrf.mxu2 }
 0x3d1   :  { %v15639_v3 = vld [vmem:[%s25061_s1 + $0x4ac] sm:$0xf0] }
 0x3d2   :  { %7111 = vmatpush.bf16.msra.mxu2 %v10900_v45  ;;  %v11091_v5 = vld [vmem:[%s25061_s1 + $0x690] sm:$0xf]  ;;  %7086 = vmatpush.bf16.msra.mxu0 %v10356_v55  ;;  %v10836_v12 = vor.u32 %v15639_v3, %v10835_v0 }
 0x3d3   :  { %v15703_v6 = vld [vmem:[%s25061_s1 + $0x6ac] sm:$0xf0] }
 0x3d4   :  { %7124 = vmatpush.bf16.msra.mxu3 %v11156_v57  ;;  %7099 = vmatpush.bf16.msra.mxu1 %v10612_v56  ;;  %v10291_v13 = vld [vmem:[%s25061_s1 + $0x50] sm:$0xf]  ;;  %v11092_v16 = vor.u32 %v15703_v6, %v11091_v5  ;;  %v6872_v55 = vpop.f32.mrf.mxu3 }
 0x3d5   :  { %v15503_v29 = vld [vmem:[%s25061_s1 + $0x6c] sm:$0xf0] }
 0x3d6   :  { %7112 = vmatpush.bf16.msra.mxu2 %v10868_v2  ;;  %v10547_v14 = vld [vmem:[%s25061_s1 + $0x250] sm:$0xf]  ;;  %7087 = vmatpush.bf16.msra.mxu0 %v10324_v8  ;;  %v10292_v32 = vor.u32 %v15503_v29, %v10291_v13 }
 0x3d7   :  { %v15567_v17 = vld [vmem:[%s25061_s1 + $0x26c] sm:$0xf0] }
 0x3d8   :  { %7125 = vmatpush.bf16.msra.mxu3 %v11124_v61  ;;  %v10803_v18 = vld [vmem:[%s25061_s1 + $0x450] sm:$0xf]  ;;  %7100 = vmatpush.bf16.msra.mxu1 %v10580_v11  ;;  %v10548_v38 = vor.u32 %v15567_v17, %v10547_v14 }
 0x3d9   :  { %v15631_v22 = vld [vmem:[%s25061_s1 + $0x46c] sm:$0xf0] }
 0x3da   :  { %v11059_v25 = vld [vmem:[%s25061_s1 + $0x650] sm:$0xf]  ;;  %7113 = vmatpush.bf16.msra.mxu2 %v10836_v12  ;;  %v10804_v41 = vor.u32 %v15631_v22, %v10803_v18  ;;  %7088 = vmatpush.bf16.msra.mxu0 %v10292_v32 }
 0x3db   :  { %v15695_v31 = vld [vmem:[%s25061_s1 + $0x66c] sm:$0xf0] }
 0x3dc   :  { %v10259_v33 = vld [vmem:[%s25061_s1 + $0x10] sm:$0xf]  ;;  %7126 = vmatpush.bf16.msra.mxu3 %v11092_v16  ;;  %v11060_v58 = vor.u32 %v15695_v31, %v11059_v25  ;;  %7101 = vmatpush.bf16.msra.mxu1 %v10548_v38 }
 0x3dd   :  { %v15495_v37 = vld [vmem:[%s25061_s1 + $0x2c] sm:$0xf0] }
 0x3de   :  { %v10515_v45 = vld [vmem:[%s25061_s1 + $0x210] sm:$0xf]  ;;  %v10260_v56 = vor.u32 %v15495_v37, %v10259_v33  ;;  %7114 = vmatpush.bf16.msra.mxu2 %v10804_v41 }
 0x3df   :  { %v15559_v46 = vld [vmem:[%s25061_s1 + $0x22c] sm:$0xf0] }
 0x3e0   :  { %v10771_v47 = vld [vmem:[%s25061_s1 + $0x410] sm:$0xf]  ;;  %v10516_v9 = vor.u32 %v15559_v46, %v10515_v45  ;;  %7127 = vmatpush.bf16.msra.mxu3 %v11060_v58  ;;  %7089 = vmatpush.bf16.msra.mxu0 %v10260_v56 }
 0x3e1   :  { %v15623_v57 = vld [vmem:[%s25061_s1 + $0x42c] sm:$0xf0] }
 0x3e2   :  { %v11027_v51 = vld [vmem:[%s25061_s1 + $0x610] sm:$0xf]  ;;  %v10772_v61 = vor.u32 %v15623_v57, %v10771_v47  ;;  %7102 = vmatpush.bf16.msra.mxu1 %v10516_v9 }
 0x3e3   :  { %v15687_v48 = vld [vmem:[%s25061_s1 + $0x62c] sm:$0xf0]  ;;  %7090 = vmatmul.bf16.vlgmr.msra.gmra.mxu0 %v17214_v36 }
 0x3e4   :  { %v11507_v52 = vld [vmem:[%s25061_s1 + $0x9d0] sm:$0xf]  ;;  %v11028_v0 = vor.u32 %v15687_v48, %v11027_v51  ;;  %7115 = vmatpush.bf16.msra.mxu2 %v10772_v61  ;;  %v16809_v48 = vld [vmem:[%s25062_s2] sm:$0xff] }
 0x3e5   :  { %v15807_v53 = vld [vmem:[%s25061_s1 + $0x9ec] sm:$0xf0]  ;;  %7103 = vmatmul.bf16.vlgmr.msra.gmra.mxu1 %v17224_v43  ;;  %v1117_v49 = vperm.slane %v16809_v48, 3 }
 0x3e6   :  { %v11763_v54 = vld [vmem:[%s25061_s1 + $0xbd0] sm:$0xf]  ;;  %v11508_v3 = vor.u32 %v15807_v53, %v11507_v52  ;;  %7128 = vmatpush.bf16.msra.mxu3 %v11028_v0 }
 0x3e7   :  { %v15871_v2 = vld [vmem:[%s25061_s1 + $0xbec] sm:$0xf0]  ;;  %7116 = vmatmul.bf16.vlgmr.msra.gmra.mxu2 %v17212_v35 }
 0x3e8   :  { %v12019_v59 = vld [vmem:[%s25061_s1 + $0xdd0] sm:$0xf]  ;;  %v11764_v1 = vor.u32 %v15871_v2, %v11763_v54  ;;  %7134 = vmatpush.bf16.msrb.mxu0 %v11508_v3 }
 0x3e9   :  { %v15935_v60 = vld [vmem:[%s25061_s1 + $0xdec] sm:$0xf0]  ;;  %7129 = vmatmul.bf16.vlgmr.msra.gmra.mxu3 %v17222_v42 }
 0x3ea   :  { %v12275_v62 = vld [vmem:[%s25061_s1 + $0xfd0] sm:$0xf]  ;;  %v12020_v4 = vor.u32 %v15935_v60, %v12019_v59  ;;  %7147 = vmatpush.bf16.msrb.mxu1 %v11764_v1  ;;  %v6883_v60 = vpop.f32.mrf.mxu0  ;;  %v6896_v1 = vpop.f32.mrf.mxu1 }
 0x3eb   :  { %v15999_v63 = vld [vmem:[%s25061_s1 + $0xfec] sm:$0xf0]  ;;  %v6884_v3 = vadd.f32 %v6883_v60, %v1117_v49 }
 0x3ec   :  { %v11475_v5 = vld [vmem:[%s25061_s1 + $0x990] sm:$0xf]  ;;  %v12276_v8 = vor.u32 %v15999_v63, %v12275_v62  ;;  %7160 = vmatpush.bf16.msrb.mxu2 %v12020_v4 }
 0x3ed   :  { %v15799_v6 = vld [vmem:[%s25061_s1 + $0x9ac] sm:$0xf0] }
 0x3ee   :  { %v11731_v7 = vld [vmem:[%s25061_s1 + $0xb90] sm:$0xf]  ;;  %v11476_v14 = vor.u32 %v15799_v6, %v11475_v5  ;;  %7173 = vmatpush.bf16.msrb.mxu3 %v12276_v8 }
 0x3ef   :  { %v15863_v28 = vld [vmem:[%s25061_s1 + $0xbac] sm:$0xf0] }
 0x3f0   :  { %v11987_v11 = vld [vmem:[%s25061_s1 + $0xd90] sm:$0xf]  ;;  %v11732_v16 = vor.u32 %v15863_v28, %v11731_v7  ;;  %7135 = vmatpush.bf16.msrb.mxu0 %v11476_v14 }
 0x3f1   :  { %v15927_v12 = vld [vmem:[%s25061_s1 + $0xdac] sm:$0xf0] }
 0x3f2   :  { %v12243_v13 = vld [vmem:[%s25061_s1 + $0xf90] sm:$0xf]  ;;  %v11988_v17 = vor.u32 %v15927_v12, %v11987_v11  ;;  %7148 = vmatpush.bf16.msrb.mxu1 %v11732_v16  ;;  %v6897_v11 = vadd.f32 %v6896_v1, %v6884_v3 }
 0x3f3   :  { %v15991_v29 = vld [vmem:[%s25061_s1 + $0xfac] sm:$0xf0] }
 0x3f4   :  { %v11443_v18 = vld [vmem:[%s25061_s1 + $0x950] sm:$0xf]  ;;  %v12244_v31 = vor.u32 %v15991_v29, %v12243_v13  ;;  %7161 = vmatpush.bf16.msrb.mxu2 %v11988_v17 }
 0x3f5   :  { %v15791_v22 = vld [vmem:[%s25061_s1 + $0x96c] sm:$0xf0] }
 0x3f6   :  { %v11699_v25 = vld [vmem:[%s25061_s1 + $0xb50] sm:$0xf]  ;;  %v11444_v45 = vor.u32 %v15791_v22, %v11443_v18  ;;  %7174 = vmatpush.bf16.msrb.mxu3 %v12244_v31  ;;  %v6909_v18 = vpop.f32.mrf.mxu2 }
 0x3f7   :  { %v15855_v32 = vld [vmem:[%s25061_s1 + $0xb6c] sm:$0xf0] }
 0x3f8   :  { %v11955_v33 = vld [vmem:[%s25061_s1 + $0xd50] sm:$0xf]  ;;  %v11700_v47 = vor.u32 %v15855_v32, %v11699_v25  ;;  %7136 = vmatpush.bf16.msrb.mxu0 %v11444_v45 }
 0x3f9   :  { %v15919_v37 = vld [vmem:[%s25061_s1 + $0xd6c] sm:$0xf0] }
 0x3fa   :  { %v12211_v38 = vld [vmem:[%s25061_s1 + $0xf50] sm:$0xf]  ;;  %v11956_v58 = vor.u32 %v15919_v37, %v11955_v33  ;;  %7149 = vmatpush.bf16.msrb.mxu1 %v11700_v47  ;;  %v6910_v33 = vadd.f32 %v6909_v18, %v6897_v11  ;;  %v6922_v37 = vpop.f32.mrf.mxu3  ;;  %v6885_v47 = vpop.f32.mrf.mxu0 }
 0x3fb   :  { %v15983_v41 = vld [vmem:[%s25061_s1 + $0xf6c] sm:$0xf0] }
 0x3fc   :  { %v11411_v46 = vld [vmem:[%s25061_s1 + $0x910] sm:$0xf]  ;;  %v12212_v52 = vor.u32 %v15983_v41, %v12211_v38  ;;  %7162 = vmatpush.bf16.msrb.mxu2 %v11956_v58 }
 0x3fd   :  { %v15783_v57 = vld [vmem:[%s25061_s1 + $0x92c] sm:$0xf0] }
 0x3fe   :  { %v11667_v51 = vld [vmem:[%s25061_s1 + $0xb10] sm:$0xf]  ;;  %v11412_v59 = vor.u32 %v15783_v57, %v11411_v46  ;;  %7175 = vmatpush.bf16.msrb.mxu3 %v12212_v52  ;;  %v20444_v46 = vadd.f32 %v6922_v37, %v6910_v33  ;;  %v6898_v52 = vpop.f32.mrf.mxu1 }
 0x3ff   :  { %v15847_v53 = vld [vmem:[%s25061_s1 + $0xb2c] sm:$0xf0] }
 0x400   :  { %v11923_v54 = vld [vmem:[%s25061_s1 + $0xd10] sm:$0xf]  ;;  %v11668_v9 = vor.u32 %v15847_v53, %v11667_v51  ;;  %7137 = vmatpush.bf16.msrb.mxu0 %v11412_v59 }
 0x401   :  { %v15911_v55 = vld [vmem:[%s25061_s1 + $0xd2c] sm:$0xf0] }
 0x402   :  { %v12179_v56 = vld [vmem:[%s25061_s1 + $0xf10] sm:$0xf]  ;;  %v11924_v61 = vor.u32 %v15911_v55, %v11923_v54  ;;  %7150 = vmatpush.bf16.msrb.mxu1 %v11668_v9 }
 0x403   :  { %v15975_v2 = vld [vmem:[%s25061_s1 + $0xf2c] sm:$0xf0] }
 0x404   :  { %v11379_v62 = vld [vmem:[%s25061_s1 + $0x8d0] sm:$0xf]  ;;  %v12180_v4 = vor.u32 %v15975_v2, %v12179_v56  ;;  %7163 = vmatpush.bf16.msrb.mxu2 %v11924_v61 }
 0x405   :  { %v15775_v63 = vld [vmem:[%s25061_s1 + $0x8ec] sm:$0xf0] }
 0x406   :  { %v11635_v0 = vld [vmem:[%s25061_s1 + $0xad0] sm:$0xf]  ;;  %v11380_v12 = vor.u32 %v15775_v63, %v11379_v62  ;;  %7176 = vmatpush.bf16.msrb.mxu3 %v12180_v4  ;;  %v6911_v4 = vpop.f32.mrf.mxu2 }
 0x407   :  { %v15839_v5 = vld [vmem:[%s25061_s1 + $0xaec] sm:$0xf0] }
 0x408   :  { %v11891_v6 = vld [vmem:[%s25061_s1 + $0xcd0] sm:$0xf]  ;;  %v11636_v13 = vor.u32 %v15839_v5, %v11635_v0  ;;  %7138 = vmatpush.bf16.msrb.mxu0 %v11380_v12 }
 0x409   :  { %v15903_v7 = vld [vmem:[%s25061_s1 + $0xcec] sm:$0xf0] }
 0x40a   :  { %v12147_v8 = vld [vmem:[%s25061_s1 + $0xed0] sm:$0xf]  ;;  %v11892_v29 = vor.u32 %v15903_v7, %v11891_v6  ;;  %7151 = vmatpush.bf16.msrb.mxu1 %v11636_v13 }
 0x40b   :  { %v15967_v28 = vld [vmem:[%s25061_s1 + $0xeec] sm:$0xf0] }
 0x40c   :  { %v11347_v14 = vld [vmem:[%s25061_s1 + $0x890] sm:$0xf]  ;;  %v12148_v22 = vor.u32 %v15967_v28, %v12147_v8  ;;  %7164 = vmatpush.bf16.msrb.mxu2 %v11892_v29  ;;  %v6924_v28 = vpop.f32.mrf.mxu3 }
 0x40d   :  { %v15767_v16 = vld [vmem:[%s25061_s1 + $0x8ac] sm:$0xf0] }
 0x40e   :  { %v11603_v17 = vld [vmem:[%s25061_s1 + $0xa90] sm:$0xf]  ;;  %v11348_v45 = vor.u32 %v15767_v16, %v11347_v14  ;;  %7177 = vmatpush.bf16.msrb.mxu3 %v12148_v22 }
 0x40f   :  { %v15831_v25 = vld [vmem:[%s25061_s1 + $0xaac] sm:$0xf0] }
 0x410   :  { %v11859_v31 = vld [vmem:[%s25061_s1 + $0xc90] sm:$0xf]  ;;  %v11604_v58 = vor.u32 %v15831_v25, %v11603_v17  ;;  %7139 = vmatpush.bf16.msrb.mxu0 %v11348_v45 }
 0x411   :  { %v15895_v32 = vld [vmem:[%s25061_s1 + $0xcac] sm:$0xf0] }
 0x412   :  { %v12115_v38 = vld [vmem:[%s25061_s1 + $0xe90] sm:$0xf]  ;;  %v11860_v57 = vor.u32 %v15895_v32, %v11859_v31  ;;  %7152 = vmatpush.bf16.msrb.mxu1 %v11604_v58 }
 0x413   :  { %v15959_v41 = vld [vmem:[%s25061_s1 + $0xeac] sm:$0xf0] }
 0x414   :  { %v11315_v51 = vld [vmem:[%s25061_s1 + $0x850] sm:$0xf]  ;;  %v12116_v53 = vor.u32 %v15959_v41, %v12115_v38  ;;  %7165 = vmatpush.bf16.msrb.mxu2 %v11860_v57 }
 0x415   :  { %v15759_v48 = vld [vmem:[%s25061_s1 + $0x86c] sm:$0xf0] }
 0x416   :  { %v11571_v49 = vld [vmem:[%s25061_s1 + $0xa50] sm:$0xf]  ;;  %v11316_v60 = vor.u32 %v15759_v48, %v11315_v51  ;;  %7178 = vmatpush.bf16.msrb.mxu3 %v12116_v53 }
 0x417   :  { %v15823_v54 = vld [vmem:[%s25061_s1 + $0xa6c] sm:$0xf0] }
 0x418   :  { %v11827_v55 = vld [vmem:[%s25061_s1 + $0xc50] sm:$0xf]  ;;  %v11572_v62 = vor.u32 %v15823_v54, %v11571_v49  ;;  %7140 = vmatpush.bf16.msrb.mxu0 %v11316_v60 }
 0x419   :  { %v15887_v56 = vld [vmem:[%s25061_s1 + $0xc6c] sm:$0xf0] }
 0x41a   :  { %v12083_v2 = vld [vmem:[%s25061_s1 + $0xe50] sm:$0xf]  ;;  %v11828_v63 = vor.u32 %v15887_v56, %v11827_v55  ;;  %7153 = vmatpush.bf16.msrb.mxu1 %v11572_v62 }
 0x41b   :  { %v15951_v59 = vld [vmem:[%s25061_s1 + $0xe6c] sm:$0xf0] }
 0x41c   :  { %v11283_v9 = vld [vmem:[%s25061_s1 + $0x810] sm:$0xf]  ;;  %v12084_v5 = vor.u32 %v15951_v59, %v12083_v2  ;;  %7166 = vmatpush.bf16.msrb.mxu2 %v11828_v63 }
 0x41d   :  { %v15751_v61 = vld [vmem:[%s25061_s1 + $0x82c] sm:$0xf0] }
 0x41e   :  { %v11539_v0 = vld [vmem:[%s25061_s1 + $0xa10] sm:$0xf]  ;;  %v11284_v29 = vor.u32 %v15751_v61, %v11283_v9  ;;  %7179 = vmatpush.bf16.msrb.mxu3 %v12084_v5 }
 0x41f   :  { %v15815_v3 = vld [vmem:[%s25061_s1 + $0xa2c] sm:$0xf0] }
 0x420   :  { %v11795_v1 = vld [vmem:[%s25061_s1 + $0xc10] sm:$0xf]  ;;  %v11540_v18 = vor.u32 %v15815_v3, %v11539_v0  ;;  %7141 = vmatpush.bf16.msrb.mxu0 %v11284_v29 }
 0x421   :  { %v15879_v6 = vld [vmem:[%s25061_s1 + $0xc2c] sm:$0xf0] }
 0x422   :  { %v12051_v7 = vld [vmem:[%s25061_s1 + $0xe10] sm:$0xf]  ;;  %v11796_v22 = vor.u32 %v15879_v6, %v11795_v1  ;;  %7154 = vmatpush.bf16.msrb.mxu1 %v11540_v18 }
 0x423   :  { %v15943_v8 = vld [vmem:[%s25061_s1 + $0xe2c] sm:$0xf0]  ;;  %7142 = vmatmul.bf16.vlgmr.msrb.gmra.mxu0 %v17340_v39 }
 0x424   :  { %v12531_v11 = vld [vmem:[%s25061_s1 + $0x11d0] sm:$0xf]  ;;  %v12052_v32 = vor.u32 %v15943_v8, %v12051_v7  ;;  %7167 = vmatpush.bf16.msrb.mxu2 %v11796_v22 }
 0x425   :  { %v16063_v12 = vld [vmem:[%s25061_s1 + $0x11ec] sm:$0xf0]  ;;  %7155 = vmatmul.bf16.vlgmr.msrb.gmra.mxu1 %v17344_v44 }
 0x426   :  { %v12787_v13 = vld [vmem:[%s25061_s1 + $0x13d0] sm:$0xf]  ;;  %v12532_v33 = vor.u32 %v16063_v12, %v12531_v11  ;;  %7180 = vmatpush.bf16.msrb.mxu3 %v12052_v32 }
 0x427   :  { %v16127_v14 = vld [vmem:[%s25061_s1 + $0x13ec] sm:$0xf0]  ;;  %7168 = vmatmul.bf16.vlgmr.msrb.gmra.mxu2 %v17332_v34 }
 0x428   :  { %v13043_v16 = vld [vmem:[%s25061_s1 + $0x15d0] sm:$0xf]  ;;  %v12788_v37 = vor.u32 %v16127_v14, %v12787_v13  ;;  %7186 = vmatpush.bf16.msra.mxu0 %v12532_v33  ;;  %v6948_v33 = vpop.f32.mrf.mxu1 }
 0x429   :  { %v16191_v17 = vld [vmem:[%s25061_s1 + $0x15ec] sm:$0xf0]  ;;  %7181 = vmatmul.bf16.vlgmr.msrb.gmra.mxu3 %v17342_v40 }
 0x42a   :  { %v13299_v25 = vld [vmem:[%s25061_s1 + $0x17d0] sm:$0xf]  ;;  %v13044_v38 = vor.u32 %v16191_v17, %v13043_v16  ;;  %7199 = vmatpush.bf16.msra.mxu1 %v12788_v37  ;;  %v6935_v16 = vpop.f32.mrf.mxu0 }
 0x42b   :  { %v16255_v31 = vld [vmem:[%s25061_s1 + $0x17ec] sm:$0xf0]  ;;  %v6936_v32 = vadd.f32 %v6935_v16, %v20444_v46 }
 0x42c   :  { %v12499_v41 = vld [vmem:[%s25061_s1 + $0x1190] sm:$0xf]  ;;  %v13300_v58 = vor.u32 %v16255_v31, %v13299_v25  ;;  %7212 = vmatpush.bf16.msra.mxu2 %v13044_v38 }
 0x42d   :  { %v16055_v45 = vld [vmem:[%s25061_s1 + $0x11ac] sm:$0xf0] }
 0x42e   :  { %v12755_v47 = vld [vmem:[%s25061_s1 + $0x1390] sm:$0xf]  ;;  %v12500_v53 = vor.u32 %v16055_v45, %v12499_v41  ;;  %7225 = vmatpush.bf16.msra.mxu3 %v13300_v58  ;;  %v6949_v58 = vadd.f32 %v6948_v33, %v6936_v32 }
 0x42f   :  { %v16119_v57 = vld [vmem:[%s25061_s1 + $0x13ac] sm:$0xf0] }
 0x430   :  { %v13011_v51 = vld [vmem:[%s25061_s1 + $0x1590] sm:$0xf]  ;;  %v12756_v54 = vor.u32 %v16119_v57, %v12755_v47  ;;  %7187 = vmatpush.bf16.msra.mxu0 %v12500_v53 }
 0x431   :  { %v16183_v48 = vld [vmem:[%s25061_s1 + $0x15ac] sm:$0xf0] }
 0x432   :  { %v13267_v49 = vld [vmem:[%s25061_s1 + $0x1790] sm:$0xf]  ;;  %v13012_v55 = vor.u32 %v16183_v48, %v13011_v51  ;;  %7200 = vmatpush.bf16.msra.mxu1 %v12756_v54  ;;  %v6961_v54 = vpop.f32.mrf.mxu2 }
 0x433   :  { %v16247_v52 = vld [vmem:[%s25061_s1 + $0x17ac] sm:$0xf0] }
 0x434   :  { %v12467_v56 = vld [vmem:[%s25061_s1 + $0x1150] sm:$0xf]  ;;  %v13268_v60 = vor.u32 %v16247_v52, %v13267_v49  ;;  %7213 = vmatpush.bf16.msra.mxu2 %v13012_v55 }
 0x435   :  { %v16047_v2 = vld [vmem:[%s25061_s1 + $0x116c] sm:$0xf0] }
 0x436   :  { %v12723_v59 = vld [vmem:[%s25061_s1 + $0x1350] sm:$0xf]  ;;  %v12468_v3 = vor.u32 %v16047_v2, %v12467_v56  ;;  %7226 = vmatpush.bf16.msra.mxu3 %v13268_v60  ;;  %v6962_v60 = vadd.f32 %v6961_v54, %v6949_v58 }
 0x437   :  { %v16111_v9 = vld [vmem:[%s25061_s1 + $0x136c] sm:$0xf0] }
 0x438   :  { %v12979_v61 = vld [vmem:[%s25061_s1 + $0x1550] sm:$0xf]  ;;  %v12724_v1 = vor.u32 %v16111_v9, %v12723_v59  ;;  %7188 = vmatpush.bf16.msra.mxu0 %v12468_v3  ;;  %v6974_v9 = vpop.f32.mrf.mxu3  ;;  %v6937_v3 = vpop.f32.mrf.mxu0 }
 0x439   :  { %v16175_v62 = vld [vmem:[%s25061_s1 + $0x156c] sm:$0xf0] }
 0x43a   :  { %v13235_v63 = vld [vmem:[%s25061_s1 + $0x1750] sm:$0xf]  ;;  %v12980_v4 = vor.u32 %v16175_v62, %v12979_v61  ;;  %7201 = vmatpush.bf16.msra.mxu1 %v12724_v1 }
 0x43b   :  { %v16239_v0 = vld [vmem:[%s25061_s1 + $0x176c] sm:$0xf0] }
 0x43c   :  { %v12435_v5 = vld [vmem:[%s25061_s1 + $0x1110] sm:$0xf]  ;;  %v13236_v8 = vor.u32 %v16239_v0, %v13235_v63  ;;  %7214 = vmatpush.bf16.msra.mxu2 %v12980_v4  ;;  %v20643_v0 = vadd.f32 %v6974_v9, %v6962_v60 }
 0x43d   :  { %v16039_v6 = vld [vmem:[%s25061_s1 + $0x112c] sm:$0xf0] }
 0x43e   :  { %v12691_v7 = vld [vmem:[%s25061_s1 + $0x1310] sm:$0xf]  ;;  %v12436_v14 = vor.u32 %v16039_v6, %v12435_v5  ;;  %7227 = vmatpush.bf16.msra.mxu3 %v13236_v8  ;;  %v6950_v8 = vpop.f32.mrf.mxu1 }
 0x43f   :  { %v16103_v28 = vld [vmem:[%s25061_s1 + $0x132c] sm:$0xf0] }
 0x440   :  { %v12947_v11 = vld [vmem:[%s25061_s1 + $0x1510] sm:$0xf]  ;;  %v12692_v17 = vor.u32 %v16103_v28, %v12691_v7  ;;  %7189 = vmatpush.bf16.msra.mxu0 %v12436_v14 }
 0x441   :  { %v16167_v12 = vld [vmem:[%s25061_s1 + $0x152c] sm:$0xf0] }
 0x442   :  { %v13203_v13 = vld [vmem:[%s25061_s1 + $0x1710] sm:$0xf]  ;;  %v12948_v18 = vor.u32 %v16167_v12, %v12947_v11  ;;  %7202 = vmatpush.bf16.msra.mxu1 %v12692_v17 }
 0x443   :  { %v16231_v29 = vld [vmem:[%s25061_s1 + $0x172c] sm:$0xf0] }
 0x444   :  { %v12403_v22 = vld [vmem:[%s25061_s1 + $0x10d0] sm:$0xf]  ;;  %v13204_v37 = vor.u32 %v16231_v29, %v13203_v13  ;;  %7215 = vmatpush.bf16.msra.mxu2 %v12948_v18 }
 0x445   :  { %v16031_v25 = vld [vmem:[%s25061_s1 + $0x10ec] sm:$0xf0] }
 0x446   :  { %v12659_v31 = vld [vmem:[%s25061_s1 + $0x12d0] sm:$0xf]  ;;  %v12404_v57 = vor.u32 %v16031_v25, %v12403_v22  ;;  %7228 = vmatpush.bf16.msra.mxu3 %v13204_v37  ;;  %v6963_v37 = vpop.f32.mrf.mxu2 }
 0x447   :  { %v16095_v38 = vld [vmem:[%s25061_s1 + $0x12ec] sm:$0xf0] }
 0x448   :  { %v12915_v41 = vld [vmem:[%s25061_s1 + $0x14d0] sm:$0xf]  ;;  %v12660_v51 = vor.u32 %v16095_v38, %v12659_v31  ;;  %7190 = vmatpush.bf16.msra.mxu0 %v12404_v57 }
 0x449   :  { %v16159_v45 = vld [vmem:[%s25061_s1 + $0x14ec] sm:$0xf0] }
 0x44a   :  { %v13171_v47 = vld [vmem:[%s25061_s1 + $0x16d0] sm:$0xf]  ;;  %v12916_v48 = vor.u32 %v16159_v45, %v12915_v41  ;;  %7203 = vmatpush.bf16.msra.mxu1 %v12660_v51 }
 0x44b   :  { %v16223_v46 = vld [vmem:[%s25061_s1 + $0x16ec] sm:$0xf0] }
 0x44c   :  { %v12371_v49 = vld [vmem:[%s25061_s1 + $0x1090] sm:$0xf]  ;;  %v13172_v55 = vor.u32 %v16223_v46, %v13171_v47  ;;  %7216 = vmatpush.bf16.msra.mxu2 %v12916_v48  ;;  %v6976_v46 = vpop.f32.mrf.mxu3 }
 0x44d   :  { %v16023_v52 = vld [vmem:[%s25061_s1 + $0x10ac] sm:$0xf0] }
 0x44e   :  { %v12627_v53 = vld [vmem:[%s25061_s1 + $0x1290] sm:$0xf]  ;;  %v12372_v63 = vor.u32 %v16023_v52, %v12371_v49  ;;  %7229 = vmatpush.bf16.msra.mxu3 %v13172_v55 }
 0x44f   :  { %v16087_v56 = vld [vmem:[%s25061_s1 + $0x12ac] sm:$0xf0] }
 0x450   :  { %v12883_v2 = vld [vmem:[%s25061_s1 + $0x1490] sm:$0xf]  ;;  %v12628_v1 = vor.u32 %v16087_v56, %v12627_v53  ;;  %7191 = vmatpush.bf16.msra.mxu0 %v12372_v63 }
 0x451   :  { %v16151_v59 = vld [vmem:[%s25061_s1 + $0x14ac] sm:$0xf0] }
 0x452   :  { %v13139_v61 = vld [vmem:[%s25061_s1 + $0x1690] sm:$0xf]  ;;  %v12884_v4 = vor.u32 %v16151_v59, %v12883_v2  ;;  %7204 = vmatpush.bf16.msra.mxu1 %v12628_v1 }
 0x453   :  { %v16215_v62 = vld [vmem:[%s25061_s1 + $0x16ac] sm:$0xf0] }
 0x454   :  { %v12339_v5 = vld [vmem:[%s25061_s1 + $0x1050] sm:$0xf]  ;;  %v13140_v28 = vor.u32 %v16215_v62, %v13139_v61  ;;  %7217 = vmatpush.bf16.msra.mxu2 %v12884_v4 }
 0x455   :  { %v16015_v6 = vld [vmem:[%s25061_s1 + $0x106c] sm:$0xf0] }
 0x456   :  { %v12595_v7 = vld [vmem:[%s25061_s1 + $0x1250] sm:$0xf]  ;;  %v12340_v16 = vor.u32 %v16015_v6, %v12339_v5  ;;  %7230 = vmatpush.bf16.msra.mxu3 %v13140_v28 }
 0x457   :  { %v16079_v11 = vld [vmem:[%s25061_s1 + $0x126c] sm:$0xf0] }
 0x458   :  { %v12851_v12 = vld [vmem:[%s25061_s1 + $0x1450] sm:$0xf]  ;;  %v12596_v22 = vor.u32 %v16079_v11, %v12595_v7  ;;  %7192 = vmatpush.bf16.msra.mxu0 %v12340_v16 }
 0x459   :  { %v16143_v13 = vld [vmem:[%s25061_s1 + $0x146c] sm:$0xf0] }
 0x45a   :  { %v13107_v29 = vld [vmem:[%s25061_s1 + $0x1650] sm:$0xf]  ;;  %v12852_v25 = vor.u32 %v16143_v13, %v12851_v12  ;;  %7205 = vmatpush.bf16.msra.mxu1 %v12596_v22 }
 0x45b   :  { %v16207_v14 = vld [vmem:[%s25061_s1 + $0x166c] sm:$0xf0] }
 0x45c   :  { %v12307_v17 = vld [vmem:[%s25061_s1 + $0x1010] sm:$0xf]  ;;  %v13108_v38 = vor.u32 %v16207_v14, %v13107_v29  ;;  %7218 = vmatpush.bf16.msra.mxu2 %v12852_v25 }
 0x45d   :  { %v16007_v18 = vld [vmem:[%s25061_s1 + $0x102c] sm:$0xf0] }
 0x45e   :  { %v12563_v31 = vld [vmem:[%s25061_s1 + $0x1210] sm:$0xf]  ;;  %v12308_v48 = vor.u32 %v16007_v18, %v12307_v17  ;;  %7231 = vmatpush.bf16.msra.mxu3 %v13108_v38 }
 0x45f   :  { %v16071_v32 = vld [vmem:[%s25061_s1 + $0x122c] sm:$0xf0] }
 0x460   :  { %v12819_v33 = vld [vmem:[%s25061_s1 + $0x1410] sm:$0xf]  ;;  %v12564_v54 = vor.u32 %v16071_v32, %v12563_v31  ;;  %7193 = vmatpush.bf16.msra.mxu0 %v12308_v48 }
 0x461   :  { %v16135_v41 = vld [vmem:[%s25061_s1 + $0x142c] sm:$0xf0] }
 0x462   :  { %v13075_v45 = vld [vmem:[%s25061_s1 + $0x1610] sm:$0xf]  ;;  %v12820_v55 = vor.u32 %v16135_v41, %v12819_v33  ;;  %7206 = vmatpush.bf16.msra.mxu1 %v12564_v54  ;;  %v7000_v54 = vpop.f32.mrf.mxu1 }
 0x463   :  { %v16199_v47 = vld [vmem:[%s25061_s1 + $0x162c] sm:$0xf0]  ;;  %7194 = vmatmul.bf16.vlgmr.msra.gmra.mxu0 %v17527_v19 }
 0x464   :  { %v13555_v58 = vld [vmem:[%s25061_s1 + $0x19d0] sm:$0xf]  ;;  %v13076_v59 = vor.u32 %v16199_v47, %v13075_v45  ;;  %7219 = vmatpush.bf16.msra.mxu2 %v12820_v55 }
 0x465   :  { %v16319_v57 = vld [vmem:[%s25061_s1 + $0x19ec] sm:$0xf0]  ;;  %7207 = vmatmul.bf16.vlgmr.msra.gmra.mxu1 %v17540_v24 }
 0x466   :  { %v13811_v51 = vld [vmem:[%s25061_s1 + $0x1bd0] sm:$0xf]  ;;  %v13556_v60 = vor.u32 %v16319_v57, %v13555_v58  ;;  %7232 = vmatpush.bf16.msra.mxu3 %v13076_v59 }
 0x467   :  { %v16383_v49 = vld [vmem:[%s25061_s1 + $0x1bec] sm:$0xf0]  ;;  %7220 = vmatmul.bf16.vlgmr.msra.gmra.mxu2 %v17538_v23 }
 0x468   :  { %v14067_v52 = vld [vmem:[%s25061_s1 + $0x1dd0] sm:$0xf]  ;;  %v13812_v9 = vor.u32 %v16383_v49, %v13811_v51  ;;  %7238 = vmatpush.bf16.msrb.mxu0 %v13556_v60  ;;  %v6987_v51 = vpop.f32.mrf.mxu0 }
 0x469   :  { %v16447_v53 = vld [vmem:[%s25061_s1 + $0x1dec] sm:$0xf0]  ;;  %7233 = vmatmul.bf16.vlgmr.msra.gmra.mxu3 %v17548_v27 }
 0x46a   :  { %v14323_v56 = vld [vmem:[%s25061_s1 + $0x1fd0] sm:$0xf]  ;;  %v14068_v61 = vor.u32 %v16447_v53, %v14067_v52  ;;  %7251 = vmatpush.bf16.msrb.mxu1 %v13812_v9  ;;  %v6988_v52 = vadd.f32 %v6987_v51, %v20643_v0 }
 0x46b   :  { %v16511_v2 = vld [vmem:[%s25061_s1 + $0x1fec] sm:$0xf0] }
 0x46c   :  { %v13523_v62 = vld [vmem:[%s25061_s1 + $0x1990] sm:$0xf]  ;;  %v14324_v1 = vor.u32 %v16511_v2, %v14323_v56  ;;  %7264 = vmatpush.bf16.msrb.mxu2 %v14068_v61  ;;  %v7001_v9 = vadd.f32 %v7000_v54, %v6988_v52 }
 0x46d   :  { %v16311_v63 = vld [vmem:[%s25061_s1 + $0x19ac] sm:$0xf0] }
 0x46e   :  { %v13779_v3 = vld [vmem:[%s25061_s1 + $0x1b90] sm:$0xf]  ;;  %v13524_v28 = vor.u32 %v16311_v63, %v13523_v62  ;;  %7277 = vmatpush.bf16.msrb.mxu3 %v14324_v1 }
 0x46f   :  { %v16375_v4 = vld [vmem:[%s25061_s1 + $0x1bac] sm:$0xf0] }
 0x470   :  { %v14035_v5 = vld [vmem:[%s25061_s1 + $0x1d90] sm:$0xf]  ;;  %v13780_v11 = vor.u32 %v16375_v4, %v13779_v3  ;;  %7239 = vmatpush.bf16.msrb.mxu0 %v13524_v28 }
 0x471   :  { %v16439_v6 = vld [vmem:[%s25061_s1 + $0x1dac] sm:$0xf0] }
 0x472   :  { %v14291_v7 = vld [vmem:[%s25061_s1 + $0x1f90] sm:$0xf]  ;;  %v14036_v12 = vor.u32 %v16439_v6, %v14035_v5  ;;  %7252 = vmatpush.bf16.msrb.mxu1 %v13780_v11 }
 0x473   :  { %v16503_v8 = vld [vmem:[%s25061_s1 + $0x1fac] sm:$0xf0] }
 0x474   :  { %v13491_v13 = vld [vmem:[%s25061_s1 + $0x1950] sm:$0xf]  ;;  %v14292_v16 = vor.u32 %v16503_v8, %v14291_v7  ;;  %7265 = vmatpush.bf16.msrb.mxu2 %v14036_v12  ;;  %v7013_v12 = vpop.f32.mrf.mxu2 }
 0x475   :  { %v16303_v29 = vld [vmem:[%s25061_s1 + $0x196c] sm:$0xf0] }
 0x476   :  { %v13747_v14 = vld [vmem:[%s25061_s1 + $0x1b50] sm:$0xf]  ;;  %v13492_v32 = vor.u32 %v16303_v29, %v13491_v13  ;;  %7278 = vmatpush.bf16.msrb.mxu3 %v14292_v16  ;;  %v7014_v16 = vadd.f32 %v7013_v12, %v7001_v9 }
 0x477   :  { %v16367_v17 = vld [vmem:[%s25061_s1 + $0x1b6c] sm:$0xf0] }
 0x478   :  { %v14003_v18 = vld [vmem:[%s25061_s1 + $0x1d50] sm:$0xf]  ;;  %v13748_v33 = vor.u32 %v16367_v17, %v13747_v14  ;;  %7240 = vmatpush.bf16.msrb.mxu0 %v13492_v32  ;;  %v7026_v17 = vpop.f32.mrf.mxu3  ;;  %v7002_v32 = vpop.f32.mrf.mxu1 }
 0x479   :  { %v16431_v22 = vld [vmem:[%s25061_s1 + $0x1d6c] sm:$0xf0] }
 0x47a   :  { %v14259_v25 = vld [vmem:[%s25061_s1 + $0x1f50] sm:$0xf]  ;;  %v14004_v37 = vor.u32 %v16431_v22, %v14003_v18  ;;  %7253 = vmatpush.bf16.msrb.mxu1 %v13748_v33  ;;  %v20842_v33 = vadd.f32 %v7026_v17, %v7014_v16 }
 0x47b   :  { %v16495_v31 = vld [vmem:[%s25061_s1 + $0x1f6c] sm:$0xf0] }
 0x47c   :  { %v13459_v38 = vld [vmem:[%s25061_s1 + $0x1910] sm:$0xf]  ;;  %v14260_v47 = vor.u32 %v16495_v31, %v14259_v25  ;;  %7266 = vmatpush.bf16.msrb.mxu2 %v14004_v37  ;;  %v6989_v25 = vpop.f32.mrf.mxu0 }
 0x47d   :  { %v16295_v41 = vld [vmem:[%s25061_s1 + $0x192c] sm:$0xf0]  ;;  %v10453_v25 = vld [vmem:[%s25061_s1 + $0x1b0] sm:$0xf0] }
 0x47e   :  { %v13715_v45 = vld [vmem:[%s25061_s1 + $0x1b10] sm:$0xf]  ;;  %v13460_v53 = vor.u32 %v16295_v41, %v13459_v38  ;;  %7279 = vmatpush.bf16.msrb.mxu3 %v14260_v47 }
 0x47f   :  { %v16359_v46 = vld [vmem:[%s25061_s1 + $0x1b2c] sm:$0xf0] }
 0x480   :  { %v13971_v58 = vld [vmem:[%s25061_s1 + $0x1d10] sm:$0xf]  ;;  %v13716_v55 = vor.u32 %v16359_v46, %v13715_v45  ;;  %7241 = vmatpush.bf16.msrb.mxu0 %v13460_v53 }
 0x481   :  { %v16423_v57 = vld [vmem:[%s25061_s1 + $0x1d2c] sm:$0xf0] }
 0x482   :  { %v14227_v48 = vld [vmem:[%s25061_s1 + $0x1f10] sm:$0xf]  ;;  %v13972_v56 = vor.u32 %v16423_v57, %v13971_v58  ;;  %7254 = vmatpush.bf16.msrb.mxu1 %v13716_v55 }
 0x483   :  { %v16487_v49 = vld [vmem:[%s25061_s1 + $0x1f2c] sm:$0xf0] }
 0x484   :  { %v13427_v2 = vld [vmem:[%s25061_s1 + $0x18d0] sm:$0xf]  ;;  %v14228_v0 = vor.u32 %v16487_v49, %v14227_v48  ;;  %7267 = vmatpush.bf16.msrb.mxu2 %v13972_v56 }
 0x485   :  { %v16287_v59 = vld [vmem:[%s25061_s1 + $0x18ec] sm:$0xf0] }
 0x486   :  { %v13683_v60 = vld [vmem:[%s25061_s1 + $0x1ad0] sm:$0xf]  ;;  %v13428_v4 = vor.u32 %v16287_v59, %v13427_v2  ;;  %7280 = vmatpush.bf16.msrb.mxu3 %v14228_v0 }
 0x487   :  { %v16351_v61 = vld [vmem:[%s25061_s1 + $0x1aec] sm:$0xf0] }
 0x488   :  { %v13939_v62 = vld [vmem:[%s25061_s1 + $0x1cd0] sm:$0xf]  ;;  %v13684_v5 = vor.u32 %v16351_v61, %v13683_v60  ;;  %7242 = vmatpush.bf16.msrb.mxu0 %v13428_v4  ;;  %v15611_v4 = vld [vmem:[%s25061_s1 + $0x3d4] sm:$0xf] }
 0x489   :  { %v16415_v63 = vld [vmem:[%s25061_s1 + $0x1cec] sm:$0xf0] }
 0x48a   :  { %v14195_v3 = vld [vmem:[%s25061_s1 + $0x1ed0] sm:$0xf]  ;;  %v13940_v6 = vor.u32 %v16415_v63, %v13939_v62  ;;  %7255 = vmatpush.bf16.msrb.mxu1 %v13684_v5  ;;  %v7015_v63 = vpop.f32.mrf.mxu2  ;;  %v7028_v5 = vpop.f32.mrf.mxu3 }
 0x48b   :  { %v16479_v1 = vld [vmem:[%s25061_s1 + $0x1eec] sm:$0xf0]  ;;  %v7039_v5 = vpop.f32.mrf.mxu0 }
 0x48c   :  { %v13395_v7 = vld [vmem:[%s25061_s1 + $0x1890] sm:$0xf]  ;;  %v14196_v11 = vor.u32 %v16479_v1, %v14195_v3  ;;  %7268 = vmatpush.bf16.msrb.mxu2 %v13940_v6  ;;  %v15547_v3 = vld [vmem:[%s25061_s1 + $0x1d4] sm:$0xf] }
 0x48d   :  { %v16279_v8 = vld [vmem:[%s25061_s1 + $0x18ac] sm:$0xf0]  ;;  %v10485_v1 = vld [vmem:[%s25061_s1 + $0x1f0] sm:$0xf0] }
 0x48e   :  { %v13651_v28 = vld [vmem:[%s25061_s1 + $0x1a90] sm:$0xf]  ;;  %v13396_v31 = vor.u32 %v16279_v8, %v13395_v7  ;;  %7281 = vmatpush.bf16.msrb.mxu3 %v14196_v11  ;;  %v10741_v7 = vld [vmem:[%s25061_s1 + $0x3f0] sm:$0xf0]  ;;  %v10488_v16 = vor.u32 %v15547_v3, %v10485_v1 }
 0x48f   :  { %v16343_v13 = vld [vmem:[%s25061_s1 + $0x1aac] sm:$0xf0]  ;;  %v15675_v8 = vld [vmem:[%s25061_s1 + $0x5d4] sm:$0xf]  ;;  %v10744_v17 = vor.u32 %v15611_v4, %v10741_v7 }
 0x490   :  { %v13907_v29 = vld [vmem:[%s25061_s1 + $0x1c90] sm:$0xf]  ;;  %v13652_v37 = vor.u32 %v16343_v13, %v13651_v28  ;;  %7243 = vmatpush.bf16.msrb.mxu0 %v13396_v31  ;;  %v10997_v28 = vld [vmem:[%s25061_s1 + $0x5f0] sm:$0xf0] }
 0x491   :  { %v16407_v14 = vld [vmem:[%s25061_s1 + $0x1cac] sm:$0xf0]  ;;  %v15739_v13 = vld [vmem:[%s25061_s1 + $0x7d4] sm:$0xf] }
 0x492   :  { %v14163_v18 = vld [vmem:[%s25061_s1 + $0x1e90] sm:$0xf]  ;;  %v13908_v38 = vor.u32 %v16407_v14, %v13907_v29  ;;  %7256 = vmatpush.bf16.msrb.mxu1 %v13652_v37  ;;  %v11253_v29 = vld [vmem:[%s25061_s1 + $0x7f0] sm:$0xf0] }
 0x493   :  { %v16471_v22 = vld [vmem:[%s25061_s1 + $0x1eac] sm:$0xf0]  ;;  %v15603_v31 = vld [vmem:[%s25061_s1 + $0x394] sm:$0xf]  ;;  %v11256_v32 = vor.u32 %v15739_v13, %v11253_v29 }
 0x494   :  { %v13363_v41 = vld [vmem:[%s25061_s1 + $0x1850] sm:$0xf]  ;;  %v14164_v46 = vor.u32 %v16471_v22, %v14163_v18  ;;  %7269 = vmatpush.bf16.msrb.mxu2 %v13908_v38  ;;  %v11000_v18 = vor.u32 %v15675_v8, %v10997_v28  ;;  %v15539_v22 = vld [vmem:[%s25061_s1 + $0x194] sm:$0xf]  ;;  %v7040_v8 = vadd.f32 %v7039_v5, %v20842_v33 }
 0x495   :  { %v16271_v45 = vld [vmem:[%s25061_s1 + $0x186c] sm:$0xf0]  ;;  %v10709_v37 = vld [vmem:[%s25061_s1 + $0x3b0] sm:$0xf0] }
 0x496   :  { %v13619_v47 = vld [vmem:[%s25061_s1 + $0x1a50] sm:$0xf]  ;;  %v13364_v52 = vor.u32 %v16271_v45, %v13363_v41  ;;  %7282 = vmatpush.bf16.msrb.mxu3 %v14164_v46  ;;  %v15667_v38 = vld [vmem:[%s25061_s1 + $0x594] sm:$0xf]  ;;  %v10456_v46 = vor.u32 %v15539_v22, %v10453_v25 }
 0x497   :  { %v16335_v58 = vld [vmem:[%s25061_s1 + $0x1a6c] sm:$0xf0]  ;;  %v10965_v41 = vld [vmem:[%s25061_s1 + $0x5b0] sm:$0xf0] }
 0x498   :  { %v13875_v57 = vld [vmem:[%s25061_s1 + $0x1c50] sm:$0xf]  ;;  %v13620_v55 = vor.u32 %v16335_v58, %v13619_v47  ;;  %7244 = vmatpush.bf16.msrb.mxu0 %v13364_v52  ;;  %v15731_v45 = vld [vmem:[%s25061_s1 + $0x794] sm:$0xf]  ;;  %v10712_v58 = vor.u32 %v15603_v31, %v10709_v37 }
 0x499   :  { %v16399_v51 = vld [vmem:[%s25061_s1 + $0x1c6c] sm:$0xf0]  ;;  %v11221_v47 = vld [vmem:[%s25061_s1 + $0x7b0] sm:$0xf0] }
 0x49a   :  { %v14131_v48 = vld [vmem:[%s25061_s1 + $0x1e50] sm:$0xf]  ;;  %v13876_v56 = vor.u32 %v16399_v51, %v13875_v57  ;;  %7257 = vmatpush.bf16.msrb.mxu1 %v13620_v55  ;;  %v10968_v57 = vor.u32 %v15667_v38, %v10965_v41  ;;  %v15531_v51 = vld [vmem:[%s25061_s1 + $0x154] sm:$0xf]  ;;  %v11224_v52 = vor.u32 %v15731_v45, %v11221_v47 }
 0x49b   :  { %v16463_v49 = vld [vmem:[%s25061_s1 + $0x1e6c] sm:$0xf0]  ;;  %v10933_v55 = vld [vmem:[%s25061_s1 + $0x570] sm:$0xf0] }
 0x49c   :  { %v13331_v53 = vld [vmem:[%s25061_s1 + $0x1810] sm:$0xf]  ;;  %v14132_v0 = vor.u32 %v16463_v49, %v14131_v48  ;;  %7270 = vmatpush.bf16.msrb.mxu2 %v13876_v56  ;;  %v10421_v48 = vld [vmem:[%s25061_s1 + $0x170] sm:$0xf0] }
 0x49d   :  { %v16263_v54 = vld [vmem:[%s25061_s1 + $0x182c] sm:$0xf0]  ;;  %v15595_v49 = vld [vmem:[%s25061_s1 + $0x354] sm:$0xf] }
 0x49e   :  { %v13587_v2 = vld [vmem:[%s25061_s1 + $0x1a10] sm:$0xf]  ;;  %v13332_v6 = vor.u32 %v16263_v54, %v13331_v53  ;;  %7283 = vmatpush.bf16.msrb.mxu3 %v14132_v0  ;;  %v10677_v53 = vld [vmem:[%s25061_s1 + $0x370] sm:$0xf0] }
 0x49f   :  { %v16327_v59 = vld [vmem:[%s25061_s1 + $0x1a2c] sm:$0xf0]  ;;  %v15659_v54 = vld [vmem:[%s25061_s1 + $0x554] sm:$0xf] }
 0x4a0   :  { %v13843_v60 = vld [vmem:[%s25061_s1 + $0x1c10] sm:$0xf]  ;;  %v13588_v11 = vor.u32 %v16327_v59, %v13587_v2  ;;  %7245 = vmatpush.bf16.msrb.mxu0 %v13332_v6  ;;  %v15723_v56 = vld [vmem:[%s25061_s1 + $0x754] sm:$0xf]  ;;  %v10424_v59 = vor.u32 %v15531_v51, %v10421_v48  ;;  %v10936_v0 = vor.u32 %v15659_v54, %v10933_v55 }
 0x4a1   :  { %v16391_v9 = vld [vmem:[%s25061_s1 + $0x1c2c] sm:$0xf0]  ;;  %v11189_v2 = vld [vmem:[%s25061_s1 + $0x770] sm:$0xf0] }
 0x4a2   :  { %v14099_v61 = vld [vmem:[%s25061_s1 + $0x1e10] sm:$0xf]  ;;  %v13844_v12 = vor.u32 %v16391_v9, %v13843_v60  ;;  %7258 = vmatpush.bf16.msrb.mxu1 %v13588_v11  ;;  %v10680_v60 = vor.u32 %v15595_v49, %v10677_v53  ;;  %v15523_v9 = vld [vmem:[%s25061_s1 + $0x114] sm:$0xf]  ;;  %v11192_v63 = vor.u32 %v15723_v56, %v11189_v2  ;;  %v7052_v11 = vpop.f32.mrf.mxu1  ;;  %v7078_v53 = vpop.f32.mrf.mxu3 }
 0x4a3   :  { %v16455_v62 = vld [vmem:[%s25061_s1 + $0x1e2c] sm:$0xf0]  ;;  %7246 = vmatmul.bf16.vlgmr.msrb.gmra.mxu0 %v17731_v15  ;;  %v10645_v3 = vld [vmem:[%s25061_s1 + $0x330] sm:$0xf0]  ;;  %v7041_v56 = vpop.f32.mrf.mxu0 }
 0x4a4   :  { %v14100_v14 = vor.u32 %v16455_v62, %v14099_v61  ;;  %7271 = vmatpush.bf16.msrb.mxu2 %v13844_v12  ;;  %7290 = vmatpush.bf16.msra.mxu0 %v10488_v16  ;;  %v10389_v61 = vld [vmem:[%s25061_s1 + $0x130] sm:$0xf0] }
 0x4a5   :  { %7259 = vmatmul.bf16.vlgmr.msrb.gmra.mxu1 %v17744_v21  ;;  %v15587_v62 = vld [vmem:[%s25061_s1 + $0x314] sm:$0xf]  ;;  %v10392_v28 = vor.u32 %v15523_v9, %v10389_v61 }
 0x4a6   :  { %7284 = vmatpush.bf16.msrb.mxu3 %v14100_v14  ;;  %7303 = vmatpush.bf16.msra.mxu1 %v10744_v17  ;;  %v15651_v1 = vld [vmem:[%s25061_s1 + $0x514] sm:$0xf]  ;;  %v10648_v12 = vor.u32 %v15587_v62, %v10645_v3  ;;  %v7053_v17 = vadd.f32 %v7052_v11, %v7040_v8 }
 0x4a7   :  { %7272 = vmatmul.bf16.vlgmr.msrb.gmra.mxu2 %v17742_v20  ;;  %v10901_v4 = vld [vmem:[%s25061_s1 + $0x530] sm:$0xf0] }
 0x4a8   :  { %7316 = vmatpush.bf16.msra.mxu2 %v11000_v18  ;;  %7291 = vmatpush.bf16.msra.mxu0 %v10456_v46  ;;  %v15715_v6 = vld [vmem:[%s25061_s1 + $0x714] sm:$0xf]  ;;  %v10904_v13 = vor.u32 %v15651_v1, %v10901_v4 }
 0x4a9   :  { %7285 = vmatmul.bf16.vlgmr.msrb.gmra.mxu3 %v17752_v26  ;;  %v11157_v7 = vld [vmem:[%s25061_s1 + $0x730] sm:$0xf0] }
 0x4aa   :  { %7329 = vmatpush.bf16.msra.mxu3 %v11256_v32  ;;  %7304 = vmatpush.bf16.msra.mxu1 %v10712_v58  ;;  %v15515_v29 = vld [vmem:[%s25061_s1 + $0xd4] sm:$0xf]  ;;  %v11160_v33 = vor.u32 %v15715_v6, %v11157_v7 }
 0x4ab   :  { %v10357_v14 = vld [vmem:[%s25061_s1 + $0xf0] sm:$0xf0] }
 0x4ac   :  { %7317 = vmatpush.bf16.msra.mxu2 %v10968_v57  ;;  %7292 = vmatpush.bf16.msra.mxu0 %v10424_v59  ;;  %v15579_v16 = vld [vmem:[%s25061_s1 + $0x2d4] sm:$0xf]  ;;  %v10360_v37 = vor.u32 %v15515_v29, %v10357_v14  ;;  %v7065_v57 = vpop.f32.mrf.mxu2  ;;  %v7054_v59 = vpop.f32.mrf.mxu1 }
 0x4ad   :  { %v10613_v18 = vld [vmem:[%s25061_s1 + $0x2f0] sm:$0xf0] }
 0x4ae   :  { %7330 = vmatpush.bf16.msra.mxu3 %v11224_v52  ;;  %7305 = vmatpush.bf16.msra.mxu1 %v10680_v60  ;;  %v15643_v22 = vld [vmem:[%s25061_s1 + $0x4d4] sm:$0xf]  ;;  %v10616_v38 = vor.u32 %v15579_v16, %v10613_v18  ;;  %v7066_v52 = vadd.f32 %v7065_v57, %v7053_v17 }
 0x4af   :  { %v10869_v25 = vld [vmem:[%s25061_s1 + $0x4f0] sm:$0xf0] }
 0x4b0   :  { %7318 = vmatpush.bf16.msra.mxu2 %v10936_v0  ;;  %v15707_v31 = vld [vmem:[%s25061_s1 + $0x6d4] sm:$0xf]  ;;  %7293 = vmatpush.bf16.msra.mxu0 %v10392_v28  ;;  %v10872_v41 = vor.u32 %v15643_v22, %v10869_v25  ;;  %v21041_v60 = vadd.f32 %v7078_v53, %v7066_v52 }
 0x4b1   :  { %v11125_v32 = vld [vmem:[%s25061_s1 + $0x6f0] sm:$0xf0] }
 0x4b2   :  { %7331 = vmatpush.bf16.msra.mxu3 %v11192_v63  ;;  %7306 = vmatpush.bf16.msra.mxu1 %v10648_v12  ;;  %v15507_v45 = vld [vmem:[%s25061_s1 + $0x94] sm:$0xf]  ;;  %v11128_v58 = vor.u32 %v15707_v31, %v11125_v32 }
 0x4b3   :  { %v10325_v47 = vld [vmem:[%s25061_s1 + $0xb0] sm:$0xf0] }
 0x4b4   :  { %7319 = vmatpush.bf16.msra.mxu2 %v10904_v13  ;;  %v15571_v46 = vld [vmem:[%s25061_s1 + $0x294] sm:$0xf]  ;;  %7294 = vmatpush.bf16.msra.mxu0 %v10360_v37  ;;  %v10328_v2 = vor.u32 %v15507_v45, %v10325_v47  ;;  %v7067_v25 = vpop.f32.mrf.mxu2 }
 0x4b5   :  { %v10581_v51 = vld [vmem:[%s25061_s1 + $0x2b0] sm:$0xf0]  ;;  %v16810_v25 = vld [vmem:[%s25062_s2] sm:$0xff] }
 0x4b6   :  { %7332 = vmatpush.bf16.msra.mxu3 %v11160_v33  ;;  %v15635_v48 = vld [vmem:[%s25061_s1 + $0x494] sm:$0xf]  ;;  %7307 = vmatpush.bf16.msra.mxu1 %v10616_v38  ;;  %v10584_v0 = vor.u32 %v15571_v46, %v10581_v51  ;;  %v7080_v38 = vpop.f32.mrf.mxu3 }
 0x4b7   :  { %v10837_v49 = vld [vmem:[%s25061_s1 + $0x4b0] sm:$0xf0] }
 0x4b8   :  { %v15699_v54 = vld [vmem:[%s25061_s1 + $0x694] sm:$0xf]  ;;  %7320 = vmatpush.bf16.msra.mxu2 %v10872_v41  ;;  %v10840_v9 = vor.u32 %v15635_v48, %v10837_v49  ;;  %7295 = vmatpush.bf16.msra.mxu0 %v10328_v2 }
 0x4b9   :  { %v11093_v55 = vld [vmem:[%s25061_s1 + $0x6b0] sm:$0xf0] }
 0x4ba   :  { %v15499_v61 = vld [vmem:[%s25061_s1 + $0x54] sm:$0xf]  ;;  %7333 = vmatpush.bf16.msra.mxu3 %v11128_v58  ;;  %v11096_v3 = vor.u32 %v15699_v54, %v11093_v55  ;;  %7308 = vmatpush.bf16.msra.mxu1 %v10584_v0 }
 0x4bb   :  { %v10293_v62 = vld [vmem:[%s25061_s1 + $0x70] sm:$0xf0] }
 0x4bc   :  { %v15563_v63 = vld [vmem:[%s25061_s1 + $0x254] sm:$0xf]  ;;  %v10296_v8 = vor.u32 %v15499_v61, %v10293_v62  ;;  %7321 = vmatpush.bf16.msra.mxu2 %v10840_v9 }
 0x4bd   :  { %v10549_v1 = vld [vmem:[%s25061_s1 + $0x270] sm:$0xf0] }
 0x4be   :  { %v15627_v4 = vld [vmem:[%s25061_s1 + $0x454] sm:$0xf]  ;;  %v10552_v12 = vor.u32 %v15563_v63, %v10549_v1  ;;  %7334 = vmatpush.bf16.msra.mxu3 %v11096_v3  ;;  %7296 = vmatpush.bf16.msra.mxu0 %v10296_v8 }
 0x4bf   :  { %v10805_v5 = vld [vmem:[%s25061_s1 + $0x470] sm:$0xf0] }
 0x4c0   :  { %v15691_v6 = vld [vmem:[%s25061_s1 + $0x654] sm:$0xf]  ;;  %v10808_v13 = vor.u32 %v15627_v4, %v10805_v5  ;;  %7309 = vmatpush.bf16.msra.mxu1 %v10552_v12 }
 0x4c1   :  { %v11061_v7 = vld [vmem:[%s25061_s1 + $0x670] sm:$0xf0] }
 0x4c2   :  { %v15491_v28 = vld [vmem:[%s25061_s1 + $0x14] sm:$0xf]  ;;  %v11064_v33 = vor.u32 %v15691_v6, %v11061_v7  ;;  %7322 = vmatpush.bf16.msra.mxu2 %v10808_v13 }
 0x4c3   :  { %v10261_v11 = vld [vmem:[%s25061_s1 + $0x30] sm:$0xf0] }
 0x4c4   :  { %v15555_v29 = vld [vmem:[%s25061_s1 + $0x214] sm:$0xf]  ;;  %v10264_v41 = vor.u32 %v15491_v28, %v10261_v11  ;;  %7335 = vmatpush.bf16.msra.mxu3 %v11064_v33 }
 0x4c5   :  { %v10517_v14 = vld [vmem:[%s25061_s1 + $0x230] sm:$0xf0] }
 0x4c6   :  { %v15619_v16 = vld [vmem:[%s25061_s1 + $0x414] sm:$0xf]  ;;  %v10520_v58 = vor.u32 %v15555_v29, %v10517_v14  ;;  %7297 = vmatpush.bf16.msra.mxu0 %v10264_v41 }
 0x4c7   :  { %v10773_v17 = vld [vmem:[%s25061_s1 + $0x430] sm:$0xf0] }
 0x4c8   :  { %v15683_v18 = vld [vmem:[%s25061_s1 + $0x614] sm:$0xf]  ;;  %v10776_v57 = vor.u32 %v15619_v16, %v10773_v17  ;;  %7310 = vmatpush.bf16.msra.mxu1 %v10520_v58  ;;  %v7091_v58 = vpop.f32.mrf.mxu0 }
 0x4c9   :  { %v11029_v22 = vld [vmem:[%s25061_s1 + $0x630] sm:$0xf0]  ;;  %7298 = vmatmul.bf16.vlgmr.msra.gmra.mxu0 %v17214_v36 }
 0x4ca   :  { %v15803_v31 = vld [vmem:[%s25061_s1 + $0x9d4] sm:$0xf]  ;;  %v11032_v49 = vor.u32 %v15683_v18, %v11029_v22  ;;  %7323 = vmatpush.bf16.msra.mxu2 %v10776_v57 }
 0x4cb   :  { %v11509_v32 = vld [vmem:[%s25061_s1 + $0x9f0] sm:$0xf0]  ;;  %7311 = vmatmul.bf16.vlgmr.msra.gmra.mxu1 %v17224_v43 }
 0x4cc   :  { %v15867_v37 = vld [vmem:[%s25061_s1 + $0xbd4] sm:$0xf]  ;;  %v11512_v52 = vor.u32 %v15803_v31, %v11509_v32  ;;  %7336 = vmatpush.bf16.msra.mxu3 %v11032_v49  ;;  %v1118_v31 = vperm.slane %v16810_v25, 4 }
 0x4cd   :  { %v11765_v45 = vld [vmem:[%s25061_s1 + $0xbf0] sm:$0xf0]  ;;  %7324 = vmatmul.bf16.vlgmr.msra.gmra.mxu2 %v17212_v35 }
 0x4ce   :  { %v15931_v47 = vld [vmem:[%s25061_s1 + $0xdd4] sm:$0xf]  ;;  %v11768_v53 = vor.u32 %v15867_v37, %v11765_v45  ;;  %7342 = vmatpush.bf16.msrb.mxu0 %v11512_v52 }
 0x4cf   :  { %v12021_v46 = vld [vmem:[%s25061_s1 + $0xdf0] sm:$0xf0]  ;;  %7337 = vmatmul.bf16.vlgmr.msra.gmra.mxu3 %v17222_v42 }
 0x4d0   :  { %v15995_v51 = vld [vmem:[%s25061_s1 + $0xfd4] sm:$0xf]  ;;  %v12024_v54 = vor.u32 %v15931_v47, %v12021_v46  ;;  %7355 = vmatpush.bf16.msrb.mxu1 %v11768_v53  ;;  %v7092_v53 = vadd.f32 %v7091_v58, %v1118_v31 }
 0x4d1   :  { %v12277_v48 = vld [vmem:[%s25061_s1 + $0xff0] sm:$0xf0] }
 0x4d2   :  { %v15795_v55 = vld [vmem:[%s25061_s1 + $0x994] sm:$0xf]  ;;  %v12280_v59 = vor.u32 %v15995_v51, %v12277_v48  ;;  %7368 = vmatpush.bf16.msrb.mxu2 %v12024_v54  ;;  %v7104_v54 = vpop.f32.mrf.mxu1 }
 0x4d3   :  { %v11477_v56 = vld [vmem:[%s25061_s1 + $0x9b0] sm:$0xf0] }
 0x4d4   :  { %v15859_v2 = vld [vmem:[%s25061_s1 + $0xb94] sm:$0xf]  ;;  %v11480_v3 = vor.u32 %v15795_v55, %v11477_v56  ;;  %7381 = vmatpush.bf16.msrb.mxu3 %v12280_v59 }
 0x4d5   :  { %v11733_v0 = vld [vmem:[%s25061_s1 + $0xbb0] sm:$0xf0] }
 0x4d6   :  { %v15923_v9 = vld [vmem:[%s25061_s1 + $0xd94] sm:$0xf]  ;;  %v11736_v1 = vor.u32 %v15859_v2, %v11733_v0  ;;  %7343 = vmatpush.bf16.msrb.mxu0 %v11480_v3 }
 0x4d7   :  { %v11989_v61 = vld [vmem:[%s25061_s1 + $0xdb0] sm:$0xf0] }
 0x4d8   :  { %v15987_v62 = vld [vmem:[%s25061_s1 + $0xf94] sm:$0xf]  ;;  %v11992_v4 = vor.u32 %v15923_v9, %v11989_v61  ;;  %7356 = vmatpush.bf16.msrb.mxu1 %v11736_v1  ;;  %v7105_v61 = vadd.f32 %v7104_v54, %v7092_v53 }
 0x4d9   :  { %v12245_v63 = vld [vmem:[%s25061_s1 + $0xfb0] sm:$0xf0] }
 0x4da   :  { %v15787_v5 = vld [vmem:[%s25061_s1 + $0x954] sm:$0xf]  ;;  %v12248_v8 = vor.u32 %v15987_v62, %v12245_v63  ;;  %7369 = vmatpush.bf16.msrb.mxu2 %v11992_v4 }
 0x4db   :  { %v11445_v6 = vld [vmem:[%s25061_s1 + $0x970] sm:$0xf0] }
 0x4dc   :  { %v15851_v7 = vld [vmem:[%s25061_s1 + $0xb54] sm:$0xf]  ;;  %v11448_v14 = vor.u32 %v15787_v5, %v11445_v6  ;;  %7382 = vmatpush.bf16.msrb.mxu3 %v12248_v8  ;;  %v7117_v6 = vpop.f32.mrf.mxu2 }
 0x4dd   :  { %v11701_v28 = vld [vmem:[%s25061_s1 + $0xb70] sm:$0xf0] }
 0x4de   :  { %v15915_v11 = vld [vmem:[%s25061_s1 + $0xd54] sm:$0xf]  ;;  %v11704_v33 = vor.u32 %v15851_v7, %v11701_v28  ;;  %7344 = vmatpush.bf16.msrb.mxu0 %v11448_v14 }
 0x4df   :  { %v11957_v12 = vld [vmem:[%s25061_s1 + $0xd70] sm:$0xf0] }
 0x4e0   :  { %v15979_v13 = vld [vmem:[%s25061_s1 + $0xf54] sm:$0xf]  ;;  %v11960_v17 = vor.u32 %v15915_v11, %v11957_v12  ;;  %7357 = vmatpush.bf16.msrb.mxu1 %v11704_v33  ;;  %v7118_v12 = vadd.f32 %v7117_v6, %v7105_v61 }
 0x4e1   :  { %v12213_v29 = vld [vmem:[%s25061_s1 + $0xf70] sm:$0xf0] }
 0x4e2   :  { %v15779_v16 = vld [vmem:[%s25061_s1 + $0x914] sm:$0xf]  ;;  %v12216_v32 = vor.u32 %v15979_v13, %v12213_v29  ;;  %7370 = vmatpush.bf16.msrb.mxu2 %v11960_v17  ;;  %v7130_v13 = vpop.f32.mrf.mxu3  ;;  %v7093_v17 = vpop.f32.mrf.mxu0 }
 0x4e3   :  { %v11413_v18 = vld [vmem:[%s25061_s1 + $0x930] sm:$0xf0]  ;;  %v21242_v33 = vadd.f32 %v7130_v13, %v7118_v12 }
 0x4e4   :  { %v15843_v22 = vld [vmem:[%s25061_s1 + $0xb14] sm:$0xf]  ;;  %v11416_v46 = vor.u32 %v15779_v16, %v11413_v18  ;;  %7383 = vmatpush.bf16.msrb.mxu3 %v12216_v32 }
 0x4e5   :  { %v11669_v37 = vld [vmem:[%s25061_s1 + $0xb30] sm:$0xf0] }
 0x4e6   :  { %v15907_v38 = vld [vmem:[%s25061_s1 + $0xd14] sm:$0xf]  ;;  %v11672_v57 = vor.u32 %v15843_v22, %v11669_v37  ;;  %7345 = vmatpush.bf16.msrb.mxu0 %v11416_v46  ;;  %v7106_v37 = vpop.f32.mrf.mxu1 }
 0x4e7   :  { %v11925_v41 = vld [vmem:[%s25061_s1 + $0xd30] sm:$0xf0] }
 0x4e8   :  { %v15971_v45 = vld [vmem:[%s25061_s1 + $0xf14] sm:$0xf]  ;;  %v11928_v51 = vor.u32 %v15907_v38, %v11925_v41  ;;  %7358 = vmatpush.bf16.msrb.mxu1 %v11672_v57 }
 0x4e9   :  { %v12181_v47 = vld [vmem:[%s25061_s1 + $0xf30] sm:$0xf0] }
 0x4ea   :  { %v15771_v48 = vld [vmem:[%s25061_s1 + $0x8d4] sm:$0xf]  ;;  %v12184_v55 = vor.u32 %v15971_v45, %v12181_v47  ;;  %7371 = vmatpush.bf16.msrb.mxu2 %v11928_v51  ;;  %v7132_v61 = vpop.f32.mrf.mxu3 }
 0x4eb   :  { %v11381_v49 = vld [vmem:[%s25061_s1 + $0x8f0] sm:$0xf0] }
 0x4ec   :  { %v15835_v52 = vld [vmem:[%s25061_s1 + $0xad4] sm:$0xf]  ;;  %v11384_v62 = vor.u32 %v15771_v48, %v11381_v49  ;;  %7384 = vmatpush.bf16.msrb.mxu3 %v12184_v55 }
 0x4ed   :  { %v11637_v56 = vld [vmem:[%s25061_s1 + $0xaf0] sm:$0xf0] }
 0x4ee   :  { %v15899_v2 = vld [vmem:[%s25061_s1 + $0xcd4] sm:$0xf]  ;;  %v11640_v63 = vor.u32 %v15835_v52, %v11637_v56  ;;  %7346 = vmatpush.bf16.msrb.mxu0 %v11384_v62  ;;  %v7119_v56 = vpop.f32.mrf.mxu2 }
 0x4ef   :  { %v11893_v59 = vld [vmem:[%s25061_s1 + $0xcf0] sm:$0xf0] }
 0x4f0   :  { %v15963_v0 = vld [vmem:[%s25061_s1 + $0xed4] sm:$0xf]  ;;  %v11896_v3 = vor.u32 %v15899_v2, %v11893_v59  ;;  %7359 = vmatpush.bf16.msrb.mxu1 %v11640_v63 }
 0x4f1   :  { %v12149_v9 = vld [vmem:[%s25061_s1 + $0xef0] sm:$0xf0] }
 0x4f2   :  { %v15763_v1 = vld [vmem:[%s25061_s1 + $0x894] sm:$0xf]  ;;  %v12152_v7 = vor.u32 %v15963_v0, %v12149_v9  ;;  %7372 = vmatpush.bf16.msrb.mxu2 %v11896_v3 }
 0x4f3   :  { %v11349_v4 = vld [vmem:[%s25061_s1 + $0x8b0] sm:$0xf0] }
 0x4f4   :  { %v15827_v5 = vld [vmem:[%s25061_s1 + $0xa94] sm:$0xf]  ;;  %v11352_v16 = vor.u32 %v15763_v1, %v11349_v4  ;;  %7385 = vmatpush.bf16.msrb.mxu3 %v12152_v7 }
 0x4f5   :  { %v11605_v8 = vld [vmem:[%s25061_s1 + $0xab0] sm:$0xf0] }
 0x4f6   :  { %v15891_v28 = vld [vmem:[%s25061_s1 + $0xc94] sm:$0xf]  ;;  %v11608_v18 = vor.u32 %v15827_v5, %v11605_v8  ;;  %7347 = vmatpush.bf16.msrb.mxu0 %v11352_v16 }
 0x4f7   :  { %v11861_v11 = vld [vmem:[%s25061_s1 + $0xcb0] sm:$0xf0] }
 0x4f8   :  { %v15955_v29 = vld [vmem:[%s25061_s1 + $0xe94] sm:$0xf]  ;;  %v11864_v22 = vor.u32 %v15891_v28, %v11861_v11  ;;  %7360 = vmatpush.bf16.msrb.mxu1 %v11608_v18 }
 0x4f9   :  { %v12117_v14 = vld [vmem:[%s25061_s1 + $0xeb0] sm:$0xf0] }
 0x4fa   :  { %v15755_v25 = vld [vmem:[%s25061_s1 + $0x854] sm:$0xf]  ;;  %v12120_v38 = vor.u32 %v15955_v29, %v12117_v14  ;;  %7373 = vmatpush.bf16.msrb.mxu2 %v11864_v22 }
 0x4fb   :  { %v11317_v31 = vld [vmem:[%s25061_s1 + $0x870] sm:$0xf0] }
 0x4fc   :  { %v15819_v32 = vld [vmem:[%s25061_s1 + $0xa54] sm:$0xf]  ;;  %v11320_v57 = vor.u32 %v15755_v25, %v11317_v31  ;;  %7386 = vmatpush.bf16.msrb.mxu3 %v12120_v38 }
 0x4fd   :  { %v11573_v41 = vld [vmem:[%s25061_s1 + $0xa70] sm:$0xf0] }
 0x4fe   :  { %v15883_v45 = vld [vmem:[%s25061_s1 + $0xc54] sm:$0xf]  ;;  %v11576_v49 = vor.u32 %v15819_v32, %v11573_v41  ;;  %7348 = vmatpush.bf16.msrb.mxu0 %v11320_v57 }
 0x4ff   :  { %v11829_v47 = vld [vmem:[%s25061_s1 + $0xc70] sm:$0xf0] }
 0x500   :  { %v15947_v46 = vld [vmem:[%s25061_s1 + $0xe54] sm:$0xf]  ;;  %v11832_v52 = vor.u32 %v15883_v45, %v11829_v47  ;;  %7361 = vmatpush.bf16.msrb.mxu1 %v11576_v49 }
 0x501   :  { %v12085_v58 = vld [vmem:[%s25061_s1 + $0xe70] sm:$0xf0] }
 0x502   :  { %v15747_v51 = vld [vmem:[%s25061_s1 + $0x814] sm:$0xf]  ;;  %v12088_v2 = vor.u32 %v15947_v46, %v12085_v58  ;;  %7374 = vmatpush.bf16.msrb.mxu2 %v11832_v52 }
 0x503   :  { %v11285_v48 = vld [vmem:[%s25061_s1 + $0x830] sm:$0xf0] }
 0x504   :  { %v15811_v53 = vld [vmem:[%s25061_s1 + $0xa14] sm:$0xf]  ;;  %v11288_v1 = vor.u32 %v15747_v51, %v11285_v48  ;;  %7387 = vmatpush.bf16.msrb.mxu3 %v12088_v2 }
 0x505   :  { %v11541_v54 = vld [vmem:[%s25061_s1 + $0xa30] sm:$0xf0] }
 0x506   :  { %v15875_v55 = vld [vmem:[%s25061_s1 + $0xc14] sm:$0xf]  ;;  %v11544_v7 = vor.u32 %v15811_v53, %v11541_v54  ;;  %7349 = vmatpush.bf16.msrb.mxu0 %v11288_v1 }
 0x507   :  { %v11797_v59 = vld [vmem:[%s25061_s1 + $0xc30] sm:$0xf0] }
 0x508   :  { %v15939_v0 = vld [vmem:[%s25061_s1 + $0xe14] sm:$0xf]  ;;  %v11800_v8 = vor.u32 %v15875_v55, %v11797_v59  ;;  %7362 = vmatpush.bf16.msrb.mxu1 %v11544_v7 }
 0x509   :  { %v12053_v9 = vld [vmem:[%s25061_s1 + $0xe30] sm:$0xf0]  ;;  %7350 = vmatmul.bf16.vlgmr.msrb.gmra.mxu0 %v17340_v39 }
 0x50a   :  { %v16059_v62 = vld [vmem:[%s25061_s1 + $0x11d4] sm:$0xf]  ;;  %v12056_v12 = vor.u32 %v15939_v0, %v12053_v9  ;;  %7375 = vmatpush.bf16.msrb.mxu2 %v11800_v8 }
 0x50b   :  { %v12533_v63 = vld [vmem:[%s25061_s1 + $0x11f0] sm:$0xf0]  ;;  %7363 = vmatmul.bf16.vlgmr.msrb.gmra.mxu1 %v17344_v44 }
 0x50c   :  { %v16123_v3 = vld [vmem:[%s25061_s1 + $0x13d4] sm:$0xf]  ;;  %v12536_v13 = vor.u32 %v16059_v62, %v12533_v63  ;;  %7388 = vmatpush.bf16.msrb.mxu3 %v12056_v12 }
 0x50d   :  { %v12789_v4 = vld [vmem:[%s25061_s1 + $0x13f0] sm:$0xf0]  ;;  %7376 = vmatmul.bf16.vlgmr.msrb.gmra.mxu2 %v17332_v34 }
 0x50e   :  { %v16187_v5 = vld [vmem:[%s25061_s1 + $0x15d4] sm:$0xf]  ;;  %v12792_v29 = vor.u32 %v16123_v3, %v12789_v4  ;;  %7394 = vmatpush.bf16.msra.mxu0 %v12536_v13 }
 0x50f   :  { %v13045_v6 = vld [vmem:[%s25061_s1 + $0x15f0] sm:$0xf0]  ;;  %7389 = vmatmul.bf16.vlgmr.msrb.gmra.mxu3 %v17342_v40 }
 0x510   :  { %v16251_v28 = vld [vmem:[%s25061_s1 + $0x17d4] sm:$0xf]  ;;  %v13048_v14 = vor.u32 %v16187_v5, %v13045_v6  ;;  %7407 = vmatpush.bf16.msra.mxu1 %v12792_v29  ;;  %v7143_v6 = vpop.f32.mrf.mxu0  ;;  %v7156_v29 = vpop.f32.mrf.mxu1 }
 0x511   :  { %v13301_v11 = vld [vmem:[%s25061_s1 + $0x17f0] sm:$0xf0]  ;;  %v7144_v13 = vadd.f32 %v7143_v6, %v21242_v33 }
 0x512   :  { %v16051_v16 = vld [vmem:[%s25061_s1 + $0x1194] sm:$0xf]  ;;  %v13304_v22 = vor.u32 %v16251_v28, %v13301_v11  ;;  %7420 = vmatpush.bf16.msra.mxu2 %v13048_v14 }
 0x513   :  { %v12501_v17 = vld [vmem:[%s25061_s1 + $0x11b0] sm:$0xf0] }
 0x514   :  { %v16115_v18 = vld [vmem:[%s25061_s1 + $0x1394] sm:$0xf]  ;;  %v12504_v41 = vor.u32 %v16051_v16, %v12501_v17  ;;  %7433 = vmatpush.bf16.msra.mxu3 %v13304_v22 }
 0x515   :  { %v12757_v25 = vld [vmem:[%s25061_s1 + $0x13b0] sm:$0xf0] }
 0x516   :  { %v16179_v31 = vld [vmem:[%s25061_s1 + $0x1594] sm:$0xf]  ;;  %v12760_v45 = vor.u32 %v16115_v18, %v12757_v25  ;;  %7395 = vmatpush.bf16.msra.mxu0 %v12504_v41  ;;  %v7157_v25 = vadd.f32 %v7156_v29, %v7144_v13 }
 0x517   :  { %v13013_v32 = vld [vmem:[%s25061_s1 + $0x15b0] sm:$0xf0] }
 0x518   :  { %v16243_v37 = vld [vmem:[%s25061_s1 + $0x1794] sm:$0xf]  ;;  %v13016_v47 = vor.u32 %v16179_v31, %v13013_v32  ;;  %7408 = vmatpush.bf16.msra.mxu1 %v12760_v45 }
 0x519   :  { %v13269_v38 = vld [vmem:[%s25061_s1 + $0x17b0] sm:$0xf0] }
 0x51a   :  { %v16043_v46 = vld [vmem:[%s25061_s1 + $0x1154] sm:$0xf]  ;;  %v13272_v51 = vor.u32 %v16243_v37, %v13269_v38  ;;  %7421 = vmatpush.bf16.msra.mxu2 %v13016_v47  ;;  %v7169_v47 = vpop.f32.mrf.mxu2 }
 0x51b   :  { %v12469_v58 = vld [vmem:[%s25061_s1 + $0x1170] sm:$0xf0] }
 0x51c   :  { %v16107_v57 = vld [vmem:[%s25061_s1 + $0x1354] sm:$0xf]  ;;  %v12472_v55 = vor.u32 %v16043_v46, %v12469_v58  ;;  %7434 = vmatpush.bf16.msra.mxu3 %v13272_v51 }
 0x51d   :  { %v12725_v48 = vld [vmem:[%s25061_s1 + $0x1370] sm:$0xf0] }
 0x51e   :  { %v16171_v49 = vld [vmem:[%s25061_s1 + $0x1554] sm:$0xf]  ;;  %v12728_v56 = vor.u32 %v16107_v57, %v12725_v48  ;;  %7396 = vmatpush.bf16.msra.mxu0 %v12472_v55  ;;  %v7170_v48 = vadd.f32 %v7169_v47, %v7157_v25 }
 0x51f   :  { %v12981_v52 = vld [vmem:[%s25061_s1 + $0x1570] sm:$0xf0] }
 0x520   :  { %v16235_v53 = vld [vmem:[%s25061_s1 + $0x1754] sm:$0xf]  ;;  %v12984_v2 = vor.u32 %v16171_v49, %v12981_v52  ;;  %7409 = vmatpush.bf16.msra.mxu1 %v12728_v56  ;;  %v7182_v49 = vpop.f32.mrf.mxu3  ;;  %v7145_v56 = vpop.f32.mrf.mxu0 }
 0x521   :  { %v13237_v54 = vld [vmem:[%s25061_s1 + $0x1770] sm:$0xf0]  ;;  %v21441_v55 = vadd.f32 %v7182_v49, %v7170_v48 }
 0x522   :  { %v16035_v59 = vld [vmem:[%s25061_s1 + $0x1114] sm:$0xf]  ;;  %v13240_v61 = vor.u32 %v16235_v53, %v13237_v54  ;;  %7422 = vmatpush.bf16.msra.mxu2 %v12984_v2 }
 0x523   :  { %v12437_v0 = vld [vmem:[%s25061_s1 + $0x1130] sm:$0xf0] }
 0x524   :  { %v16099_v9 = vld [vmem:[%s25061_s1 + $0x1314] sm:$0xf]  ;;  %v12440_v5 = vor.u32 %v16035_v59, %v12437_v0  ;;  %7435 = vmatpush.bf16.msra.mxu3 %v13240_v61 }
 0x525   :  { %v12693_v62 = vld [vmem:[%s25061_s1 + $0x1330] sm:$0xf0] }
 0x526   :  { %v16163_v63 = vld [vmem:[%s25061_s1 + $0x1514] sm:$0xf]  ;;  %v12696_v7 = vor.u32 %v16099_v9, %v12693_v62  ;;  %7397 = vmatpush.bf16.msra.mxu0 %v12440_v5  ;;  %v7158_v62 = vpop.f32.mrf.mxu1 }
 0x527   :  { %v12949_v3 = vld [vmem:[%s25061_s1 + $0x1530] sm:$0xf0] }
 0x528   :  { %v16227_v1 = vld [vmem:[%s25061_s1 + $0x1714] sm:$0xf]  ;;  %v12952_v8 = vor.u32 %v16163_v63, %v12949_v3  ;;  %7410 = vmatpush.bf16.msra.mxu1 %v12696_v7  ;;  %v7184_v25 = vpop.f32.mrf.mxu3 }
 0x529   :  { %v13205_v4 = vld [vmem:[%s25061_s1 + $0x1730] sm:$0xf0] }
 0x52a   :  { %v16027_v28 = vld [vmem:[%s25061_s1 + $0x10d4] sm:$0xf]  ;;  %v13208_v14 = vor.u32 %v16227_v1, %v13205_v4  ;;  %7423 = vmatpush.bf16.msra.mxu2 %v12952_v8 }
 0x52b   :  { %v12405_v11 = vld [vmem:[%s25061_s1 + $0x10f0] sm:$0xf0] }
 0x52c   :  { %v16091_v12 = vld [vmem:[%s25061_s1 + $0x12d4] sm:$0xf]  ;;  %v12408_v31 = vor.u32 %v16027_v28, %v12405_v11  ;;  %7436 = vmatpush.bf16.msra.mxu3 %v13208_v14 }
 0x52d   :  { %v12661_v16 = vld [vmem:[%s25061_s1 + $0x12f0] sm:$0xf0] }
 0x52e   :  { %v16155_v17 = vld [vmem:[%s25061_s1 + $0x14d4] sm:$0xf]  ;;  %v12664_v32 = vor.u32 %v16091_v12, %v12661_v16  ;;  %7398 = vmatpush.bf16.msra.mxu0 %v12408_v31  ;;  %v7171_v16 = vpop.f32.mrf.mxu2 }
 0x52f   :  { %v12917_v18 = vld [vmem:[%s25061_s1 + $0x14f0] sm:$0xf0] }
 0x530   :  { %v16219_v22 = vld [vmem:[%s25061_s1 + $0x16d4] sm:$0xf]  ;;  %v12920_v37 = vor.u32 %v16155_v17, %v12917_v18  ;;  %7411 = vmatpush.bf16.msra.mxu1 %v12664_v32 }
 0x531   :  { %v13173_v33 = vld [vmem:[%s25061_s1 + $0x16f0] sm:$0xf0] }
 0x532   :  { %v16019_v38 = vld [vmem:[%s25061_s1 + $0x1094] sm:$0xf]  ;;  %v13176_v46 = vor.u32 %v16219_v22, %v13173_v33  ;;  %7424 = vmatpush.bf16.msra.mxu2 %v12920_v37 }
 0x533   :  { %v12373_v41 = vld [vmem:[%s25061_s1 + $0x10b0] sm:$0xf0] }
 0x534   :  { %v16083_v45 = vld [vmem:[%s25061_s1 + $0x1294] sm:$0xf]  ;;  %v12376_v54 = vor.u32 %v16019_v38, %v12373_v41  ;;  %7437 = vmatpush.bf16.msra.mxu3 %v13176_v46 }
 0x535   :  { %v12629_v58 = vld [vmem:[%s25061_s1 + $0x12b0] sm:$0xf0] }
 0x536   :  { %v16147_v57 = vld [vmem:[%s25061_s1 + $0x1494] sm:$0xf]  ;;  %v12632_v2 = vor.u32 %v16083_v45, %v12629_v58  ;;  %7399 = vmatpush.bf16.msra.mxu0 %v12376_v54 }
 0x537   :  { %v12885_v51 = vld [vmem:[%s25061_s1 + $0x14b0] sm:$0xf0] }
 0x538   :  { %v16211_v52 = vld [vmem:[%s25061_s1 + $0x1694] sm:$0xf]  ;;  %v12888_v59 = vor.u32 %v16147_v57, %v12885_v51  ;;  %7412 = vmatpush.bf16.msra.mxu1 %v12632_v2 }
 0x539   :  { %v13141_v53 = vld [vmem:[%s25061_s1 + $0x16b0] sm:$0xf0] }
 0x53a   :  { %v16011_v0 = vld [vmem:[%s25061_s1 + $0x1054] sm:$0xf]  ;;  %v13144_v63 = vor.u32 %v16211_v52, %v13141_v53  ;;  %7425 = vmatpush.bf16.msra.mxu2 %v12888_v59 }
 0x53b   :  { %v12341_v9 = vld [vmem:[%s25061_s1 + $0x1070] sm:$0xf0] }
 0x53c   :  { %v16075_v61 = vld [vmem:[%s25061_s1 + $0x1254] sm:$0xf]  ;;  %v12344_v7 = vor.u32 %v16011_v0, %v12341_v9  ;;  %7438 = vmatpush.bf16.msra.mxu3 %v13144_v63 }
 0x53d   :  { %v12597_v3 = vld [vmem:[%s25061_s1 + $0x1270] sm:$0xf0] }
 0x53e   :  { %v16139_v1 = vld [vmem:[%s25061_s1 + $0x1454] sm:$0xf]  ;;  %v12600_v11 = vor.u32 %v16075_v61, %v12597_v3  ;;  %7400 = vmatpush.bf16.msra.mxu0 %v12344_v7 }
 0x53f   :  { %v12853_v4 = vld [vmem:[%s25061_s1 + $0x1470] sm:$0xf0] }
 0x540   :  { %v16203_v5 = vld [vmem:[%s25061_s1 + $0x1654] sm:$0xf]  ;;  %v12856_v12 = vor.u32 %v16139_v1, %v12853_v4  ;;  %7413 = vmatpush.bf16.msra.mxu1 %v12600_v11 }
 0x541   :  { %v13109_v6 = vld [vmem:[%s25061_s1 + $0x1670] sm:$0xf0] }
 0x542   :  { %v16003_v8 = vld [vmem:[%s25061_s1 + $0x1014] sm:$0xf]  ;;  %v13112_v17 = vor.u32 %v16203_v5, %v13109_v6  ;;  %7426 = vmatpush.bf16.msra.mxu2 %v12856_v12 }
 0x543   :  { %v12309_v28 = vld [vmem:[%s25061_s1 + $0x1030] sm:$0xf0] }
 0x544   :  { %v16067_v13 = vld [vmem:[%s25061_s1 + $0x1214] sm:$0xf]  ;;  %v12312_v38 = vor.u32 %v16003_v8, %v12309_v28  ;;  %7439 = vmatpush.bf16.msra.mxu3 %v13112_v17 }
 0x545   :  { %v12565_v29 = vld [vmem:[%s25061_s1 + $0x1230] sm:$0xf0] }
 0x546   :  { %v16131_v14 = vld [vmem:[%s25061_s1 + $0x1414] sm:$0xf]  ;;  %v12568_v46 = vor.u32 %v16067_v13, %v12565_v29  ;;  %7401 = vmatpush.bf16.msra.mxu0 %v12312_v38  ;;  %v7195_v38 = vpop.f32.mrf.mxu0 }
 0x547   :  { %v12821_v18 = vld [vmem:[%s25061_s1 + $0x1430] sm:$0xf0] }
 0x548   :  { %v16195_v22 = vld [vmem:[%s25061_s1 + $0x1614] sm:$0xf]  ;;  %v12824_v58 = vor.u32 %v16131_v14, %v12821_v18  ;;  %7414 = vmatpush.bf16.msra.mxu1 %v12568_v46 }
 0x549   :  { %v13077_v33 = vld [vmem:[%s25061_s1 + $0x1630] sm:$0xf0]  ;;  %7402 = vmatmul.bf16.vlgmr.msra.gmra.mxu0 %v17527_v19 }
 0x54a   :  { %v16315_v31 = vld [vmem:[%s25061_s1 + $0x19d4] sm:$0xf]  ;;  %v13080_v48 = vor.u32 %v16195_v22, %v13077_v33  ;;  %7427 = vmatpush.bf16.msra.mxu2 %v12824_v58  ;;  %v7208_v58 = vpop.f32.mrf.mxu1 }
 0x54b   :  { %v13557_v32 = vld [vmem:[%s25061_s1 + $0x19f0] sm:$0xf0]  ;;  %7415 = vmatmul.bf16.vlgmr.msra.gmra.mxu1 %v17540_v24 }
 0x54c   :  { %v16379_v37 = vld [vmem:[%s25061_s1 + $0x1bd4] sm:$0xf]  ;;  %v13560_v49 = vor.u32 %v16315_v31, %v13557_v32  ;;  %7440 = vmatpush.bf16.msra.mxu3 %v13080_v48 }
 0x54d   :  { %v13813_v41 = vld [vmem:[%s25061_s1 + $0x1bf0] sm:$0xf0]  ;;  %7428 = vmatmul.bf16.vlgmr.msra.gmra.mxu2 %v17538_v23 }
 0x54e   :  { %v16443_v45 = vld [vmem:[%s25061_s1 + $0x1dd4] sm:$0xf]  ;;  %v13816_v52 = vor.u32 %v16379_v37, %v13813_v41  ;;  %7446 = vmatpush.bf16.msrb.mxu0 %v13560_v49 }
 0x54f   :  { %v14069_v47 = vld [vmem:[%s25061_s1 + $0x1df0] sm:$0xf0]  ;;  %7441 = vmatmul.bf16.vlgmr.msra.gmra.mxu3 %v17548_v27 }
 0x550   :  { %v16507_v57 = vld [vmem:[%s25061_s1 + $0x1fd4] sm:$0xf]  ;;  %v14072_v53 = vor.u32 %v16443_v45, %v14069_v47  ;;  %7459 = vmatpush.bf16.msrb.mxu1 %v13816_v52  ;;  %v7196_v47 = vadd.f32 %v7195_v38, %v21441_v55 }
 0x551   :  { %v14325_v51 = vld [vmem:[%s25061_s1 + $0x1ff0] sm:$0xf0] }
 0x552   :  { %v16307_v54 = vld [vmem:[%s25061_s1 + $0x1994] sm:$0xf]  ;;  %v14328_v59 = vor.u32 %v16507_v57, %v14325_v51  ;;  %7472 = vmatpush.bf16.msrb.mxu2 %v14072_v53  ;;  %v7209_v53 = vadd.f32 %v7208_v58, %v7196_v47 }
 0x553   :  { %v13525_v56 = vld [vmem:[%s25061_s1 + $0x19b0] sm:$0xf0] }
 0x554   :  { %v16371_v2 = vld [vmem:[%s25061_s1 + $0x1b94] sm:$0xf]  ;;  %v13528_v3 = vor.u32 %v16307_v54, %v13525_v56  ;;  %7485 = vmatpush.bf16.msrb.mxu3 %v14328_v59 }
 0x555   :  { %v13781_v0 = vld [vmem:[%s25061_s1 + $0x1bb0] sm:$0xf0] }
 0x556   :  { %v16435_v9 = vld [vmem:[%s25061_s1 + $0x1d94] sm:$0xf]  ;;  %v13784_v1 = vor.u32 %v16371_v2, %v13781_v0  ;;  %7447 = vmatpush.bf16.msrb.mxu0 %v13528_v3 }
 0x557   :  { %v14037_v61 = vld [vmem:[%s25061_s1 + $0x1db0] sm:$0xf0] }
 0x558   :  { %v16499_v62 = vld [vmem:[%s25061_s1 + $0x1f94] sm:$0xf]  ;;  %v14040_v4 = vor.u32 %v16435_v9, %v14037_v61  ;;  %7460 = vmatpush.bf16.msrb.mxu1 %v13784_v1 }
 0x559   :  { %v14293_v63 = vld [vmem:[%s25061_s1 + $0x1fb0] sm:$0xf0] }
 0x55a   :  { %v16299_v5 = vld [vmem:[%s25061_s1 + $0x1954] sm:$0xf]  ;;  %v14296_v8 = vor.u32 %v16499_v62, %v14293_v63  ;;  %7473 = vmatpush.bf16.msrb.mxu2 %v14040_v4 }
 0x55b   :  { %v13493_v6 = vld [vmem:[%s25061_s1 + $0x1970] sm:$0xf0] }
 0x55c   :  { %v16363_v7 = vld [vmem:[%s25061_s1 + $0x1b54] sm:$0xf]  ;;  %v13496_v14 = vor.u32 %v16299_v5, %v13493_v6  ;;  %7486 = vmatpush.bf16.msrb.mxu3 %v14296_v8  ;;  %v7221_v5 = vpop.f32.mrf.mxu2 }
 0x55d   :  { %v13749_v28 = vld [vmem:[%s25061_s1 + $0x1b70] sm:$0xf0] }
 0x55e   :  { %v16427_v11 = vld [vmem:[%s25061_s1 + $0x1d54] sm:$0xf]  ;;  %v13752_v16 = vor.u32 %v16363_v7, %v13749_v28  ;;  %7448 = vmatpush.bf16.msrb.mxu0 %v13496_v14  ;;  %v7222_v28 = vadd.f32 %v7221_v5, %v7209_v53 }
 0x55f   :  { %v14005_v12 = vld [vmem:[%s25061_s1 + $0x1d70] sm:$0xf0] }
 0x560   :  { %v16491_v13 = vld [vmem:[%s25061_s1 + $0x1f54] sm:$0xf]  ;;  %v14008_v17 = vor.u32 %v16427_v11, %v14005_v12  ;;  %7461 = vmatpush.bf16.msrb.mxu1 %v13752_v16  ;;  %v7234_v11 = vpop.f32.mrf.mxu3  ;;  %v7210_v16 = vpop.f32.mrf.mxu1 }
 0x561   :  { %v14261_v29 = vld [vmem:[%s25061_s1 + $0x1f70] sm:$0xf0]  ;;  %v10715_v16 = vld [vmem:[%s25061_s1 + $0x398] sm:$0xf] }
 0x562   :  { %v16291_v18 = vld [vmem:[%s25061_s1 + $0x1914] sm:$0xf]  ;;  %v14264_v25 = vor.u32 %v16491_v13, %v14261_v29  ;;  %7474 = vmatpush.bf16.msrb.mxu2 %v14008_v17  ;;  %v7197_v29 = vpop.f32.mrf.mxu0  ;;  %v21640_v17 = vadd.f32 %v7234_v11, %v7222_v28 }
 0x563   :  { %v13461_v22 = vld [vmem:[%s25061_s1 + $0x1930] sm:$0xf0]  ;;  %v10459_v29 = vld [vmem:[%s25061_s1 + $0x198] sm:$0xf] }
 0x564   :  { %v16355_v33 = vld [vmem:[%s25061_s1 + $0x1b14] sm:$0xf]  ;;  %v13464_v46 = vor.u32 %v16291_v18, %v13461_v22  ;;  %7487 = vmatpush.bf16.msrb.mxu3 %v14264_v25 }
 0x565   :  { %v13717_v31 = vld [vmem:[%s25061_s1 + $0x1b30] sm:$0xf0] }
 0x566   :  { %v16419_v32 = vld [vmem:[%s25061_s1 + $0x1d14] sm:$0xf]  ;;  %v13720_v57 = vor.u32 %v16355_v33, %v13717_v31  ;;  %7449 = vmatpush.bf16.msrb.mxu0 %v13464_v46 }
 0x567   :  { %v13973_v37 = vld [vmem:[%s25061_s1 + $0x1d30] sm:$0xf0] }
 0x568   :  { %v16483_v41 = vld [vmem:[%s25061_s1 + $0x1f14] sm:$0xf]  ;;  %v13976_v51 = vor.u32 %v16419_v32, %v13973_v37  ;;  %7462 = vmatpush.bf16.msrb.mxu1 %v13720_v57 }
 0x569   :  { %v14229_v45 = vld [vmem:[%s25061_s1 + $0x1f30] sm:$0xf0] }
 0x56a   :  { %v16283_v48 = vld [vmem:[%s25061_s1 + $0x18d4] sm:$0xf]  ;;  %v14232_v55 = vor.u32 %v16483_v41, %v14229_v45  ;;  %7475 = vmatpush.bf16.msrb.mxu2 %v13976_v51 }
 0x56b   :  { %v13429_v49 = vld [vmem:[%s25061_s1 + $0x18f0] sm:$0xf0] }
 0x56c   :  { %v16347_v52 = vld [vmem:[%s25061_s1 + $0x1ad4] sm:$0xf]  ;;  %v13432_v9 = vor.u32 %v16283_v48, %v13429_v49  ;;  %7488 = vmatpush.bf16.msrb.mxu3 %v14232_v55 }
 0x56d   :  { %v13685_v54 = vld [vmem:[%s25061_s1 + $0x1af0] sm:$0xf0] }
 0x56e   :  { %v16411_v56 = vld [vmem:[%s25061_s1 + $0x1cd4] sm:$0xf]  ;;  %v13688_v61 = vor.u32 %v16347_v52, %v13685_v54  ;;  %7450 = vmatpush.bf16.msrb.mxu0 %v13432_v9  ;;  %v15552_v9 = vld [vmem:[%s25061_s1 + $0x1f4] sm:$0xf0] }
 0x56f   :  { %v13941_v2 = vld [vmem:[%s25061_s1 + $0x1cf0] sm:$0xf0] }
 0x570   :  { %v16475_v59 = vld [vmem:[%s25061_s1 + $0x1ed4] sm:$0xf]  ;;  %v13944_v62 = vor.u32 %v16411_v56, %v13941_v2  ;;  %7463 = vmatpush.bf16.msrb.mxu1 %v13688_v61  ;;  %v10747_v61 = vld [vmem:[%s25061_s1 + $0x3d8] sm:$0xf] }
 0x571   :  { %v14197_v0 = vld [vmem:[%s25061_s1 + $0x1ef0] sm:$0xf0] }
 0x572   :  { %v16275_v63 = vld [vmem:[%s25061_s1 + $0x1894] sm:$0xf]  ;;  %v14200_v4 = vor.u32 %v16475_v59, %v14197_v0  ;;  %7476 = vmatpush.bf16.msrb.mxu2 %v13944_v62  ;;  %v7223_v59 = vpop.f32.mrf.mxu2  ;;  %v10491_v0 = vld [vmem:[%s25061_s1 + $0x1d8] sm:$0xf]  ;;  %v7236_v62 = vpop.f32.mrf.mxu3 }
 0x573   :  { %v13397_v3 = vld [vmem:[%s25061_s1 + $0x18b0] sm:$0xf0]  ;;  %v10492_v11 = vor.u32 %v15552_v9, %v10491_v0  ;;  %v10651_v59 = vld [vmem:[%s25061_s1 + $0x318] sm:$0xf] }
 0x574   :  { %v16339_v1 = vld [vmem:[%s25061_s1 + $0x1a94] sm:$0xf]  ;;  %v13400_v14 = vor.u32 %v16275_v63, %v13397_v3  ;;  %7489 = vmatpush.bf16.msrb.mxu3 %v14200_v4  ;;  %v15616_v3 = vld [vmem:[%s25061_s1 + $0x3f4] sm:$0xf0] }
 0x575   :  { %v13653_v6 = vld [vmem:[%s25061_s1 + $0x1ab0] sm:$0xf0]  ;;  %v15680_v4 = vld [vmem:[%s25061_s1 + $0x5f4] sm:$0xf0] }
 0x576   :  { %v16403_v7 = vld [vmem:[%s25061_s1 + $0x1c94] sm:$0xf]  ;;  %v13656_v18 = vor.u32 %v16339_v1, %v13653_v6  ;;  %7451 = vmatpush.bf16.msrb.mxu0 %v13400_v14  ;;  %v11003_v1 = vld [vmem:[%s25061_s1 + $0x5d8] sm:$0xf] }
 0x577   :  { %v13909_v8 = vld [vmem:[%s25061_s1 + $0x1cb0] sm:$0xf0]  ;;  %v15544_v14 = vld [vmem:[%s25061_s1 + $0x1b4] sm:$0xf0] }
 0x578   :  { %v16467_v12 = vld [vmem:[%s25061_s1 + $0x1e94] sm:$0xf]  ;;  %v13912_v22 = vor.u32 %v16403_v7, %v13909_v8  ;;  %7464 = vmatpush.bf16.msrb.mxu1 %v13656_v18  ;;  %v11259_v7 = vld [vmem:[%s25061_s1 + $0x7d8] sm:$0xf] }
 0x579   :  { %v14165_v13 = vld [vmem:[%s25061_s1 + $0x1eb0] sm:$0xf0]  ;;  %v15744_v8 = vld [vmem:[%s25061_s1 + $0x7f4] sm:$0xf0] }
 0x57a   :  { %v16267_v33 = vld [vmem:[%s25061_s1 + $0x1854] sm:$0xf]  ;;  %v14168_v32 = vor.u32 %v16467_v12, %v14165_v13  ;;  %7477 = vmatpush.bf16.msrb.mxu2 %v13912_v22  ;;  %v10748_v12 = vor.u32 %v15616_v3, %v10747_v61  ;;  %v11004_v13 = vor.u32 %v15680_v4, %v11003_v1  ;;  %v11260_v18 = vor.u32 %v15744_v8, %v11259_v7  ;;  %v15608_v22 = vld [vmem:[%s25061_s1 + $0x3b4] sm:$0xf0] }
 0x57b   :  { %v13365_v25 = vld [vmem:[%s25061_s1 + $0x1870] sm:$0xf0]  ;;  %v15592_v9 = vld [vmem:[%s25061_s1 + $0x334] sm:$0xf0] }
 0x57c   :  { %v16331_v31 = vld [vmem:[%s25061_s1 + $0x1a54] sm:$0xf]  ;;  %v13368_v46 = vor.u32 %v16267_v33, %v13365_v25  ;;  %7490 = vmatpush.bf16.msrb.mxu3 %v14168_v32  ;;  %v10971_v33 = vld [vmem:[%s25061_s1 + $0x598] sm:$0xf]  ;;  %v10652_v7 = vor.u32 %v15592_v9, %v10651_v59 }
 0x57d   :  { %v13621_v37 = vld [vmem:[%s25061_s1 + $0x1a70] sm:$0xf0]  ;;  %v15672_v25 = vld [vmem:[%s25061_s1 + $0x5b4] sm:$0xf0] }
 0x57e   :  { %v16395_v38 = vld [vmem:[%s25061_s1 + $0x1c54] sm:$0xf]  ;;  %v13624_v51 = vor.u32 %v16331_v31, %v13621_v37  ;;  %7452 = vmatpush.bf16.msrb.mxu0 %v13368_v46  ;;  %v11227_v31 = vld [vmem:[%s25061_s1 + $0x798] sm:$0xf]  ;;  %v10460_v37 = vor.u32 %v15544_v14, %v10459_v29 }
 0x57f   :  { %v13877_v41 = vld [vmem:[%s25061_s1 + $0x1c70] sm:$0xf0]  ;;  %v15736_v32 = vld [vmem:[%s25061_s1 + $0x7b4] sm:$0xf0] }
 0x580   :  { %v16459_v45 = vld [vmem:[%s25061_s1 + $0x1e54] sm:$0xf]  ;;  %v13880_v48 = vor.u32 %v16395_v38, %v13877_v41  ;;  %7465 = vmatpush.bf16.msrb.mxu1 %v13624_v51  ;;  %v10716_v38 = vor.u32 %v15608_v22, %v10715_v16  ;;  %v10972_v41 = vor.u32 %v15672_v25, %v10971_v33  ;;  %v10683_v46 = vld [vmem:[%s25061_s1 + $0x358] sm:$0xf] }
 0x581   :  { %v14133_v47 = vld [vmem:[%s25061_s1 + $0x1e70] sm:$0xf0]  ;;  %v10939_v51 = vld [vmem:[%s25061_s1 + $0x558] sm:$0xf] }
 0x582   :  { %v16259_v58 = vld [vmem:[%s25061_s1 + $0x1814] sm:$0xf]  ;;  %v14136_v53 = vor.u32 %v16459_v45, %v14133_v47  ;;  %7478 = vmatpush.bf16.msrb.mxu2 %v13880_v48  ;;  %v10427_v45 = vld [vmem:[%s25061_s1 + $0x158] sm:$0xf] }
 0x583   :  { %v13333_v57 = vld [vmem:[%s25061_s1 + $0x1830] sm:$0xf0]  ;;  %v15536_v47 = vld [vmem:[%s25061_s1 + $0x174] sm:$0xf0] }
 0x584   :  { %v16323_v49 = vld [vmem:[%s25061_s1 + $0x1a14] sm:$0xf]  ;;  %v13336_v63 = vor.u32 %v16259_v58, %v13333_v57  ;;  %7491 = vmatpush.bf16.msrb.mxu3 %v14136_v53  ;;  %v11228_v58 = vor.u32 %v15736_v32, %v11227_v31  ;;  %v15600_v57 = vld [vmem:[%s25061_s1 + $0x374] sm:$0xf0] }
 0x585   :  { %v13589_v52 = vld [vmem:[%s25061_s1 + $0x1a30] sm:$0xf0]  ;;  %v15664_v48 = vld [vmem:[%s25061_s1 + $0x574] sm:$0xf0]  ;;  %v10684_v53 = vor.u32 %v15600_v57, %v10683_v46 }
 0x586   :  { %v16387_v55 = vld [vmem:[%s25061_s1 + $0x1c14] sm:$0xf]  ;;  %v13592_v5 = vor.u32 %v16323_v49, %v13589_v52  ;;  %7453 = vmatpush.bf16.msrb.mxu0 %v13336_v63  ;;  %v11195_v49 = vld [vmem:[%s25061_s1 + $0x758] sm:$0xf]  ;;  %v7247_v63 = vpop.f32.mrf.mxu0 }
 0x587   :  { %v13845_v54 = vld [vmem:[%s25061_s1 + $0x1c30] sm:$0xf0]  ;;  %v15728_v52 = vld [vmem:[%s25061_s1 + $0x774] sm:$0xf0]  ;;  %v7248_v4 = vadd.f32 %v7247_v63, %v21640_v17 }
 0x588   :  { %v16451_v56 = vld [vmem:[%s25061_s1 + $0x1e14] sm:$0xf]  ;;  %v13848_v6 = vor.u32 %v16387_v55, %v13845_v54  ;;  %7466 = vmatpush.bf16.msrb.mxu1 %v13592_v5  ;;  %v10428_v55 = vor.u32 %v15536_v47, %v10427_v45  ;;  %v10940_v54 = vor.u32 %v15664_v48, %v10939_v51  ;;  %v11196_v0 = vor.u32 %v15728_v52, %v11195_v49  ;;  %v10907_v61 = vld [vmem:[%s25061_s1 + $0x518] sm:$0xf]  ;;  %v7273_v45 = vpop.f32.mrf.mxu2  ;;  %v7286_v51 = vpop.f32.mrf.mxu3 }
 0x589   :  { %v14101_v2 = vld [vmem:[%s25061_s1 + $0x1e30] sm:$0xf0]  ;;  %7454 = vmatmul.bf16.vlgmr.msrb.gmra.mxu0 %v17731_v15  ;;  %v15656_v62 = vld [vmem:[%s25061_s1 + $0x534] sm:$0xf0] }
 0x58a   :  { %v14104_v28 = vor.u32 %v16451_v56, %v14101_v2  ;;  %7479 = vmatpush.bf16.msrb.mxu2 %v13848_v6  ;;  %7498 = vmatpush.bf16.msra.mxu0 %v10492_v11  ;;  %v10395_v56 = vld [vmem:[%s25061_s1 + $0x118] sm:$0xf]  ;;  %v7260_v6 = vpop.f32.mrf.mxu1  ;;  %v10908_v8 = vor.u32 %v15656_v62, %v10907_v61 }
 0x58b   :  { %7467 = vmatmul.bf16.vlgmr.msrb.gmra.mxu1 %v17744_v21  ;;  %v15528_v2 = vld [vmem:[%s25061_s1 + $0x134] sm:$0xf0] }
 0x58c   :  { %7492 = vmatpush.bf16.msrb.mxu3 %v14104_v28  ;;  %7511 = vmatpush.bf16.msra.mxu1 %v10748_v12  ;;  %v11163_v3 = vld [vmem:[%s25061_s1 + $0x718] sm:$0xf]  ;;  %v10396_v5 = vor.u32 %v15528_v2, %v10395_v56 }
 0x58d   :  { %7480 = vmatmul.bf16.vlgmr.msrb.gmra.mxu2 %v17742_v20  ;;  %v15720_v1 = vld [vmem:[%s25061_s1 + $0x734] sm:$0xf0] }
 0x58e   :  { %7524 = vmatpush.bf16.msra.mxu2 %v11004_v13  ;;  %7499 = vmatpush.bf16.msra.mxu0 %v10460_v37  ;;  %v10363_v28 = vld [vmem:[%s25061_s1 + $0xd8] sm:$0xf]  ;;  %v11164_v17 = vor.u32 %v15720_v1, %v11163_v3  ;;  %v7261_v13 = vadd.f32 %v7260_v6, %v7248_v4  ;;  %v7249_v52 = vpop.f32.mrf.mxu0 }
 0x58f   :  { %7493 = vmatmul.bf16.vlgmr.msrb.gmra.mxu3 %v17752_v26  ;;  %v15520_v11 = vld [vmem:[%s25061_s1 + $0xf4] sm:$0xf0] }
 0x590   :  { %7537 = vmatpush.bf16.msra.mxu3 %v11260_v18  ;;  %7512 = vmatpush.bf16.msra.mxu1 %v10716_v38  ;;  %v10619_v12 = vld [vmem:[%s25061_s1 + $0x2d8] sm:$0xf]  ;;  %v10364_v33 = vor.u32 %v15520_v11, %v10363_v28  ;;  %v7274_v57 = vadd.f32 %v7273_v45, %v7261_v13 }
 0x591   :  { %v15584_v29 = vld [vmem:[%s25061_s1 + $0x2f4] sm:$0xf0] }
 0x592   :  { %7525 = vmatpush.bf16.msra.mxu2 %v10972_v41  ;;  %7500 = vmatpush.bf16.msra.mxu0 %v10428_v55  ;;  %v10875_v14 = vld [vmem:[%s25061_s1 + $0x4d8] sm:$0xf]  ;;  %v10620_v25 = vor.u32 %v15584_v29, %v10619_v12 }
 0x593   :  { %v15648_v16 = vld [vmem:[%s25061_s1 + $0x4f4] sm:$0xf0] }
 0x594   :  { %7538 = vmatpush.bf16.msra.mxu3 %v11228_v58  ;;  %7513 = vmatpush.bf16.msra.mxu1 %v10684_v53  ;;  %v11131_v18 = vld [vmem:[%s25061_s1 + $0x6d8] sm:$0xf]  ;;  %v10876_v31 = vor.u32 %v15648_v16, %v10875_v14  ;;  %v7262_v53 = vpop.f32.mrf.mxu1 }
 0x595   :  { %v15712_v22 = vld [vmem:[%s25061_s1 + $0x6f4] sm:$0xf0] }
 0x596   :  { %7526 = vmatpush.bf16.msra.mxu2 %v10940_v54  ;;  %7501 = vmatpush.bf16.msra.mxu0 %v10396_v5  ;;  %v10331_v32 = vld [vmem:[%s25061_s1 + $0x98] sm:$0xf]  ;;  %v11132_v41 = vor.u32 %v15712_v22, %v11131_v18  ;;  %v21839_v54 = vadd.f32 %v7286_v51, %v7274_v57  ;;  %v7275_v18 = vpop.f32.mrf.mxu2 }
 0x597   :  { %v15512_v37 = vld [vmem:[%s25061_s1 + $0xb4] sm:$0xf0] }
 0x598   :  { %7539 = vmatpush.bf16.msra.mxu3 %v11196_v0  ;;  %7514 = vmatpush.bf16.msra.mxu1 %v10652_v7  ;;  %v10587_v38 = vld [vmem:[%s25061_s1 + $0x298] sm:$0xf]  ;;  %v10332_v55 = vor.u32 %v15512_v37, %v10331_v32 }
 0x599   :  { %v15576_v47 = vld [vmem:[%s25061_s1 + $0x2b4] sm:$0xf0] }
 0x59a   :  { %7527 = vmatpush.bf16.msra.mxu2 %v10908_v8  ;;  %v10843_v46 = vld [vmem:[%s25061_s1 + $0x498] sm:$0xf]  ;;  %7502 = vmatpush.bf16.msra.mxu0 %v10364_v33  ;;  %v10588_v56 = vor.u32 %v15576_v47, %v10587_v38 }
 0x59b   :  { %v15640_v58 = vld [vmem:[%s25061_s1 + $0x4b4] sm:$0xf0] }
 0x59c   :  { %7540 = vmatpush.bf16.msra.mxu3 %v11164_v17  ;;  %v11099_v48 = vld [vmem:[%s25061_s1 + $0x698] sm:$0xf]  ;;  %7515 = vmatpush.bf16.msra.mxu1 %v10620_v25  ;;  %v10844_v2 = vor.u32 %v15640_v58, %v10843_v46 }
 0x59d   :  { %v15704_v49 = vld [vmem:[%s25061_s1 + $0x6b4] sm:$0xf0] }
 0x59e   :  { %7528 = vmatpush.bf16.msra.mxu2 %v10876_v31  ;;  %v10299_v59 = vld [vmem:[%s25061_s1 + $0x58] sm:$0xf]  ;;  %v11100_v61 = vor.u32 %v15704_v49, %v11099_v48  ;;  %7503 = vmatpush.bf16.msra.mxu0 %v10332_v55  ;;  %v7288_v31 = vpop.f32.mrf.mxu3 }
 0x59f   :  { %v15504_v0 = vld [vmem:[%s25061_s1 + $0x74] sm:$0xf0] }
 0x5a0   :  { %v10555_v9 = vld [vmem:[%s25061_s1 + $0x258] sm:$0xf]  ;;  %7541 = vmatpush.bf16.msra.mxu3 %v11132_v41  ;;  %v10300_v5 = vor.u32 %v15504_v0, %v10299_v59  ;;  %7516 = vmatpush.bf16.msra.mxu1 %v10588_v56 }
 0x5a1   :  { %v15568_v62 = vld [vmem:[%s25061_s1 + $0x274] sm:$0xf0] }
 0x5a2   :  { %v10811_v63 = vld [vmem:[%s25061_s1 + $0x458] sm:$0xf]  ;;  %7529 = vmatpush.bf16.msra.mxu2 %v10844_v2  ;;  %v10556_v8 = vor.u32 %v15568_v62, %v10555_v9  ;;  %7504 = vmatpush.bf16.msra.mxu0 %v10300_v5 }
 0x5a3   :  { %v15632_v3 = vld [vmem:[%s25061_s1 + $0x474] sm:$0xf0] }
 0x5a4   :  { %v11067_v1 = vld [vmem:[%s25061_s1 + $0x658] sm:$0xf]  ;;  %v10812_v28 = vor.u32 %v15632_v3, %v10811_v63  ;;  %7542 = vmatpush.bf16.msra.mxu3 %v11100_v61  ;;  %7517 = vmatpush.bf16.msra.mxu1 %v10556_v8 }
 0x5a5   :  { %v15696_v4 = vld [vmem:[%s25061_s1 + $0x674] sm:$0xf0] }
 0x5a6   :  { %v10267_v6 = vld [vmem:[%s25061_s1 + $0x18] sm:$0xf]  ;;  %v11068_v13 = vor.u32 %v15696_v4, %v11067_v1  ;;  %7530 = vmatpush.bf16.msra.mxu2 %v10812_v28 }
 0x5a7   :  { %v15496_v7 = vld [vmem:[%s25061_s1 + $0x34] sm:$0xf0] }
 0x5a8   :  { %v10523_v11 = vld [vmem:[%s25061_s1 + $0x218] sm:$0xf]  ;;  %v10268_v32 = vor.u32 %v15496_v7, %v10267_v6  ;;  %7543 = vmatpush.bf16.msra.mxu3 %v11068_v13 }
 0x5a9   :  { %v15560_v12 = vld [vmem:[%s25061_s1 + $0x234] sm:$0xf0] }
 0x5aa   :  { %v10779_v17 = vld [vmem:[%s25061_s1 + $0x418] sm:$0xf]  ;;  %v10524_v45 = vor.u32 %v15560_v12, %v10523_v11  ;;  %7505 = vmatpush.bf16.msra.mxu0 %v10268_v32 }
 0x5ab   :  { %v15624_v29 = vld [vmem:[%s25061_s1 + $0x434] sm:$0xf0] }
 0x5ac   :  { %v11035_v14 = vld [vmem:[%s25061_s1 + $0x618] sm:$0xf]  ;;  %v10780_v47 = vor.u32 %v15624_v29, %v10779_v17  ;;  %7518 = vmatpush.bf16.msra.mxu1 %v10524_v45 }
 0x5ad   :  { %v15688_v16 = vld [vmem:[%s25061_s1 + $0x634] sm:$0xf0]  ;;  %7506 = vmatmul.bf16.vlgmr.msra.gmra.mxu0 %v17214_v36 }
 0x5ae   :  { %v11515_v22 = vld [vmem:[%s25061_s1 + $0x9d8] sm:$0xf]  ;;  %v11036_v57 = vor.u32 %v15688_v16, %v11035_v14  ;;  %7531 = vmatpush.bf16.msra.mxu2 %v10780_v47  ;;  %v7299_v47 = vpop.f32.mrf.mxu0 }
 0x5af   :  { %v15808_v33 = vld [vmem:[%s25061_s1 + $0x9f4] sm:$0xf0]  ;;  %7519 = vmatmul.bf16.vlgmr.msra.gmra.mxu1 %v17224_v43 }
 0x5b0   :  { %v11771_v25 = vld [vmem:[%s25061_s1 + $0xbd8] sm:$0xf]  ;;  %v11516_v51 = vor.u32 %v15808_v33, %v11515_v22  ;;  %7544 = vmatpush.bf16.msra.mxu3 %v11036_v57  ;;  %v16811_v22 = vld [vmem:[%s25062_s2] sm:$0xff] }
 0x5b1   :  { %v15872_v37 = vld [vmem:[%s25061_s1 + $0xbf4] sm:$0xf0]  ;;  %7532 = vmatmul.bf16.vlgmr.msra.gmra.mxu2 %v17212_v35  ;;  %v1119_v33 = vperm.slane %v16811_v22, 5 }
 0x5b2   :  { %v12027_v38 = vld [vmem:[%s25061_s1 + $0xdd8] sm:$0xf]  ;;  %v11772_v48 = vor.u32 %v15872_v37, %v11771_v25  ;;  %7550 = vmatpush.bf16.msrb.mxu0 %v11516_v51 }
 0x5b3   :  { %v15936_v41 = vld [vmem:[%s25061_s1 + $0xdf4] sm:$0xf0]  ;;  %7545 = vmatmul.bf16.vlgmr.msra.gmra.mxu3 %v17222_v42 }
 0x5b4   :  { %v12283_v46 = vld [vmem:[%s25061_s1 + $0xfd8] sm:$0xf]  ;;  %v12028_v49 = vor.u32 %v15936_v41, %v12027_v38  ;;  %7563 = vmatpush.bf16.msrb.mxu1 %v11772_v48 }
 0x5b5   :  { %v16000_v58 = vld [vmem:[%s25061_s1 + $0xff4] sm:$0xf0] }
 0x5b6   :  { %v11483_v52 = vld [vmem:[%s25061_s1 + $0x998] sm:$0xf]  ;;  %v12284_v56 = vor.u32 %v16000_v58, %v12283_v46  ;;  %7576 = vmatpush.bf16.msrb.mxu2 %v12028_v49  ;;  %v7300_v49 = vadd.f32 %v7299_v47, %v1119_v33 }
 0x5b7   :  { %v15800_v55 = vld [vmem:[%s25061_s1 + $0x9b4] sm:$0xf0] }
 0x5b8   :  { %v11739_v53 = vld [vmem:[%s25061_s1 + $0xb98] sm:$0xf]  ;;  %v11484_v62 = vor.u32 %v15800_v55, %v11483_v52  ;;  %7589 = vmatpush.bf16.msrb.mxu3 %v12284_v56  ;;  %v7312_v52 = vpop.f32.mrf.mxu1 }
 0x5b9   :  { %v15864_v2 = vld [vmem:[%s25061_s1 + $0xbb4] sm:$0xf0] }
 0x5ba   :  { %v11995_v59 = vld [vmem:[%s25061_s1 + $0xd98] sm:$0xf]  ;;  %v11740_v63 = vor.u32 %v15864_v2, %v11739_v53  ;;  %7551 = vmatpush.bf16.msrb.mxu0 %v11484_v62 }
 0x5bb   :  { %v15928_v0 = vld [vmem:[%s25061_s1 + $0xdb4] sm:$0xf0] }
 0x5bc   :  { %v12251_v9 = vld [vmem:[%s25061_s1 + $0xf98] sm:$0xf]  ;;  %v11996_v3 = vor.u32 %v15928_v0, %v11995_v59  ;;  %7564 = vmatpush.bf16.msrb.mxu1 %v11740_v63 }
 0x5bd   :  { %v15992_v61 = vld [vmem:[%s25061_s1 + $0xfb4] sm:$0xf0] }
 0x5be   :  { %v11451_v1 = vld [vmem:[%s25061_s1 + $0x958] sm:$0xf]  ;;  %v12252_v6 = vor.u32 %v15992_v61, %v12251_v9  ;;  %7577 = vmatpush.bf16.msrb.mxu2 %v11996_v3  ;;  %v7313_v9 = vadd.f32 %v7312_v52, %v7300_v49 }
 0x5bf   :  { %v15792_v4 = vld [vmem:[%s25061_s1 + $0x974] sm:$0xf0] }
 0x5c0   :  { %v11707_v5 = vld [vmem:[%s25061_s1 + $0xb58] sm:$0xf]  ;;  %v11452_v17 = vor.u32 %v15792_v4, %v11451_v1  ;;  %7590 = vmatpush.bf16.msrb.mxu3 %v12252_v6 }
 0x5c1   :  { %v15856_v7 = vld [vmem:[%s25061_s1 + $0xb74] sm:$0xf0] }
 0x5c2   :  { %v11963_v8 = vld [vmem:[%s25061_s1 + $0xd58] sm:$0xf]  ;;  %v11708_v29 = vor.u32 %v15856_v7, %v11707_v5  ;;  %7552 = vmatpush.bf16.msrb.mxu0 %v11452_v17  ;;  %v7325_v5 = vpop.f32.mrf.mxu2 }
 0x5c3   :  { %v15920_v28 = vld [vmem:[%s25061_s1 + $0xd74] sm:$0xf0] }
 0x5c4   :  { %v12219_v11 = vld [vmem:[%s25061_s1 + $0xf58] sm:$0xf]  ;;  %v11964_v14 = vor.u32 %v15920_v28, %v11963_v8  ;;  %7565 = vmatpush.bf16.msrb.mxu1 %v11708_v29 }
 0x5c5   :  { %v15984_v12 = vld [vmem:[%s25061_s1 + $0xf74] sm:$0xf0] }
 0x5c6   :  { %v11419_v13 = vld [vmem:[%s25061_s1 + $0x918] sm:$0xf]  ;;  %v12220_v25 = vor.u32 %v15984_v12, %v12219_v11  ;;  %7578 = vmatpush.bf16.msrb.mxu2 %v11964_v14  ;;  %v7326_v11 = vadd.f32 %v7325_v5, %v7313_v9  ;;  %v7338_v12 = vpop.f32.mrf.mxu3 }
 0x5c7   :  { %v15784_v16 = vld [vmem:[%s25061_s1 + $0x934] sm:$0xf0] }
 0x5c8   :  { %v11675_v18 = vld [vmem:[%s25061_s1 + $0xb18] sm:$0xf]  ;;  %v11420_v45 = vor.u32 %v15784_v16, %v11419_v13  ;;  %7591 = vmatpush.bf16.msrb.mxu3 %v12220_v25  ;;  %v22040_v14 = vadd.f32 %v7338_v12, %v7326_v11  ;;  %v7301_v16 = vpop.f32.mrf.mxu0 }
 0x5c9   :  { %v15848_v31 = vld [vmem:[%s25061_s1 + $0xb34] sm:$0xf0] }
 0x5ca   :  { %v11931_v32 = vld [vmem:[%s25061_s1 + $0xd18] sm:$0xf]  ;;  %v11676_v46 = vor.u32 %v15848_v31, %v11675_v18  ;;  %7553 = vmatpush.bf16.msrb.mxu0 %v11420_v45 }
 0x5cb   :  { %v15912_v37 = vld [vmem:[%s25061_s1 + $0xd34] sm:$0xf0] }
 0x5cc   :  { %v12187_v38 = vld [vmem:[%s25061_s1 + $0xf18] sm:$0xf]  ;;  %v11932_v58 = vor.u32 %v15912_v37, %v11931_v32  ;;  %7566 = vmatpush.bf16.msrb.mxu1 %v11676_v46  ;;  %v7314_v32 = vpop.f32.mrf.mxu1 }
 0x5cd   :  { %v15976_v41 = vld [vmem:[%s25061_s1 + $0xf34] sm:$0xf0] }
 0x5ce   :  { %v11387_v57 = vld [vmem:[%s25061_s1 + $0x8d8] sm:$0xf]  ;;  %v12188_v55 = vor.u32 %v15976_v41, %v12187_v38  ;;  %7579 = vmatpush.bf16.msrb.mxu2 %v11932_v58 }
 0x5cf   :  { %v15776_v51 = vld [vmem:[%s25061_s1 + $0x8f4] sm:$0xf0] }
 0x5d0   :  { %v11643_v48 = vld [vmem:[%s25061_s1 + $0xad8] sm:$0xf]  ;;  %v11388_v61 = vor.u32 %v15776_v51, %v11387_v57  ;;  %7592 = vmatpush.bf16.msrb.mxu3 %v12188_v55 }
 0x5d1   :  { %v15840_v53 = vld [vmem:[%s25061_s1 + $0xaf4] sm:$0xf0] }
 0x5d2   :  { %v11899_v56 = vld [vmem:[%s25061_s1 + $0xcd8] sm:$0xf]  ;;  %v11644_v62 = vor.u32 %v15840_v53, %v11643_v48  ;;  %7554 = vmatpush.bf16.msrb.mxu0 %v11388_v61  ;;  %v7340_v61 = vpop.f32.mrf.mxu3 }
 0x5d3   :  { %v15904_v2 = vld [vmem:[%s25061_s1 + $0xcf4] sm:$0xf0] }
 0x5d4   :  { %v12155_v59 = vld [vmem:[%s25061_s1 + $0xed8] sm:$0xf]  ;;  %v11900_v63 = vor.u32 %v15904_v2, %v11899_v56  ;;  %7567 = vmatpush.bf16.msrb.mxu1 %v11644_v62  ;;  %v7327_v56 = vpop.f32.mrf.mxu2 }
 0x5d5   :  { %v15968_v0 = vld [vmem:[%s25061_s1 + $0xef4] sm:$0xf0] }
 0x5d6   :  { %v11355_v3 = vld [vmem:[%s25061_s1 + $0x898] sm:$0xf]  ;;  %v12156_v6 = vor.u32 %v15968_v0, %v12155_v59  ;;  %7580 = vmatpush.bf16.msrb.mxu2 %v11900_v63 }
 0x5d7   :  { %v15768_v1 = vld [vmem:[%s25061_s1 + $0x8b4] sm:$0xf0] }
 0x5d8   :  { %v11611_v4 = vld [vmem:[%s25061_s1 + $0xa98] sm:$0xf]  ;;  %v11356_v29 = vor.u32 %v15768_v1, %v11355_v3  ;;  %7593 = vmatpush.bf16.msrb.mxu3 %v12156_v6 }
 0x5d9   :  { %v15832_v7 = vld [vmem:[%s25061_s1 + $0xab4] sm:$0xf0] }
 0x5da   :  { %v11867_v8 = vld [vmem:[%s25061_s1 + $0xc98] sm:$0xf]  ;;  %v11612_v18 = vor.u32 %v15832_v7, %v11611_v4  ;;  %7555 = vmatpush.bf16.msrb.mxu0 %v11356_v29 }
 0x5db   :  { %v15896_v28 = vld [vmem:[%s25061_s1 + $0xcb4] sm:$0xf0] }
 0x5dc   :  { %v12123_v17 = vld [vmem:[%s25061_s1 + $0xe98] sm:$0xf]  ;;  %v11868_v22 = vor.u32 %v15896_v28, %v11867_v8  ;;  %7568 = vmatpush.bf16.msrb.mxu1 %v11612_v18 }
 0x5dd   :  { %v15960_v13 = vld [vmem:[%s25061_s1 + $0xeb4] sm:$0xf0] }
 0x5de   :  { %v11323_v33 = vld [vmem:[%s25061_s1 + $0x858] sm:$0xf]  ;;  %v12124_v37 = vor.u32 %v15960_v13, %v12123_v17  ;;  %7581 = vmatpush.bf16.msrb.mxu2 %v11868_v22 }
 0x5df   :  { %v15760_v25 = vld [vmem:[%s25061_s1 + $0x874] sm:$0xf0] }
 0x5e0   :  { %v11579_v31 = vld [vmem:[%s25061_s1 + $0xa58] sm:$0xf]  ;;  %v11324_v58 = vor.u32 %v15760_v25, %v11323_v33  ;;  %7594 = vmatpush.bf16.msrb.mxu3 %v12124_v37 }
 0x5e1   :  { %v15824_v38 = vld [vmem:[%s25061_s1 + $0xa74] sm:$0xf0] }
 0x5e2   :  { %v11835_v41 = vld [vmem:[%s25061_s1 + $0xc58] sm:$0xf]  ;;  %v11580_v48 = vor.u32 %v15824_v38, %v11579_v31  ;;  %7556 = vmatpush.bf16.msrb.mxu0 %v11324_v58 }
 0x5e3   :  { %v15888_v45 = vld [vmem:[%s25061_s1 + $0xc74] sm:$0xf0] }
 0x5e4   :  { %v12091_v47 = vld [vmem:[%s25061_s1 + $0xe58] sm:$0xf]  ;;  %v11836_v49 = vor.u32 %v15888_v45, %v11835_v41  ;;  %7569 = vmatpush.bf16.msrb.mxu1 %v11580_v48 }
 0x5e5   :  { %v15952_v46 = vld [vmem:[%s25061_s1 + $0xe74] sm:$0xf0] }
 0x5e6   :  { %v11291_v57 = vld [vmem:[%s25061_s1 + $0x818] sm:$0xf]  ;;  %v12092_v2 = vor.u32 %v15952_v46, %v12091_v47  ;;  %7582 = vmatpush.bf16.msrb.mxu2 %v11836_v49 }
 0x5e7   :  { %v15752_v51 = vld [vmem:[%s25061_s1 + $0x834] sm:$0xf0] }
 0x5e8   :  { %v11547_v52 = vld [vmem:[%s25061_s1 + $0xa18] sm:$0xf]  ;;  %v11292_v1 = vor.u32 %v15752_v51, %v11291_v57  ;;  %7595 = vmatpush.bf16.msrb.mxu3 %v12092_v2 }
 0x5e9   :  { %v15816_v55 = vld [vmem:[%s25061_s1 + $0xa34] sm:$0xf0] }
 0x5ea   :  { %v11803_v53 = vld [vmem:[%s25061_s1 + $0xc18] sm:$0xf]  ;;  %v11548_v7 = vor.u32 %v15816_v55, %v11547_v52  ;;  %7557 = vmatpush.bf16.msrb.mxu0 %v11292_v1 }
 0x5eb   :  { %v15880_v59 = vld [vmem:[%s25061_s1 + $0xc34] sm:$0xf0] }
 0x5ec   :  { %v12059_v0 = vld [vmem:[%s25061_s1 + $0xe18] sm:$0xf]  ;;  %v11804_v8 = vor.u32 %v15880_v59, %v11803_v53  ;;  %7570 = vmatpush.bf16.msrb.mxu1 %v11548_v7  ;;  %v7351_v7 = vpop.f32.mrf.mxu0 }
 0x5ed   :  { %v15944_v9 = vld [vmem:[%s25061_s1 + $0xe34] sm:$0xf0]  ;;  %7558 = vmatmul.bf16.vlgmr.msrb.gmra.mxu0 %v17340_v39 }
 0x5ee   :  { %v12539_v62 = vld [vmem:[%s25061_s1 + $0x11d8] sm:$0xf]  ;;  %v12060_v12 = vor.u32 %v15944_v9, %v12059_v0  ;;  %7583 = vmatpush.bf16.msrb.mxu2 %v11804_v8 }
 0x5ef   :  { %v16064_v63 = vld [vmem:[%s25061_s1 + $0x11f4] sm:$0xf0]  ;;  %7571 = vmatmul.bf16.vlgmr.msrb.gmra.mxu1 %v17344_v44 }
 0x5f0   :  { %v12795_v3 = vld [vmem:[%s25061_s1 + $0x13d8] sm:$0xf]  ;;  %v12540_v17 = vor.u32 %v16064_v63, %v12539_v62  ;;  %7596 = vmatpush.bf16.msrb.mxu3 %v12060_v12 }
 0x5f1   :  { %v16128_v4 = vld [vmem:[%s25061_s1 + $0x13f4] sm:$0xf0]  ;;  %7584 = vmatmul.bf16.vlgmr.msrb.gmra.mxu2 %v17332_v34 }
 0x5f2   :  { %v13051_v5 = vld [vmem:[%s25061_s1 + $0x15d8] sm:$0xf]  ;;  %v12796_v13 = vor.u32 %v16128_v4, %v12795_v3  ;;  %7602 = vmatpush.bf16.msra.mxu0 %v12540_v17 }
 0x5f3   :  { %v16192_v6 = vld [vmem:[%s25061_s1 + $0x15f4] sm:$0xf0]  ;;  %7597 = vmatmul.bf16.vlgmr.msrb.gmra.mxu3 %v17342_v40 }
 0x5f4   :  { %v13307_v28 = vld [vmem:[%s25061_s1 + $0x17d8] sm:$0xf]  ;;  %v13052_v29 = vor.u32 %v16192_v6, %v13051_v5  ;;  %7615 = vmatpush.bf16.msra.mxu1 %v12796_v13  ;;  %v7352_v13 = vadd.f32 %v7351_v7, %v22040_v14 }
 0x5f5   :  { %v16256_v11 = vld [vmem:[%s25061_s1 + $0x17f4] sm:$0xf0] }
 0x5f6   :  { %v12507_v16 = vld [vmem:[%s25061_s1 + $0x1198] sm:$0xf]  ;;  %v13308_v33 = vor.u32 %v16256_v11, %v13307_v28  ;;  %7628 = vmatpush.bf16.msra.mxu2 %v13052_v29  ;;  %v7364_v29 = vpop.f32.mrf.mxu1 }
 0x5f7   :  { %v16056_v18 = vld [vmem:[%s25061_s1 + $0x11b4] sm:$0xf0] }
 0x5f8   :  { %v12763_v22 = vld [vmem:[%s25061_s1 + $0x1398] sm:$0xf]  ;;  %v12508_v41 = vor.u32 %v16056_v18, %v12507_v16  ;;  %7641 = vmatpush.bf16.msra.mxu3 %v13308_v33 }
 0x5f9   :  { %v16120_v25 = vld [vmem:[%s25061_s1 + $0x13b4] sm:$0xf0] }
 0x5fa   :  { %v13019_v31 = vld [vmem:[%s25061_s1 + $0x1598] sm:$0xf]  ;;  %v12764_v45 = vor.u32 %v16120_v25, %v12763_v22  ;;  %7603 = vmatpush.bf16.msra.mxu0 %v12508_v41 }
 0x5fb   :  { %v16184_v32 = vld [vmem:[%s25061_s1 + $0x15b4] sm:$0xf0] }
 0x5fc   :  { %v13275_v37 = vld [vmem:[%s25061_s1 + $0x1798] sm:$0xf]  ;;  %v13020_v47 = vor.u32 %v16184_v32, %v13019_v31  ;;  %7616 = vmatpush.bf16.msra.mxu1 %v12764_v45  ;;  %v7365_v31 = vadd.f32 %v7364_v29, %v7352_v13 }
 0x5fd   :  { %v16248_v38 = vld [vmem:[%s25061_s1 + $0x17b4] sm:$0xf0] }
 0x5fe   :  { %v12475_v46 = vld [vmem:[%s25061_s1 + $0x1158] sm:$0xf]  ;;  %v13276_v51 = vor.u32 %v16248_v38, %v13275_v37  ;;  %7629 = vmatpush.bf16.msra.mxu2 %v13020_v47 }
 0x5ff   :  { %v16048_v58 = vld [vmem:[%s25061_s1 + $0x1174] sm:$0xf0] }
 0x600   :  { %v12731_v57 = vld [vmem:[%s25061_s1 + $0x1358] sm:$0xf]  ;;  %v12476_v56 = vor.u32 %v16048_v58, %v12475_v46  ;;  %7642 = vmatpush.bf16.msra.mxu3 %v13276_v51  ;;  %v7377_v46 = vpop.f32.mrf.mxu2 }
 0x601   :  { %v16112_v48 = vld [vmem:[%s25061_s1 + $0x1374] sm:$0xf0] }
 0x602   :  { %v12987_v49 = vld [vmem:[%s25061_s1 + $0x1558] sm:$0xf]  ;;  %v12732_v2 = vor.u32 %v16112_v48, %v12731_v57  ;;  %7604 = vmatpush.bf16.msra.mxu0 %v12476_v56 }
 0x603   :  { %v16176_v52 = vld [vmem:[%s25061_s1 + $0x1574] sm:$0xf0] }
 0x604   :  { %v13243_v55 = vld [vmem:[%s25061_s1 + $0x1758] sm:$0xf]  ;;  %v12988_v59 = vor.u32 %v16176_v52, %v12987_v49  ;;  %7617 = vmatpush.bf16.msra.mxu1 %v12732_v2  ;;  %v7378_v49 = vadd.f32 %v7377_v46, %v7365_v31  ;;  %v7390_v52 = vpop.f32.mrf.mxu3 }
 0x605   :  { %v16240_v53 = vld [vmem:[%s25061_s1 + $0x1774] sm:$0xf0] }
 0x606   :  { %v12443_v0 = vld [vmem:[%s25061_s1 + $0x1118] sm:$0xf]  ;;  %v13244_v62 = vor.u32 %v16240_v53, %v13243_v55  ;;  %7630 = vmatpush.bf16.msra.mxu2 %v12988_v59  ;;  %v22239_v2 = vadd.f32 %v7390_v52, %v7378_v49  ;;  %v7353_v59 = vpop.f32.mrf.mxu0 }
 0x607   :  { %v16040_v9 = vld [vmem:[%s25061_s1 + $0x1134] sm:$0xf0] }
 0x608   :  { %v12699_v61 = vld [vmem:[%s25061_s1 + $0x1318] sm:$0xf]  ;;  %v12444_v6 = vor.u32 %v16040_v9, %v12443_v0  ;;  %7643 = vmatpush.bf16.msra.mxu3 %v13244_v62 }
 0x609   :  { %v16104_v63 = vld [vmem:[%s25061_s1 + $0x1334] sm:$0xf0] }
 0x60a   :  { %v12955_v3 = vld [vmem:[%s25061_s1 + $0x1518] sm:$0xf]  ;;  %v12700_v8 = vor.u32 %v16104_v63, %v12699_v61  ;;  %7605 = vmatpush.bf16.msra.mxu0 %v12444_v6 }
 0x60b   :  { %v16168_v1 = vld [vmem:[%s25061_s1 + $0x1534] sm:$0xf0] }
 0x60c   :  { %v13211_v4 = vld [vmem:[%s25061_s1 + $0x1718] sm:$0xf]  ;;  %v12956_v28 = vor.u32 %v16168_v1, %v12955_v3  ;;  %7618 = vmatpush.bf16.msra.mxu1 %v12700_v8  ;;  %v7366_v3 = vpop.f32.mrf.mxu1 }
 0x60d   :  { %v16232_v5 = vld [vmem:[%s25061_s1 + $0x1734] sm:$0xf0] }
 0x60e   :  { %v12411_v11 = vld [vmem:[%s25061_s1 + $0x10d8] sm:$0xf]  ;;  %v13212_v16 = vor.u32 %v16232_v5, %v13211_v4  ;;  %7631 = vmatpush.bf16.msra.mxu2 %v12956_v28 }
 0x60f   :  { %v16032_v12 = vld [vmem:[%s25061_s1 + $0x10f4] sm:$0xf0] }
 0x610   :  { %v12667_v17 = vld [vmem:[%s25061_s1 + $0x12d8] sm:$0xf]  ;;  %v12412_v32 = vor.u32 %v16032_v12, %v12411_v11  ;;  %7644 = vmatpush.bf16.msra.mxu3 %v13212_v16 }
 0x611   :  { %v16096_v18 = vld [vmem:[%s25061_s1 + $0x12f4] sm:$0xf0] }
 0x612   :  { %v12923_v22 = vld [vmem:[%s25061_s1 + $0x14d8] sm:$0xf]  ;;  %v12668_v37 = vor.u32 %v16096_v18, %v12667_v17  ;;  %7606 = vmatpush.bf16.msra.mxu0 %v12412_v32  ;;  %v7392_v32 = vpop.f32.mrf.mxu3 }
 0x613   :  { %v16160_v33 = vld [vmem:[%s25061_s1 + $0x14f4] sm:$0xf0] }
 0x614   :  { %v13179_v25 = vld [vmem:[%s25061_s1 + $0x16d8] sm:$0xf]  ;;  %v12924_v38 = vor.u32 %v16160_v33, %v12923_v22  ;;  %7619 = vmatpush.bf16.msra.mxu1 %v12668_v37  ;;  %v7379_v22 = vpop.f32.mrf.mxu2 }
 0x615   :  { %v16224_v14 = vld [vmem:[%s25061_s1 + $0x16f4] sm:$0xf0] }
 0x616   :  { %v12379_v41 = vld [vmem:[%s25061_s1 + $0x1098] sm:$0xf]  ;;  %v13180_v58 = vor.u32 %v16224_v14, %v13179_v25  ;;  %7632 = vmatpush.bf16.msra.mxu2 %v12924_v38 }
 0x617   :  { %v16024_v45 = vld [vmem:[%s25061_s1 + $0x10b4] sm:$0xf0] }
 0x618   :  { %v12635_v47 = vld [vmem:[%s25061_s1 + $0x1298] sm:$0xf]  ;;  %v12380_v56 = vor.u32 %v16024_v45, %v12379_v41  ;;  %7645 = vmatpush.bf16.msra.mxu3 %v13180_v58 }
 0x619   :  { %v16088_v57 = vld [vmem:[%s25061_s1 + $0x12b4] sm:$0xf0] }
 0x61a   :  { %v12891_v51 = vld [vmem:[%s25061_s1 + $0x1498] sm:$0xf]  ;;  %v12636_v0 = vor.u32 %v16088_v57, %v12635_v47  ;;  %7607 = vmatpush.bf16.msra.mxu0 %v12380_v56 }
 0x61b   :  { %v16152_v48 = vld [vmem:[%s25061_s1 + $0x14b4] sm:$0xf0] }
 0x61c   :  { %v13147_v55 = vld [vmem:[%s25061_s1 + $0x1698] sm:$0xf]  ;;  %v12892_v9 = vor.u32 %v16152_v48, %v12891_v51  ;;  %7620 = vmatpush.bf16.msra.mxu1 %v12636_v0 }
 0x61d   :  { %v16216_v53 = vld [vmem:[%s25061_s1 + $0x16b4] sm:$0xf0] }
 0x61e   :  { %v12347_v61 = vld [vmem:[%s25061_s1 + $0x1058] sm:$0xf]  ;;  %v13148_v1 = vor.u32 %v16216_v53, %v13147_v55  ;;  %7633 = vmatpush.bf16.msra.mxu2 %v12892_v9 }
 0x61f   :  { %v16016_v62 = vld [vmem:[%s25061_s1 + $0x1074] sm:$0xf0] }
 0x620   :  { %v12603_v63 = vld [vmem:[%s25061_s1 + $0x1258] sm:$0xf]  ;;  %v12348_v28 = vor.u32 %v16016_v62, %v12347_v61  ;;  %7646 = vmatpush.bf16.msra.mxu3 %v13148_v1 }
 0x621   :  { %v16080_v4 = vld [vmem:[%s25061_s1 + $0x1274] sm:$0xf0] }
 0x622   :  { %v12859_v5 = vld [vmem:[%s25061_s1 + $0x1458] sm:$0xf]  ;;  %v12604_v17 = vor.u32 %v16080_v4, %v12603_v63  ;;  %7608 = vmatpush.bf16.msra.mxu0 %v12348_v28 }
 0x623   :  { %v16144_v6 = vld [vmem:[%s25061_s1 + $0x1474] sm:$0xf0] }
 0x624   :  { %v13115_v7 = vld [vmem:[%s25061_s1 + $0x1658] sm:$0xf]  ;;  %v12860_v13 = vor.u32 %v16144_v6, %v12859_v5  ;;  %7621 = vmatpush.bf16.msra.mxu1 %v12604_v17 }
 0x625   :  { %v16208_v8 = vld [vmem:[%s25061_s1 + $0x1674] sm:$0xf0] }
 0x626   :  { %v12315_v11 = vld [vmem:[%s25061_s1 + $0x1018] sm:$0xf]  ;;  %v13116_v33 = vor.u32 %v16208_v8, %v13115_v7  ;;  %7634 = vmatpush.bf16.msra.mxu2 %v12860_v13 }
 0x627   :  { %v16008_v12 = vld [vmem:[%s25061_s1 + $0x1034] sm:$0xf0] }
 0x628   :  { %v12571_v29 = vld [vmem:[%s25061_s1 + $0x1218] sm:$0xf]  ;;  %v12316_v45 = vor.u32 %v16008_v12, %v12315_v11  ;;  %7647 = vmatpush.bf16.msra.mxu3 %v13116_v33 }
 0x629   :  { %v16072_v16 = vld [vmem:[%s25061_s1 + $0x1234] sm:$0xf0] }
 0x62a   :  { %v12827_v18 = vld [vmem:[%s25061_s1 + $0x1418] sm:$0xf]  ;;  %v12572_v57 = vor.u32 %v16072_v16, %v12571_v29  ;;  %7609 = vmatpush.bf16.msra.mxu0 %v12316_v45 }
 0x62b   :  { %v16136_v25 = vld [vmem:[%s25061_s1 + $0x1434] sm:$0xf0] }
 0x62c   :  { %v13083_v14 = vld [vmem:[%s25061_s1 + $0x1618] sm:$0xf]  ;;  %v12828_v51 = vor.u32 %v16136_v25, %v12827_v18  ;;  %7622 = vmatpush.bf16.msra.mxu1 %v12572_v57 }
 0x62d   :  { %v16200_v31 = vld [vmem:[%s25061_s1 + $0x1634] sm:$0xf0]  ;;  %7610 = vmatmul.bf16.vlgmr.msra.gmra.mxu0 %v17527_v19 }
 0x62e   :  { %v13563_v37 = vld [vmem:[%s25061_s1 + $0x19d8] sm:$0xf]  ;;  %v13084_v52 = vor.u32 %v16200_v31, %v13083_v14  ;;  %7635 = vmatpush.bf16.msra.mxu2 %v12828_v51 }
 0x62f   :  { %v16320_v38 = vld [vmem:[%s25061_s1 + $0x19f4] sm:$0xf0]  ;;  %7623 = vmatmul.bf16.vlgmr.msra.gmra.mxu1 %v17540_v24 }
 0x630   :  { %v13819_v41 = vld [vmem:[%s25061_s1 + $0x1bd8] sm:$0xf]  ;;  %v13564_v55 = vor.u32 %v16320_v38, %v13563_v37  ;;  %7648 = vmatpush.bf16.msra.mxu3 %v13084_v52 }
 0x631   :  { %v16384_v47 = vld [vmem:[%s25061_s1 + $0x1bf4] sm:$0xf0]  ;;  %7636 = vmatmul.bf16.vlgmr.msra.gmra.mxu2 %v17538_v23 }
 0x632   :  { %v14075_v46 = vld [vmem:[%s25061_s1 + $0x1dd8] sm:$0xf]  ;;  %v13820_v53 = vor.u32 %v16384_v47, %v13819_v41  ;;  %7654 = vmatpush.bf16.msrb.mxu0 %v13564_v55  ;;  %v7403_v47 = vpop.f32.mrf.mxu0 }
 0x633   :  { %v16448_v58 = vld [vmem:[%s25061_s1 + $0x1df4] sm:$0xf0]  ;;  %7649 = vmatmul.bf16.vlgmr.msra.gmra.mxu3 %v17548_v27  ;;  %v7404_v57 = vadd.f32 %v7403_v47, %v22239_v2 }
 0x634   :  { %v14331_v48 = vld [vmem:[%s25061_s1 + $0x1fd8] sm:$0xf]  ;;  %v14076_v56 = vor.u32 %v16448_v58, %v14075_v46  ;;  %7667 = vmatpush.bf16.msrb.mxu1 %v13820_v53 }
 0x635   :  { %v16512_v49 = vld [vmem:[%s25061_s1 + $0x1ff4] sm:$0xf0] }
 0x636   :  { %v13531_v59 = vld [vmem:[%s25061_s1 + $0x1998] sm:$0xf]  ;;  %v14332_v61 = vor.u32 %v16512_v49, %v14331_v48  ;;  %7680 = vmatpush.bf16.msrb.mxu2 %v14076_v56  ;;  %v7416_v48 = vpop.f32.mrf.mxu1 }
 0x637   :  { %v16312_v0 = vld [vmem:[%s25061_s1 + $0x19b4] sm:$0xf0] }
 0x638   :  { %v13787_v9 = vld [vmem:[%s25061_s1 + $0x1b98] sm:$0xf]  ;;  %v13532_v5 = vor.u32 %v16312_v0, %v13531_v59  ;;  %7693 = vmatpush.bf16.msrb.mxu3 %v14332_v61  ;;  %v7417_v59 = vadd.f32 %v7416_v48, %v7404_v57 }
 0x639   :  { %v16376_v62 = vld [vmem:[%s25061_s1 + $0x1bb4] sm:$0xf0] }
 0x63a   :  { %v14043_v63 = vld [vmem:[%s25061_s1 + $0x1d98] sm:$0xf]  ;;  %v13788_v6 = vor.u32 %v16376_v62, %v13787_v9  ;;  %7655 = vmatpush.bf16.msrb.mxu0 %v13532_v5 }
 0x63b   :  { %v16440_v3 = vld [vmem:[%s25061_s1 + $0x1db4] sm:$0xf0] }
 0x63c   :  { %v14299_v1 = vld [vmem:[%s25061_s1 + $0x1f98] sm:$0xf]  ;;  %v14044_v7 = vor.u32 %v16440_v3, %v14043_v63  ;;  %7668 = vmatpush.bf16.msrb.mxu1 %v13788_v6 }
 0x63d   :  { %v16504_v4 = vld [vmem:[%s25061_s1 + $0x1fb4] sm:$0xf0] }
 0x63e   :  { %v13499_v8 = vld [vmem:[%s25061_s1 + $0x1958] sm:$0xf]  ;;  %v14300_v12 = vor.u32 %v16504_v4, %v14299_v1  ;;  %7681 = vmatpush.bf16.msrb.mxu2 %v14044_v7 }
 0x63f   :  { %v16304_v28 = vld [vmem:[%s25061_s1 + $0x1974] sm:$0xf0] }
 0x640   :  { %v13755_v11 = vld [vmem:[%s25061_s1 + $0x1b58] sm:$0xf]  ;;  %v13500_v22 = vor.u32 %v16304_v28, %v13499_v8  ;;  %7694 = vmatpush.bf16.msrb.mxu3 %v14300_v12  ;;  %v7429_v28 = vpop.f32.mrf.mxu2 }
 0x641   :  { %v16368_v17 = vld [vmem:[%s25061_s1 + $0x1b74] sm:$0xf0] }
 0x642   :  { %v14011_v13 = vld [vmem:[%s25061_s1 + $0x1d58] sm:$0xf]  ;;  %v13756_v33 = vor.u32 %v16368_v17, %v13755_v11  ;;  %7656 = vmatpush.bf16.msrb.mxu0 %v13500_v22  ;;  %v7405_v22 = vpop.f32.mrf.mxu0 }
 0x643   :  { %v16432_v29 = vld [vmem:[%s25061_s1 + $0x1d74] sm:$0xf0] }
 0x644   :  { %v14267_v16 = vld [vmem:[%s25061_s1 + $0x1f58] sm:$0xf]  ;;  %v14012_v25 = vor.u32 %v16432_v29, %v14011_v13  ;;  %7669 = vmatpush.bf16.msrb.mxu1 %v13756_v33  ;;  %v7430_v13 = vadd.f32 %v7429_v28, %v7417_v59  ;;  %v7442_v29 = vpop.f32.mrf.mxu3  ;;  %v11005_v28 = vld [vmem:[%s25061_s1 + $0x5f8] sm:$0xf0] }
 0x645   :  { %v16496_v18 = vld [vmem:[%s25061_s1 + $0x1f74] sm:$0xf0] }
 0x646   :  { %v13467_v14 = vld [vmem:[%s25061_s1 + $0x1918] sm:$0xf]  ;;  %v14268_v37 = vor.u32 %v16496_v18, %v14267_v16  ;;  %7682 = vmatpush.bf16.msrb.mxu2 %v14012_v25  ;;  %v7418_v25 = vpop.f32.mrf.mxu1 }
 0x647   :  { %v16296_v31 = vld [vmem:[%s25061_s1 + $0x1934] sm:$0xf0]  ;;  %v10461_v25 = vld [vmem:[%s25061_s1 + $0x1b8] sm:$0xf0] }
 0x648   :  { %v13723_v32 = vld [vmem:[%s25061_s1 + $0x1b18] sm:$0xf]  ;;  %v13468_v51 = vor.u32 %v16296_v31, %v13467_v14  ;;  %7695 = vmatpush.bf16.msrb.mxu3 %v14268_v37  ;;  %v22438_v14 = vadd.f32 %v7442_v29, %v7430_v13  ;;  %v11261_v13 = vld [vmem:[%s25061_s1 + $0x7f8] sm:$0xf0] }
 0x649   :  { %v16360_v38 = vld [vmem:[%s25061_s1 + $0x1b34] sm:$0xf0] }
 0x64a   :  { %v13979_v41 = vld [vmem:[%s25061_s1 + $0x1d18] sm:$0xf]  ;;  %v13724_v49 = vor.u32 %v16360_v38, %v13723_v32  ;;  %7657 = vmatpush.bf16.msrb.mxu0 %v13468_v51 }
 0x64b   :  { %v16424_v45 = vld [vmem:[%s25061_s1 + $0x1d34] sm:$0xf0] }
 0x64c   :  { %v14235_v46 = vld [vmem:[%s25061_s1 + $0x1f18] sm:$0xf]  ;;  %v13980_v52 = vor.u32 %v16424_v45, %v13979_v41  ;;  %7670 = vmatpush.bf16.msrb.mxu1 %v13724_v49 }
 0x64d   :  { %v16488_v58 = vld [vmem:[%s25061_s1 + $0x1f34] sm:$0xf0] }
 0x64e   :  { %v13435_v55 = vld [vmem:[%s25061_s1 + $0x18d8] sm:$0xf]  ;;  %v14236_v2 = vor.u32 %v16488_v58, %v14235_v46  ;;  %7683 = vmatpush.bf16.msrb.mxu2 %v13980_v52 }
 0x64f   :  { %v16288_v53 = vld [vmem:[%s25061_s1 + $0x18f4] sm:$0xf0] }
 0x650   :  { %v13691_v56 = vld [vmem:[%s25061_s1 + $0x1ad8] sm:$0xf]  ;;  %v13436_v3 = vor.u32 %v16288_v53, %v13435_v55  ;;  %7696 = vmatpush.bf16.msrb.mxu3 %v14236_v2 }
 0x651   :  { %v16352_v0 = vld [vmem:[%s25061_s1 + $0x1af4] sm:$0xf0] }
 0x652   :  { %v13947_v9 = vld [vmem:[%s25061_s1 + $0x1cd8] sm:$0xf]  ;;  %v13692_v1 = vor.u32 %v16352_v0, %v13691_v56  ;;  %7658 = vmatpush.bf16.msrb.mxu0 %v13436_v3  ;;  %v15548_v3 = vld [vmem:[%s25061_s1 + $0x1dc] sm:$0xf] }
 0x653   :  { %v16416_v61 = vld [vmem:[%s25061_s1 + $0x1cf4] sm:$0xf0] }
 0x654   :  { %v14203_v62 = vld [vmem:[%s25061_s1 + $0x1ed8] sm:$0xf]  ;;  %v13948_v4 = vor.u32 %v16416_v61, %v13947_v9  ;;  %7671 = vmatpush.bf16.msrb.mxu1 %v13692_v1  ;;  %v10493_v1 = vld [vmem:[%s25061_s1 + $0x1f8] sm:$0xf0] }
 0x655   :  { %v16480_v63 = vld [vmem:[%s25061_s1 + $0x1ef4] sm:$0xf0] }
 0x656   :  { %v13403_v5 = vld [vmem:[%s25061_s1 + $0x1898] sm:$0xf]  ;;  %v14204_v8 = vor.u32 %v16480_v63, %v14203_v62  ;;  %7684 = vmatpush.bf16.msrb.mxu2 %v13948_v4  ;;  %v7431_v63 = vpop.f32.mrf.mxu2  ;;  %v15612_v4 = vld [vmem:[%s25061_s1 + $0x3dc] sm:$0xf] }
 0x657   :  { %v16280_v6 = vld [vmem:[%s25061_s1 + $0x18b4] sm:$0xf0]  ;;  %v10397_v63 = vld [vmem:[%s25061_s1 + $0x138] sm:$0xf0] }
 0x658   :  { %v13659_v7 = vld [vmem:[%s25061_s1 + $0x1a98] sm:$0xf]  ;;  %v13404_v33 = vor.u32 %v16280_v6, %v13403_v5  ;;  %7697 = vmatpush.bf16.msrb.mxu3 %v14204_v8  ;;  %v7444_v5 = vpop.f32.mrf.mxu3  ;;  %v15676_v8 = vld [vmem:[%s25061_s1 + $0x5dc] sm:$0xf] }
 0x659   :  { %v16344_v11 = vld [vmem:[%s25061_s1 + $0x1ab4] sm:$0xf0]  ;;  %v11008_v22 = vor.u32 %v15676_v8, %v11005_v28  ;;  %v15652_v5 = vld [vmem:[%s25061_s1 + $0x51c] sm:$0xf] }
 0x65a   :  { %v13915_v12 = vld [vmem:[%s25061_s1 + $0x1c98] sm:$0xf]  ;;  %v13660_v31 = vor.u32 %v16344_v11, %v13659_v7  ;;  %7659 = vmatpush.bf16.msrb.mxu0 %v13404_v33  ;;  %v10749_v7 = vld [vmem:[%s25061_s1 + $0x3f8] sm:$0xf0] }
 0x65b   :  { %v16408_v17 = vld [vmem:[%s25061_s1 + $0x1cb4] sm:$0xf0]  ;;  %v15540_v33 = vld [vmem:[%s25061_s1 + $0x19c] sm:$0xf] }
 0x65c   :  { %v14171_v16 = vld [vmem:[%s25061_s1 + $0x1e98] sm:$0xf]  ;;  %v13916_v32 = vor.u32 %v16408_v17, %v13915_v12  ;;  %7672 = vmatpush.bf16.msrb.mxu1 %v13660_v31  ;;  %v15740_v17 = vld [vmem:[%s25061_s1 + $0x7dc] sm:$0xf] }
 0x65d   :  { %v16472_v18 = vld [vmem:[%s25061_s1 + $0x1eb4] sm:$0xf0]  ;;  %v15604_v31 = vld [vmem:[%s25061_s1 + $0x39c] sm:$0xf] }
 0x65e   :  { %v13371_v37 = vld [vmem:[%s25061_s1 + $0x1858] sm:$0xf]  ;;  %v14172_v45 = vor.u32 %v16472_v18, %v14171_v16  ;;  %7685 = vmatpush.bf16.msrb.mxu2 %v13916_v32  ;;  %v10496_v16 = vor.u32 %v15548_v3, %v10493_v1  ;;  %v10752_v18 = vor.u32 %v15612_v4, %v10749_v7  ;;  %v11264_v32 = vor.u32 %v15740_v17, %v11261_v13  ;;  %v15588_v3 = vld [vmem:[%s25061_s1 + $0x31c] sm:$0xf]  ;;  %v7455_v7 = vpop.f32.mrf.mxu0  ;;  %v7468_v17 = vpop.f32.mrf.mxu1 }
 0x65f   :  { %v16272_v38 = vld [vmem:[%s25061_s1 + $0x1874] sm:$0xf0]  ;;  %v10653_v4 = vld [vmem:[%s25061_s1 + $0x338] sm:$0xf0] }
 0x660   :  { %v13627_v41 = vld [vmem:[%s25061_s1 + $0x1a58] sm:$0xf]  ;;  %v13372_v48 = vor.u32 %v16272_v38, %v13371_v37  ;;  %7698 = vmatpush.bf16.msrb.mxu3 %v14172_v45  ;;  %v10717_v37 = vld [vmem:[%s25061_s1 + $0x3b8] sm:$0xf0]  ;;  %v10656_v13 = vor.u32 %v15588_v3, %v10653_v4 }
 0x661   :  { %v16336_v47 = vld [vmem:[%s25061_s1 + $0x1a74] sm:$0xf0]  ;;  %v15668_v38 = vld [vmem:[%s25061_s1 + $0x59c] sm:$0xf] }
 0x662   :  { %v13883_v46 = vld [vmem:[%s25061_s1 + $0x1c58] sm:$0xf]  ;;  %v13628_v55 = vor.u32 %v16336_v47, %v13627_v41  ;;  %7660 = vmatpush.bf16.msrb.mxu0 %v13372_v48  ;;  %v10973_v41 = vld [vmem:[%s25061_s1 + $0x5b8] sm:$0xf0] }
 0x663   :  { %v16400_v58 = vld [vmem:[%s25061_s1 + $0x1c74] sm:$0xf0]  ;;  %v15732_v45 = vld [vmem:[%s25061_s1 + $0x79c] sm:$0xf] }
 0x664   :  { %v14139_v57 = vld [vmem:[%s25061_s1 + $0x1e58] sm:$0xf]  ;;  %v13884_v53 = vor.u32 %v16400_v58, %v13883_v46  ;;  %7673 = vmatpush.bf16.msrb.mxu1 %v13628_v55  ;;  %v11229_v47 = vld [vmem:[%s25061_s1 + $0x7b8] sm:$0xf0]  ;;  %v10464_v46 = vor.u32 %v15540_v33, %v10461_v25  ;;  %v10720_v58 = vor.u32 %v15604_v31, %v10717_v37 }
 0x665   :  { %v16464_v51 = vld [vmem:[%s25061_s1 + $0x1e74] sm:$0xf0]  ;;  %v10429_v48 = vld [vmem:[%s25061_s1 + $0x178] sm:$0xf0] }
 0x666   :  { %v13339_v49 = vld [vmem:[%s25061_s1 + $0x1818] sm:$0xf]  ;;  %v14140_v0 = vor.u32 %v16464_v51, %v14139_v57  ;;  %7686 = vmatpush.bf16.msrb.mxu2 %v13884_v53  ;;  %v10976_v57 = vor.u32 %v15668_v38, %v10973_v41  ;;  %v15532_v51 = vld [vmem:[%s25061_s1 + $0x15c] sm:$0xf] }
 0x667   :  { %v16264_v52 = vld [vmem:[%s25061_s1 + $0x1834] sm:$0xf0]  ;;  %v10685_v55 = vld [vmem:[%s25061_s1 + $0x378] sm:$0xf0] }
 0x668   :  { %v13595_v56 = vld [vmem:[%s25061_s1 + $0x1a18] sm:$0xf]  ;;  %v13340_v6 = vor.u32 %v16264_v52, %v13339_v49  ;;  %7699 = vmatpush.bf16.msrb.mxu3 %v14140_v0  ;;  %v15596_v49 = vld [vmem:[%s25061_s1 + $0x35c] sm:$0xf]  ;;  %v11232_v52 = vor.u32 %v15732_v45, %v11229_v47  ;;  %v10432_v0 = vor.u32 %v15532_v51, %v10429_v48  ;;  %v7481_v48 = vpop.f32.mrf.mxu2 }
 0x669   :  { %v16328_v2 = vld [vmem:[%s25061_s1 + $0x1a34] sm:$0xf0]  ;;  %v15660_v53 = vld [vmem:[%s25061_s1 + $0x55c] sm:$0xf] }
 0x66a   :  { %v13851_v59 = vld [vmem:[%s25061_s1 + $0x1c18] sm:$0xf]  ;;  %v13596_v11 = vor.u32 %v16328_v2, %v13595_v56  ;;  %7661 = vmatpush.bf16.msrb.mxu0 %v13340_v6  ;;  %v10941_v56 = vld [vmem:[%s25061_s1 + $0x578] sm:$0xf0] }
 0x66b   :  { %v16392_v9 = vld [vmem:[%s25061_s1 + $0x1c34] sm:$0xf0]  ;;  %v15724_v2 = vld [vmem:[%s25061_s1 + $0x75c] sm:$0xf] }
 0x66c   :  { %v14107_v61 = vld [vmem:[%s25061_s1 + $0x1e18] sm:$0xf]  ;;  %v13852_v12 = vor.u32 %v16392_v9, %v13851_v59  ;;  %7674 = vmatpush.bf16.msrb.mxu1 %v13596_v11  ;;  %v11197_v59 = vld [vmem:[%s25061_s1 + $0x778] sm:$0xf0]  ;;  %v10688_v9 = vor.u32 %v15596_v49, %v10685_v55  ;;  %v7456_v11 = vadd.f32 %v7455_v7, %v22438_v14 }
 0x66d   :  { %v16456_v62 = vld [vmem:[%s25061_s1 + $0x1e34] sm:$0xf0]  ;;  %7662 = vmatmul.bf16.vlgmr.msrb.gmra.mxu0 %v17731_v15  ;;  %v11200_v1 = vor.u32 %v15724_v2, %v11197_v59  ;;  %v10909_v6 = vld [vmem:[%s25061_s1 + $0x538] sm:$0xf0] }
 0x66e   :  { %v14108_v29 = vor.u32 %v16456_v62, %v14107_v61  ;;  %7687 = vmatpush.bf16.msrb.mxu2 %v13852_v12  ;;  %7706 = vmatpush.bf16.msra.mxu0 %v10496_v16  ;;  %v10944_v61 = vor.u32 %v15660_v53, %v10941_v56  ;;  %v15524_v62 = vld [vmem:[%s25061_s1 + $0x11c] sm:$0xf]  ;;  %v7469_v33 = vadd.f32 %v7468_v17, %v7456_v11  ;;  %v7494_v56 = vpop.f32.mrf.mxu3 }
 0x66f   :  { %7675 = vmatmul.bf16.vlgmr.msrb.gmra.mxu1 %v17744_v21  ;;  %v15716_v8 = vld [vmem:[%s25061_s1 + $0x71c] sm:$0xf]  ;;  %v10400_v12 = vor.u32 %v15524_v62, %v10397_v63 }
 0x670   :  { %7700 = vmatpush.bf16.msrb.mxu3 %v14108_v29  ;;  %7719 = vmatpush.bf16.msra.mxu1 %v10752_v18  ;;  %v11165_v28 = vld [vmem:[%s25061_s1 + $0x738] sm:$0xf0]  ;;  %v10912_v29 = vor.u32 %v15652_v5, %v10909_v6  ;;  %v7482_v53 = vadd.f32 %v7481_v48, %v7469_v33 }
 0x671   :  { %7688 = vmatmul.bf16.vlgmr.msrb.gmra.mxu2 %v17742_v20  ;;  %v15516_v16 = vld [vmem:[%s25061_s1 + $0xdc] sm:$0xf]  ;;  %v11168_v14 = vor.u32 %v15716_v8, %v11165_v28 }
 0x672   :  { %7732 = vmatpush.bf16.msra.mxu2 %v11008_v22  ;;  %7707 = vmatpush.bf16.msra.mxu0 %v10464_v46  ;;  %v10365_v18 = vld [vmem:[%s25061_s1 + $0xf8] sm:$0xf0]  ;;  %v22637_v62 = vadd.f32 %v7494_v56, %v7482_v53 }
 0x673   :  { %7701 = vmatmul.bf16.vlgmr.msrb.gmra.mxu3 %v17752_v26  ;;  %v15580_v22 = vld [vmem:[%s25061_s1 + $0x2dc] sm:$0xf]  ;;  %v10368_v41 = vor.u32 %v15516_v16, %v10365_v18 }
 0x674   :  { %7745 = vmatpush.bf16.msra.mxu3 %v11264_v32  ;;  %7720 = vmatpush.bf16.msra.mxu1 %v10720_v58  ;;  %v10621_v25 = vld [vmem:[%s25061_s1 + $0x2f8] sm:$0xf0] }
 0x675   :  { %v15644_v31 = vld [vmem:[%s25061_s1 + $0x4dc] sm:$0xf]  ;;  %v10624_v45 = vor.u32 %v15580_v22, %v10621_v25 }
 0x676   :  { %7733 = vmatpush.bf16.msra.mxu2 %v10976_v57  ;;  %7708 = vmatpush.bf16.msra.mxu0 %v10432_v0  ;;  %v10877_v32 = vld [vmem:[%s25061_s1 + $0x4f8] sm:$0xf0]  ;;  %v7457_v0 = vpop.f32.mrf.mxu0 }
 0x677   :  { %v15708_v37 = vld [vmem:[%s25061_s1 + $0x6dc] sm:$0xf]  ;;  %v10880_v47 = vor.u32 %v15644_v31, %v10877_v32 }
 0x678   :  { %7746 = vmatpush.bf16.msra.mxu3 %v11232_v52  ;;  %7721 = vmatpush.bf16.msra.mxu1 %v10688_v9  ;;  %v11133_v38 = vld [vmem:[%s25061_s1 + $0x6f8] sm:$0xf0] }
 0x679   :  { %v15508_v46 = vld [vmem:[%s25061_s1 + $0x9c] sm:$0xf]  ;;  %v11136_v51 = vor.u32 %v15708_v37, %v11133_v38  ;;  %v7483_v38 = vpop.f32.mrf.mxu2 }
 0x67a   :  { %7734 = vmatpush.bf16.msra.mxu2 %v10944_v61  ;;  %7709 = vmatpush.bf16.msra.mxu0 %v10400_v12  ;;  %v10333_v58 = vld [vmem:[%s25061_s1 + $0xb8] sm:$0xf0]  ;;  %v7470_v61 = vpop.f32.mrf.mxu1 }
 0x67b   :  { %v15572_v57 = vld [vmem:[%s25061_s1 + $0x29c] sm:$0xf]  ;;  %v10336_v9 = vor.u32 %v15508_v46, %v10333_v58  ;;  %v7496_v46 = vpop.f32.mrf.mxu3 }
 0x67c   :  { %7747 = vmatpush.bf16.msra.mxu3 %v11200_v1  ;;  %7722 = vmatpush.bf16.msra.mxu1 %v10656_v13  ;;  %v10589_v49 = vld [vmem:[%s25061_s1 + $0x2b8] sm:$0xf0] }
 0x67d   :  { %v15636_v52 = vld [vmem:[%s25061_s1 + $0x49c] sm:$0xf]  ;;  %v10592_v63 = vor.u32 %v15572_v57, %v10589_v49 }
 0x67e   :  { %7735 = vmatpush.bf16.msra.mxu2 %v10912_v29  ;;  %v10845_v55 = vld [vmem:[%s25061_s1 + $0x4b8] sm:$0xf0]  ;;  %7710 = vmatpush.bf16.msra.mxu0 %v10368_v41 }
 0x67f   :  { %v15700_v2 = vld [vmem:[%s25061_s1 + $0x69c] sm:$0xf]  ;;  %v10848_v3 = vor.u32 %v15636_v52, %v10845_v55 }
 0x680   :  { %7748 = vmatpush.bf16.msra.mxu3 %v11168_v14  ;;  %v11101_v59 = vld [vmem:[%s25061_s1 + $0x6b8] sm:$0xf0]  ;;  %7723 = vmatpush.bf16.msra.mxu1 %v10624_v45 }
 0x681   :  { %v15500_v1 = vld [vmem:[%s25061_s1 + $0x5c] sm:$0xf]  ;;  %v11104_v6 = vor.u32 %v15700_v2, %v11101_v59 }
 0x682   :  { %7736 = vmatpush.bf16.msra.mxu2 %v10880_v47  ;;  %v10301_v4 = vld [vmem:[%s25061_s1 + $0x78] sm:$0xf0]  ;;  %7711 = vmatpush.bf16.msra.mxu0 %v10336_v9 }
 0x683   :  { %v15564_v5 = vld [vmem:[%s25061_s1 + $0x25c] sm:$0xf]  ;;  %v10304_v17 = vor.u32 %v15500_v1, %v10301_v4 }
 0x684   :  { %7749 = vmatpush.bf16.msra.mxu3 %v11136_v51  ;;  %v10557_v7 = vld [vmem:[%s25061_s1 + $0x278] sm:$0xf0]  ;;  %7724 = vmatpush.bf16.msra.mxu1 %v10592_v63 }
 0x685   :  { %v15628_v8 = vld [vmem:[%s25061_s1 + $0x45c] sm:$0xf]  ;;  %v10560_v16 = vor.u32 %v15564_v5, %v10557_v7 }
 0x686   :  { %v10813_v28 = vld [vmem:[%s25061_s1 + $0x478] sm:$0xf0]  ;;  %7737 = vmatpush.bf16.msra.mxu2 %v10848_v3  ;;  %7712 = vmatpush.bf16.msra.mxu0 %v10304_v17 }
 0x687   :  { %v15692_v11 = vld [vmem:[%s25061_s1 + $0x65c] sm:$0xf]  ;;  %v10816_v18 = vor.u32 %v15628_v8, %v10813_v28 }
 0x688   :  { %v11069_v12 = vld [vmem:[%s25061_s1 + $0x678] sm:$0xf0]  ;;  %7750 = vmatpush.bf16.msra.mxu3 %v11104_v6  ;;  %7725 = vmatpush.bf16.msra.mxu1 %v10560_v16 }
 0x689   :  { %v15492_v13 = vld [vmem:[%s25061_s1 + $0x1c] sm:$0xf]  ;;  %v11072_v25 = vor.u32 %v15692_v11, %v11069_v12 }
 0x68a   :  { %v10269_v29 = vld [vmem:[%s25061_s1 + $0x38] sm:$0xf0]  ;;  %7738 = vmatpush.bf16.msra.mxu2 %v10816_v18 }
 0x68b   :  { %v15556_v22 = vld [vmem:[%s25061_s1 + $0x21c] sm:$0xf]  ;;  %v10272_v58 = vor.u32 %v15492_v13, %v10269_v29 }
 0x68c   :  { %v10525_v14 = vld [vmem:[%s25061_s1 + $0x238] sm:$0xf0]  ;;  %7751 = vmatpush.bf16.msra.mxu3 %v11072_v25 }
 0x68d   :  { %v15620_v33 = vld [vmem:[%s25061_s1 + $0x41c] sm:$0xf]  ;;  %v10528_v49 = vor.u32 %v15556_v22, %v10525_v14  ;;  %7713 = vmatpush.bf16.msra.mxu0 %v10272_v58 }
 0x68e   :  { %v10781_v31 = vld [vmem:[%s25061_s1 + $0x438] sm:$0xf0] }
 0x68f   :  { %v15684_v32 = vld [vmem:[%s25061_s1 + $0x61c] sm:$0xf]  ;;  %v10784_v52 = vor.u32 %v15620_v33, %v10781_v31  ;;  %7726 = vmatpush.bf16.msra.mxu1 %v10528_v49 }
 0x690   :  { %v11037_v37 = vld [vmem:[%s25061_s1 + $0x638] sm:$0xf0]  ;;  %7714 = vmatmul.bf16.vlgmr.msra.gmra.mxu0 %v17214_v36 }
 0x691   :  { %v15804_v41 = vld [vmem:[%s25061_s1 + $0x9dc] sm:$0xf]  ;;  %v11040_v56 = vor.u32 %v15684_v32, %v11037_v37  ;;  %7739 = vmatpush.bf16.msra.mxu2 %v10784_v52 }
 0x692   :  { %v11517_v45 = vld [vmem:[%s25061_s1 + $0x9f8] sm:$0xf0]  ;;  %7727 = vmatmul.bf16.vlgmr.msra.gmra.mxu1 %v17224_v43 }
 0x693   :  { %v15868_v47 = vld [vmem:[%s25061_s1 + $0xbdc] sm:$0xf]  ;;  %v11520_v2 = vor.u32 %v15804_v41, %v11517_v45  ;;  %7752 = vmatpush.bf16.msra.mxu3 %v11040_v56 }
 0x694   :  { %v11773_v57 = vld [vmem:[%s25061_s1 + $0xbf8] sm:$0xf0]  ;;  %7740 = vmatmul.bf16.vlgmr.msra.gmra.mxu2 %v17212_v35 }
 0x695   :  { %v15932_v51 = vld [vmem:[%s25061_s1 + $0xddc] sm:$0xf]  ;;  %v11776_v59 = vor.u32 %v15868_v47, %v11773_v57  ;;  %7758 = vmatpush.bf16.msrb.mxu0 %v11520_v2  ;;  %v7520_v2 = vpop.f32.mrf.mxu1 }
 0x696   :  { %v12029_v48 = vld [vmem:[%s25061_s1 + $0xdf8] sm:$0xf0]  ;;  %7753 = vmatmul.bf16.vlgmr.msra.gmra.mxu3 %v17222_v42  ;;  %v16812_v42 = vld [vmem:[%s25062_s2] sm:$0xff] }
 0x697   :  { %v15996_v55 = vld [vmem:[%s25061_s1 + $0xfdc] sm:$0xf]  ;;  %v12032_v0 = vor.u32 %v15932_v51, %v12029_v48  ;;  %7771 = vmatpush.bf16.msrb.mxu1 %v11776_v59  ;;  %v1120_v38 = vperm.slane %v16812_v42, 6  ;;  %v7507_v51 = vpop.f32.mrf.mxu0 }
 0x698   :  { %v12285_v53 = vld [vmem:[%s25061_s1 + $0xff8] sm:$0xf0] }
 0x699   :  { %v15796_v9 = vld [vmem:[%s25061_s1 + $0x99c] sm:$0xf]  ;;  %v12288_v3 = vor.u32 %v15996_v55, %v12285_v53  ;;  %7784 = vmatpush.bf16.msrb.mxu2 %v12032_v0  ;;  %v7508_v56 = vadd.f32 %v7507_v51, %v1120_v38 }
 0x69a   :  { %v11485_v61 = vld [vmem:[%s25061_s1 + $0x9b8] sm:$0xf0] }
 0x69b   :  { %v15860_v63 = vld [vmem:[%s25061_s1 + $0xb9c] sm:$0xf]  ;;  %v11488_v8 = vor.u32 %v15796_v9, %v11485_v61  ;;  %7797 = vmatpush.bf16.msrb.mxu3 %v12288_v3 }
 0x69c   :  { %v11741_v1 = vld [vmem:[%s25061_s1 + $0xbb8] sm:$0xf0] }
 0x69d   :  { %v15924_v4 = vld [vmem:[%s25061_s1 + $0xd9c] sm:$0xf]  ;;  %v11744_v28 = vor.u32 %v15860_v63, %v11741_v1  ;;  %7759 = vmatpush.bf16.msrb.mxu0 %v11488_v8  ;;  %v7521_v1 = vadd.f32 %v7520_v2, %v7508_v56  ;;  %v7522_v38 = vpop.f32.mrf.mxu1 }
 0x69e   :  { %v11997_v5 = vld [vmem:[%s25061_s1 + $0xdb8] sm:$0xf0] }
 0x69f   :  { %v15988_v6 = vld [vmem:[%s25061_s1 + $0xf9c] sm:$0xf]  ;;  %v12000_v11 = vor.u32 %v15924_v4, %v11997_v5  ;;  %7772 = vmatpush.bf16.msrb.mxu1 %v11744_v28 }
 0x6a0   :  { %v12253_v7 = vld [vmem:[%s25061_s1 + $0xfb8] sm:$0xf0] }
 0x6a1   :  { %v15788_v12 = vld [vmem:[%s25061_s1 + $0x95c] sm:$0xf]  ;;  %v12256_v29 = vor.u32 %v15988_v6, %v12253_v7  ;;  %7785 = vmatpush.bf16.msrb.mxu2 %v12000_v11  ;;  %v7533_v11 = vpop.f32.mrf.mxu2 }
 0x6a2   :  { %v11453_v17 = vld [vmem:[%s25061_s1 + $0x978] sm:$0xf0] }
 0x6a3   :  { %v15852_v13 = vld [vmem:[%s25061_s1 + $0xb5c] sm:$0xf]  ;;  %v11456_v25 = vor.u32 %v15788_v12, %v11453_v17  ;;  %7798 = vmatpush.bf16.msrb.mxu3 %v12256_v29 }
 0x6a4   :  { %v11709_v16 = vld [vmem:[%s25061_s1 + $0xb78] sm:$0xf0] }
 0x6a5   :  { %v15916_v18 = vld [vmem:[%s25061_s1 + $0xd5c] sm:$0xf]  ;;  %v11712_v35 = vor.u32 %v15852_v13, %v11709_v16  ;;  %7760 = vmatpush.bf16.msrb.mxu0 %v11456_v25  ;;  %v7534_v16 = vadd.f32 %v7533_v11, %v7521_v1 }
 0x6a6   :  { %v11965_v22 = vld [vmem:[%s25061_s1 + $0xd78] sm:$0xf0] }
 0x6a7   :  { %v15980_v14 = vld [vmem:[%s25061_s1 + $0xf5c] sm:$0xf]  ;;  %v11968_v32 = vor.u32 %v15916_v18, %v11965_v22  ;;  %7773 = vmatpush.bf16.msrb.mxu1 %v11712_v35  ;;  %v7546_v18 = vpop.f32.mrf.mxu3 }
 0x6a8   :  { %v12221_v33 = vld [vmem:[%s25061_s1 + $0xf78] sm:$0xf0]  ;;  %v22838_v25 = vadd.f32 %v7546_v18, %v7534_v16 }
 0x6a9   :  { %v15780_v31 = vld [vmem:[%s25061_s1 + $0x91c] sm:$0xf]  ;;  %v12224_v41 = vor.u32 %v15980_v14, %v12221_v33  ;;  %7786 = vmatpush.bf16.msrb.mxu2 %v11968_v32  ;;  %v7535_v2 = vpop.f32.mrf.mxu2 }
 0x6aa   :  { %v11421_v37 = vld [vmem:[%s25061_s1 + $0x938] sm:$0xf0] }
 0x6ab   :  { %v15844_v36 = vld [vmem:[%s25061_s1 + $0xb1c] sm:$0xf]  ;;  %v11424_v57 = vor.u32 %v15780_v31, %v11421_v37  ;;  %7799 = vmatpush.bf16.msrb.mxu3 %v12224_v41  ;;  %v7509_v31 = vpop.f32.mrf.mxu0 }
 0x6ac   :  { %v11677_v43 = vld [vmem:[%s25061_s1 + $0xb38] sm:$0xf0] }
 0x6ad   :  { %v15908_v45 = vld [vmem:[%s25061_s1 + $0xd1c] sm:$0xf]  ;;  %v11680_v48 = vor.u32 %v15844_v36, %v11677_v43  ;;  %7761 = vmatpush.bf16.msrb.mxu0 %v11424_v57 }
 0x6ae   :  { %v11933_v47 = vld [vmem:[%s25061_s1 + $0xd38] sm:$0xf0] }
 0x6af   :  { %v15972_v46 = vld [vmem:[%s25061_s1 + $0xf1c] sm:$0xf]  ;;  %v11936_v49 = vor.u32 %v15908_v45, %v11933_v47  ;;  %7774 = vmatpush.bf16.msrb.mxu1 %v11680_v48 }
 0x6b0   :  { %v12189_v58 = vld [vmem:[%s25061_s1 + $0xf38] sm:$0xf0] }
 0x6b1   :  { %v15772_v52 = vld [vmem:[%s25061_s1 + $0x8dc] sm:$0xf]  ;;  %v12192_v59 = vor.u32 %v15972_v46, %v12189_v58  ;;  %7787 = vmatpush.bf16.msrb.mxu2 %v11936_v49 }
 0x6b2   :  { %v11389_v55 = vld [vmem:[%s25061_s1 + $0x8f8] sm:$0xf0] }
 0x6b3   :  { %v15836_v53 = vld [vmem:[%s25061_s1 + $0xadc] sm:$0xf]  ;;  %v11392_v4 = vor.u32 %v15772_v52, %v11389_v55  ;;  %7800 = vmatpush.bf16.msrb.mxu3 %v12192_v59 }
 0x6b4   :  { %v11645_v0 = vld [vmem:[%s25061_s1 + $0xaf8] sm:$0xf0] }
 0x6b5   :  { %v15900_v9 = vld [vmem:[%s25061_s1 + $0xcdc] sm:$0xf]  ;;  %v11648_v5 = vor.u32 %v15836_v53, %v11645_v0  ;;  %7762 = vmatpush.bf16.msrb.mxu0 %v11392_v4 }
 0x6b6   :  { %v11901_v61 = vld [vmem:[%s25061_s1 + $0xcf8] sm:$0xf0] }
 0x6b7   :  { %v15964_v63 = vld [vmem:[%s25061_s1 + $0xedc] sm:$0xf]  ;;  %v11904_v6 = vor.u32 %v15900_v9, %v11901_v61  ;;  %7775 = vmatpush.bf16.msrb.mxu1 %v11648_v5 }
 0x6b8   :  { %v12157_v3 = vld [vmem:[%s25061_s1 + $0xef8] sm:$0xf0] }
 0x6b9   :  { %v15764_v7 = vld [vmem:[%s25061_s1 + $0x89c] sm:$0xf]  ;;  %v12160_v12 = vor.u32 %v15964_v63, %v12157_v3  ;;  %7788 = vmatpush.bf16.msrb.mxu2 %v11904_v6  ;;  %v7548_v63 = vpop.f32.mrf.mxu3 }
 0x6ba   :  { %v11357_v8 = vld [vmem:[%s25061_s1 + $0x8b8] sm:$0xf0] }
 0x6bb   :  { %v15828_v28 = vld [vmem:[%s25061_s1 + $0xa9c] sm:$0xf]  ;;  %v11360_v33 = vor.u32 %v15764_v7, %v11357_v8  ;;  %7801 = vmatpush.bf16.msrb.mxu3 %v12160_v12 }
 0x6bc   :  { %v11613_v17 = vld [vmem:[%s25061_s1 + $0xab8] sm:$0xf0] }
 0x6bd   :  { %v15892_v13 = vld [vmem:[%s25061_s1 + $0xc9c] sm:$0xf]  ;;  %v11616_v35 = vor.u32 %v15828_v28, %v11613_v17  ;;  %7763 = vmatpush.bf16.msrb.mxu0 %v11360_v33 }
 0x6be   :  { %v11869_v29 = vld [vmem:[%s25061_s1 + $0xcb8] sm:$0xf0] }
 0x6bf   :  { %v15956_v22 = vld [vmem:[%s25061_s1 + $0xe9c] sm:$0xf]  ;;  %v11872_v32 = vor.u32 %v15892_v13, %v11869_v29  ;;  %7776 = vmatpush.bf16.msrb.mxu1 %v11616_v35 }
 0x6c0   :  { %v12125_v14 = vld [vmem:[%s25061_s1 + $0xeb8] sm:$0xf0] }
 0x6c1   :  { %v15756_v37 = vld [vmem:[%s25061_s1 + $0x85c] sm:$0xf]  ;;  %v12128_v41 = vor.u32 %v15956_v22, %v12125_v14  ;;  %7789 = vmatpush.bf16.msrb.mxu2 %v11872_v32 }
 0x6c2   :  { %v11325_v36 = vld [vmem:[%s25061_s1 + $0x878] sm:$0xf0] }
 0x6c3   :  { %v15820_v42 = vld [vmem:[%s25061_s1 + $0xa5c] sm:$0xf]  ;;  %v11328_v57 = vor.u32 %v15756_v37, %v11325_v36  ;;  %7802 = vmatpush.bf16.msrb.mxu3 %v12128_v41 }
 0x6c4   :  { %v11581_v43 = vld [vmem:[%s25061_s1 + $0xa78] sm:$0xf0] }
 0x6c5   :  { %v15884_v45 = vld [vmem:[%s25061_s1 + $0xc5c] sm:$0xf]  ;;  %v11584_v49 = vor.u32 %v15820_v42, %v11581_v43  ;;  %7764 = vmatpush.bf16.msrb.mxu0 %v11328_v57 }
 0x6c6   :  { %v11837_v47 = vld [vmem:[%s25061_s1 + $0xc78] sm:$0xf0] }
 0x6c7   :  { %v15948_v46 = vld [vmem:[%s25061_s1 + $0xe5c] sm:$0xf]  ;;  %v11840_v52 = vor.u32 %v15884_v45, %v11837_v47  ;;  %7777 = vmatpush.bf16.msrb.mxu1 %v11584_v49 }
 0x6c8   :  { %v12093_v58 = vld [vmem:[%s25061_s1 + $0xe78] sm:$0xf0] }
 0x6c9   :  { %v15748_v51 = vld [vmem:[%s25061_s1 + $0x81c] sm:$0xf]  ;;  %v12096_v59 = vor.u32 %v15948_v46, %v12093_v58  ;;  %7790 = vmatpush.bf16.msrb.mxu2 %v11840_v52 }
 0x6ca   :  { %v11293_v48 = vld [vmem:[%s25061_s1 + $0x838] sm:$0xf0] }
 0x6cb   :  { %v15812_v55 = vld [vmem:[%s25061_s1 + $0xa1c] sm:$0xf]  ;;  %v11296_v5 = vor.u32 %v15748_v51, %v11293_v48  ;;  %7803 = vmatpush.bf16.msrb.mxu3 %v12096_v59 }
 0x6cc   :  { %v11549_v53 = vld [vmem:[%s25061_s1 + $0xa38] sm:$0xf0] }
 0x6cd   :  { %v15876_v56 = vld [vmem:[%s25061_s1 + $0xc1c] sm:$0xf]  ;;  %v11552_v28 = vor.u32 %v15812_v55, %v11549_v53  ;;  %7765 = vmatpush.bf16.msrb.mxu0 %v11296_v5 }
 0x6ce   :  { %v11805_v0 = vld [vmem:[%s25061_s1 + $0xc38] sm:$0xf0] }
 0x6cf   :  { %v15940_v9 = vld [vmem:[%s25061_s1 + $0xe1c] sm:$0xf]  ;;  %v11808_v11 = vor.u32 %v15876_v56, %v11805_v0  ;;  %7778 = vmatpush.bf16.msrb.mxu1 %v11552_v28  ;;  %v7572_v28 = vpop.f32.mrf.mxu1 }
 0x6d0   :  { %v12061_v61 = vld [vmem:[%s25061_s1 + $0xe38] sm:$0xf0]  ;;  %7766 = vmatmul.bf16.vlgmr.msrb.gmra.mxu0 %v17340_v39 }
 0x6d1   :  { %v16060_v3 = vld [vmem:[%s25061_s1 + $0x11dc] sm:$0xf]  ;;  %v12064_v13 = vor.u32 %v15940_v9, %v12061_v61  ;;  %7791 = vmatpush.bf16.msrb.mxu2 %v11808_v11 }
 0x6d2   :  { %v12541_v1 = vld [vmem:[%s25061_s1 + $0x11f8] sm:$0xf0]  ;;  %7779 = vmatmul.bf16.vlgmr.msrb.gmra.mxu1 %v17344_v44 }
 0x6d3   :  { %v16124_v4 = vld [vmem:[%s25061_s1 + $0x13dc] sm:$0xf]  ;;  %v12544_v29 = vor.u32 %v16060_v3, %v12541_v1  ;;  %7804 = vmatpush.bf16.msrb.mxu3 %v12064_v13  ;;  %v7559_v3 = vpop.f32.mrf.mxu0 }
 0x6d4   :  { %v12797_v6 = vld [vmem:[%s25061_s1 + $0x13f8] sm:$0xf0]  ;;  %7792 = vmatmul.bf16.vlgmr.msrb.gmra.mxu2 %v17332_v34 }
 0x6d5   :  { %v16188_v7 = vld [vmem:[%s25061_s1 + $0x15dc] sm:$0xf]  ;;  %v12800_v16 = vor.u32 %v16124_v4, %v12797_v6  ;;  %7810 = vmatpush.bf16.msra.mxu0 %v12544_v29 }
 0x6d6   :  { %v13053_v8 = vld [vmem:[%s25061_s1 + $0x15f8] sm:$0xf0]  ;;  %7805 = vmatmul.bf16.vlgmr.msrb.gmra.mxu3 %v17342_v40 }
 0x6d7   :  { %v16252_v12 = vld [vmem:[%s25061_s1 + $0x17dc] sm:$0xf]  ;;  %v13056_v18 = vor.u32 %v16188_v7, %v13053_v8  ;;  %7823 = vmatpush.bf16.msra.mxu1 %v12800_v16  ;;  %v7560_v8 = vadd.f32 %v7559_v3, %v22838_v25 }
 0x6d8   :  { %v13309_v17 = vld [vmem:[%s25061_s1 + $0x17f8] sm:$0xf0] }
 0x6d9   :  { %v16052_v22 = vld [vmem:[%s25061_s1 + $0x119c] sm:$0xf]  ;;  %v13312_v31 = vor.u32 %v16252_v12, %v13309_v17  ;;  %7836 = vmatpush.bf16.msra.mxu2 %v13056_v18  ;;  %v7573_v16 = vadd.f32 %v7572_v28, %v7560_v8 }
 0x6da   :  { %v12509_v14 = vld [vmem:[%s25061_s1 + $0x11b8] sm:$0xf0] }
 0x6db   :  { %v16116_v33 = vld [vmem:[%s25061_s1 + $0x139c] sm:$0xf]  ;;  %v12512_v38 = vor.u32 %v16052_v22, %v12509_v14  ;;  %7849 = vmatpush.bf16.msra.mxu3 %v13312_v31 }
 0x6dc   :  { %v12765_v35 = vld [vmem:[%s25061_s1 + $0x13b8] sm:$0xf0] }
 0x6dd   :  { %v16180_v32 = vld [vmem:[%s25061_s1 + $0x159c] sm:$0xf]  ;;  %v12768_v41 = vor.u32 %v16116_v33, %v12765_v35  ;;  %7811 = vmatpush.bf16.msra.mxu0 %v12512_v38 }
 0x6de   :  { %v13021_v37 = vld [vmem:[%s25061_s1 + $0x15b8] sm:$0xf0] }
 0x6df   :  { %v16244_v36 = vld [vmem:[%s25061_s1 + $0x179c] sm:$0xf]  ;;  %v13024_v43 = vor.u32 %v16180_v32, %v13021_v37  ;;  %7824 = vmatpush.bf16.msra.mxu1 %v12768_v41  ;;  %v7585_v32 = vpop.f32.mrf.mxu2 }
 0x6e0   :  { %v13277_v42 = vld [vmem:[%s25061_s1 + $0x17b8] sm:$0xf0]  ;;  %v7586_v41 = vadd.f32 %v7585_v32, %v7573_v16 }
 0x6e1   :  { %v16044_v45 = vld [vmem:[%s25061_s1 + $0x115c] sm:$0xf]  ;;  %v13280_v58 = vor.u32 %v16244_v36, %v13277_v42  ;;  %7837 = vmatpush.bf16.msra.mxu2 %v13024_v43  ;;  %v7598_v43 = vpop.f32.mrf.mxu3 }
 0x6e2   :  { %v12477_v47 = vld [vmem:[%s25061_s1 + $0x1178] sm:$0xf0] }
 0x6e3   :  { %v16108_v46 = vld [vmem:[%s25061_s1 + $0x135c] sm:$0xf]  ;;  %v12480_v52 = vor.u32 %v16044_v45, %v12477_v47  ;;  %7850 = vmatpush.bf16.msra.mxu3 %v13280_v58  ;;  %v23037_v58 = vadd.f32 %v7598_v43, %v7586_v41 }
 0x6e4   :  { %v12733_v57 = vld [vmem:[%s25061_s1 + $0x1378] sm:$0xf0] }
 0x6e5   :  { %v16172_v51 = vld [vmem:[%s25061_s1 + $0x155c] sm:$0xf]  ;;  %v12736_v55 = vor.u32 %v16108_v46, %v12733_v57  ;;  %7812 = vmatpush.bf16.msra.mxu0 %v12480_v52  ;;  %v7561_v57 = vpop.f32.mrf.mxu0 }
 0x6e6   :  { %v12989_v48 = vld [vmem:[%s25061_s1 + $0x1578] sm:$0xf0] }
 0x6e7   :  { %v16236_v49 = vld [vmem:[%s25061_s1 + $0x175c] sm:$0xf]  ;;  %v12992_v53 = vor.u32 %v16172_v51, %v12989_v48  ;;  %7825 = vmatpush.bf16.msra.mxu1 %v12736_v55  ;;  %v7574_v55 = vpop.f32.mrf.mxu1 }
 0x6e8   :  { %v13245_v34 = vld [vmem:[%s25061_s1 + $0x1778] sm:$0xf0] }
 0x6e9   :  { %v16036_v56 = vld [vmem:[%s25061_s1 + $0x111c] sm:$0xf]  ;;  %v13248_v40 = vor.u32 %v16236_v49, %v13245_v34  ;;  %7838 = vmatpush.bf16.msra.mxu2 %v12992_v53 }
 0x6ea   :  { %v12445_v2 = vld [vmem:[%s25061_s1 + $0x1138] sm:$0xf0] }
 0x6eb   :  { %v16100_v39 = vld [vmem:[%s25061_s1 + $0x131c] sm:$0xf]  ;;  %v12448_v63 = vor.u32 %v16036_v56, %v12445_v2  ;;  %7851 = vmatpush.bf16.msra.mxu3 %v13248_v40 }
 0x6ec   :  { %v12701_v44 = vld [vmem:[%s25061_s1 + $0x1338] sm:$0xf0] }
 0x6ed   :  { %v16164_v59 = vld [vmem:[%s25061_s1 + $0x151c] sm:$0xf]  ;;  %v12704_v1 = vor.u32 %v16100_v39, %v12701_v44  ;;  %7813 = vmatpush.bf16.msra.mxu0 %v12448_v63 }
 0x6ee   :  { %v12957_v0 = vld [vmem:[%s25061_s1 + $0x1538] sm:$0xf0] }
 0x6ef   :  { %v16228_v9 = vld [vmem:[%s25061_s1 + $0x171c] sm:$0xf]  ;;  %v12960_v4 = vor.u32 %v16164_v59, %v12957_v0  ;;  %7826 = vmatpush.bf16.msra.mxu1 %v12704_v1 }
 0x6f0   :  { %v13213_v61 = vld [vmem:[%s25061_s1 + $0x1738] sm:$0xf0] }
 0x6f1   :  { %v16028_v5 = vld [vmem:[%s25061_s1 + $0x10dc] sm:$0xf]  ;;  %v13216_v11 = vor.u32 %v16228_v9, %v13213_v61  ;;  %7839 = vmatpush.bf16.msra.mxu2 %v12960_v4 }
 0x6f2   :  { %v12413_v6 = vld [vmem:[%s25061_s1 + $0x10f8] sm:$0xf0] }
 0x6f3   :  { %v16092_v7 = vld [vmem:[%s25061_s1 + $0x12dc] sm:$0xf]  ;;  %v12416_v18 = vor.u32 %v16028_v5, %v12413_v6  ;;  %7852 = vmatpush.bf16.msra.mxu3 %v13216_v11  ;;  %v7587_v5 = vpop.f32.mrf.mxu2  ;;  %v7600_v11 = vpop.f32.mrf.mxu3 }
 0x6f4   :  { %v12669_v12 = vld [vmem:[%s25061_s1 + $0x12f8] sm:$0xf0] }
 0x6f5   :  { %v16156_v17 = vld [vmem:[%s25061_s1 + $0x14dc] sm:$0xf]  ;;  %v12672_v22 = vor.u32 %v16092_v7, %v12669_v12  ;;  %7814 = vmatpush.bf16.msra.mxu0 %v12416_v18 }
 0x6f6   :  { %v12925_v13 = vld [vmem:[%s25061_s1 + $0x14f8] sm:$0xf0] }
 0x6f7   :  { %v16220_v29 = vld [vmem:[%s25061_s1 + $0x16dc] sm:$0xf]  ;;  %v12928_v14 = vor.u32 %v16156_v17, %v12925_v13  ;;  %7827 = vmatpush.bf16.msra.mxu1 %v12672_v22 }
 0x6f8   :  { %v13181_v25 = vld [vmem:[%s25061_s1 + $0x16f8] sm:$0xf0] }
 0x6f9   :  { %v16020_v33 = vld [vmem:[%s25061_s1 + $0x109c] sm:$0xf]  ;;  %v13184_v37 = vor.u32 %v16220_v29, %v13181_v25  ;;  %7840 = vmatpush.bf16.msra.mxu2 %v12928_v14 }
 0x6fa   :  { %v12381_v31 = vld [vmem:[%s25061_s1 + $0x10b8] sm:$0xf0] }
 0x6fb   :  { %v16084_v35 = vld [vmem:[%s25061_s1 + $0x129c] sm:$0xf]  ;;  %v12384_v46 = vor.u32 %v16020_v33, %v12381_v31  ;;  %7853 = vmatpush.bf16.msra.mxu3 %v13184_v37 }
 0x6fc   :  { %v12637_v36 = vld [vmem:[%s25061_s1 + $0x12b8] sm:$0xf0] }
 0x6fd   :  { %v16148_v42 = vld [vmem:[%s25061_s1 + $0x149c] sm:$0xf]  ;;  %v12640_v51 = vor.u32 %v16084_v35, %v12637_v36  ;;  %7815 = vmatpush.bf16.msra.mxu0 %v12384_v46 }
 0x6fe   :  { %v12893_v38 = vld [vmem:[%s25061_s1 + $0x14b8] sm:$0xf0] }
 0x6ff   :  { %v16212_v45 = vld [vmem:[%s25061_s1 + $0x169c] sm:$0xf]  ;;  %v12896_v48 = vor.u32 %v16148_v42, %v12893_v38  ;;  %7828 = vmatpush.bf16.msra.mxu1 %v12640_v51 }
 0x700   :  { %v13149_v47 = vld [vmem:[%s25061_s1 + $0x16b8] sm:$0xf0] }
 0x701   :  { %v16012_v49 = vld [vmem:[%s25061_s1 + $0x105c] sm:$0xf]  ;;  %v13152_v53 = vor.u32 %v16212_v45, %v13149_v47  ;;  %7841 = vmatpush.bf16.msra.mxu2 %v12896_v48 }
 0x702   :  { %v12349_v34 = vld [vmem:[%s25061_s1 + $0x1078] sm:$0xf0] }
 0x703   :  { %v16076_v52 = vld [vmem:[%s25061_s1 + $0x125c] sm:$0xf]  ;;  %v12352_v59 = vor.u32 %v16012_v49, %v12349_v34  ;;  %7854 = vmatpush.bf16.msra.mxu3 %v13152_v53 }
 0x704   :  { %v12605_v56 = vld [vmem:[%s25061_s1 + $0x1278] sm:$0xf0] }
 0x705   :  { %v16140_v2 = vld [vmem:[%s25061_s1 + $0x145c] sm:$0xf]  ;;  %v12608_v61 = vor.u32 %v16076_v52, %v12605_v56  ;;  %7816 = vmatpush.bf16.msra.mxu0 %v12352_v59 }
 0x706   :  { %v12861_v39 = vld [vmem:[%s25061_s1 + $0x1478] sm:$0xf0] }
 0x707   :  { %v16204_v40 = vld [vmem:[%s25061_s1 + $0x165c] sm:$0xf]  ;;  %v12864_v63 = vor.u32 %v16140_v2, %v12861_v39  ;;  %7829 = vmatpush.bf16.msra.mxu1 %v12608_v61 }
 0x708   :  { %v13117_v44 = vld [vmem:[%s25061_s1 + $0x1678] sm:$0xf0] }
 0x709   :  { %v16004_v0 = vld [vmem:[%s25061_s1 + $0x101c] sm:$0xf]  ;;  %v13120_v6 = vor.u32 %v16204_v40, %v13117_v44  ;;  %7842 = vmatpush.bf16.msra.mxu2 %v12864_v63 }
 0x70a   :  { %v12317_v9 = vld [vmem:[%s25061_s1 + $0x1038] sm:$0xf0] }
 0x70b   :  { %v16068_v3 = vld [vmem:[%s25061_s1 + $0x121c] sm:$0xf]  ;;  %v12320_v29 = vor.u32 %v16004_v0, %v12317_v9  ;;  %7855 = vmatpush.bf16.msra.mxu3 %v13120_v6 }
 0x70c   :  { %v12573_v1 = vld [vmem:[%s25061_s1 + $0x1238] sm:$0xf0] }
 0x70d   :  { %v16132_v4 = vld [vmem:[%s25061_s1 + $0x141c] sm:$0xf]  ;;  %v12576_v22 = vor.u32 %v16068_v3, %v12573_v1  ;;  %7817 = vmatpush.bf16.msra.mxu0 %v12320_v29 }
 0x70e   :  { %v12829_v7 = vld [vmem:[%s25061_s1 + $0x1438] sm:$0xf0] }
 0x70f   :  { %v16196_v8 = vld [vmem:[%s25061_s1 + $0x161c] sm:$0xf]  ;;  %v12832_v14 = vor.u32 %v16132_v4, %v12829_v7  ;;  %7830 = vmatpush.bf16.msra.mxu1 %v12576_v22  ;;  %v7611_v4 = vpop.f32.mrf.mxu0 }
 0x710   :  { %v13085_v28 = vld [vmem:[%s25061_s1 + $0x1638] sm:$0xf0]  ;;  %7818 = vmatmul.bf16.vlgmr.msra.gmra.mxu0 %v17527_v19  ;;  %v7612_v7 = vadd.f32 %v7611_v4, %v23037_v58 }
 0x711   :  { %v16316_v12 = vld [vmem:[%s25061_s1 + $0x19dc] sm:$0xf]  ;;  %v13088_v35 = vor.u32 %v16196_v8, %v13085_v28  ;;  %7843 = vmatpush.bf16.msra.mxu2 %v12832_v14  ;;  %v7624_v28 = vpop.f32.mrf.mxu1 }
 0x712   :  { %v13565_v17 = vld [vmem:[%s25061_s1 + $0x19f8] sm:$0xf0]  ;;  %7831 = vmatmul.bf16.vlgmr.msra.gmra.mxu1 %v17540_v24 }
 0x713   :  { %v16380_v13 = vld [vmem:[%s25061_s1 + $0x1bdc] sm:$0xf]  ;;  %v13568_v32 = vor.u32 %v16316_v12, %v13565_v17  ;;  %7856 = vmatpush.bf16.msra.mxu3 %v13088_v35 }
 0x714   :  { %v13821_v25 = vld [vmem:[%s25061_s1 + $0x1bf8] sm:$0xf0]  ;;  %7844 = vmatmul.bf16.vlgmr.msra.gmra.mxu2 %v17538_v23 }
 0x715   :  { %v16444_v16 = vld [vmem:[%s25061_s1 + $0x1ddc] sm:$0xf]  ;;  %v13824_v37 = vor.u32 %v16380_v13, %v13821_v25  ;;  %7862 = vmatpush.bf16.msrb.mxu0 %v13568_v32  ;;  %v23197_v25 = vadd.f32 %v7624_v28, %v7612_v7  ;;  %v14451_v28 = vld [vmem:[%s25063_s3 + $0xe0] sm:$0xf] }
 0x716   :  { %v14077_v18 = vld [vmem:[%s25061_s1 + $0x1df8] sm:$0xf0]  ;;  %7857 = vmatmul.bf16.vlgmr.msra.gmra.mxu3 %v17548_v27 }
 0x717   :  { %v16508_v33 = vld [vmem:[%s25061_s1 + $0x1fdc] sm:$0xf]  ;;  %v14080_v36 = vor.u32 %v16444_v16, %v14077_v18  ;;  %7875 = vmatpush.bf16.msrb.mxu1 %v13824_v37 }
 0x718   :  { %v14333_v31 = vld [vmem:[%s25061_s1 + $0x1ff8] sm:$0xf0] }
 0x719   :  { %v16308_v42 = vld [vmem:[%s25061_s1 + $0x199c] sm:$0xf]  ;;  %v14336_v43 = vor.u32 %v16508_v33, %v14333_v31  ;;  %7888 = vmatpush.bf16.msrb.mxu2 %v14080_v36 }
 0x71a   :  { %v13533_v38 = vld [vmem:[%s25061_s1 + $0x19b8] sm:$0xf0] }
 0x71b   :  { %v16372_v41 = vld [vmem:[%s25061_s1 + $0x1b9c] sm:$0xf]  ;;  %v13536_v48 = vor.u32 %v16308_v42, %v13533_v38  ;;  %7901 = vmatpush.bf16.msrb.mxu3 %v14336_v43 }
 0x71c   :  { %v13789_v45 = vld [vmem:[%s25061_s1 + $0x1bb8] sm:$0xf0] }
 0x71d   :  { %v16436_v47 = vld [vmem:[%s25061_s1 + $0x1d9c] sm:$0xf]  ;;  %v13792_v49 = vor.u32 %v16372_v41, %v13789_v45  ;;  %7863 = vmatpush.bf16.msrb.mxu0 %v13536_v48  ;;  %v23223_v41 = vpop.f32.mrf.mxu2  ;;  %v7613_v48 = vpop.f32.mrf.mxu0 }
 0x71e   :  { %v14045_v46 = vld [vmem:[%s25061_s1 + $0x1db8] sm:$0xf0]  ;;  %v16635_v48 = vld [vmem:[%s25063_s3 + $0x3cc] sm:$0xf0] }
 0x71f   :  { %v16500_v57 = vld [vmem:[%s25061_s1 + $0x1f9c] sm:$0xf]  ;;  %v14048_v34 = vor.u32 %v16436_v47, %v14045_v46  ;;  %7876 = vmatpush.bf16.msrb.mxu1 %v13792_v49  ;;  %v23234_v46 = vpop.f32.mrf.mxu3 }
 0x720   :  { %v14301_v51 = vld [vmem:[%s25061_s1 + $0x1fb8] sm:$0xf0] }
 0x721   :  { %v16300_v52 = vld [vmem:[%s25061_s1 + $0x195c] sm:$0xf]  ;;  %v14304_v56 = vor.u32 %v16500_v57, %v14301_v51  ;;  %7889 = vmatpush.bf16.msrb.mxu2 %v14048_v34  ;;  %v7626_v34 = vpop.f32.mrf.mxu1 }
 0x722   :  { %v13501_v55 = vld [vmem:[%s25061_s1 + $0x1978] sm:$0xf0] }
 0x723   :  { %v16364_v53 = vld [vmem:[%s25061_s1 + $0x1b5c] sm:$0xf]  ;;  %v13504_v59 = vor.u32 %v16300_v52, %v13501_v55  ;;  %7902 = vmatpush.bf16.msrb.mxu3 %v14304_v56 }
 0x724   :  { %v13757_v2 = vld [vmem:[%s25061_s1 + $0x1b78] sm:$0xf0] }
 0x725   :  { %v16428_v39 = vld [vmem:[%s25061_s1 + $0x1d5c] sm:$0xf]  ;;  %v13760_v0 = vor.u32 %v16364_v53, %v13757_v2  ;;  %7864 = vmatpush.bf16.msrb.mxu0 %v13504_v59 }
 0x726   :  { %v14013_v40 = vld [vmem:[%s25061_s1 + $0x1d78] sm:$0xf0] }
 0x727   :  { %v16492_v19 = vld [vmem:[%s25061_s1 + $0x1f5c] sm:$0xf]  ;;  %v14016_v9 = vor.u32 %v16428_v39, %v14013_v40  ;;  %7877 = vmatpush.bf16.msrb.mxu1 %v13760_v0 }
 0x728   :  { %v14269_v44 = vld [vmem:[%s25061_s1 + $0x1f78] sm:$0xf0] }
 0x729   :  { %v16292_v23 = vld [vmem:[%s25061_s1 + $0x191c] sm:$0xf]  ;;  %v14272_v27 = vor.u32 %v16492_v19, %v14269_v44  ;;  %7890 = vmatpush.bf16.msrb.mxu2 %v14016_v9 }
 0x72a   :  { %v13469_v24 = vld [vmem:[%s25061_s1 + $0x1938] sm:$0xf0] }
 0x72b   :  { %v16356_v61 = vld [vmem:[%s25061_s1 + $0x1b1c] sm:$0xf]  ;;  %v13472_v8 = vor.u32 %v16292_v23, %v13469_v24  ;;  %7903 = vmatpush.bf16.msrb.mxu3 %v14272_v27 }
 0x72c   :  { %v13725_v63 = vld [vmem:[%s25061_s1 + $0x1b38] sm:$0xf0] }
 0x72d   :  { %v16420_v3 = vld [vmem:[%s25061_s1 + $0x1d1c] sm:$0xf]  ;;  %v13728_v11 = vor.u32 %v16356_v61, %v13725_v63  ;;  %7865 = vmatpush.bf16.msrb.mxu0 %v13472_v8  ;;  %v7639_v8 = vpop.f32.mrf.mxu2 }
 0x72e   :  { %v13981_v1 = vld [vmem:[%s25061_s1 + $0x1d38] sm:$0xf0]  ;;  %v14387_v8 = vld [vmem:[%s25063_s3 + $0x60] sm:$0xf] }
 0x72f   :  { %v16484_v5 = vld [vmem:[%s25061_s1 + $0x1f1c] sm:$0xf]  ;;  %v13984_v12 = vor.u32 %v16420_v3, %v13981_v1  ;;  %7878 = vmatpush.bf16.msrb.mxu1 %v13728_v11  ;;  %v16543_v11 = vld [vmem:[%s25063_s3 + $0xec] sm:$0xf0] }
 0x730   :  { %v14237_v6 = vld [vmem:[%s25061_s1 + $0x1f38] sm:$0xf0] }
 0x731   :  { %v16284_v17 = vld [vmem:[%s25061_s1 + $0x18dc] sm:$0xf]  ;;  %v14240_v58 = vor.u32 %v16484_v5, %v14237_v6  ;;  %7891 = vmatpush.bf16.msrb.mxu2 %v13984_v12  ;;  %v14579_v12 = vld [vmem:[%s25063_s3 + $0x1e0] sm:$0xf] }
 0x732   :  { %v13437_v13 = vld [vmem:[%s25061_s1 + $0x18f8] sm:$0xf0] }
 0x733   :  { %v16348_v29 = vld [vmem:[%s25061_s1 + $0x1adc] sm:$0xf]  ;;  %v13440_v31 = vor.u32 %v16284_v17, %v13437_v13  ;;  %7904 = vmatpush.bf16.msrb.mxu3 %v14240_v58  ;;  %v7652_v17 = vpop.f32.mrf.mxu3  ;;  %v14707_v58 = vld [vmem:[%s25063_s3 + $0x2e0] sm:$0xf] }
 0x734   :  { %v13693_v16 = vld [vmem:[%s25061_s1 + $0x1af8] sm:$0xf0]  ;;  %v16559_v17 = vld [vmem:[%s25063_s3 + $0x16c] sm:$0xf0] }
 0x735   :  { %v16412_v18 = vld [vmem:[%s25061_s1 + $0x1cdc] sm:$0xf]  ;;  %v13696_v35 = vor.u32 %v16348_v29, %v13693_v16  ;;  %7866 = vmatpush.bf16.msrb.mxu0 %v13440_v31  ;;  %v16575_v29 = vld [vmem:[%s25063_s3 + $0x1ec] sm:$0xf0] }
 0x736   :  { %v13949_v22 = vld [vmem:[%s25061_s1 + $0x1cf8] sm:$0xf0]  ;;  %v16607_v16 = vld [vmem:[%s25063_s3 + $0x2ec] sm:$0xf0] }
 0x737   :  { %v16476_v14 = vld [vmem:[%s25061_s1 + $0x1edc] sm:$0xf]  ;;  %v13952_v32 = vor.u32 %v16412_v18, %v13949_v22  ;;  %7879 = vmatpush.bf16.msrb.mxu1 %v13696_v35  ;;  %v14452_v35 = vor.u32 %v16543_v11, %v14451_v28  ;;  %v16527_v28 = vld [vmem:[%s25063_s3 + $0x6c] sm:$0xf0]  ;;  %v14515_v11 = vld [vmem:[%s25063_s3 + $0x160] sm:$0xf] }
 0x738   :  { %v14205_v33 = vld [vmem:[%s25061_s1 + $0x1ef8] sm:$0xf0] }
 0x739   :  { %v16276_v37 = vld [vmem:[%s25061_s1 + $0x189c] sm:$0xf]  ;;  %v14208_v38 = vor.u32 %v16476_v14, %v14205_v33  ;;  %7892 = vmatpush.bf16.msrb.mxu2 %v13952_v32  ;;  %v14835_v14 = vld [vmem:[%s25063_s3 + $0x3e0] sm:$0xf]  ;;  %v16639_v33 = vld [vmem:[%s25063_s3 + $0x3ec] sm:$0xf0]  ;;  %v14580_v32 = vor.u32 %v16575_v29, %v14579_v12 }
 0x73a   :  { %v13405_v36 = vld [vmem:[%s25061_s1 + $0x18b8] sm:$0xf0]  ;;  %v16591_v29 = vld [vmem:[%s25063_s3 + $0x26c] sm:$0xf0] }
 0x73b   :  { %v16340_v42 = vld [vmem:[%s25061_s1 + $0x1a9c] sm:$0xf]  ;;  %v13408_v49 = vor.u32 %v16276_v37, %v13405_v36  ;;  %7905 = vmatpush.bf16.msrb.mxu3 %v14208_v38  ;;  %v14708_v37 = vor.u32 %v16607_v16, %v14707_v58  ;;  %v14435_v36 = vld [vmem:[%s25063_s3 + $0xc0] sm:$0xf]  ;;  %v16623_v16 = vld [vmem:[%s25063_s3 + $0x36c] sm:$0xf0] }
 0x73c   :  { %v13661_v43 = vld [vmem:[%s25061_s1 + $0x1ab8] sm:$0xf0]  ;;  %v14563_v38 = vld [vmem:[%s25063_s3 + $0x1c0] sm:$0xf] }
 0x73d   :  { %v16404_v45 = vld [vmem:[%s25061_s1 + $0x1c9c] sm:$0xf]  ;;  %v13664_v52 = vor.u32 %v16340_v42, %v13661_v43  ;;  %7867 = vmatpush.bf16.msrb.mxu0 %v13408_v49  ;;  %v16539_v42 = vld [vmem:[%s25063_s3 + $0xcc] sm:$0xf0]  ;;  %v14836_v43 = vor.u32 %v16639_v33, %v14835_v14  ;;  %v14771_v58 = vld [vmem:[%s25063_s3 + $0x360] sm:$0xf] }
 0x73e   :  { %v13917_v47 = vld [vmem:[%s25061_s1 + $0x1cb8] sm:$0xf0]  ;;  %v14436_v49 = vor.u32 %v16539_v42, %v14435_v36  ;;  %v14371_v33 = vld [vmem:[%s25063_s3 + $0x40] sm:$0xf]  ;;  %v16555_v36 = vld [vmem:[%s25063_s3 + $0x14c] sm:$0xf0] }
 0x73f   :  { %v16468_v57 = vld [vmem:[%s25061_s1 + $0x1e9c] sm:$0xf]  ;;  %v13920_v55 = vor.u32 %v16404_v45, %v13917_v47  ;;  %7880 = vmatpush.bf16.msrb.mxu1 %v13664_v52  ;;  %v16571_v45 = vld [vmem:[%s25063_s3 + $0x1cc] sm:$0xf0]  ;;  %v14691_v47 = vld [vmem:[%s25063_s3 + $0x2c0] sm:$0xf] }
 0x740   :  { %v14173_v51 = vld [vmem:[%s25061_s1 + $0x1eb8] sm:$0xf0]  ;;  %v14564_v34 = vor.u32 %v16571_v45, %v14563_v38  ;;  %v14627_v42 = vld [vmem:[%s25063_s3 + $0x240] sm:$0xf]  ;;  %v16587_v38 = vld [vmem:[%s25063_s3 + $0x24c] sm:$0xf0] }
 0x741   :  { %v16268_v53 = vld [vmem:[%s25061_s1 + $0x185c] sm:$0xf]  ;;  %v14176_v39 = vor.u32 %v16468_v57, %v14173_v51  ;;  %7893 = vmatpush.bf16.msrb.mxu2 %v13920_v55  ;;  %v16603_v57 = vld [vmem:[%s25063_s3 + $0x2cc] sm:$0xf0]  ;;  %v14819_v51 = vld [vmem:[%s25063_s3 + $0x3c0] sm:$0xf] }
 0x742   :  { %v13373_v56 = vld [vmem:[%s25061_s1 + $0x1878] sm:$0xf0]  ;;  %v14692_v52 = vor.u32 %v16603_v57, %v14691_v47  ;;  %v14419_v55 = vld [vmem:[%s25063_s3 + $0xa0] sm:$0xf]  ;;  %v16619_v47 = vld [vmem:[%s25063_s3 + $0x34c] sm:$0xf0] }
 0x743   :  { %v16332_v2 = vld [vmem:[%s25061_s1 + $0x1a5c] sm:$0xf]  ;;  %v13376_v9 = vor.u32 %v16268_v53, %v13373_v56  ;;  %7906 = vmatpush.bf16.msrb.mxu3 %v14176_v39  ;;  %v16535_v53 = vld [vmem:[%s25063_s3 + $0xac] sm:$0xf0]  ;;  %v14547_v56 = vld [vmem:[%s25063_s3 + $0x1a0] sm:$0xf] }
 0x744   :  { %v13629_v40 = vld [vmem:[%s25061_s1 + $0x1a78] sm:$0xf0]  ;;  %v16567_v39 = vld [vmem:[%s25063_s3 + $0x1ac] sm:$0xf0]  ;;  %v14755_v45 = vld [vmem:[%s25063_s3 + $0x340] sm:$0xf] }
 0x745   :  { %v16396_v19 = vld [vmem:[%s25061_s1 + $0x1c5c] sm:$0xf]  ;;  %v13632_v61 = vor.u32 %v16332_v2, %v13629_v40  ;;  %7868 = vmatpush.bf16.msrb.mxu0 %v13376_v9  ;;  %v14820_v2 = vor.u32 %v16635_v48, %v14819_v51  ;;  %v14675_v40 = vld [vmem:[%s25063_s3 + $0x2a0] sm:$0xf] }
 0x746   :  { %v13885_v44 = vld [vmem:[%s25061_s1 + $0x1c78] sm:$0xf0] }
 0x747   :  { %v16460_v59 = vld [vmem:[%s25061_s1 + $0x1e5c] sm:$0xf]  ;;  %v13888_v27 = vor.u32 %v16396_v19, %v13885_v44  ;;  %7881 = vmatpush.bf16.msrb.mxu1 %v13632_v61  ;;  %v16599_v19 = vld [vmem:[%s25063_s3 + $0x2ac] sm:$0xf0]  ;;  %v14659_v61 = vld [vmem:[%s25063_s3 + $0x280] sm:$0xf] }
 0x748   :  { %v14141_v0 = vld [vmem:[%s25061_s1 + $0x1e78] sm:$0xf0]  ;;  %v16631_v44 = vld [vmem:[%s25063_s3 + $0x3ac] sm:$0xf0]  ;;  %v14676_v9 = vor.u32 %v16599_v19, %v14675_v40  ;;  %v14739_v19 = vld [vmem:[%s25063_s3 + $0x320] sm:$0xf] }
 0x749   :  { %v16260_v23 = vld [vmem:[%s25061_s1 + $0x181c] sm:$0xf]  ;;  %v14144_v4 = vor.u32 %v16460_v59, %v14141_v0  ;;  %7894 = vmatpush.bf16.msrb.mxu2 %v13888_v27  ;;  %v14420_v59 = vor.u32 %v16535_v53, %v14419_v55  ;;  %v14548_v0 = vor.u32 %v16567_v39, %v14547_v56  ;;  %v16595_v27 = vld [vmem:[%s25063_s3 + $0x28c] sm:$0xf0]  ;;  %v14483_v53 = vld [vmem:[%s25063_s3 + $0x120] sm:$0xf]  ;;  %v14756_v56 = vor.u32 %v16619_v47, %v14755_v45 }
 0x74a   :  { %v13341_v24 = vld [vmem:[%s25061_s1 + $0x1838] sm:$0xf0]  ;;  %v16519_v55 = vld [vmem:[%s25063_s3 + $0x2c] sm:$0xf0]  ;;  %v14611_v39 = vld [vmem:[%s25063_s3 + $0x220] sm:$0xf] }
 0x74b   :  { %v16324_v63 = vld [vmem:[%s25061_s1 + $0x1a1c] sm:$0xf]  ;;  %v13344_v13 = vor.u32 %v16260_v23, %v13341_v24  ;;  %7907 = vmatpush.bf16.msrb.mxu3 %v14144_v4  ;;  %v14531_v23 = vld [vmem:[%s25063_s3 + $0x180] sm:$0xf]  ;;  %v16563_v24 = vld [vmem:[%s25063_s3 + $0x18c] sm:$0xf0] }
 0x74c   :  { %v13597_v3 = vld [vmem:[%s25061_s1 + $0x1a38] sm:$0xf0]  ;;  %v16583_v40 = vld [vmem:[%s25063_s3 + $0x22c] sm:$0xf0] }
 0x74d   :  { %v16388_v1 = vld [vmem:[%s25061_s1 + $0x1c1c] sm:$0xf]  ;;  %v13600_v18 = vor.u32 %v16324_v63, %v13597_v3  ;;  %7869 = vmatpush.bf16.msrb.mxu0 %v13344_v13  ;;  %v23384_v63 = vpop.f32.mrf.mxu0  ;;  %v14787_v3 = vld [vmem:[%s25063_s3 + $0x380] sm:$0xf] }
 0x74e   :  { %v13853_v5 = vld [vmem:[%s25061_s1 + $0x1c38] sm:$0xf0]  ;;  %v14643_v13 = vld [vmem:[%s25063_s3 + $0x260] sm:$0xf] }
 0x74f   :  { %v16452_v6 = vld [vmem:[%s25061_s1 + $0x1e1c] sm:$0xf]  ;;  %v13856_v22 = vor.u32 %v16388_v1, %v13853_v5  ;;  %7882 = vmatpush.bf16.msrb.mxu1 %v13600_v18  ;;  %v16627_v1 = vld [vmem:[%s25063_s3 + $0x38c] sm:$0xf0]  ;;  %v23392_v5 = vpop.f32.mrf.mxu1  ;;  %v14388_v18 = vor.u32 %v16527_v28, %v14387_v8  ;;  %v14644_v14 = vor.u32 %v16591_v29, %v14643_v13  ;;  %v7914_v13 = vmax.f32 %v18647_v30, 0.0 }
 0x750   :  { %v14109_v7 = vld [vmem:[%s25061_s1 + $0x1e38] sm:$0xf0]  ;;  %7870 = vmatmul.bf16.vlgmr.msrb.gmra.mxu0 %v17731_v15  ;;  %v14803_v15 = vld [vmem:[%s25063_s3 + $0x3a0] sm:$0xf]  ;;  %v14788_v12 = vor.u32 %v16627_v1, %v14787_v3  ;;  %v16611_v3 = vld [vmem:[%s25063_s3 + $0x30c] sm:$0xf0] }
 0x751   :  { %v14112_v31 = vor.u32 %v16452_v6, %v14109_v7  ;;  %7895 = vmatpush.bf16.msrb.mxu2 %v13856_v22  ;;  %9476 = vmatpush.bf16.msra.mxu0 %v14452_v35  ;;  %v14532_v6 = vor.u32 %v16563_v24, %v14531_v23  ;;  %v14660_v7 = vor.u32 %v16595_v27, %v14659_v61  ;;  %v14499_v35 = vld [vmem:[%s25063_s3 + $0x140] sm:$0xf]  ;;  %v16547_v23 = vld [vmem:[%s25063_s3 + $0x10c] sm:$0xf0]  ;;  %v7915_v29 = vmax.f32 %v19445_v50, 0.0 }
 0x752   :  { %7883 = vmatmul.bf16.vlgmr.msrb.gmra.mxu1 %v17744_v21  ;;  %v16531_v21 = vld [vmem:[%s25063_s3 + $0x8c] sm:$0xf0]  ;;  %v14516_v22 = vor.u32 %v16559_v17, %v14515_v11  ;;  %v14723_v27 = vld [vmem:[%s25063_s3 + $0x300] sm:$0xf] }
 0x753   :  { %7908 = vmatpush.bf16.msrb.mxu3 %v14112_v31  ;;  %9489 = vmatpush.bf16.msra.mxu1 %v14580_v32  ;;  %v16523_v31 = vld [vmem:[%s25063_s3 + $0x4c] sm:$0xf0]  ;;  %v14772_v32 = vor.u32 %v16623_v16, %v14771_v58  ;;  %v15075_v50 = vld [vmem:[%s25063_s3 + $0x5c0] sm:$0xf] }
 0x754   :  { %7896 = vmatmul.bf16.vlgmr.msrb.gmra.mxu2 %v17742_v20  ;;  %v14403_v20 = vld [vmem:[%s25063_s3 + $0x80] sm:$0xf]  ;;  %v14372_v51 = vor.u32 %v16523_v31, %v14371_v33  ;;  %v16579_v61 = vld [vmem:[%s25063_s3 + $0x20c] sm:$0xf0] }
 0x755   :  { %9502 = vmatpush.bf16.msra.mxu2 %v14708_v37  ;;  %9477 = vmatpush.bf16.msra.mxu0 %v14436_v49  ;;  %v14404_v4 = vor.u32 %v16531_v21, %v14403_v20  ;;  %v23427_v37 = vpop.f32.mrf.mxu2  ;;  %v7665_v57 = vpop.f32.mrf.mxu0  ;;  %v14500_v49 = vor.u32 %v16555_v36, %v14499_v35  ;;  %v14612_v20 = vor.u32 %v16583_v40, %v14611_v39  ;;  %v14467_v21 = vld [vmem:[%s25063_s3 + $0x100] sm:$0xf]  ;;  %v16703_v11 = vld [vmem:[%s25063_s3 + $0x5ec] sm:$0xf0] }
 0x756   :  { %7909 = vmatmul.bf16.vlgmr.msrb.gmra.mxu3 %v17752_v26  ;;  %v14804_v26 = vor.u32 %v16631_v44, %v14803_v15  ;;  %v16615_v15 = vld [vmem:[%s25063_s3 + $0x32c] sm:$0xf0]  ;;  %v14468_v58 = vor.u32 %v16547_v23, %v14467_v21  ;;  %v14915_v40 = vld [vmem:[%s25063_s3 + $0x480] sm:$0xf] }
 0x757   :  { %9515 = vmatpush.bf16.msra.mxu3 %v14836_v43  ;;  %9490 = vmatpush.bf16.msra.mxu1 %v14564_v34  ;;  %v23438_v43 = vpop.f32.mrf.mxu3  ;;  %v7678_v48 = vpop.f32.mrf.mxu1  ;;  %v14628_v34 = vor.u32 %v16587_v38, %v14627_v42  ;;  %v14740_v24 = vor.u32 %v16615_v15, %v14739_v19  ;;  %v16735_v17 = vld [vmem:[%s25063_s3 + $0x6ec] sm:$0xf0]  ;;  %v23534_v42 = vpack.c.bf16 %v7914_v13, %v7914_v13 }
 0x758   :  { %v16667_v30 = vld [vmem:[%s25063_s3 + $0x4cc] sm:$0xf0]  ;;  %v23536_v38 = vpack.c.bf16 %v7915_v29, %v7915_v29  ;;  %v14883_v29 = vld [vmem:[%s25063_s3 + $0x440] sm:$0xf] }
 0x759   :  { %9503 = vmatpush.bf16.msra.mxu2 %v14692_v52  ;;  %9478 = vmatpush.bf16.msra.mxu0 %v14420_v59  ;;  %v14355_v52 = vld [vmem:[%s25063_s3 + $0x20] sm:$0xf]  ;;  %v16731_v36 = vld [vmem:[%s25063_s3 + $0x6cc] sm:$0xf0] }
 0x75a   :  { %v14356_v44 = vor.u32 %v16519_v55, %v14355_v52  ;;  %v14339_v59 = vld [vmem:[%s25063_s3] sm:$0xf]  ;;  %v16695_v55 = vld [vmem:[%s25063_s3 + $0x5ac] sm:$0xf0] }
 0x75b   :  { %9516 = vmatpush.bf16.msra.mxu3 %v14820_v2  ;;  %9491 = vmatpush.bf16.msra.mxu1 %v14548_v0  ;;  %v16551_v2 = vld [vmem:[%s25063_s3 + $0x12c] sm:$0xf0]  ;;  %v15059_v52 = vld [vmem:[%s25063_s3 + $0x5a0] sm:$0xf] }
 0x75c   :  { %v16515_v0 = vld [vmem:[%s25063_s3 + $0xc] sm:$0xf0]  ;;  %v15060_v19 = vor.u32 %v16695_v55, %v15059_v52  ;;  %v14851_v55 = vld [vmem:[%s25063_s3 + $0x400] sm:$0xf] }
 0x75d   :  { %9504 = vmatpush.bf16.msra.mxu2 %v14676_v9  ;;  %9479 = vmatpush.bf16.msra.mxu0 %v14404_v4  ;;  %v14484_v9 = vor.u32 %v16551_v2, %v14483_v53  ;;  %v7691_v1 = vpop.f32.mrf.mxu2  ;;  %v14963_v4 = vld [vmem:[%s25063_s3 + $0x4e0] sm:$0xf]  ;;  %v14340_v28 = vor.u32 %v16515_v0, %v14339_v59  ;;  %v7638_v2 = vadd.f32 %v23223_v41, %v23197_v25  ;;  %v16691_v0 = vld [vmem:[%s25063_s3 + $0x58c] sm:$0xf0] }
 0x75e   :  { %v15187_v53 = vld [vmem:[%s25063_s3 + $0x6a0] sm:$0xf] }
 0x75f   :  { %9517 = vmatpush.bf16.msra.mxu3 %v14804_v26  ;;  %9492 = vmatpush.bf16.msra.mxu1 %v14532_v6  ;;  %v14595_v26 = vld [vmem:[%s25063_s3 + $0x200] sm:$0xf]  ;;  %v16671_v6 = vld [vmem:[%s25063_s3 + $0x4ec] sm:$0xf0]  ;;  %v7704_v8 = vpop.f32.mrf.mxu3  ;;  %v7651_v21 = vadd.f32 %v23234_v46, %v7638_v2 }
 0x760   :  { %v14596_v16 = vor.u32 %v16579_v61, %v14595_v26  ;;  %v14964_v33 = vor.u32 %v16671_v6, %v14963_v4  ;;  %v15043_v59 = vld [vmem:[%s25063_s3 + $0x580] sm:$0xf]  ;;  %v7715_v26 = vpop.f32.mrf.mxu0  ;;  %v7728_v4 = vpop.f32.mrf.mxu1  ;;  %v16687_v6 = vld [vmem:[%s25063_s3 + $0x56c] sm:$0xf0] }
 0x761   :  { %9505 = vmatpush.bf16.msra.mxu2 %v14660_v7  ;;  %9480 = vmatpush.bf16.msra.mxu0 %v14388_v18  ;;  %v15091_v7 = vld [vmem:[%s25063_s3 + $0x5e0] sm:$0xf]  ;;  %v7916_v18 = vmax.f32 %v20243_v10, 0.0  ;;  %v16699_v10 = vld [vmem:[%s25063_s3 + $0x5cc] sm:$0xf0] }
 0x762   :  { %v15092_v31 = vor.u32 %v16703_v11, %v15091_v7  ;;  %v16813_v25 = vld [vmem:[%s25062_s2] sm:$0xff]  ;;  %v16719_v8 = vld [vmem:[%s25063_s3 + $0x66c] sm:$0xf0] }
 0x763   :  { %9518 = vmatpush.bf16.msra.mxu3 %v14788_v12  ;;  %9493 = vmatpush.bf16.msra.mxu1 %v14516_v22  ;;  %v15219_v12 = vld [vmem:[%s25063_s3 + $0x6e0] sm:$0xf]  ;;  %v7917_v22 = vmax.f32 %v21041_v60, 0.0  ;;  %v23538_v45 = vpack.c.bf16 %v7916_v18, %v7916_v18  ;;  %v1121_v41 = vperm.slane %v16813_v25, 7  ;;  %v16683_v18 = vld [vmem:[%s25063_s3 + $0x54c] sm:$0xf0] }
 0x764   :  { %v15220_v35 = vor.u32 %v16735_v17, %v15219_v12  ;;  %v15203_v60 = vld [vmem:[%s25063_s3 + $0x6c0] sm:$0xf] }
 0x765   :  { %9506 = vmatpush.bf16.msra.mxu2 %v14644_v14  ;;  %9481 = vmatpush.bf16.msra.mxu0 %v14372_v51  ;;  %v14724_v14 = vor.u32 %v16611_v3, %v14723_v27  ;;  %v23540_v57 = vpack.c.bf16 %v7917_v22, %v7917_v22  ;;  %v15076_v51 = vor.u32 %v16699_v10, %v15075_v50  ;;  %v14899_v27 = vld [vmem:[%s25063_s3 + $0x460] sm:$0xf]  ;;  %v16655_v3 = vld [vmem:[%s25063_s3 + $0x46c] sm:$0xf0] }
 0x766   :  { %v15204_v48 = vor.u32 %v16731_v36, %v15203_v60  ;;  %v15027_v1 = vld [vmem:[%s25063_s3 + $0x560] sm:$0xf]  ;;  %v7716_v46 = vadd.f32 %v7715_v26, %v1121_v41  ;;  %v14900_v12 = vor.u32 %v16655_v3, %v14899_v27  ;;  %v7918_v26 = vmax.f32 %v21839_v54, 0.0  ;;  %v14709_v27 = vld [vmem:[%s25063_s3 + $0x2f0] sm:$0xf0] }
 0x767   :  { %9519 = vmatpush.bf16.msra.mxu3 %v14772_v32  ;;  %9494 = vmatpush.bf16.msra.mxu1 %v14500_v49  ;;  %v14947_v32 = vld [vmem:[%s25063_s3 + $0x4c0] sm:$0xf]  ;;  %v15028_v17 = vor.u32 %v16687_v6, %v15027_v1  ;;  %v7919_v3 = vmax.f32 %v22637_v62, 0.0  ;;  %v16537_v54 = vld [vmem:[%s25063_s3 + $0xc4] sm:$0xf] }
 0x768   :  { %v14948_v47 = vor.u32 %v16667_v30, %v14947_v32  ;;  %v14931_v49 = vld [vmem:[%s25063_s3 + $0x4a0] sm:$0xf]  ;;  %v7729_v11 = vadd.f32 %v7728_v4, %v7716_v46  ;;  %v7717_v50 = vpop.f32.mrf.mxu0 }
 0x769   :  { %9507 = vmatpush.bf16.msra.mxu2 %v14628_v34  ;;  %9482 = vmatpush.bf16.msra.mxu0 %v14356_v44  ;;  %v16663_v34 = vld [vmem:[%s25063_s3 + $0x4ac] sm:$0xf0]  ;;  %v15155_v7 = vld [vmem:[%s25063_s3 + $0x660] sm:$0xf]  ;;  %v14549_v50 = vld [vmem:[%s25063_s3 + $0x1b0] sm:$0xf0] }
 0x76a   :  { %v14932_v39 = vor.u32 %v16663_v34, %v14931_v49  ;;  %v16659_v44 = vld [vmem:[%s25063_s3 + $0x48c] sm:$0xf0]  ;;  %v15156_v13 = vor.u32 %v16719_v8, %v15155_v7  ;;  %v15139_v22 = vld [vmem:[%s25063_s3 + $0x640] sm:$0xf]  ;;  %v14437_v8 = vld [vmem:[%s25063_s3 + $0xd0] sm:$0xf0] }
 0x76b   :  { %9520 = vmatpush.bf16.msra.mxu3 %v14756_v56  ;;  %9495 = vmatpush.bf16.msra.mxu1 %v14484_v9  ;;  %v16727_v56 = vld [vmem:[%s25063_s3 + $0x6ac] sm:$0xf0]  ;;  %v15171_v9 = vld [vmem:[%s25063_s3 + $0x680] sm:$0xf]  ;;  %v14916_v23 = vor.u32 %v16659_v44, %v14915_v40 }
 0x76c   :  { %v15188_v15 = vor.u32 %v16727_v56, %v15187_v53  ;;  %v15123_v49 = vld [vmem:[%s25063_s3 + $0x620] sm:$0xf]  ;;  %v16711_v34 = vld [vmem:[%s25063_s3 + $0x62c] sm:$0xf0] }
 0x76d   :  { %9508 = vmatpush.bf16.msra.mxu2 %v14612_v20  ;;  %9483 = vmatpush.bf16.msra.mxu0 %v14340_v28  ;;  %v16723_v20 = vld [vmem:[%s25063_s3 + $0x68c] sm:$0xf0]  ;;  %v7664_v28 = vadd.f32 %v23384_v63, %v7651_v21  ;;  %v7741_v63 = vpop.f32.mrf.mxu2  ;;  %v14979_v56 = vld [vmem:[%s25063_s3 + $0x500] sm:$0xf]  ;;  %v15124_v40 = vor.u32 %v16711_v34, %v15123_v49  ;;  %v14581_v21 = vld [vmem:[%s25063_s3 + $0x1f0] sm:$0xf0] }
 0x76e   :  { %v15172_v61 = vor.u32 %v16723_v20, %v15171_v9  ;;  %v16643_v53 = vld [vmem:[%s25063_s3 + $0x40c] sm:$0xf0]  ;;  %v15347_v41 = vld [vmem:[%s25063_s3 + $0x7e0] sm:$0xf]  ;;  %v14453_v9 = vld [vmem:[%s25063_s3 + $0xf0] sm:$0xf0] }
 0x76f   :  { %9521 = vmatpush.bf16.msra.mxu3 %v14740_v24  ;;  %9496 = vmatpush.bf16.msra.mxu1 %v14468_v58  ;;  %v15044_v24 = vor.u32 %v16691_v0, %v15043_v59  ;;  %v16651_v58 = vld [vmem:[%s25063_s3 + $0x44c] sm:$0xf0]  ;;  %v16573_v20 = vld [vmem:[%s25063_s3 + $0x1e4] sm:$0xf]  ;;  %v15299_v49 = vld [vmem:[%s25063_s3 + $0x780] sm:$0xf] }
 0x770   :  { %9484 = vmatmul.bf16.vlgmr.msra.gmra.mxu0 %v23534_v42  ;;  %v14884_v32 = vor.u32 %v16651_v58, %v14883_v29  ;;  %v16707_v44 = vld [vmem:[%s25063_s3 + $0x60c] sm:$0xf0]  ;;  %v14584_v7 = vor.u32 %v16573_v20, %v14581_v21  ;;  %v14693_v29 = vld [vmem:[%s25063_s3 + $0x2d0] sm:$0xf0]  ;;  %v23716_v58 = vpack.c.bf16 %v7918_v26, %v7918_v26 }
 0x771   :  { %9509 = vmatpush.bf16.msra.mxu2 %v14596_v16  ;;  %9528 = vmatpush.bf16.msrb.mxu0 %v14964_v33  ;;  %v15011_v16 = vld [vmem:[%s25063_s3 + $0x540] sm:$0xf]  ;;  %v7742_v33 = vadd.f32 %v7741_v63, %v7729_v11  ;;  %v16767_v0 = vld [vmem:[%s25063_s3 + $0x7ec] sm:$0xf0]  ;;  %v14565_v11 = vld [vmem:[%s25063_s3 + $0x1d0] sm:$0xf0] }
 0x772   :  { %9497 = vmatmul.bf16.vlgmr.msra.gmra.mxu1 %v23536_v38  ;;  %v15012_v60 = vor.u32 %v16683_v18, %v15011_v16  ;;  %v23718_v16 = vpack.c.bf16 %v7919_v3, %v7919_v3  ;;  %v16755_v34 = vld [vmem:[%s25063_s3 + $0x78c] sm:$0xf0]  ;;  %v14517_v20 = vld [vmem:[%s25063_s3 + $0x170] sm:$0xf0]  ;;  %v16521_v3 = vld [vmem:[%s25063_s3 + $0x44] sm:$0xf] }
 0x773   :  { %9522 = vmatpush.bf16.msra.mxu3 %v14724_v14  ;;  %9541 = vmatpush.bf16.msrb.mxu1 %v15092_v31  ;;  %v16715_v14 = vld [vmem:[%s25063_s3 + $0x64c] sm:$0xf0]  ;;  %v7754_v31 = vpop.f32.mrf.mxu3  ;;  %v14645_v26 = vld [vmem:[%s25063_s3 + $0x270] sm:$0xf0] }
 0x774   :  { %9510 = vmatmul.bf16.vlgmr.msra.gmra.mxu2 %v23538_v45  ;;  %v23626_v30 = vadd.f32 %v7754_v31, %v7742_v33  ;;  %v15140_v36 = vor.u32 %v16715_v14, %v15139_v22  ;;  %v14440_v22 = vor.u32 %v16537_v54, %v14437_v8  ;;  %v16533_v33 = vld [vmem:[%s25063_s3 + $0xa4] sm:$0xf]  ;;  %v14421_v31 = vld [vmem:[%s25063_s3 + $0xb0] sm:$0xf0] }
 0x775   :  { %9554 = vmatpush.bf16.msrb.mxu2 %v15220_v35  ;;  %9529 = vmatpush.bf16.msrb.mxu0 %v14948_v47  ;;  %v7677_v35 = vadd.f32 %v23392_v5, %v7664_v28  ;;  %v14867_v47 = vld [vmem:[%s25063_s3 + $0x420] sm:$0xf]  ;;  %v7743_v59 = vpop.f32.mrf.mxu2  ;;  %v16569_v28 = vld [vmem:[%s25063_s3 + $0x1c4] sm:$0xf]  ;;  %v14501_v54 = vld [vmem:[%s25063_s3 + $0x150] sm:$0xf0] }
 0x776   :  { %9523 = vmatmul.bf16.vlgmr.msra.gmra.mxu3 %v23540_v57  ;;  %v14995_v5 = vld [vmem:[%s25063_s3 + $0x520] sm:$0xf]  ;;  %v14568_v14 = vor.u32 %v16569_v28, %v14565_v11  ;;  %v23776_v59 = vpop.f32.mrf.mxu0  ;;  %v16585_v28 = vld [vmem:[%s25063_s3 + $0x244] sm:$0xf] }
 0x777   :  { %9542 = vmatpush.bf16.msrb.mxu1 %v15076_v51  ;;  %v7690_v10 = vadd.f32 %v23427_v37, %v7677_v35  ;;  %v16647_v51 = vld [vmem:[%s25063_s3 + $0x42c] sm:$0xf0]  ;;  %v16565_v35 = vld [vmem:[%s25063_s3 + $0x1a4] sm:$0xf] }
 0x778   :  { %v16679_v37 = vld [vmem:[%s25063_s3 + $0x52c] sm:$0xf0]  ;;  %v14868_v52 = vor.u32 %v16647_v51, %v14867_v47  ;;  %v14677_v47 = vld [vmem:[%s25063_s3 + $0x2b0] sm:$0xf0] }
 0x779   :  { %9555 = vmatpush.bf16.msrb.mxu2 %v15204_v48  ;;  %9530 = vmatpush.bf16.msrb.mxu0 %v14932_v39  ;;  %v7730_v48 = vpop.f32.mrf.mxu1  ;;  %v7703_v2 = vadd.f32 %v23438_v43, %v7690_v10  ;;  %v14996_v39 = vor.u32 %v16679_v37, %v14995_v5  ;;  %v16541_v43 = vld [vmem:[%s25063_s3 + $0xe4] sm:$0xf]  ;;  %v15315_v10 = vld [vmem:[%s25063_s3 + $0x7a0] sm:$0xf]  ;;  %v14424_v5 = vor.u32 %v16533_v33, %v14421_v31  ;;  %v14485_v31 = vld [vmem:[%s25063_s3 + $0x130] sm:$0xf0] }
 0x77a   :  { %v14456_v6 = vor.u32 %v16541_v43, %v14453_v9  ;;  %v14552_v48 = vor.u32 %v16565_v35, %v14549_v50  ;;  %v16529_v37 = vld [vmem:[%s25063_s3 + $0x84] sm:$0xf]  ;;  %v15283_v43 = vld [vmem:[%s25063_s3 + $0x760] sm:$0xf]  ;;  %v16743_v50 = vld [vmem:[%s25063_s3 + $0x72c] sm:$0xf0] }
 0x77b   :  { %9543 = vmatpush.bf16.msrb.mxu1 %v15060_v19  ;;  %v16675_v19 = vld [vmem:[%s25063_s3 + $0x50c] sm:$0xf0]  ;;  %v7756_v25 = vpop.f32.mrf.mxu3  ;;  %v7920_v1 = vmax.f32 %v7703_v2, 0.0  ;;  %v16593_v2 = vld [vmem:[%s25063_s3 + $0x284] sm:$0xf] }
 0x77c   :  { %v14980_v46 = vor.u32 %v16675_v19, %v14979_v56  ;;  %v14533_v56 = vld [vmem:[%s25063_s3 + $0x190] sm:$0xf0]  ;;  %v16751_v25 = vld [vmem:[%s25063_s3 + $0x76c] sm:$0xf0]  ;;  %v16557_v9 = vld [vmem:[%s25063_s3 + $0x164] sm:$0xf] }
 0x77d   :  { %9556 = vmatpush.bf16.msrb.mxu2 %v15188_v15  ;;  %9531 = vmatpush.bf16.msrb.mxu0 %v14916_v23  ;;  %v15107_v15 = vld [vmem:[%s25063_s3 + $0x600] sm:$0xf]  ;;  %v15348_v23 = vor.u32 %v16767_v0, %v15347_v41  ;;  %v23720_v18 = vpack.c.bf16 %v7920_v1, %v7920_v1  ;;  %v14389_v0 = vld [vmem:[%s25063_s3 + $0x70] sm:$0xf0]  ;;  %v23819_v8 = vpop.f32.mrf.mxu2 }
 0x77e   :  { %v15108_v4 = vor.u32 %v16707_v44, %v15107_v15  ;;  %v16525_v44 = vld [vmem:[%s25063_s3 + $0x64] sm:$0xf]  ;;  %v15267_v1 = vld [vmem:[%s25063_s3 + $0x740] sm:$0xf] }
 0x77f   :  { %9544 = vmatpush.bf16.msrb.mxu1 %v15044_v24  ;;  %v14852_v24 = vor.u32 %v16643_v53, %v14851_v55  ;;  %9567 = vmatpush.bf16.msrb.mxu3 %v15348_v23  ;;  %v14405_v55 = vld [vmem:[%s25063_s3 + $0x90] sm:$0xf0]  ;;  %v16561_v53 = vld [vmem:[%s25063_s3 + $0x184] sm:$0xf] }
 0x780   :  { %v14408_v19 = vor.u32 %v16529_v37, %v14405_v55  ;;  %v14536_v15 = vor.u32 %v16561_v53, %v14533_v56  ;;  %v16589_v23 = vld [vmem:[%s25063_s3 + $0x264] sm:$0xf]  ;;  %v14469_v55 = vld [vmem:[%s25063_s3 + $0x110] sm:$0xf0] }
 0x781   :  { %9557 = vmatpush.bf16.msrb.mxu2 %v15172_v61  ;;  %9532 = vmatpush.bf16.msrb.mxu0 %v14900_v12  ;;  %v16605_v61 = vld [vmem:[%s25063_s3 + $0x2e4] sm:$0xf]  ;;  %v15331_v12 = vld [vmem:[%s25063_s3 + $0x7c0] sm:$0xf]  ;;  %v23793_v21 = vpop.f32.mrf.mxu1  ;;  %v14597_v56 = vld [vmem:[%s25063_s3 + $0x210] sm:$0xf0] }
 0x782   :  { %v14712_v62 = vor.u32 %v16605_v61, %v14709_v27  ;;  %v14392_v61 = vor.u32 %v16525_v44, %v14389_v0  ;;  %v14520_v27 = vor.u32 %v16557_v9, %v14517_v20  ;;  %v16545_v37 = vld [vmem:[%s25063_s3 + $0x104] sm:$0xf]  ;;  %v15093_v44 = vld [vmem:[%s25063_s3 + $0x5f0] sm:$0xf0] }
 0x783   :  { %9545 = vmatpush.bf16.msrb.mxu1 %v15028_v17  ;;  %v16763_v17 = vld [vmem:[%s25063_s3 + $0x7cc] sm:$0xf0]  ;;  %v23827_v11 = vpop.f32.mrf.mxu3  ;;  %v16577_v53 = vld [vmem:[%s25063_s3 + $0x204] sm:$0xf]  ;;  %v14472_v9 = vor.u32 %v16545_v37, %v14469_v55 }
 0x784   :  { %v15332_v63 = vor.u32 %v16763_v17, %v15331_v12  ;;  %v14600_v20 = vor.u32 %v16577_v53, %v14597_v56  ;;  %v16721_v37 = vld [vmem:[%s25063_s3 + $0x684] sm:$0xf]  ;;  %v14789_v56 = vld [vmem:[%s25063_s3 + $0x390] sm:$0xf0] }
 0x785   :  { %9558 = vmatpush.bf16.msrb.mxu2 %v15156_v13  ;;  %9533 = vmatpush.bf16.msrb.mxu0 %v14884_v32  ;;  %v16601_v13 = vld [vmem:[%s25063_s3 + $0x2c4] sm:$0xf] }
 0x786   :  { %v14696_v32 = vor.u32 %v16601_v13, %v14693_v29  ;;  %9568 = vmatpush.bf16.msrb.mxu3 %v15332_v63  ;;  %v16517_v29 = vld [vmem:[%s25063_s3 + $0x24] sm:$0xf]  ;;  %v14357_v63 = vld [vmem:[%s25063_s3 + $0x30] sm:$0xf0] }
 0x787   :  { %9546 = vmatpush.bf16.msrb.mxu1 %v15012_v60  ;;  %v16759_v60 = vld [vmem:[%s25063_s3 + $0x7ac] sm:$0xf0]  ;;  %v16625_v53 = vld [vmem:[%s25063_s3 + $0x384] sm:$0xf] }
 0x788   :  { %v15316_v51 = vor.u32 %v16759_v60, %v15315_v10  ;;  %v16581_v10 = vld [vmem:[%s25063_s3 + $0x224] sm:$0xf]  ;;  %v14613_v60 = vld [vmem:[%s25063_s3 + $0x230] sm:$0xf0] }
 0x789   :  { %9559 = vmatpush.bf16.msrb.mxu2 %v15140_v36  ;;  %9534 = vmatpush.bf16.msrb.mxu0 %v14868_v52  ;;  %v16597_v36 = vld [vmem:[%s25063_s3 + $0x2a4] sm:$0xf]  ;;  %v7782_v35 = vpop.f32.mrf.mxu1 }
 0x78a   :  { %v14680_v52 = vor.u32 %v16597_v36, %v14677_v47  ;;  %9569 = vmatpush.bf16.msrb.mxu3 %v15316_v51  ;;  %v16513_v36 = vld [vmem:[%s25063_s3 + $0x4] sm:$0xf]  ;;  %v14341_v47 = vld [vmem:[%s25063_s3 + $0x10] sm:$0xf0] }
 0x78b   :  { %9547 = vmatpush.bf16.msrb.mxu1 %v14996_v39  ;;  %v14661_v39 = vld [vmem:[%s25063_s3 + $0x290] sm:$0xf0]  ;;  %v14344_v0 = vor.u32 %v16513_v36, %v14341_v47  ;;  %v16657_v47 = vld [vmem:[%s25063_s3 + $0x484] sm:$0xf] }
 0x78c   :  { %v14664_v41 = vor.u32 %v16593_v2, %v14661_v39  ;;  %v7795_v2 = vpop.f32.mrf.mxu2  ;;  %v16669_v39 = vld [vmem:[%s25063_s3 + $0x4e4] sm:$0xf] }
 0x78d   :  { %9560 = vmatpush.bf16.msrb.mxu2 %v15124_v40  ;;  %9535 = vmatpush.bf16.msrb.mxu0 %v14852_v24  ;;  %v15300_v40 = vor.u32 %v16755_v34, %v15299_v49  ;;  %v15284_v24 = vor.u32 %v16751_v25, %v15283_v43  ;;  %v15235_v49 = vld [vmem:[%s25063_s3 + $0x700] sm:$0xf]  ;;  %v16739_v34 = vld [vmem:[%s25063_s3 + $0x70c] sm:$0xf0]  ;;  %v16733_v43 = vld [vmem:[%s25063_s3 + $0x6e4] sm:$0xf] }
 0x78e   :  { %v15221_v25 = vld [vmem:[%s25063_s3 + $0x6f0] sm:$0xf0] }
 0x78f   :  { %9548 = vmatpush.bf16.msrb.mxu1 %v14980_v46  ;;  %9570 = vmatpush.bf16.msrb.mxu3 %v15300_v40  ;;  %v16747_v46 = vld [vmem:[%s25063_s3 + $0x74c] sm:$0xf0]  ;;  %v14965_v40 = vld [vmem:[%s25063_s3 + $0x4f0] sm:$0xf0] }
 0x790   :  { %9536 = vmatmul.bf16.vlgmr.msrb.gmra.mxu0 %v23716_v58  ;;  %v15268_v12 = vor.u32 %v16747_v46, %v15267_v1  ;;  %v14949_v1 = vld [vmem:[%s25063_s3 + $0x4d0] sm:$0xf0]  ;;  %v16697_v46 = vld [vmem:[%s25063_s3 + $0x5c4] sm:$0xf] }
 0x791   :  { %9561 = vmatpush.bf16.msrb.mxu2 %v15108_v4  ;;  %9580 = vmatpush.bf16.msra.mxu0 %v14456_v6  ;;  %v14648_v4 = vor.u32 %v16589_v23, %v14645_v26  ;;  %v14373_v6 = vld [vmem:[%s25063_s3 + $0x50] sm:$0xf0]  ;;  %v14968_v23 = vor.u32 %v16669_v39, %v14965_v40  ;;  %v16637_v26 = vld [vmem:[%s25063_s3 + $0x3e4] sm:$0xf]  ;;  %v23978_v40 = vpop.f32.mrf.mxu1 }
 0x792   :  { %9549 = vmatmul.bf16.vlgmr.msrb.gmra.mxu1 %v23718_v16  ;;  %v14376_v17 = vor.u32 %v16521_v3, %v14373_v6  ;;  %v16665_v3 = vld [vmem:[%s25063_s3 + $0x4c4] sm:$0xf] }
 0x793   :  { %9593 = vmatpush.bf16.msra.mxu1 %v14584_v7  ;;  %v16553_v7 = vld [vmem:[%s25063_s3 + $0x144] sm:$0xf]  ;;  %9571 = vmatpush.bf16.msrb.mxu3 %v15284_v24  ;;  %v14837_v24 = vld [vmem:[%s25063_s3 + $0x3f0] sm:$0xf0] }
 0x794   :  { %9562 = vmatmul.bf16.vlgmr.msrb.gmra.mxu2 %v23720_v18  ;;  %v14504_v13 = vor.u32 %v16553_v7, %v14501_v54  ;;  %v16729_v6 = vld [vmem:[%s25063_s3 + $0x6c4] sm:$0xf]  ;;  %v15205_v7 = vld [vmem:[%s25063_s3 + $0x6d0] sm:$0xf0]  ;;  %v14840_v54 = vor.u32 %v16637_v26, %v14837_v24 }
 0x795   :  { %9606 = vmatpush.bf16.msra.mxu2 %v14712_v62  ;;  %9581 = vmatpush.bf16.msra.mxu0 %v14440_v22  ;;  %v14629_v62 = vld [vmem:[%s25063_s3 + $0x250] sm:$0xf0]  ;;  %v16549_v22 = vld [vmem:[%s25063_s3 + $0x124] sm:$0xf] }
 0x796   :  { %v14632_v33 = vor.u32 %v16585_v28, %v14629_v62  ;;  %v14952_v28 = vor.u32 %v16665_v3, %v14949_v1  ;;  %v16633_v62 = vld [vmem:[%s25063_s3 + $0x3c4] sm:$0xf]  ;;  %v7768_v1 = vadd.f32 %v23776_v59, %v23626_v30 }
 0x797   :  { %9594 = vmatpush.bf16.msra.mxu1 %v14568_v14  ;;  %v7769_v14 = vpop.f32.mrf.mxu0  ;;  %9572 = vmatpush.bf16.msrb.mxu3 %v15268_v12  ;;  %v14821_v12 = vld [vmem:[%s25063_s3 + $0x3d0] sm:$0xf0]  ;;  %v16681_v3 = vld [vmem:[%s25063_s3 + $0x544] sm:$0xf] }
 0x798   :  { %v15061_v14 = vld [vmem:[%s25063_s3 + $0x5b0] sm:$0xf0]  ;;  %v14824_v35 = vor.u32 %v16633_v62, %v14821_v12  ;;  %v16617_v62 = vld [vmem:[%s25063_s3 + $0x344] sm:$0xf] }
 0x799   :  { %9607 = vmatpush.bf16.msra.mxu2 %v14696_v32  ;;  %9582 = vmatpush.bf16.msra.mxu0 %v14424_v5  ;;  %v15251_v32 = vld [vmem:[%s25063_s3 + $0x720] sm:$0xf]  ;;  %v14360_v5 = vor.u32 %v16517_v29, %v14357_v63  ;;  %v16661_v29 = vld [vmem:[%s25063_s3 + $0x4a4] sm:$0xf]  ;;  %v14933_v63 = vld [vmem:[%s25063_s3 + $0x4b0] sm:$0xf0] }
 0x79a   :  { %v15252_v51 = vor.u32 %v16743_v50, %v15251_v32  ;;  %v14936_v32 = vor.u32 %v16661_v29, %v14933_v63  ;;  %v16629_v50 = vld [vmem:[%s25063_s3 + $0x3a4] sm:$0xf]  ;;  %v14757_v12 = vld [vmem:[%s25063_s3 + $0x350] sm:$0xf0] }
 0x79b   :  { %9595 = vmatpush.bf16.msra.mxu1 %v14552_v48  ;;  %v14488_v48 = vor.u32 %v16549_v22, %v14485_v31  ;;  %v16693_v22 = vld [vmem:[%s25063_s3 + $0x5a4] sm:$0xf]  ;;  %v15189_v31 = vld [vmem:[%s25063_s3 + $0x6b0] sm:$0xf0] }
 0x79c   :  { %9573 = vmatpush.bf16.msrb.mxu3 %v15252_v51  ;;  %v14917_v51 = vld [vmem:[%s25063_s3 + $0x490] sm:$0xf0]  ;;  %v16645_v29 = vld [vmem:[%s25063_s3 + $0x424] sm:$0xf] }
 0x79d   :  { %9608 = vmatpush.bf16.msra.mxu2 %v14680_v52  ;;  %9583 = vmatpush.bf16.msra.mxu0 %v14408_v19  ;;  %v14616_v52 = vor.u32 %v16581_v10, %v14613_v60  ;;  %v16701_v19 = vld [vmem:[%s25063_s3 + $0x5e4] sm:$0xf]  ;;  %v14805_v10 = vld [vmem:[%s25063_s3 + $0x3b0] sm:$0xf0]  ;;  %v15064_v60 = vor.u32 %v16693_v22, %v15061_v14  ;;  %v14920_v55 = vor.u32 %v16657_v47, %v14917_v51  ;;  %v7834_v14 = vpop.f32.mrf.mxu1 }
 0x79e   :  { %v14869_v63 = vld [vmem:[%s25063_s3 + $0x430] sm:$0xf0]  ;;  %v16677_v22 = vld [vmem:[%s25063_s3 + $0x524] sm:$0xf] }
 0x79f   :  { %9596 = vmatpush.bf16.msra.mxu1 %v14536_v15  ;;  %v7808_v15 = vpop.f32.mrf.mxu3 }
 0x7a0   :  { %v14901_v15 = vld [vmem:[%s25063_s3 + $0x470] sm:$0xf0] }
 0x7a1   :  { %9609 = vmatpush.bf16.msra.mxu2 %v14664_v41  ;;  %9584 = vmatpush.bf16.msra.mxu0 %v14392_v61  ;;  %v15236_v41 = vor.u32 %v16739_v34, %v15235_v49  ;;  %v15096_v61 = vor.u32 %v16701_v19, %v15093_v44  ;;  %v15173_v49 = vld [vmem:[%s25063_s3 + $0x690] sm:$0xf0]  ;;  %v14808_v34 = vor.u32 %v16629_v50, %v14805_v10  ;;  %v16653_v19 = vld [vmem:[%s25063_s3 + $0x464] sm:$0xf] }
 0x7a2   :  { %v15176_v39 = vor.u32 %v16721_v37, %v15173_v49  ;;  %v16685_v44 = vld [vmem:[%s25063_s3 + $0x564] sm:$0xf]  ;;  %v14760_v50 = vor.u32 %v16617_v62, %v14757_v12  ;;  %v14872_v10 = vor.u32 %v16645_v29, %v14869_v63  ;;  %v14981_v37 = vld [vmem:[%s25063_s3 + $0x510] sm:$0xf0]  ;;  %v16536_v12 = vld [vmem:[%s25063_s3 + $0xb4] sm:$0xf0] }
 0x7a3   :  { %9597 = vmatpush.bf16.msra.mxu1 %v14520_v27  ;;  %v15224_v27 = vor.u32 %v16733_v43, %v15221_v25  ;;  %9574 = vmatpush.bf16.msrb.mxu3 %v15236_v41  ;;  %v15029_v43 = vld [vmem:[%s25063_s3 + $0x570] sm:$0xf0]  ;;  %v16717_v25 = vld [vmem:[%s25063_s3 + $0x664] sm:$0xf]  ;;  %v14683_v63 = vld [vmem:[%s25063_s3 + $0x2a8] sm:$0xf] }
 0x7a4   :  { %v15157_v41 = vld [vmem:[%s25063_s3 + $0x670] sm:$0xf0]  ;;  %v15032_v26 = vor.u32 %v16685_v44, %v15029_v43  ;;  %v14715_v44 = vld [vmem:[%s25063_s3 + $0x2e8] sm:$0xf]  ;;  %v16608_v43 = vld [vmem:[%s25063_s3 + $0x2f4] sm:$0xf0] }
 0x7a5   :  { %9610 = vmatpush.bf16.msra.mxu2 %v14648_v4  ;;  %9585 = vmatpush.bf16.msra.mxu0 %v14376_v17  ;;  %v15077_v4 = vld [vmem:[%s25063_s3 + $0x5d0] sm:$0xf0]  ;;  %v15160_v24 = vor.u32 %v16717_v25, %v15157_v41 }
 0x7a6   :  { %v15080_v17 = vor.u32 %v16697_v46, %v15077_v4  ;;  %v15013_v46 = vld [vmem:[%s25063_s3 + $0x550] sm:$0xf0]  ;;  %v16713_v4 = vld [vmem:[%s25063_s3 + $0x644] sm:$0xf] }
 0x7a7   :  { %9598 = vmatpush.bf16.msra.mxu1 %v14504_v13  ;;  %v15208_v13 = vor.u32 %v16729_v6, %v15205_v7  ;;  %9619 = vmatpush.bf16.msra.mxu3 %v14840_v54  ;;  %v15141_v6 = vld [vmem:[%s25063_s3 + $0x650] sm:$0xf0]  ;;  %v24024_v7 = vpop.f32.mrf.mxu2 }
 0x7a9   :  { %9611 = vmatpush.bf16.msra.mxu2 %v14632_v33  ;;  %9586 = vmatpush.bf16.msra.mxu0 %v14360_v5  ;;  %v16725_v33 = vld [vmem:[%s25063_s3 + $0x6a4] sm:$0xf] }
 0x7aa   :  { %v15192_v36 = vor.u32 %v16725_v33, %v15189_v31  ;;  %v16689_v5 = vld [vmem:[%s25063_s3 + $0x584] sm:$0xf]  ;;  %v7781_v33 = vadd.f32 %v23793_v21, %v7768_v1  ;;  %v14997_v31 = vld [vmem:[%s25063_s3 + $0x530] sm:$0xf0]  ;;  %v16572_v1 = vld [vmem:[%s25063_s3 + $0x1d4] sm:$0xf0] }
 0x7ab   :  { %9599 = vmatpush.bf16.msra.mxu1 %v14488_v48  ;;  %v15045_v48 = vld [vmem:[%s25063_s3 + $0x590] sm:$0xf0]  ;;  %9620 = vmatpush.bf16.msra.mxu3 %v14824_v35  ;;  %v16709_v35 = vld [vmem:[%s25063_s3 + $0x624] sm:$0xf]  ;;  %v15000_v47 = vor.u32 %v16677_v22, %v14997_v31  ;;  %v16600_v22 = vld [vmem:[%s25063_s3 + $0x2b4] sm:$0xf0] }
 0x7ac   :  { %v15048_v2 = vor.u32 %v16689_v5, %v15045_v48  ;;  %v16641_v21 = vld [vmem:[%s25063_s3 + $0x404] sm:$0xf]  ;;  %v14853_v5 = vld [vmem:[%s25063_s3 + $0x410] sm:$0xf0]  ;;  %v7794_v49 = vadd.f32 %v23819_v8, %v7781_v33  ;;  %v14587_v8 = vld [vmem:[%s25063_s3 + $0x1e8] sm:$0xf] }
 0x7ad   :  { %9612 = vmatpush.bf16.msra.mxu2 %v14616_v52  ;;  %9587 = vmatpush.bf16.msra.mxu0 %v14344_v0  ;;  %v23970_v52 = vpop.f32.mrf.mxu0  ;;  %v14792_v0 = vor.u32 %v16625_v53, %v14789_v56  ;;  %v16673_v48 = vld [vmem:[%s25063_s3 + $0x504] sm:$0xf]  ;;  %v14459_v53 = vld [vmem:[%s25063_s3 + $0xe8] sm:$0xf]  ;;  %v16544_v56 = vld [vmem:[%s25063_s3 + $0xf4] sm:$0xf0] }
 0x7ae   :  { %v14984_v41 = vor.u32 %v16673_v48, %v14981_v37 }
 0x7af   :  { %9600 = vmatpush.bf16.msra.mxu1 %v14472_v9  ;;  %9621 = vmatpush.bf16.msra.mxu3 %v14808_v34  ;;  %v14904_v9 = vor.u32 %v16653_v19, %v14901_v15  ;;  %v16705_v34 = vld [vmem:[%s25063_s3 + $0x604] sm:$0xf]  ;;  %v14856_v15 = vor.u32 %v16641_v21, %v14853_v5  ;;  %v16596_v21 = vld [vmem:[%s25063_s3 + $0x294] sm:$0xf0]  ;;  %v14395_v5 = vld [vmem:[%s25063_s3 + $0x68] sm:$0xf] }
 0x7b0   :  { %9588 = vmatmul.bf16.vlgmr.msra.gmra.mxu0 %v23534_v42 }
 0x7b1   :  { %9613 = vmatpush.bf16.msra.mxu2 %v14600_v20  ;;  %9632 = vmatpush.bf16.msrb.mxu0 %v14968_v23  ;;  %v16621_v20 = vld [vmem:[%s25063_s3 + $0x364] sm:$0xf]  ;;  %v14773_v23 = vld [vmem:[%s25063_s3 + $0x370] sm:$0xf0] }
 0x7b2   :  { %9601 = vmatmul.bf16.vlgmr.msra.gmra.mxu1 %v23536_v38  ;;  %v14776_v54 = vor.u32 %v16621_v20, %v14773_v23  ;;  %v14460_v20 = vor.u32 %v16544_v56, %v14459_v53  ;;  %v14651_v53 = vld [vmem:[%s25063_s3 + $0x268] sm:$0xf]  ;;  %v16592_v56 = vld [vmem:[%s25063_s3 + $0x274] sm:$0xf0] }
 0x7b3   :  { %9645 = vmatpush.bf16.msrb.mxu1 %v15096_v61  ;;  %v16649_v61 = vld [vmem:[%s25063_s3 + $0x444] sm:$0xf]  ;;  %9622 = vmatpush.bf16.msra.mxu3 %v14792_v0 }
 0x7b4   :  { %9614 = vmatmul.bf16.vlgmr.msra.gmra.mxu2 %v23538_v45 }
 0x7b5   :  { %9658 = vmatpush.bf16.msrb.mxu2 %v15224_v27  ;;  %9633 = vmatpush.bf16.msrb.mxu0 %v14952_v28  ;;  %v14885_v27 = vld [vmem:[%s25063_s3 + $0x450] sm:$0xf0]  ;;  %v24026_v28 = vpop.f32.mrf.mxu3  ;;  %v7821_v59 = vpop.f32.mrf.mxu0 }
 0x7b6   :  { %v14888_v30 = vor.u32 %v16649_v61, %v14885_v27  ;;  %v14725_v61 = vld [vmem:[%s25063_s3 + $0x310] sm:$0xf0]  ;;  %v14716_v27 = vor.u32 %v16608_v43, %v14715_v44  ;;  %v14507_v44 = vld [vmem:[%s25063_s3 + $0x148] sm:$0xf]  ;;  %v16556_v43 = vld [vmem:[%s25063_s3 + $0x154] sm:$0xf0] }
 0x7b7   :  { %9646 = vmatpush.bf16.msrb.mxu1 %v15080_v17  ;;  %v15016_v17 = vor.u32 %v16681_v3, %v15013_v46  ;;  %9623 = vmatpush.bf16.msra.mxu3 %v14776_v54  ;;  %v16540_v3 = vld [vmem:[%s25063_s3 + $0xd4] sm:$0xf0] }
 0x7b9   :  { %9659 = vmatpush.bf16.msrb.mxu2 %v15208_v13  ;;  %9634 = vmatpush.bf16.msrb.mxu0 %v14936_v32  ;;  %v15144_v13 = vor.u32 %v16713_v4, %v15141_v6  ;;  %v15125_v32 = vld [vmem:[%s25063_s3 + $0x630] sm:$0xf0]  ;;  %v14699_v4 = vld [vmem:[%s25063_s3 + $0x2c8] sm:$0xf]  ;;  %v16604_v6 = vld [vmem:[%s25063_s3 + $0x2d4] sm:$0xf0] }
 0x7ba   :  { %v15128_v51 = vor.u32 %v16709_v35, %v15125_v32  ;;  %v14700_v62 = vor.u32 %v16604_v6, %v14699_v4  ;;  %v14684_v35 = vor.u32 %v16600_v22, %v14683_v63  ;;  %v16532_v32 = vld [vmem:[%s25063_s3 + $0x94] sm:$0xf0]  ;;  %v14475_v63 = vld [vmem:[%s25063_s3 + $0x108] sm:$0xf] }
 0x7bb   :  { %9647 = vmatpush.bf16.msrb.mxu1 %v15064_v60  ;;  %v16613_v60 = vld [vmem:[%s25063_s3 + $0x324] sm:$0xf]  ;;  %9624 = vmatpush.bf16.msra.mxu3 %v14760_v50  ;;  %v14539_v50 = vld [vmem:[%s25063_s3 + $0x188] sm:$0xf]  ;;  %v16552_v4 = vld [vmem:[%s25063_s3 + $0x134] sm:$0xf0] }
 0x7bd   :  { %9660 = vmatpush.bf16.msrb.mxu2 %v15192_v36  ;;  %9635 = vmatpush.bf16.msrb.mxu0 %v14920_v55  ;;  %v14741_v36 = vld [vmem:[%s25063_s3 + $0x330] sm:$0xf0]  ;;  %v7860_v25 = vpop.f32.mrf.mxu3 }
 0x7be   :  { %v15109_v55 = vld [vmem:[%s25063_s3 + $0x610] sm:$0xf0]  ;;  %v14744_v19 = vor.u32 %v16613_v60, %v14741_v36 }
 0x7bf   :  { %9648 = vmatpush.bf16.msrb.mxu1 %v15048_v2  ;;  %v16576_v2 = vld [vmem:[%s25063_s3 + $0x1f4] sm:$0xf0]  ;;  %v15112_v0 = vor.u32 %v16705_v34, %v15109_v55 }
 0x7c0   :  { %v14588_v23 = vor.u32 %v16576_v2, %v14587_v8  ;;  %9625 = vmatpush.bf16.msra.mxu3 %v14744_v19  ;;  %v16560_v34 = vld [vmem:[%s25063_s3 + $0x174] sm:$0xf0]  ;;  %v14652_v19 = vor.u32 %v16592_v56, %v14651_v53  ;;  %v14955_v53 = vld [vmem:[%s25063_s3 + $0x4c8] sm:$0xf] }
 0x7c1   :  { %9661 = vmatpush.bf16.msrb.mxu2 %v15176_v39  ;;  %9636 = vmatpush.bf16.msrb.mxu0 %v14904_v9  ;;  %v7847_v39 = vpop.f32.mrf.mxu2  ;;  %v7807_v9 = vadd.f32 %v23827_v11, %v7794_v49  ;;  %v14571_v11 = vld [vmem:[%s25063_s3 + $0x1c8] sm:$0xf]  ;;  %v16528_v49 = vld [vmem:[%s25063_s3 + $0x74] sm:$0xf0] }
 0x7c2   :  { %v14572_v59 = vor.u32 %v16572_v1, %v14571_v11  ;;  %v14396_v8 = vor.u32 %v16528_v49, %v14395_v5  ;;  %v14379_v39 = vld [vmem:[%s25063_s3 + $0x48] sm:$0xf]  ;;  %v16520_v1 = vld [vmem:[%s25063_s3 + $0x34] sm:$0xf0] }
 0x7c3   :  { %9649 = vmatpush.bf16.msrb.mxu1 %v15032_v26  ;;  %v14443_v26 = vld [vmem:[%s25063_s3 + $0xc8] sm:$0xf]  ;;  %v7820_v46 = vadd.f32 %v23970_v52, %v7807_v9  ;;  %v16668_v56 = vld [vmem:[%s25063_s3 + $0x4d4] sm:$0xf0] }
 0x7c4   :  { %v14427_v52 = vld [vmem:[%s25063_s3 + $0xa8] sm:$0xf] }
 0x7c5   :  { %9662 = vmatpush.bf16.msrb.mxu2 %v15160_v24  ;;  %9637 = vmatpush.bf16.msrb.mxu0 %v14888_v30  ;;  %v16609_v24 = vld [vmem:[%s25063_s3 + $0x304] sm:$0xf]  ;;  %v14444_v30 = vor.u32 %v16540_v3, %v14443_v26  ;;  %v7833_v29 = vadd.f32 %v23978_v40, %v7820_v46  ;;  %v14428_v33 = vor.u32 %v16536_v12, %v14427_v52  ;;  %v14411_v40 = vld [vmem:[%s25063_s3 + $0x88] sm:$0xf]  ;;  %v15349_v52 = vld [vmem:[%s25063_s3 + $0x7f0] sm:$0xf0] }
 0x7c6   :  { %v14728_v54 = vor.u32 %v16609_v24, %v14725_v61  ;;  %v14508_v61 = vor.u32 %v16556_v43, %v14507_v44  ;;  %v14491_v46 = vld [vmem:[%s25063_s3 + $0x128] sm:$0xf]  ;;  %v16757_v44 = vld [vmem:[%s25063_s3 + $0x7a4] sm:$0xf]  ;;  %v15317_v43 = vld [vmem:[%s25063_s3 + $0x7b0] sm:$0xf0] }
 0x7c7   :  { %9650 = vmatpush.bf16.msrb.mxu1 %v15016_v17  ;;  %v14555_v17 = vld [vmem:[%s25063_s3 + $0x1a8] sm:$0xf]  ;;  %v7846_v14 = vadd.f32 %v24024_v7, %v7833_v29  ;;  %v16564_v7 = vld [vmem:[%s25063_s3 + $0x194] sm:$0xf0] }
 0x7c8   :  { %9626 = vmatpush.bf16.msra.mxu3 %v14728_v54  ;;  %v14619_v54 = vld [vmem:[%s25063_s3 + $0x228] sm:$0xf]  ;;  %v16516_v29 = vld [vmem:[%s25063_s3 + $0x14] sm:$0xf0] }
 0x7c9   :  { %9663 = vmatpush.bf16.msrb.mxu2 %v15144_v13  ;;  %9638 = vmatpush.bf16.msrb.mxu0 %v14872_v10  ;;  %v16568_v13 = vld [vmem:[%s25063_s3 + $0x1b4] sm:$0xf0]  ;;  %v14667_v10 = vld [vmem:[%s25063_s3 + $0x288] sm:$0xf]  ;;  %v7859_v60 = vadd.f32 %v24026_v28, %v7846_v14 }
 0x7ca   :  { %v14556_v31 = vor.u32 %v16568_v13, %v14555_v17  ;;  %v14668_v37 = vor.u32 %v16596_v21, %v14667_v10  ;;  %v14523_v28 = vld [vmem:[%s25063_s3 + $0x168] sm:$0xf]  ;;  %v14492_v13 = vor.u32 %v16552_v4, %v14491_v46  ;;  %v16548_v14 = vld [vmem:[%s25063_s3 + $0x114] sm:$0xf0] }
 0x7cb   :  { %9651 = vmatpush.bf16.msrb.mxu1 %v15000_v47  ;;  %v14412_v47 = vor.u32 %v16532_v32, %v14411_v40  ;;  %v14524_v2 = vor.u32 %v16560_v34, %v14523_v28  ;;  %v14971_v32 = vld [vmem:[%s25063_s3 + $0x4e8] sm:$0xf]  ;;  %v16704_v21 = vld [vmem:[%s25063_s3 + $0x5f4] sm:$0xf0]  ;;  %v14476_v5 = vor.u32 %v16548_v14, %v14475_v63  ;;  %v15285_v63 = vld [vmem:[%s25063_s3 + $0x770] sm:$0xf0] }
 0x7cc   :  { %v14923_v4 = vld [vmem:[%s25063_s3 + $0x488] sm:$0xf] }
 0x7cd   :  { %9664 = vmatpush.bf16.msrb.mxu2 %v15128_v51  ;;  %9639 = vmatpush.bf16.msrb.mxu0 %v14856_v15  ;;  %v7871_v36 = vpop.f32.mrf.mxu0  ;;  %v14540_v51 = vor.u32 %v16564_v7, %v14539_v50  ;;  %v16524_v15 = vld [vmem:[%s25063_s3 + $0x54] sm:$0xf0]  ;;  %v15099_v7 = vld [vmem:[%s25063_s3 + $0x5e8] sm:$0xf] }
 0x7ce   :  { %v7872_v55 = vadd.f32 %v7871_v36, %v7859_v60  ;;  %v14380_v24 = vor.u32 %v16524_v15, %v14379_v39  ;;  %v16672_v50 = vld [vmem:[%s25063_s3 + $0x4f4] sm:$0xf0]  ;;  %v15227_v60 = vld [vmem:[%s25063_s3 + $0x6e8] sm:$0xf]  ;;  %v15100_v34 = vor.u32 %v16704_v21, %v15099_v7 }
 0x7cf   :  { %9652 = vmatpush.bf16.msrb.mxu1 %v14984_v41  ;;  %v7884_v48 = vpop.f32.mrf.mxu1  ;;  %v14635_v41 = vld [vmem:[%s25063_s3 + $0x248] sm:$0xf]  ;;  %v16736_v36 = vld [vmem:[%s25063_s3 + $0x6f4] sm:$0xf0]  ;;  %v14972_v28 = vor.u32 %v16672_v50, %v14971_v32 }
 0x7d0   :  { %9640 = vmatmul.bf16.vlgmr.msrb.gmra.mxu0 %v23716_v58  ;;  %v7885_v25 = vadd.f32 %v7884_v48, %v7872_v55  ;;  %v16761_v48 = vld [vmem:[%s25063_s3 + $0x7c4] sm:$0xf]  ;;  %v15228_v55 = vor.u32 %v16736_v36, %v15227_v60  ;;  %v16700_v39 = vld [vmem:[%s25063_s3 + $0x5d4] sm:$0xf0]  ;;  %v14907_v32 = vld [vmem:[%s25063_s3 + $0x468] sm:$0xf] }
 0x7d1   :  { %9665 = vmatpush.bf16.msrb.mxu2 %v15112_v0  ;;  %9684 = vmatpush.bf16.msra.mxu0 %v14460_v20  ;;  %v16588_v0 = vld [vmem:[%s25063_s3 + $0x254] sm:$0xf0]  ;;  %v15035_v7 = vld [vmem:[%s25063_s3 + $0x568] sm:$0xf] }
 0x7d2   :  { %9653 = vmatmul.bf16.vlgmr.msrb.gmra.mxu1 %v23718_v16  ;;  %v14636_v11 = vor.u32 %v16588_v0, %v14635_v41  ;;  %v16732_v15 = vld [vmem:[%s25063_s3 + $0x6d4] sm:$0xf0]  ;;  %v14939_v41 = vld [vmem:[%s25063_s3 + $0x4a8] sm:$0xf] }
 0x7d3   :  { %9697 = vmatpush.bf16.msra.mxu1 %v14588_v23  ;;  %v16656_v50 = vld [vmem:[%s25063_s3 + $0x474] sm:$0xf0]  ;;  %v15163_v36 = vld [vmem:[%s25063_s3 + $0x668] sm:$0xf] }
 0x7d4   :  { %9666 = vmatmul.bf16.vlgmr.msrb.gmra.mxu2 %v23720_v18  ;;  %v16688_v60 = vld [vmem:[%s25063_s3 + $0x574] sm:$0xf0] }
 0x7d5   :  { %9710 = vmatpush.bf16.msra.mxu2 %v14716_v27  ;;  %9685 = vmatpush.bf16.msra.mxu0 %v14444_v30  ;;  %v7873_v26 = vpop.f32.mrf.mxu0  ;;  %v14363_v27 = vld [vmem:[%s25063_s3 + $0x28] sm:$0xf]  ;;  %v16584_v30 = vld [vmem:[%s25063_s3 + $0x234] sm:$0xf0] }
 0x7d6   :  { %v14364_v17 = vor.u32 %v16520_v1, %v14363_v27  ;;  %v14620_v22 = vor.u32 %v16584_v30, %v14619_v54  ;;  %v16696_v26 = vld [vmem:[%s25063_s3 + $0x5b4] sm:$0xf0]  ;;  %v15301_v1 = vld [vmem:[%s25063_s3 + $0x790] sm:$0xf0] }
 0x7d7   :  { %9698 = vmatpush.bf16.msra.mxu1 %v14572_v59  ;;  %v7897_v9 = vpop.f32.mrf.mxu2  ;;  %v7886_v3 = vpop.f32.mrf.mxu1  ;;  %v16765_v59 = vld [vmem:[%s25063_s3 + $0x7e4] sm:$0xf]  ;;  %v16728_v27 = vld [vmem:[%s25063_s3 + $0x6b4] sm:$0xf0] }
 0x7d8   :  { %v7898_v20 = vadd.f32 %v7897_v9, %v7885_v25  ;;  %v14956_v25 = vor.u32 %v16668_v56, %v14955_v53  ;;  %v24315_v3 = vld [vmem:[%s25064_s4] sm:$0xf]  ;;  %v15019_v53 = vld [vmem:[%s25063_s3 + $0x548] sm:$0xf] }
 0x7d9   :  { %9711 = vmatpush.bf16.msra.mxu2 %v14700_v62  ;;  %9686 = vmatpush.bf16.msra.mxu0 %v14428_v33  ;;  %v7910_v23 = vpop.f32.mrf.mxu3  ;;  %v14347_v62 = vld [vmem:[%s25063_s3 + $0x8] sm:$0xf]  ;;  %v8188_v30 = vperm.slane %v24315_v3, 0 }
 0x7da   :  { %v7911_v6 = vadd.f32 %v7910_v23, %v7898_v20  ;;  %v14603_v33 = vld [vmem:[%s25063_s3 + $0x208] sm:$0xf]  ;;  %v16664_v20 = vld [vmem:[%s25063_s3 + $0x4b4] sm:$0xf0] }
 0x7db   :  { %9699 = vmatpush.bf16.msra.mxu1 %v14556_v31  ;;  %v16580_v31 = vld [vmem:[%s25063_s3 + $0x214] sm:$0xf0]  ;;  %v15067_v23 = vld [vmem:[%s25063_s3 + $0x5a8] sm:$0xf]  ;;  %v14940_v46 = vor.u32 %v16664_v20, %v14939_v41 }
 0x7dc   :  { %v7921_v12 = vmax.f32 %v7911_v6, 0.0  ;;  %v14604_v49 = vor.u32 %v16580_v31, %v14603_v33  ;;  %v15068_v6 = vor.u32 %v16696_v26, %v15067_v23  ;;  %v14875_v26 = vld [vmem:[%s25063_s3 + $0x428] sm:$0xf] }
 0x7dd   :  { %9712 = vmatpush.bf16.msra.mxu2 %v14684_v35  ;;  %9687 = vmatpush.bf16.msra.mxu0 %v14412_v47  ;;  %v15352_v35 = vor.u32 %v16765_v59, %v15349_v52  ;;  %v16660_v59 = vld [vmem:[%s25063_s3 + $0x494] sm:$0xf0]  ;;  %v15051_v52 = vld [vmem:[%s25063_s3 + $0x588] sm:$0xf] }
 0x7de   :  { %v24242_v40 = vpack.c.bf16 %v7921_v12, %v7921_v12  ;;  %v16692_v12 = vld [vmem:[%s25063_s3 + $0x594] sm:$0xf0] }
 0x7df   :  { %9700 = vmatpush.bf16.msra.mxu1 %v14540_v51  ;;  %v7899_v10 = vpop.f32.mrf.mxu2  ;;  %v14348_v51 = vor.u32 %v16516_v29, %v14347_v62  ;;  %v16749_v29 = vld [vmem:[%s25063_s3 + $0x764] sm:$0xf]  ;;  %v15052_v31 = vor.u32 %v16692_v12, %v15051_v52  ;;  %v16640_v52 = vld [vmem:[%s25063_s3 + $0x3f4] sm:$0xf0] }
 0x7e0   :  { %9575 = vmatmul.bf16.vlgmr.msrb.gmra.mxu3 %v24242_v40  ;;  %v15288_v21 = vor.u32 %v16749_v29, %v15285_v63  ;;  %v14987_v29 = vld [vmem:[%s25063_s3 + $0x508] sm:$0xf] }
 0x7e1   :  { %9713 = vmatpush.bf16.msra.mxu2 %v14668_v37  ;;  %9688 = vmatpush.bf16.msra.mxu0 %v14396_v8  ;;  %v7912_v47 = vpop.f32.mrf.mxu3  ;;  %v15333_v37 = vld [vmem:[%s25063_s3 + $0x7d0] sm:$0xf0]  ;;  %v15083_v8 = vld [vmem:[%s25063_s3 + $0x5c8] sm:$0xf] }
 0x7e2   :  { %9671 = vmatpush.bf16.msrb.mxu3 %v15352_v35  ;;  %v15084_v0 = vor.u32 %v16700_v39, %v15083_v8  ;;  %v16720_v47 = vld [vmem:[%s25063_s3 + $0x674] sm:$0xf0] }
 0x7e3   :  { %9701 = vmatpush.bf16.msra.mxu1 %v14524_v2  ;;  %v15336_v2 = vor.u32 %v16761_v48, %v15333_v37  ;;  %v14908_v37 = vor.u32 %v16656_v50, %v14907_v32  ;;  %v16684_v8 = vld [vmem:[%s25063_s3 + $0x554] sm:$0xf0]  ;;  %v14461_v32 = vld [vmem:[%s25063_s3 + $0xf8] sm:$0xf0]  ;;  %v16574_v50 = vld [vmem:[%s25063_s3 + $0x1ec] sm:$0xf] }
 0x7e4   :  { %v16716_v39 = vld [vmem:[%s25063_s3 + $0x654] sm:$0xf0]  ;;  %v15020_v20 = vor.u32 %v16684_v8, %v15019_v53  ;;  %v14445_v53 = vld [vmem:[%s25063_s3 + $0xd8] sm:$0xf0] }
 0x7e5   :  { %9714 = vmatpush.bf16.msra.mxu2 %v14652_v19  ;;  %9689 = vmatpush.bf16.msra.mxu0 %v14380_v24  ;;  %v15211_v19 = vld [vmem:[%s25063_s3 + $0x6c8] sm:$0xf]  ;;  %v15320_v24 = vor.u32 %v16757_v44, %v15317_v43 }
 0x7e6   :  { %v15212_v9 = vor.u32 %v16732_v15, %v15211_v19  ;;  %9672 = vmatpush.bf16.msrb.mxu3 %v15336_v2  ;;  %v15147_v2 = vld [vmem:[%s25063_s3 + $0x648] sm:$0xf]  ;;  %v16741_v19 = vld [vmem:[%s25063_s3 + $0x724] sm:$0xf]  ;;  %v15253_v15 = vld [vmem:[%s25063_s3 + $0x730] sm:$0xf0] }
 0x7e7   :  { %9702 = vmatpush.bf16.msra.mxu1 %v14508_v61  ;;  %v15195_v61 = vld [vmem:[%s25063_s3 + $0x6a8] sm:$0xf]  ;;  %v15148_v23 = vor.u32 %v16716_v39, %v15147_v2  ;;  %v14573_v2 = vld [vmem:[%s25063_s3 + $0x1d8] sm:$0xf0]  ;;  %v16602_v39 = vld [vmem:[%s25063_s3 + $0x2cc] sm:$0xf] }
 0x7e8   :  { %v15196_v54 = vor.u32 %v16728_v27, %v15195_v61  ;;  %v15003_v61 = vld [vmem:[%s25063_s3 + $0x528] sm:$0xf]  ;;  %v15256_v27 = vor.u32 %v16741_v19, %v15253_v15  ;;  %v14701_v19 = vld [vmem:[%s25063_s3 + $0x2d8] sm:$0xf0] }
 0x7e9   :  { %9715 = vmatpush.bf16.msra.mxu2 %v14636_v11  ;;  %9690 = vmatpush.bf16.msra.mxu0 %v14364_v17  ;;  %v16753_v11 = vld [vmem:[%s25063_s3 + $0x784] sm:$0xf]  ;;  %v15179_v17 = vld [vmem:[%s25063_s3 + $0x688] sm:$0xf] }
 0x7ea   :  { %9673 = vmatpush.bf16.msrb.mxu3 %v15320_v24  ;;  %v15304_v62 = vor.u32 %v16753_v11, %v15301_v1  ;;  %v16648_v24 = vld [vmem:[%s25063_s3 + $0x434] sm:$0xf0]  ;;  %v15131_v1 = vld [vmem:[%s25063_s3 + $0x628] sm:$0xf] }
 0x7eb   :  { %9703 = vmatpush.bf16.msra.mxu1 %v14492_v13  ;;  %v16724_v13 = vld [vmem:[%s25063_s3 + $0x694] sm:$0xf0]  ;;  %v14811_v15 = vld [vmem:[%s25063_s3 + $0x3a8] sm:$0xf] }
 0x7ec   :  { %v15180_v35 = vor.u32 %v16724_v13, %v15179_v17  ;;  %v16680_v11 = vld [vmem:[%s25063_s3 + $0x534] sm:$0xf0]  ;;  %v14859_v17 = vld [vmem:[%s25063_s3 + $0x408] sm:$0xf] }
 0x7ed   :  { %9716 = vmatpush.bf16.msra.mxu2 %v14620_v22  ;;  %9691 = vmatpush.bf16.msra.mxu0 %v14348_v51  ;;  %v14924_v22 = vor.u32 %v16660_v59, %v14923_v4  ;;  %v9485_v14 = vpop.f32.mrf.mxu0  ;;  %v16745_v51 = vld [vmem:[%s25063_s3 + $0x744] sm:$0xf]  ;;  %v14843_v59 = vld [vmem:[%s25063_s3 + $0x3e8] sm:$0xf]  ;;  %v16644_v13 = vld [vmem:[%s25063_s3 + $0x414] sm:$0xf0] }
 0x7ee   :  { %9674 = vmatpush.bf16.msrb.mxu3 %v15304_v62  ;;  %v9486_v10 = vadd.f32 %v9485_v14, %v8188_v30  ;;  %v14876_v30 = vor.u32 %v16648_v24, %v14875_v26  ;;  %v15004_v62 = vor.u32 %v16680_v11, %v15003_v61  ;;  %v15115_v14 = vld [vmem:[%s25063_s3 + $0x608] sm:$0xf]  ;;  %v14557_v26 = vld [vmem:[%s25063_s3 + $0x1b8] sm:$0xf0]  ;;  %v16598_v24 = vld [vmem:[%s25063_s3 + $0x2ac] sm:$0xf] }
 0x7ef   :  { %9704 = vmatpush.bf16.msra.mxu1 %v14476_v5  ;;  %v9498_v33 = vpop.f32.mrf.mxu1  ;;  %v15269_v5 = vld [vmem:[%s25063_s3 + $0x750] sm:$0xf0]  ;;  %v14685_v61 = vld [vmem:[%s25063_s3 + $0x2b8] sm:$0xf0]  ;;  %v16628_v11 = vld [vmem:[%s25063_s3 + $0x394] sm:$0xf0] }
 0x7f0   :  { %9692 = vmatmul.bf16.vlgmr.msra.gmra.mxu0 %v23534_v42  ;;  %v9499_v48 = vadd.f32 %v9498_v33, %v9486_v10  ;;  %9627 = vmatmul.bf16.vlgmr.msra.gmra.mxu3 %v23540_v57  ;;  %v15272_v56 = vor.u32 %v16745_v51, %v15269_v5  ;;  %v16708_v33 = vld [vmem:[%s25063_s3 + $0x614] sm:$0xf0] }
 0x7f1   :  { %9717 = vmatpush.bf16.msra.mxu2 %v14604_v49  ;;  %9736 = vmatpush.bf16.msrb.mxu0 %v14972_v28  ;;  %v15036_v49 = vor.u32 %v16688_v60, %v15035_v7  ;;  %v15164_v28 = vor.u32 %v16720_v47, %v15163_v36  ;;  %v14589_v60 = vld [vmem:[%s25063_s3 + $0x1f8] sm:$0xf0]  ;;  %v16606_v36 = vld [vmem:[%s25063_s3 + $0x2ec] sm:$0xf]  ;;  %v15116_v5 = vor.u32 %v16708_v33, %v15115_v14 }
 0x7f2   :  { %9705 = vmatmul.bf16.vlgmr.msra.gmra.mxu1 %v23536_v38  ;;  %9675 = vmatpush.bf16.msrb.mxu3 %v15288_v21  ;;  %v14860_v21 = vor.u32 %v16644_v13, %v14859_v17  ;;  %v14717_v47 = vld [vmem:[%s25063_s3 + $0x2f8] sm:$0xf0]  ;;  %v14779_v13 = vld [vmem:[%s25063_s3 + $0x368] sm:$0xf] }
 0x7f3   :  { %9749 = vmatpush.bf16.msrb.mxu1 %v15100_v34  ;;  %v14891_v34 = vld [vmem:[%s25063_s3 + $0x448] sm:$0xf]  ;;  %v14669_v17 = vld [vmem:[%s25063_s3 + $0x298] sm:$0xf0] }
 0x7f4   :  { %9718 = vmatmul.bf16.vlgmr.msra.gmra.mxu2 %v23538_v45 }
 0x7f5   :  { %9762 = vmatpush.bf16.msrb.mxu2 %v15228_v55  ;;  %9737 = vmatpush.bf16.msrb.mxu0 %v14956_v25  ;;  %v16652_v55 = vld [vmem:[%s25063_s3 + $0x454] sm:$0xf0] }
 0x7f6   :  { %v14892_v25 = vor.u32 %v16652_v55, %v14891_v34  ;;  %9676 = vmatpush.bf16.msrb.mxu3 %v15272_v56  ;;  %v14720_v34 = vor.u32 %v16606_v36, %v14717_v47  ;;  %v16538_v55 = vld [vmem:[%s25063_s3 + $0xcc] sm:$0xf]  ;;  %v14763_v47 = vld [vmem:[%s25063_s3 + $0x348] sm:$0xf] }
 0x7f7   :  { %9750 = vmatpush.bf16.msrb.mxu1 %v15084_v0  ;;  %v9511_v44 = vpop.f32.mrf.mxu2  ;;  %v9487_v0 = vpop.f32.mrf.mxu0  ;;  %v16570_v56 = vld [vmem:[%s25063_s3 + $0x1cc] sm:$0xf] }
 0x7f8   :  { %v9512_v41 = vadd.f32 %v9511_v44, %v9499_v48  ;;  %v14827_v48 = vld [vmem:[%s25063_s3 + $0x3c8] sm:$0xf]  ;;  %v16632_v44 = vld [vmem:[%s25063_s3 + $0x3b4] sm:$0xf0]  ;;  %v16534_v0 = vld [vmem:[%s25063_s3 + $0xac] sm:$0xf] }
 0x7f9   :  { %9763 = vmatpush.bf16.msrb.mxu2 %v15212_v9  ;;  %9738 = vmatpush.bf16.msrb.mxu0 %v14940_v46  ;;  %v9524_v43 = vpop.f32.mrf.mxu3  ;;  %v9500_v9 = vpop.f32.mrf.mxu1  ;;  %v16712_v46 = vld [vmem:[%s25063_s3 + $0x634] sm:$0xf0] }
 0x7fa   :  { %v24417_v4 = vadd.f32 %v9524_v43, %v9512_v41  ;;  %v15132_v12 = vor.u32 %v16712_v46, %v15131_v1  ;;  %9677 = vmatpush.bf16.msrb.mxu3 %v15256_v27  ;;  %v14448_v43 = vor.u32 %v16538_v55, %v14445_v53  ;;  %v14704_v41 = vor.u32 %v16602_v39, %v14701_v19  ;;  %v14429_v9 = vld [vmem:[%s25063_s3 + $0xb8] sm:$0xf0]  ;;  %v14795_v27 = vld [vmem:[%s25063_s3 + $0x388] sm:$0xf]  ;;  %v16616_v19 = vld [vmem:[%s25063_s3 + $0x334] sm:$0xf0] }
 0x7fb   :  { %9751 = vmatpush.bf16.msrb.mxu1 %v15068_v6  ;;  %v16737_v6 = vld [vmem:[%s25063_s3 + $0x704] sm:$0xf]  ;;  %v14432_v1 = vor.u32 %v16534_v0, %v14429_v9  ;;  %v14509_v53 = vld [vmem:[%s25063_s3 + $0x158] sm:$0xf0]  ;;  %v14747_v39 = vld [vmem:[%s25063_s3 + $0x328] sm:$0xf] }
 0x7fc   :  { %v16518_v9 = vld [vmem:[%s25063_s3 + $0x2c] sm:$0xf] }
 0x7fd   :  { %9764 = vmatpush.bf16.msrb.mxu2 %v15196_v54  ;;  %9739 = vmatpush.bf16.msrb.mxu0 %v14924_v22  ;;  %v15237_v54 = vld [vmem:[%s25063_s3 + $0x710] sm:$0xf0]  ;;  %v16676_v22 = vld [vmem:[%s25063_s3 + $0x514] sm:$0xf0] }
 0x7fe   :  { %v15240_v63 = vor.u32 %v16737_v6, %v15237_v54  ;;  %v14988_v51 = vor.u32 %v16676_v22, %v14987_v29  ;;  %v14688_v6 = vor.u32 %v16598_v24, %v14685_v61  ;;  %v16530_v54 = vld [vmem:[%s25063_s3 + $0x8c] sm:$0xf]  ;;  %v16624_v29 = vld [vmem:[%s25063_s3 + $0x374] sm:$0xf0]  ;;  %v14493_v24 = vld [vmem:[%s25063_s3 + $0x138] sm:$0xf0] }
 0x7ff   :  { %9752 = vmatpush.bf16.msrb.mxu1 %v15052_v31  ;;  %v14844_v31 = vor.u32 %v16640_v52, %v14843_v59  ;;  %v9513_v7 = vpop.f32.mrf.mxu2  ;;  %v16562_v59 = vld [vmem:[%s25063_s3 + $0x18c] sm:$0xf]  ;;  %v14796_v52 = vor.u32 %v16628_v11, %v14795_v27  ;;  %v14621_v27 = vld [vmem:[%s25063_s3 + $0x238] sm:$0xf0]  ;;  %v14731_v11 = vld [vmem:[%s25063_s3 + $0x308] sm:$0xf] }
 0x800   :  { %9678 = vmatpush.bf16.msrb.mxu3 %v15240_v63  ;;  %v16558_v7 = vld [vmem:[%s25063_s3 + $0x16c] sm:$0xf] }
 0x801   :  { %9765 = vmatpush.bf16.msrb.mxu2 %v15180_v35  ;;  %9740 = vmatpush.bf16.msrb.mxu0 %v14908_v37  ;;  %v16542_v35 = vld [vmem:[%s25063_s3 + $0xec] sm:$0xf]  ;;  %v9526_v10 = vpop.f32.mrf.mxu3  ;;  %v16636_v37 = vld [vmem:[%s25063_s3 + $0x3d4] sm:$0xf0] }
 0x802   :  { %v14828_v8 = vor.u32 %v16636_v37, %v14827_v48  ;;  %v14780_v10 = vor.u32 %v16624_v29, %v14779_v13  ;;  %v16582_v61 = vld [vmem:[%s25063_s3 + $0x22c] sm:$0xf]  ;;  %v14477_v13 = vld [vmem:[%s25063_s3 + $0x118] sm:$0xf0] }
 0x803   :  { %9753 = vmatpush.bf16.msrb.mxu1 %v15036_v49  ;;  %v14464_v49 = vor.u32 %v16542_v35, %v14461_v32  ;;  %9679 = vmatmul.bf16.vlgmr.msrb.gmra.mxu3 %v24242_v40  ;;  %v16526_v32 = vld [vmem:[%s25063_s3 + $0x6c] sm:$0xf] }
 0x804   :  { %9723 = vmatpush.bf16.msra.mxu3 %v14844_v31  ;;  %v16578_v29 = vld [vmem:[%s25063_s3 + $0x20c] sm:$0xf] }
 0x805   :  { %9766 = vmatpush.bf16.msrb.mxu2 %v15164_v28  ;;  %9741 = vmatpush.bf16.msrb.mxu0 %v14892_v25  ;;  %v14592_v28 = vor.u32 %v16574_v50, %v14589_v60  ;;  %v14576_v25 = vor.u32 %v16570_v56, %v14573_v2  ;;  %v14397_v50 = vld [vmem:[%s25063_s3 + $0x78] sm:$0xf0]  ;;  %v16586_v56 = vld [vmem:[%s25063_s3 + $0x24c] sm:$0xf] }
 0x806   :  { %v14653_v60 = vld [vmem:[%s25063_s3 + $0x278] sm:$0xf0] }
 0x807   :  { %9754 = vmatpush.bf16.msrb.mxu1 %v15020_v20  ;;  %v16566_v20 = vld [vmem:[%s25063_s3 + $0x1ac] sm:$0xf] }
 0x808   :  { %9724 = vmatpush.bf16.msra.mxu3 %v14828_v8  ;;  %v14560_v46 = vor.u32 %v16566_v20, %v14557_v26  ;;  %v14637_v8 = vld [vmem:[%s25063_s3 + $0x258] sm:$0xf0]  ;;  %v14748_v26 = vor.u32 %v16616_v19, %v14747_v39 }
 0x809   :  { %9767 = vmatpush.bf16.msrb.mxu2 %v15148_v23  ;;  %9742 = vmatpush.bf16.msrb.mxu0 %v14876_v30  ;;  %v14812_v23 = vor.u32 %v16632_v44, %v14811_v15  ;;  %v14413_v30 = vld [vmem:[%s25063_s3 + $0x98] sm:$0xf0]  ;;  %v14640_v0 = vor.u32 %v16586_v56, %v14637_v8  ;;  %v15323_v56 = vld [vmem:[%s25063_s3 + $0x7a8] sm:$0xf]  ;;  %v16760_v8 = vld [vmem:[%s25063_s3 + $0x7b4] sm:$0xf0] }
 0x80a   :  { %v14416_v22 = vor.u32 %v16530_v54, %v14413_v30  ;;  %v14365_v20 = vld [vmem:[%s25063_s3 + $0x38] sm:$0xf0]  ;;  %v16768_v54 = vld [vmem:[%s25063_s3 + $0x7f4] sm:$0xf0] }
 0x80b   :  { %9755 = vmatpush.bf16.msrb.mxu1 %v15004_v62  ;;  %v14541_v62 = vld [vmem:[%s25063_s3 + $0x198] sm:$0xf0] }
 0x80c   :  { %9725 = vmatpush.bf16.msra.mxu3 %v14812_v23  ;;  %v14544_v31 = vor.u32 %v16562_v59, %v14541_v62  ;;  %v16550_v23 = vld [vmem:[%s25063_s3 + $0x12c] sm:$0xf]  ;;  %v14624_v59 = vor.u32 %v16582_v61, %v14621_v27  ;;  %v14349_v62 = vld [vmem:[%s25063_s3 + $0x18] sm:$0xf0] }
 0x80d   :  { %9768 = vmatpush.bf16.msrb.mxu2 %v15132_v12  ;;  %9743 = vmatpush.bf16.msrb.mxu0 %v14860_v21  ;;  %v16594_v12 = vld [vmem:[%s25063_s3 + $0x28c] sm:$0xf]  ;;  %v9537_v63 = vpop.f32.mrf.mxu0  ;;  %v14496_v30 = vor.u32 %v16550_v23, %v14493_v24  ;;  %v16756_v23 = vld [vmem:[%s25063_s3 + $0x794] sm:$0xf0]  ;;  %v8189_v24 = vperm.slane %v24315_v3, 1 }
 0x80e   :  { %v9538_v14 = vadd.f32 %v9537_v63, %v24417_v4  ;;  %v14672_v35 = vor.u32 %v16594_v12, %v14669_v17  ;;  %v14525_v4 = vld [vmem:[%s25063_s3 + $0x178] sm:$0xf0]  ;;  %v16590_v21 = vld [vmem:[%s25063_s3 + $0x26c] sm:$0xf] }
 0x80f   :  { %9756 = vmatpush.bf16.msrb.mxu1 %v14988_v51  ;;  %v9550_v33 = vpop.f32.mrf.mxu1  ;;  %v16620_v51 = vld [vmem:[%s25063_s3 + $0x354] sm:$0xf0]  ;;  %v14528_v48 = vor.u32 %v16558_v7, %v14525_v4  ;;  %v14656_v37 = vor.u32 %v16590_v21, %v14653_v60  ;;  %v16546_v12 = vld [vmem:[%s25063_s3 + $0x10c] sm:$0xf]  ;;  %v14605_v63 = vld [vmem:[%s25063_s3 + $0x218] sm:$0xf0] }
 0x810   :  { %9744 = vmatmul.bf16.vlgmr.msrb.gmra.mxu0 %v23716_v58  ;;  %9726 = vmatpush.bf16.msra.mxu3 %v14796_v52  ;;  %v9551_v36 = vadd.f32 %v9550_v33, %v9538_v14  ;;  %v14764_v55 = vor.u32 %v16620_v51, %v14763_v47  ;;  %v16514_v52 = vld [vmem:[%s25063_s3 + $0xc] sm:$0xf]  ;;  %v14480_v4 = vor.u32 %v16546_v12, %v14477_v13  ;;  %v15339_v21 = vld [vmem:[%s25063_s3 + $0x7c8] sm:$0xf]  ;;  %v16764_v60 = vld [vmem:[%s25063_s3 + $0x7d4] sm:$0xf0] }
 0x811   :  { %9769 = vmatpush.bf16.msrb.mxu2 %v15116_v5  ;;  %9788 = vmatpush.bf16.msra.mxu0 %v14464_v49  ;;  %v14400_v5 = vor.u32 %v16526_v32, %v14397_v50  ;;  %v16522_v49 = vld [vmem:[%s25063_s3 + $0x4c] sm:$0xf]  ;;  %v14352_v32 = vor.u32 %v16514_v52, %v14349_v62  ;;  %v15101_v50 = vld [vmem:[%s25063_s3 + $0x5f8] sm:$0xf0] }
 0x812   :  { %9757 = vmatmul.bf16.vlgmr.msrb.gmra.mxu1 %v23718_v16  ;;  %v16670_v33 = vld [vmem:[%s25063_s3 + $0x4ec] sm:$0xf] }
 0x813   :  { %9801 = vmatpush.bf16.msra.mxu1 %v14592_v28  ;;  %v14381_v28 = vld [vmem:[%s25063_s3 + $0x58] sm:$0xf0]  ;;  %v16734_v7 = vld [vmem:[%s25063_s3 + $0x6ec] sm:$0xf] }
 0x814   :  { %9770 = vmatmul.bf16.vlgmr.msrb.gmra.mxu2 %v23720_v18  ;;  %9727 = vmatpush.bf16.msra.mxu3 %v14780_v10  ;;  %v15229_v10 = vld [vmem:[%s25063_s3 + $0x6f8] sm:$0xf0] }
 0x815   :  { %9814 = vmatpush.bf16.msra.mxu2 %v14720_v34  ;;  %9789 = vmatpush.bf16.msra.mxu0 %v14448_v43  ;;  %v16554_v34 = vld [vmem:[%s25063_s3 + $0x14c] sm:$0xf]  ;;  %v9539_v44 = vpop.f32.mrf.mxu0  ;;  %v14384_v43 = vor.u32 %v16522_v49, %v14381_v28  ;;  %v15340_v28 = vor.u32 %v16764_v60, %v15339_v21 }
 0x816   :  { %v16698_v49 = vld [vmem:[%s25063_s3 + $0x5cc] sm:$0xf] }
 0x817   :  { %9802 = vmatpush.bf16.msra.mxu1 %v14576_v25  ;;  %v9563_v2 = vpop.f32.mrf.mxu2  ;;  %v9552_v25 = vpop.f32.mrf.mxu1  ;;  %v16662_v44 = vld [vmem:[%s25063_s3 + $0x4ac] sm:$0xf] }
 0x818   :  { %v24598_v15 = vadd.f32 %v9563_v2, %v9551_v36  ;;  %9728 = vmatpush.bf16.msra.mxu3 %v14764_v55  ;;  %v14608_v36 = vor.u32 %v16578_v29, %v14605_v63  ;;  %v16730_v55 = vld [vmem:[%s25063_s3 + $0x6cc] sm:$0xf] }
 0x819   :  { %9815 = vmatpush.bf16.msra.mxu2 %v14704_v41  ;;  %9790 = vmatpush.bf16.msra.mxu0 %v14432_v1  ;;  %v14512_v41 = vor.u32 %v16554_v34, %v14509_v53  ;;  %v16612_v1 = vld [vmem:[%s25063_s3 + $0x314] sm:$0xf0]  ;;  %v15085_v34 = vld [vmem:[%s25063_s3 + $0x5d8] sm:$0xf0]  ;;  %v16694_v25 = vld [vmem:[%s25063_s3 + $0x5ac] sm:$0xf] }
 0x81a   :  { %v14732_v17 = vor.u32 %v16612_v1, %v14731_v11  ;;  %v15213_v53 = vld [vmem:[%s25063_s3 + $0x6d8] sm:$0xf0]  ;;  %v15088_v39 = vor.u32 %v16698_v49, %v15085_v34  ;;  %v16690_v11 = vld [vmem:[%s25063_s3 + $0x58c] sm:$0xf]  ;;  %v15259_v34 = vld [vmem:[%s25063_s3 + $0x728] sm:$0xf] }
 0x81b   :  { %9803 = vmatpush.bf16.msra.mxu1 %v14560_v46  ;;  %v14368_v46 = vor.u32 %v16518_v9, %v14365_v20  ;;  %v15216_v19 = vor.u32 %v16730_v55, %v15213_v53  ;;  %v16726_v9 = vld [vmem:[%s25063_s3 + $0x6ac] sm:$0xf]  ;;  %v15197_v20 = vld [vmem:[%s25063_s3 + $0x6b8] sm:$0xf0]  ;;  %v16744_v55 = vld [vmem:[%s25063_s3 + $0x734] sm:$0xf0] }
 0x81c   :  { %9729 = vmatpush.bf16.msra.mxu3 %v14748_v26  ;;  %v15200_v27 = vor.u32 %v16726_v9, %v15197_v20  ;;  %v16654_v63 = vld [vmem:[%s25063_s3 + $0x46c] sm:$0xf]  ;;  %v15149_v49 = vld [vmem:[%s25063_s3 + $0x658] sm:$0xf0] }
 0x81d   :  { %9816 = vmatpush.bf16.msra.mxu2 %v14688_v6  ;;  %9791 = vmatpush.bf16.msra.mxu0 %v14416_v22  ;;  %v15355_v6 = vld [vmem:[%s25063_s3 + $0x7e8] sm:$0xf]  ;;  %v16710_v9 = vld [vmem:[%s25063_s3 + $0x62c] sm:$0xf]  ;;  %v15133_v20 = vld [vmem:[%s25063_s3 + $0x638] sm:$0xf0] }
 0x81e   :  { %v15356_v14 = vor.u32 %v16768_v54, %v15355_v6  ;;  %v16722_v6 = vld [vmem:[%s25063_s3 + $0x68c] sm:$0xf]  ;;  %v15181_v54 = vld [vmem:[%s25063_s3 + $0x698] sm:$0xf0] }
 0x81f   :  { %9804 = vmatpush.bf16.msra.mxu1 %v14544_v31  ;;  %v9565_v22 = vpop.f32.mrf.mxu2  ;;  %v14973_v31 = vld [vmem:[%s25063_s3 + $0x4f8] sm:$0xf0]  ;;  %v15184_v29 = vor.u32 %v16722_v6, %v15181_v54 }
 0x820   :  { %9730 = vmatpush.bf16.msra.mxu3 %v14732_v17  ;;  %v14976_v47 = vor.u32 %v16670_v33, %v14973_v31  ;;  %v14909_v22 = vld [vmem:[%s25063_s3 + $0x478] sm:$0xf0] }
 0x821   :  { %9817 = vmatpush.bf16.msra.mxu2 %v14672_v35  ;;  %9792 = vmatpush.bf16.msra.mxu0 %v14400_v5  ;;  %v16702_v35 = vld [vmem:[%s25063_s3 + $0x5ec] sm:$0xf]  ;;  %v15232_v5 = vor.u32 %v16734_v7, %v15229_v10  ;;  %v15037_v31 = vld [vmem:[%s25063_s3 + $0x578] sm:$0xf0]  ;;  %v15275_v7 = vld [vmem:[%s25063_s3 + $0x748] sm:$0xf] }
 0x822   :  { %v15104_v51 = vor.u32 %v16702_v35, %v15101_v50  ;;  %v16718_v35 = vld [vmem:[%s25063_s3 + $0x66c] sm:$0xf]  ;;  %v16748_v10 = vld [vmem:[%s25063_s3 + $0x754] sm:$0xf0]  ;;  %v14989_v6 = vld [vmem:[%s25063_s3 + $0x518] sm:$0xf0] }
 0x823   :  { %9805 = vmatpush.bf16.msra.mxu1 %v14528_v48  ;;  %v16666_v48 = vld [vmem:[%s25063_s3 + $0x4cc] sm:$0xf]  ;;  %9731 = vmatmul.bf16.vlgmr.msra.gmra.mxu3 %v23540_v57 }
 0x824   :  { %9775 = vmatpush.bf16.msrb.mxu3 %v15356_v14  ;;  %v16686_v14 = vld [vmem:[%s25063_s3 + $0x56c] sm:$0xf] }
 0x825   :  { %9818 = vmatpush.bf16.msra.mxu2 %v14656_v37  ;;  %9793 = vmatpush.bf16.msra.mxu0 %v14384_v43  ;;  %v14957_v37 = vld [vmem:[%s25063_s3 + $0x4d8] sm:$0xf0]  ;;  %v15040_v21 = vor.u32 %v16686_v14, %v15037_v31  ;;  %v16630_v14 = vld [vmem:[%s25063_s3 + $0x3ac] sm:$0xf]  ;;  %v16775_v31 = vld [vmem:[%s25065_s5 + $0x30] sm:$0xff] }
 0x826   :  { %v14960_v2 = vor.u32 %v16666_v48, %v14957_v37  ;;  %v14941_v43 = vld [vmem:[%s25063_s3 + $0x4b8] sm:$0xf0]  ;;  %v16714_v37 = vld [vmem:[%s25063_s3 + $0x64c] sm:$0xf] }
 0x827   :  { %9806 = vmatpush.bf16.msra.mxu1 %v14512_v41  ;;  %v15324_v41 = vor.u32 %v16760_v8, %v15323_v56  ;;  %v14944_v26 = vor.u32 %v16662_v44, %v14941_v43  ;;  %v15021_v48 = vld [vmem:[%s25063_s3 + $0x558] sm:$0xf0]  ;;  %v16646_v44 = vld [vmem:[%s25063_s3 + $0x42c] sm:$0xf] }
 0x828   :  { %9776 = vmatpush.bf16.msrb.mxu3 %v15340_v28  ;;  %v14877_v43 = vld [vmem:[%s25063_s3 + $0x438] sm:$0xf0] }
 0x829   :  { %9819 = vmatpush.bf16.msra.mxu2 %v14640_v0  ;;  %9794 = vmatpush.bf16.msra.mxu0 %v14368_v46  ;;  %v15069_v0 = vld [vmem:[%s25063_s3 + $0x5b8] sm:$0xf0] }
 0x82a   :  { %v15072_v61 = vor.u32 %v16694_v25, %v15069_v0  ;;  %v15053_v46 = vld [vmem:[%s25063_s3 + $0x598] sm:$0xf0]  ;;  %v16678_v25 = vld [vmem:[%s25063_s3 + $0x52c] sm:$0xf] }
 0x82b   :  { %9807 = vmatpush.bf16.msra.mxu1 %v14496_v30  ;;  %v15291_v30 = vld [vmem:[%s25063_s3 + $0x768] sm:$0xf]  ;;  %v15056_v13 = vor.u32 %v16690_v11, %v15053_v46  ;;  %v15005_v0 = vld [vmem:[%s25063_s3 + $0x538] sm:$0xf0]  ;;  %v16674_v46 = vld [vmem:[%s25063_s3 + $0x50c] sm:$0xf] }
 0x82c   :  { %9777 = vmatpush.bf16.msrb.mxu3 %v15324_v41  ;;  %v15260_v41 = vor.u32 %v16744_v55, %v15259_v34  ;;  %v14861_v11 = vld [vmem:[%s25063_s3 + $0x418] sm:$0xf0] }
 0x82d   :  { %9820 = vmatpush.bf16.msra.mxu2 %v14624_v59  ;;  %9795 = vmatpush.bf16.msra.mxu0 %v14352_v32  ;;  %v16752_v59 = vld [vmem:[%s25063_s3 + $0x774] sm:$0xf0]  ;;  %v9589_v52 = vpop.f32.mrf.mxu0  ;;  %v15165_v32 = vld [vmem:[%s25063_s3 + $0x678] sm:$0xf0] }
 0x82e   :  { %v9590_v17 = vadd.f32 %v9589_v52, %v8189_v24  ;;  %v15292_v33 = vor.u32 %v16752_v59, %v15291_v30  ;;  %v15168_v60 = vor.u32 %v16718_v35, %v15165_v32  ;;  %v16638_v24 = vld [vmem:[%s25063_s3 + $0x3ec] sm:$0xf]  ;;  %v15117_v52 = vld [vmem:[%s25063_s3 + $0x618] sm:$0xf0] }
 0x82f   :  { %9808 = vmatpush.bf16.msra.mxu1 %v14480_v4  ;;  %v9602_v62 = vpop.f32.mrf.mxu1  ;;  %v14912_v4 = vor.u32 %v16654_v63, %v14909_v22  ;;  %v16706_v59 = vld [vmem:[%s25063_s3 + $0x60c] sm:$0xf]  ;;  %v16776_v63 = vld [vmem:[%s25065_s5 + $0x38] sm:$0xff] }
 0x830   :  { %9796 = vmatmul.bf16.vlgmr.msra.gmra.mxu0 %v23534_v42  ;;  %v15307_v42 = vld [vmem:[%s25063_s3 + $0x788] sm:$0xf]  ;;  %v9603_v50 = vadd.f32 %v9602_v62, %v9590_v17  ;;  %v14829_v17 = vld [vmem:[%s25063_s3 + $0x3d8] sm:$0xf0]  ;;  %v16626_v32 = vld [vmem:[%s25063_s3 + $0x38c] sm:$0xf] }
 0x831   :  { %9821 = vmatpush.bf16.msra.mxu2 %v14608_v36  ;;  %9840 = vmatpush.bf16.msrb.mxu0 %v14976_v47  ;;  %v15308_v1 = vor.u32 %v16756_v23, %v15307_v42  ;;  %v16650_v36 = vld [vmem:[%s25063_s3 + $0x44c] sm:$0xf]  ;;  %v14893_v47 = vld [vmem:[%s25063_s3 + $0x458] sm:$0xf0]  ;;  %v15243_v42 = vld [vmem:[%s25063_s3 + $0x708] sm:$0xf] }
 0x832   :  { %9809 = vmatmul.bf16.vlgmr.msra.gmra.mxu1 %v23536_v38  ;;  %v16658_v38 = vld [vmem:[%s25063_s3 + $0x48c] sm:$0xf]  ;;  %v16740_v23 = vld [vmem:[%s25063_s3 + $0x714] sm:$0xf0] }
 0x833   :  { %9853 = vmatpush.bf16.msrb.mxu1 %v15104_v51  ;;  %9778 = vmatpush.bf16.msrb.mxu3 %v15308_v1  ;;  %v16682_v51 = vld [vmem:[%s25063_s3 + $0x54c] sm:$0xf]  ;;  %v15244_v1 = vor.u32 %v16740_v23, %v15243_v42  ;;  %v15341_v42 = vld [vmem:[%s25063_s3 + $0x7d8] sm:$0xf0]  ;;  %v16769_v23 = vld [vmem:[%s25065_s5] sm:$0xff] }
 0x834   :  { %9822 = vmatmul.bf16.vlgmr.msra.gmra.mxu2 %v23538_v45  ;;  %v14925_v45 = vld [vmem:[%s25063_s3 + $0x498] sm:$0xf0] }
 0x835   :  { %9866 = vmatpush.bf16.msrb.mxu2 %v15232_v5  ;;  %9841 = vmatpush.bf16.msrb.mxu0 %v14960_v2  ;;  %v14928_v12 = vor.u32 %v16658_v38, %v14925_v45  ;;  %v15276_v5 = vor.u32 %v16748_v10, %v15275_v7  ;;  %v9591_v56 = vpop.f32.mrf.mxu0  ;;  %v14896_v2 = vor.u32 %v16650_v36, %v14893_v47  ;;  %v16642_v45 = vld [vmem:[%s25063_s3 + $0x40c] sm:$0xf]  ;;  %v14781_v10 = vld [vmem:[%s25063_s3 + $0x378] sm:$0xf0] }
 0x836   :  { %v15136_v38 = vor.u32 %v16710_v9, %v15133_v20  ;;  %v14864_v62 = vor.u32 %v16642_v45, %v14861_v11  ;;  %v16774_v7 = vld [vmem:[%s25065_s5 + $0x28] sm:$0xff]  ;;  %v14765_v47 = vld [vmem:[%s25063_s3 + $0x358] sm:$0xf0]  ;;  %v16771_v56 = vld [vmem:[%s25065_s5 + $0x10] sm:$0xff] }
 0x837   :  { %9854 = vmatpush.bf16.msrb.mxu1 %v15088_v39  ;;  %9779 = vmatpush.bf16.msrb.mxu3 %v15292_v33  ;;  %v9615_v28 = vpop.f32.mrf.mxu2  ;;  %v9604_v8 = vpop.f32.mrf.mxu1  ;;  %v15024_v39 = vor.u32 %v16682_v51, %v15021_v48  ;;  %v14813_v33 = vld [vmem:[%s25063_s3 + $0x3b8] sm:$0xf0]  ;;  %v16618_v36 = vld [vmem:[%s25063_s3 + $0x34c] sm:$0xf] }
 0x838   :  { %v24797_v53 = vadd.f32 %v9615_v28, %v9603_v50  ;;  %v14816_v35 = vor.u32 %v16630_v14, %v14813_v33  ;;  %v14797_v50 = vld [vmem:[%s25063_s3 + $0x398] sm:$0xf0]  ;;  %v16762_v20 = vld [vmem:[%s25063_s3 + $0x7cc] sm:$0xf] }
 0x839   :  { %9867 = vmatpush.bf16.msrb.mxu2 %v15216_v19  ;;  %9842 = vmatpush.bf16.msrb.mxu0 %v14944_v26  ;;  %v15152_v19 = vor.u32 %v16714_v37, %v15149_v49  ;;  %v14880_v26 = vor.u32 %v16646_v44, %v14877_v43  ;;  %v16772_v51 = vld [vmem:[%s25065_s5 + $0x18] sm:$0xff]  ;;  %v16614_v37 = vld [vmem:[%s25063_s3 + $0x32c] sm:$0xf] }
 0x83a   :  { %v14749_v49 = vld [vmem:[%s25063_s3 + $0x338] sm:$0xf0]  ;;  %v16766_v44 = vld [vmem:[%s25063_s3 + $0x7ec] sm:$0xf] }
 0x83b   :  { %9855 = vmatpush.bf16.msrb.mxu1 %v15072_v61  ;;  %9780 = vmatpush.bf16.msrb.mxu3 %v15276_v5  ;;  %v14845_v61 = vld [vmem:[%s25063_s3 + $0x3f8] sm:$0xf0]  ;;  %v14768_v5 = vor.u32 %v16618_v36, %v14765_v47  ;;  %v14752_v8 = vor.u32 %v16614_v37, %v14749_v49  ;;  %v16778_v33 = vld [vmem:[%s25065_s5 + $0x48] sm:$0xff] }
 0x83c   :  { %v14848_v30 = vor.u32 %v16638_v24, %v14845_v61  ;;  %v16784_v28 = vld [vmem:[%s25065_s5 + $0x78] sm:$0xff]  ;;  %v15344_v24 = vor.u32 %v16762_v20, %v15341_v42  ;;  %v16781_v61 = vld [vmem:[%s25065_s5 + $0x60] sm:$0xff]  ;;  %v16738_v36 = vld [vmem:[%s25063_s3 + $0x70c] sm:$0xf] }
 0x83d   :  { %9868 = vmatpush.bf16.msrb.mxu2 %v15200_v27  ;;  %9843 = vmatpush.bf16.msrb.mxu0 %v14928_v12  ;;  %v15008_v27 = vor.u32 %v16678_v25, %v15005_v0  ;;  %v16634_v12 = vld [vmem:[%s25063_s3 + $0x3cc] sm:$0xf]  ;;  %v15357_v43 = vld [vmem:[%s25063_s3 + $0x7f8] sm:$0xf0]  ;;  %v16787_v42 = vld [vmem:[%s25065_s5 + $0x90] sm:$0xff] }
 0x83e   :  { %v14832_v22 = vor.u32 %v16634_v12, %v14829_v17  ;;  %v16770_v25 = vld [vmem:[%s25065_s5 + $0x8] sm:$0xff]  ;;  %v15360_v9 = vor.u32 %v16766_v44, %v15357_v43  ;;  %v16780_v11 = vld [vmem:[%s25065_s5 + $0x58] sm:$0xff] }
 0x83f   :  { %9856 = vmatpush.bf16.msrb.mxu1 %v15056_v13  ;;  %9781 = vmatpush.bf16.msrb.mxu3 %v15260_v41  ;;  %v9617_v54 = vpop.f32.mrf.mxu2  ;;  %v14992_v13 = vor.u32 %v16674_v46, %v14989_v6  ;;  %v15309_v46 = vld [vmem:[%s25063_s3 + $0x798] sm:$0xf0] }
 0x840   :  { %v16750_v54 = vld [vmem:[%s25063_s3 + $0x76c] sm:$0xf]  ;;  %v15245_v47 = vld [vmem:[%s25063_s3 + $0x718] sm:$0xf0] }
 0x841   :  { %9869 = vmatpush.bf16.msrb.mxu2 %v15184_v29  ;;  %9844 = vmatpush.bf16.msrb.mxu0 %v14912_v4  ;;  %v15120_v29 = vor.u32 %v16706_v59, %v15117_v52  ;;  %v16779_v59 = vld [vmem:[%s25065_s5 + $0x50] sm:$0xff]  ;;  %v16792_v44 = vld [vmem:[%s25065_s5 + $0xb8] sm:$0xff] }
 0x842   :  { %v16788_v20 = vld [vmem:[%s25065_s5 + $0x98] sm:$0xff] }
 0x843   :  { %9857 = vmatpush.bf16.msrb.mxu1 %v15040_v21  ;;  %9782 = vmatpush.bf16.msrb.mxu3 %v15244_v1  ;;  %v16754_v1 = vld [vmem:[%s25063_s3 + $0x78c] sm:$0xf] }
 0x844   :  { %v15312_v6 = vor.u32 %v16754_v1, %v15309_v46  ;;  %v16785_v1 = vld [vmem:[%s25065_s5 + $0x80] sm:$0xff] }
 0x845   :  { %9870 = vmatpush.bf16.msrb.mxu2 %v15168_v60  ;;  %9845 = vmatpush.bf16.msrb.mxu0 %v14896_v2  ;;  %v16610_v2 = vld [vmem:[%s25063_s3 + $0x30c] sm:$0xf] }
 0x846   :  { %9783 = vmatmul.bf16.vlgmr.msrb.gmra.mxu3 %v24242_v40 }
 0x847   :  { %9858 = vmatpush.bf16.msrb.mxu1 %v15024_v39  ;;  %9827 = vmatpush.bf16.msra.mxu3 %v14848_v30  ;;  %v14733_v39 = vld [vmem:[%s25063_s3 + $0x318] sm:$0xf0] }
 0x848   :  { %v14736_v41 = vor.u32 %v16610_v2, %v14733_v39  ;;  %v15293_v30 = vld [vmem:[%s25063_s3 + $0x778] sm:$0xf0] }
 0x849   :  { %9871 = vmatpush.bf16.msrb.mxu2 %v15152_v19  ;;  %9846 = vmatpush.bf16.msrb.mxu0 %v14880_v26  ;;  %v16783_v19 = vld [vmem:[%s25065_s5 + $0x70] sm:$0xff]  ;;  %v16782_v26 = vld [vmem:[%s25065_s5 + $0x68] sm:$0xff] }
 0x84b   :  { %9859 = vmatpush.bf16.msrb.mxu1 %v15008_v27  ;;  %9828 = vmatpush.bf16.msra.mxu3 %v14832_v22  ;;  %v16758_v27 = vld [vmem:[%s25063_s3 + $0x7ac] sm:$0xf] }
 0x84d   :  { %9872 = vmatpush.bf16.msrb.mxu2 %v15136_v38  ;;  %9847 = vmatpush.bf16.msrb.mxu0 %v14864_v62  ;;  %v24884_v4 = vpop.f32.mrf.mxu0  ;;  %v15325_v38 = vld [vmem:[%s25063_s3 + $0x7b8] sm:$0xf0] }
 0x84e   :  { %v15328_v45 = vor.u32 %v16758_v27, %v15325_v38 }
 0x84f   :  { %9860 = vmatpush.bf16.msrb.mxu1 %v14992_v13  ;;  %9829 = vmatpush.bf16.msra.mxu3 %v14816_v35  ;;  %v24886_v21 = vpop.f32.mrf.mxu1  ;;  %v15296_v13 = vor.u32 %v16750_v54, %v15293_v30 }
 0x850   :  { %9848 = vmatmul.bf16.vlgmr.msrb.gmra.mxu0 %v23716_v58  ;;  %v14800_v58 = vor.u32 %v16626_v32, %v14797_v50  ;;  %v15261_v32 = vld [vmem:[%s25063_s3 + $0x738] sm:$0xf0] }
 0x851   :  { %9873 = vmatpush.bf16.msrb.mxu2 %v15120_v29  ;;  %10160 = vmatpush.bf16.msra.mxu0 %v16776_v63  ;;  %v16746_v29 = vld [vmem:[%s25063_s3 + $0x74c] sm:$0xf]  ;;  %v15277_v63 = vld [vmem:[%s25063_s3 + $0x758] sm:$0xf0] }
 0x852   :  { %9861 = vmatmul.bf16.vlgmr.msrb.gmra.mxu1 %v23718_v16  ;;  %v16622_v16 = vld [vmem:[%s25063_s3 + $0x36c] sm:$0xf]  ;;  %v15280_v35 = vor.u32 %v16746_v29, %v15277_v63  ;;  %v16800_v63 = vld [vmem:[%s25065_s5 + $0xf8] sm:$0xff] }
 0x853   :  { %9830 = vmatpush.bf16.msra.mxu3 %v14800_v58  ;;  %v14784_v60 = vor.u32 %v16622_v16, %v14781_v10  ;;  %10173 = vmatpush.bf16.msra.mxu1 %v16784_v28 }
 0x854   :  { %9874 = vmatmul.bf16.vlgmr.msrb.gmra.mxu2 %v23720_v18  ;;  %v16773_v18 = vld [vmem:[%s25065_s5 + $0x20] sm:$0xff] }
 0x855   :  { %10161 = vmatpush.bf16.msra.mxu0 %v16775_v31  ;;  %v9643_v34 = vpop.f32.mrf.mxu0  ;;  %10186 = vmatpush.bf16.msra.mxu2 %v16792_v44  ;;  %v16802_v44 = vld [vmem:[%s25066_s6] ss:$0 sm:$0xff] }
 0x857   :  { %9831 = vmatpush.bf16.msra.mxu3 %v14784_v60  ;;  %v24900_v48 = vpop.f32.mrf.mxu2  ;;  %v9656_v55 = vpop.f32.mrf.mxu1  ;;  %10174 = vmatpush.bf16.msra.mxu1 %v16783_v19 }
 0x859   :  { %10162 = vmatpush.bf16.msra.mxu0 %v16774_v7  ;;  %v16777_v7 = vld [vmem:[%s25065_s5 + $0x40] sm:$0xff] }
 0x85b   :  { %9832 = vmatpush.bf16.msra.mxu3 %v14768_v5  ;;  %10175 = vmatpush.bf16.msra.mxu1 %v16782_v26 }
 0x85d   :  { %10163 = vmatpush.bf16.msra.mxu0 %v16773_v18 }
 0x85f   :  { %9833 = vmatpush.bf16.msra.mxu3 %v14752_v8  ;;  %v9669_v0 = vpop.f32.mrf.mxu2  ;;  %10176 = vmatpush.bf16.msra.mxu1 %v16781_v61  ;;  %v16786_v61 = vld [vmem:[%s25065_s5 + $0x88] sm:$0xff] }
 0x861   :  { %10164 = vmatpush.bf16.msra.mxu0 %v16772_v51  ;;  %v15248_v51 = vor.u32 %v16738_v36, %v15245_v47  ;;  %v16793_v47 = vld [vmem:[%s25065_s5 + $0xc0] sm:$0xff] }
 0x863   :  { %9834 = vmatpush.bf16.msra.mxu3 %v14736_v41  ;;  %10177 = vmatpush.bf16.msra.mxu1 %v16780_v11  ;;  %v9576_v62 = vpop.f32.mrf.mxu3 }
 0x865   :  { %10165 = vmatpush.bf16.msra.mxu0 %v16771_v56 }
 0x866   :  { %9835 = vmatmul.bf16.vlgmr.msra.gmra.mxu3 %v23540_v57  ;;  %v8190_v57 = vperm.slane %v24315_v3, 2  ;;  %v9577_v3 = vadd.f32 %v9576_v62, %v24598_v15  ;;  %v16742_v15 = vld [vmem:[%s25063_s3 + $0x72c] sm:$0xf] }
 0x867   :  { %9879 = vmatpush.bf16.msrb.mxu3 %v15360_v9  ;;  %10178 = vmatpush.bf16.msra.mxu1 %v16779_v59  ;;  %v15264_v60 = vor.u32 %v16742_v15, %v15261_v32  ;;  %v16789_v9 = vld [vmem:[%s25065_s5 + $0xa0] sm:$0xff]  ;;  %v16799_v32 = vld [vmem:[%s25065_s5 + $0xf0] sm:$0xff] }
 0x868   :  { %v9892_v14 = vmax.f32 %v9577_v3, 0.0 }
 0x869   :  { %10166 = vmatpush.bf16.msra.mxu0 %v16770_v25 }
 0x86a   :  { %v9896_v31 = vpack.c.bf16 %v9892_v14, %v9892_v14 }
 0x86b   :  { %9880 = vmatpush.bf16.msrb.mxu3 %v15344_v24  ;;  %10179 = vmatpush.bf16.msra.mxu1 %v16778_v33  ;;  %v9578_v10 = vpop.f32.mrf.mxu3 }
 0x86c   :  { %v16796_v10 = vld [vmem:[%s25065_s5 + $0xd8] sm:$0xff] }
 0x86d   :  { %10167 = vmatpush.bf16.msra.mxu0 %v16769_v23  ;;  %v9693_v52 = vpop.f32.mrf.mxu0  ;;  %v16814_v23 = vld [vmem:[%s25064_s4] sm:$0xf] }
 0x86e   :  { %v9694_v12 = vadd.f32 %v9693_v52, %v8190_v57  ;;  %v8191_v26 = vperm.slane %v16814_v23, 3 }
 0x86f   :  { %9881 = vmatpush.bf16.msrb.mxu3 %v15328_v45  ;;  %v9706_v17 = vpop.f32.mrf.mxu1  ;;  %10180 = vmatpush.bf16.msra.mxu1 %v16777_v7 }
 0x870   :  { %v9707_v22 = vadd.f32 %v9706_v17, %v9694_v12  ;;  %10168 = vmatmul.bf16.vlgmr.msra.gmra.mxu0 %v9896_v31 }
 0x873   :  { %9882 = vmatpush.bf16.msrb.mxu3 %v15312_v6  ;;  %v9628_v37 = vpop.f32.mrf.mxu3 }
 0x874   :  { %v9629_v49 = vadd.f32 %v9628_v37, %v24797_v53 }
 0x875   :  { %v9695_v16 = vpop.f32.mrf.mxu0 }
 0x876   :  { %v9642_v34 = vadd.f32 %v24884_v4, %v9629_v49  ;;  %v16791_v4 = vld [vmem:[%s25065_s5 + $0xb0] sm:$0xff] }
 0x877   :  { %9883 = vmatpush.bf16.msrb.mxu3 %v15296_v13  ;;  %v9719_v50 = vpop.f32.mrf.mxu2  ;;  %v9708_v18 = vpop.f32.mrf.mxu1  ;;  %10187 = vmatpush.bf16.msra.mxu2 %v16791_v4 }
 0x878   :  { %v9720_v58 = vadd.f32 %v9719_v50, %v9707_v22  ;;  %v9655_v55 = vadd.f32 %v24886_v21, %v9642_v34  ;;  %v16798_v50 = vld [vmem:[%s25065_s5 + $0xe8] sm:$0xff]  ;;  %v16795_v18 = vld [vmem:[%s25065_s5 + $0xd0] sm:$0xff] }
 0x87a   :  { %v9668_v2 = vadd.f32 %v24900_v48, %v9655_v55  ;;  %v16790_v48 = vld [vmem:[%s25065_s5 + $0xa8] sm:$0xff] }
 0x87b   :  { %9884 = vmatpush.bf16.msrb.mxu3 %v15280_v35  ;;  %v9630_v28 = vpop.f32.mrf.mxu3  ;;  %10188 = vmatpush.bf16.msra.mxu2 %v16790_v48 }
 0x87f   :  { %9885 = vmatpush.bf16.msrb.mxu3 %v15264_v60  ;;  %v9721_v5 = vpop.f32.mrf.mxu2  ;;  %10189 = vmatpush.bf16.msra.mxu2 %v16789_v9  ;;  %v16794_v60 = vld [vmem:[%s25065_s5 + $0xc8] sm:$0xff] }
 0x883   :  { %9886 = vmatpush.bf16.msrb.mxu3 %v15248_v51  ;;  %10190 = vmatpush.bf16.msra.mxu2 %v16788_v20 }
 0x886   :  { %9887 = vmatmul.bf16.vlgmr.msrb.gmra.mxu3 %v24242_v40  ;;  %v9680_v39 = vpop.f32.mrf.mxu3 }
 0x887   :  { %v9681_v19 = vadd.f32 %v9680_v39, %v9668_v2  ;;  %10191 = vmatpush.bf16.msra.mxu2 %v16787_v42  ;;  %10199 = vmatpush.bf16.msra.mxu3 %v16800_v63 }
 0x889   :  { %v9893_v43 = vmax.f32 %v9681_v19, 0.0 }
 0x88b   :  { %v9897_v53 = vpack.c.bf16 %v9893_v43, %v9893_v43  ;;  %10192 = vmatpush.bf16.msra.mxu2 %v16786_v61  ;;  %10200 = vmatpush.bf16.msra.mxu3 %v16799_v32 }
 0x88d   :  { %v9745_v56 = vpop.f32.mrf.mxu0  ;;  %10181 = vmatmul.bf16.vlgmr.msra.gmra.mxu1 %v9897_v53 }
 0x88e   :  { %v9682_v21 = vpop.f32.mrf.mxu3 }
 0x88f   :  { %v9758_v8 = vpop.f32.mrf.mxu1  ;;  %10193 = vmatpush.bf16.msra.mxu2 %v16785_v1  ;;  %10201 = vmatpush.bf16.msra.mxu3 %v16798_v50 }
 0x895   :  { %v9747_v40 = vpop.f32.mrf.mxu0 }
 0x897   :  { %v9771_v25 = vpop.f32.mrf.mxu2  ;;  %v9760_v41 = vpop.f32.mrf.mxu1 }
 0x89f   :  { %v9773_v0 = vpop.f32.mrf.mxu2 }
 0x8a6   :  { %v9732_v11 = vpop.f32.mrf.mxu3 }
 0x8a7   :  { %v9733_v52 = vadd.f32 %v9732_v11, %v9720_v58  ;;  %v16797_v58 = vld [vmem:[%s25065_s5 + $0xe0] sm:$0xff]  ;;  %s16841_s5 = smov [#allocation2]  }
 0x8a8   :  { %10202 = vmatpush.bf16.msra.mxu3 %v16797_v58  ;;  %s10230_s6 = sshll.u32 %s16841_s5, 4  ;;  %s10231_s6 = int_to_ptr.vmem [resolvable:$true] %s10230_s6 }
 0x8a9   :  { %v9746_v62 = vadd.f32 %v9745_v56, %v9733_v52 }
 0x8ab   :  { %v9759_v12 = vadd.f32 %v9758_v8, %v9746_v62 }
 0x8ac   :  { %10203 = vmatpush.bf16.msra.mxu3 %v16796_v10 }
 0x8ad   :  { %v9797_v24 = vpop.f32.mrf.mxu0  ;;  %v9772_v13 = vadd.f32 %v9771_v25, %v9759_v12 }
 0x8ae   :  { %v9798_v27 = vadd.f32 %v9797_v24, %v8191_v26  ;;  %v9734_v30 = vpop.f32.mrf.mxu3 }
 0x8af   :  { %v9810_v38 = vpop.f32.mrf.mxu1 }
 0x8b0   :  { %v9811_v45 = vadd.f32 %v9810_v38, %v9798_v27  ;;  %10204 = vmatpush.bf16.msra.mxu3 %v16795_v18 }
 0x8b4   :  { %10205 = vmatpush.bf16.msra.mxu3 %v16794_v60 }
 0x8b5   :  { %v9799_v57 = vpop.f32.mrf.mxu0 }
 0x8b7   :  { %v9823_v46 = vpop.f32.mrf.mxu2  ;;  %v9812_v54 = vpop.f32.mrf.mxu1 }
 0x8b8   :  { %v9824_v6 = vadd.f32 %v9823_v46, %v9811_v45  ;;  %10206 = vmatpush.bf16.msra.mxu3 %v16793_v47 }
 0x8bf   :  { %v9825_v59 = vpop.f32.mrf.mxu2 }
 0x8c9   :  { %v9784_v29 = vpop.f32.mrf.mxu3 }
 0x8ca   :  { %v9785_v22 = vadd.f32 %v9784_v29, %v9772_v13 }
 0x8cc   :  { %v9894_v14 = vmax.f32 %v9785_v22, 0.0 }
 0x8cd   :  { %v9849_v17 = vpop.f32.mrf.mxu0 }
 0x8ce   :  { %v9898_v35 = vpack.c.bf16 %v9894_v14, %v9894_v14 }
 0x8cf   :  { %v9862_v3 = vpop.f32.mrf.mxu1 }
 0x8d0   :  { %10194 = vmatmul.bf16.vlgmr.msra.gmra.mxu2 %v9898_v35 }
 0x8d1   :  { %v9786_v7 = vpop.f32.mrf.mxu3 }
 0x8d5   :  { %v9851_v31 = vpop.f32.mrf.mxu0 }
 0x8d7   :  { %v9875_v33 = vpop.f32.mrf.mxu2  ;;  %v9864_v15 = vpop.f32.mrf.mxu1 }
 0x8df   :  { %v9877_v16 = vpop.f32.mrf.mxu2 }
 0x8e9   :  { %v9836_v36 = vpop.f32.mrf.mxu3 }
 0x8ea   :  { %v9837_v37 = vadd.f32 %v9836_v36, %v9824_v6 }
 0x8ec   :  { %v9850_v28 = vadd.f32 %v9849_v17, %v9837_v37 }
 0x8ed   :  { %v10169_v5 = vpop.f32.mrf.mxu0 }
 0x8ee   :  { %v9863_v34 = vadd.f32 %v9862_v3, %v9850_v28  ;;  %v10170_v43 = vadd.f32 %v16802_v44, %v10169_v5 }
 0x8f0   :  { %v9876_v55 = vadd.f32 %v9875_v33, %v9863_v34 }
 0x8f1   :  { %v9838_v51 = vpop.f32.mrf.mxu3 }
 0x8f5   :  { %v10171_v49 = vpop.f32.mrf.mxu0 }
 0x909   :  { %v9888_v56 = vpop.f32.mrf.mxu3 }
 0x90a   :  { %v9889_v8 = vadd.f32 %v9888_v56, %v9876_v55  ;;  %v10182_v25 = vpop.f32.mrf.mxu1 }
 0x90b   :  { %v10183_v40 = vadd.f32 %v10182_v25, %v10170_v43 }
 0x90c   :  { %v9895_v2 = vmax.f32 %v9889_v8, 0.0 }
 0x90e   :  { %v9899_v39 = vpack.c.bf16 %v9895_v2, %v9895_v2 }
 0x910   :  { %10207 = vmatmul.bf16.vlgmr.msra.gmra.mxu3 %v9899_v39 }
 0x911   :  { %v9890_v19 = vpop.f32.mrf.mxu3 }
 0x912   :  { %v10184_v53 = vpop.f32.mrf.mxu1 }
 0x953   :  { %v10195_v41 = vpop.f32.mrf.mxu2 }
 0x954   :  { %v10196_v21 = vadd.f32 %v10195_v41, %v10183_v40 }
 0x95b   :  { %v10197_v4 = vpop.f32.mrf.mxu2 }
 0x993   :  { %v10208_v48 = vpop.f32.mrf.mxu3 }
 0x994   :  { %v10209_v0 = vadd.f32 %v10208_v48, %v10196_v21 }
 0x996   :  { %v10213_v9 = vsel %vm10212_vm0, %v10209_v0, -inf }
 0x997   :  { %10214 = vmax.xlane.f32.xlu0 %v10213_v9 }
 0x99b   :  { %v10210_v20 = vpop.f32.mrf.mxu3 }
 0xa0a   :  { %v10215_v42 = vpop.xlane.xlu0 %10214 }
 0xa0b   :  { %v10216_v23 = vsub.f32 %v10209_v0, %v10215_v42 }
 0xa0d   :  { %v10217_v26 = vmul.f32 1.442695, %v10216_v23 }
 0xa0f   :  { %16803 = vpow2.f32 %v10217_v26 }
 0xa15   :  { %v16804_v24 = vpop.eup %16803 }
 0xa16   :  { %v10219_v61 = vsel %vm10212_vm0, %v16804_v24, 0.0 }
 0xa17   :  { %10220 = vadd.xlane.f32.xlu0 %v10219_v61 }
 0xa8a   :  { %v10221_v27 = vpop.xlane.xlu0 %10220 }
 0xa8b   :  { %16805 = vrcp.f32 %v10221_v27 }
 0xa91   :  { %v16806_v38 = vpop.eup %16805 }
 0xa92   :  { %v10223_v45 = vmul.f32 %v16806_v38, %v16804_v24 }
 0xa94   :  { %10224 = vst [vmem:[#allocation2] sm:$0x3] %v10223_v45 }
 0xa95   :  { %10235 = dma.vmem_to_hbm [thread:$0]  %s10231_s6, 32, %s10233_s11, [#allocation3]  }
 0xa96   :  { %16839 = dma.done.wait [#allocation3], 32  }
 0xa97   :  { %16840 = vsyncadd [#allocation3], 4294967264 }
 0xa98   :  { %10240 = vsyncpa [#allocation3], 1 }

</bundles_post_ra>
